<compile_context>
chip_gen: v7x
topology: tpu7x:2x2x1
jax: 0.10.0
libtpu: 0.0.40
codegen_flags: <defaults>
</compile_context>

<pallas_src>
import functools

import numpy as np
import jax
import jax.numpy as jnp
from jax import lax
from jax.experimental import pallas as pl
from jax.experimental.pallas import tpu as pltpu


# ---------------------------------------------------------------------------
# Small helpers
# ---------------------------------------------------------------------------
def _round_up(x, m):
    return (x + m - 1) // m * m


def _vmem_capacity_bytes():
    try:
        info = pltpu.get_tpu_info()
        cap = int(getattr(info, "vmem_capacity_bytes", 0) or 0)
        if cap > 0:
            return cap
    except Exception:
        pass
    return 64 * 1024 * 1024          # conservative default (v7x per-core VMEM)


def _vmem_limit_bytes(cap):
    return max(32 * 1024 * 1024, int(cap * 0.9))


def _choose_tb(B, rows_per_img, bytes_per_row, fixed_bytes, budget, target_rows=2048):
    """Largest divisor-of-B image tile whose per-step working set fits the VMEM budget.

    Row counts that are multiples of 16 keep the (sublane, lane) tiling clean for bf16;
    the full batch (block == full array) is always legal.
    """
    cands = [tb for tb in range(1, B + 1)
             if B % tb == 0 and ((tb * rows_per_img) % 16 == 0 or tb == B)]
    best = cands[0]
    for tb in cands:
        rows = tb * rows_per_img
        if tb != cands[0] and rows * bytes_per_row + fixed_bytes > budget:
            break
        best = tb
        if rows >= target_rows:
            break
    return best
    # TODO(synk): fall over to spatial (D,H) tiling with a halo when even one image
    # exceeds the budget instead of accepting an oversized single-image step.


# ---------------------------------------------------------------------------
# Pallas kernels
# ---------------------------------------------------------------------------
def _conv_stats_kernel(x_ref, w_ref, scale_ref, shift_ref, mask_ref,
                       out_ref, stats_ref, xp_ref, *, apply_prelu, small_k, hp):
    """[optional fused BN+ReLU prologue] + 3x3 conv over (D,H) + BN-stat emission.

    All arrays are flattened, lane-dense 2-D (rows, channels) slabs where
    rows = images * (D+2) * (H+2) (the 1-pixel halo is baked into the row layout), so
    every conv tap is a shifted row-slice and no reshapes/concats of big tiles occur.

    x_ref:     (M, Ci)      bf16  input rows (halo rows already zero for raw input)
    w_ref:     (9, Ci, Co)  bf16  (wide path)   or (Kp, Co) bf16 (small-channel path)
    scale_ref: (1, Ci) f32        previous block's BN scale (used iff apply_prelu)
    shift_ref: (1, Ci) f32        previous block's BN shift (used iff apply_prelu)
    mask_ref:  (M, 1)  f32        1.0 on interior rows, 0.0 on halo rows
    out_ref:   (M, Co) bf16       conv output (halo rows forced to zero)
    stats_ref: (8, Co) f32        row 0 = sum, row 1 = sum of squares (interior only)
    xp_ref:    (M+2*PAD, Ci) bf16 staging scratch with PAD zero rows at both ends
    """
    M, Ci = x_ref.shape
    Co = out_ref.shape[-1]
    Mp = xp_ref.shape[0]
    PAD = (Mp - M) // 2

    valid = mask_ref[...] != 0.0                               # (M, 1) bool

    if apply_prelu:
        # Fused BN (precomputed scale/shift) + ReLU of the previous block, then force the
        # halo rows back to zero (they act as this conv's zero padding).
        xin = x_ref[...].astype(jnp.float32)
        xin = jnp.maximum(xin * scale_ref[0] + shift_ref[0], 0.0)
        xin = jnp.where(valid, xin, 0.0).astype(jnp.bfloat16)
    else:
        xin = x_ref[...]                                       # pure bf16 copy, no casts

    # Stage into the zero-ended scratch; PAD is a multiple of 16 so the big store is
    # sublane-aligned, and every shifted tap slice below stays in bounds.
    xp_ref[0:PAD, :] = jnp.zeros((PAD, Ci), jnp.bfloat16)
    xp_ref[PAD:PAD + M, :] = xin
    xp_ref[PAD + M:Mp, :] = jnp.zeros((Mp - M - PAD, Ci), jnp.bfloat16)

    # Row offsets of the 9 taps in the flattened padded layout.
    offs = [(kd - 1) * hp + (kh - 1) for kd in range(3) for kh in range(3)]

    if small_k:
        # Small input-channel path (first UNet conv): lane-concatenate the 9 taps and
        # zero-fill the contraction dim to Kp (>=128) -> one MXU matmul.
        Kp = w_ref.shape[0]
        parts = [xp_ref[PAD + o:PAD + o + M, :] for o in offs]
        fill = Kp - 9 * Ci
        if fill > 0:
            parts.append(jnp.zeros((M, fill), jnp.bfloat16))
        patches = jnp.concatenate(parts, axis=1)               # (M, Kp) bf16
        acc = jnp.dot(patches, w_ref[...], preferred_element_type=jnp.float32)
    else:
        # Wide path: 9 accumulated MXU matmuls with K = Ci (>= 128); no patch matrix.
        acc = jnp.zeros((M, Co), jnp.float32)
        for t, o in enumerate(offs):
            acc = acc + jnp.dot(xp_ref[PAD + o:PAD + o + M, :], w_ref[t],
                                preferred_element_type=jnp.float32)

    # Zero the halo output rows (they become the next conv's zero padding) and emit the
    # per-step BN statistics over interior rows only.
    accm = jnp.where(valid, acc, 0.0)
    out_ref[...] = accm.astype(out_ref.dtype)
    srow = jnp.sum(accm, axis=0, keepdims=True)                # (1, Co)
    qrow = jnp.sum(accm * accm, axis=0, keepdims=True)         # (1, Co)
    stats_ref[...] = jnp.concatenate(
        [srow, qrow, jnp.zeros((6, Co), jnp.float32)], axis=0)


def _bn_relu_kernel(x_ref, scale_ref, shift_ref, out_ref):
    """Final fused affine batch-norm (precomputed scale/shift) + ReLU, bf16 stores."""
    y = x_ref[...].astype(jnp.float32) * scale_ref[0] + shift_ref[0]
    out_ref[...] = jnp.maximum(y, 0.0).astype(out_ref.dtype)


# ---------------------------------------------------------------------------
# pallas_call wrappers
# ---------------------------------------------------------------------------
def conv_block(x2d, wk, scale, shift, img_valid, rows_per_img, Co, hp,
               *, apply_prelu, small_k, vmem_cap):
    """One 3x3 conv (over D,H) with fused input BN+ReLU prologue and BN-stat outputs."""
    R, Ci = x2d.shape
    B = R // rows_per_img
    Kp = wk.shape[0] if small_k else 0
    Cl = _round_up(Ci, 128)                     # VMEM lane padding of narrow channels
    bytes_per_row = (2 * Ci * 2                 # input block (double-buffered)
                     + 2 * Cl * 2               # staging scratch + tap temporary
                     + 2 * Co * 2               # output block (double-buffered)
                     + 2 * Co * 4               # f32 accumulator + masked copy
                     + (Kp * 2 if small_k else 0)
                     + 8)                       # mask + slack
    fixed = 2 * int(wk.size) * 2 + 64 * 1024    # weights (double-buffered) + misc
    TB = _choose_tb(B, rows_per_img, bytes_per_row, fixed, int(vmem_cap * 0.45))
    nsteps = B // TB
    M = TB * rows_per_img
    PAD = _round_up(hp + 1, 16)

    # Interior-row indicator for one block (same pattern for every block).
    mask = jnp.asarray(np.tile(np.asarray(img_valid, np.float32), TB).reshape(M, 1))

    if small_k:
        w_spec = pl.BlockSpec((wk.shape[0], Co), lambda i: (0, 0))
    else:
        w_spec = pl.BlockSpec((9, Ci, Co), lambda i: (0, 0, 0))

    kernel = functools.partial(_conv_stats_kernel, apply_prelu=apply_prelu,
                               small_k=small_k, hp=hp)
    out, stats = pl.pallas_call(
        kernel,
        out_shape=(
            jax.ShapeDtypeStruct((R, Co), jnp.bfloat16),
            jax.ShapeDtypeStruct((nsteps * 8, Co), jnp.float32),
        ),
        grid=(nsteps,),
        in_specs=[
            pl.BlockSpec((M, Ci), lambda i: (i, 0)),
            w_spec,
            pl.BlockSpec((1, Ci), lambda i: (0, 0)),
            pl.BlockSpec((1, Ci), lambda i: (0, 0)),
            pl.BlockSpec((M, 1), lambda i: (0, 0)),
        ],
        out_specs=(
            pl.BlockSpec((M, Co), lambda i: (i, 0)),
            pl.BlockSpec((8, Co), lambda i: (i, 0)),      # per-step stats (no carry)
        ),
        scratch_shapes=[pltpu.VMEM((M + 2 * PAD, Ci), jnp.bfloat16)],
        compiler_params=pltpu.CompilerParams(
            dimension_semantics=("parallel",),            # megacore-shardable on v7x
            vmem_limit_bytes=_vmem_limit_bytes(vmem_cap)),
    )(x2d, wk, scale, shift, mask)

    stats = stats.reshape(nsteps, 8, Co)
    return out, jnp.sum(stats[:, 0, :], axis=0), jnp.sum(stats[:, 1, :], axis=0)


def bn_relu(x2d, scale, shift, rows_per_img, *, vmem_cap):
    R, C = x2d.shape
    B = R // rows_per_img
    bytes_per_row = C * (2 * 2 + 2 * 2 + 4 + 4)
    TB = _choose_tb(B, rows_per_img, bytes_per_row, 64 * 1024,
                    int(vmem_cap * 0.45), target_rows=8192)
    M = TB * rows_per_img
    return pl.pallas_call(
        _bn_relu_kernel,
        out_shape=jax.ShapeDtypeStruct((R, C), jnp.bfloat16),
        grid=(B // TB,),
        in_specs=[
            pl.BlockSpec((M, C), lambda i: (i, 0)),
            pl.BlockSpec((1, C), lambda i: (0, 0)),
            pl.BlockSpec((1, C), lambda i: (0, 0)),
        ],
        out_specs=pl.BlockSpec((M, C), lambda i: (i, 0)),
        compiler_params=pltpu.CompilerParams(
            dimension_semantics=("parallel",),
            vmem_limit_bytes=_vmem_limit_bytes(vmem_cap)),
    )(x2d, scale, shift)


# ---------------------------------------------------------------------------
# Full forward pass
# ---------------------------------------------------------------------------
def unet_conv3_forward(x_ncdhw, params, eps=1e-5):
    """Forward pass of UnetConv3(in_size, out_size, is_batchnorm=True).

    Conv biases are omitted: training-mode BatchNorm subtracts the batch mean, so they
    cancel exactly.
    """
    N, Cin, D, H, W = x_ncdhw.shape
    Cout = params["w1"].shape[-1]
    Cop = _round_up(Cout, 128)
    B = N * W
    Dp, Hp = D + 2, H + 2
    rows_per_img = Dp * Hp
    R = B * rows_per_img
    count = B * D * H
    vmem_cap = _vmem_capacity_bytes()

    # NCDHW -> (B=N*W, D, H, Cin) channels-last, bake the 1-pixel (D,H) halo into the
    # layout, flatten to a lane-dense (rows, Cin) slab (the flatten is a free reshape).
    xk = jnp.transpose(x_ncdhw, (0, 4, 2, 3, 1)).reshape(B, D, H, Cin)
    xk = jnp.pad(xk, ((0, 0), (1, 1), (1, 1), (0, 0))).astype(jnp.bfloat16)
    xk = xk.reshape(R, Cin)

    # Interior (non-halo) indicator for one image.
    img_valid = np.zeros((Dp, Hp), np.float32)
    img_valid[1:D + 1, 1:H + 1] = 1.0
    img_valid = img_valid.reshape(-1)

    def prep_w_small(w, cop):
        # (3,3,ci,co) -> (round_up(9*ci,128), cop): pad the contraction dim, NOT Cin.
        ci, co = w.shape[2], w.shape[3]
        w = jnp.pad(w, ((0, 0), (0, 0), (0, 0), (0, cop - co))).reshape(9 * ci, cop)
        w = jnp.pad(w, ((0, _round_up(9 * ci, 128) - 9 * ci), (0, 0)))
        return w.astype(jnp.bfloat16)

    def prep_w_wide(w, cip, cop):
        # (3,3,ci,co) -> (9, cip, cop), channels zero-padded to lane multiples.
        w = jnp.pad(w, ((0, 0), (0, 0), (0, cip - w.shape[2]), (0, cop - w.shape[3])))
        return w.reshape(9, cip, cop).astype(jnp.bfloat16)

    def pad_c(v, cp):
        return jnp.pad(v, (0, cp - v.shape[0]))

    # ---- block 1: conv1 + batch statistics (no BN prologue) ----------------------
    if Cin < 128:
        x1, Ci1, small1 = xk, Cin, True          # Cin stays unpadded in HBM
        w1 = prep_w_small(params["w1"], Cop)
    else:
        Cip = _round_up(Cin, 128)
        x1 = jnp.pad(xk, ((0, 0), (0, Cip - Cin)))
        Ci1, small1 = Cip, False
        w1 = prep_w_wide(params["w1"], Cip, Cop)
    ident_scale = jnp.ones((1, Ci1), jnp.float32)
    ident_shift = jnp.zeros((1, Ci1), jnp.float32)
    y1, s1, q1 = conv_block(x1, w1, ident_scale, ident_shift, img_valid, rows_per_img,
                            Cop, Hp, apply_prelu=False, small_k=small1,
                            vmem_cap=vmem_cap)
    g1, be1 = pad_c(params["g1"], Cop), pad_c(params["beta1"], Cop)
    mean1 = s1 / count
    var1 = q1 / count - mean1 * mean1
    scale1 = g1 * lax.rsqrt(var1 + eps)
    shift1 = be1 - mean1 * scale1

    # ---- block 2: BN1+ReLU fused as prologue, conv2 + batch statistics ------------
    w2 = prep_w_wide(params["w2"], Cop, Cop)
    y2, s2, q2 = conv_block(y1, w2, scale1[None, :], shift1[None, :], img_valid,
                            rows_per_img, Cop, Hp, apply_prelu=True, small_k=False,
                            vmem_cap=vmem_cap)
    g2, be2 = pad_c(params["g2"], Cop), pad_c(params["beta2"], Cop)
    mean2 = s2 / count
    var2 = q2 / count - mean2 * mean2
    scale2 = g2 * lax.rsqrt(var2 + eps)
    shift2 = be2 - mean2 * scale2

    # ---- final BN2 + ReLU (standalone, lane-dense, bf16 stores) --------------------
    y = bn_relu(y2, scale2[None, :], shift2[None, :], rows_per_img, vmem_cap=vmem_cap)

    # Drop the spatial halo and channel padding, cast back to f32, restore NCDHW.
    y = y.reshape(B, Dp, Hp, Cop)[:, 1:D + 1, 1:H + 1, :Cout].astype(jnp.float32)
    y = y.reshape(N, W, D, H, Cout)
    return jnp.transpose(y, (0, 4, 2, 3, 1))


# ---------------------------------------------------------------------------
# Deterministic parameter init (mirrors shapes / init style of the PyTorch module).
# Conv biases are omitted: they cancel exactly under training-mode BatchNorm.
# ---------------------------------------------------------------------------
def init_params(key, in_size, out_size):
    ks = jax.random.split(key, 4)
    fan1 = in_size * 3 * 3 * 1
    fan2 = out_size * 3 * 3 * 1
    p = {}
    p["w1"] = jax.random.normal(ks[0], (3, 3, in_size, out_size), jnp.float32) * np.sqrt(2.0 / fan1)
    p["g1"] = 1.0 + 0.02 * jax.random.normal(ks[1], (out_size,), jnp.float32)
    p["beta1"] = jnp.zeros((out_size,), jnp.float32)
    p["w2"] = jax.random.normal(ks[2], (3, 3, out_size, out_size), jnp.float32) * np.sqrt(2.0 / fan2)
    p["g2"] = 1.0 + 0.02 * jax.random.normal(ks[3], (out_size,), jnp.float32)
    p["beta2"] = jnp.zeros((out_size,), jnp.float32)
    return p


# ---------------------------------------------------------------------------
# Pure-JAX f32 reference (lax conv) for correctness check
# ---------------------------------------------------------------------------
def reference_forward(x, params, eps=1e-5):
    def block(x, w, gamma, beta):
        w_oidhw = jnp.transpose(w, (3, 2, 0, 1))[..., None]   # (Cout, Cin, 3, 3, 1)
        y = lax.conv_general_dilated(
            x, w_oidhw, window_strides=(1, 1, 1),
            padding=((1, 1), (1, 1), (0, 0)),
            dimension_numbers=("NCDHW", "OIDHW", "NCDHW"))
        mean = jnp.mean(y, axis=(0, 2, 3, 4), keepdims=True)
        var = jnp.mean((y - mean) ** 2, axis=(0, 2, 3, 4), keepdims=True)
        y = (y - mean) / jnp.sqrt(var + eps)
        y = y * gamma[None, :, None, None, None] + beta[None, :, None, None, None]
        return jnp.maximum(y, 0.0)

    y = block(x, params["w1"], params["g1"], params["beta1"])
    y = block(y, params["w2"], params["g2"], params["beta2"])
    return y


if __name__ == "__main__":
    key = jax.random.PRNGKey(0)
    k_x, k_p = jax.random.split(key)

    # Small NCDHW input: N=2, in_size=4, D=8, H=8, W=4; out_size=8
    N, in_size, out_size, D, H, W = 2, 4, 8, 8, 8, 4
    x = jax.random.normal(k_x, (N, in_size, D, H, W), jnp.float32)
    params = init_params(k_p, in_size, out_size)

    out = jax.block_until_ready(unet_conv3_forward(x, params))
    assert out.shape == (N, out_size, D, H, W)

    ref = jax.block_until_ready(reference_forward(x, params))
    # Kernel uses bf16 MXU operands (f32 accumulation); compare against the f32
    # reference with correspondingly loosened tolerances.
    np.testing.assert_allclose(np.asarray(out), np.asarray(ref), rtol=3e-2, atol=3e-2)

    print("KERNEL_OK")
</pallas_src>

<mosaic_0001>
module attributes {stable_mosaic.version = 11 : i64} {
  func.func @_conv_stats_kernel(%arg0: i32, %arg1: memref<800x4xbf16, #tpu.memory_space<vmem>>, %arg2: memref<128x128xbf16, #tpu.memory_space<vmem>>, %arg3: memref<1x4xf32, #tpu.memory_space<vmem>>, %arg4: memref<1x4xf32, #tpu.memory_space<vmem>>, %arg5: memref<800x1xf32, #tpu.memory_space<vmem>>, %arg6: memref<800x128xbf16, #tpu.memory_space<vmem>>, %arg7: memref<8x128xf32, #tpu.memory_space<vmem>>, %arg8: memref<832x4xbf16, #tpu.memory_space<vmem>>) attributes {dimension_semantics = [#tpu.dimension_semantics<parallel>], iteration_bounds = array<i64: 1>, scalar_prefetch = 0 : i64, scratch_operands = 1 : i64, tpu.core_type = #tpu.core_type<tc>, window_params = [{transform_indices = @transform_0, window_bounds = array<i64: 800, 4>}, {pipeline_mode = #tpu.pipeline_mode<synchronous>, transform_indices = @transform_1, window_bounds = array<i64: 128, 128>}, {pipeline_mode = #tpu.pipeline_mode<synchronous>, transform_indices = @transform_2, window_bounds = array<i64: 1, 4>}, {pipeline_mode = #tpu.pipeline_mode<synchronous>, transform_indices = @transform_3, window_bounds = array<i64: 1, 4>}, {pipeline_mode = #tpu.pipeline_mode<synchronous>, transform_indices = @transform_4, window_bounds = array<i64: 800, 1>}, {transform_indices = @transform_5, window_bounds = array<i64: 800, 128>}, {transform_indices = @transform_6, window_bounds = array<i64: 8, 128>}]} {
    %c0 = arith.constant 0 : index
    %c0_0 = arith.constant 0 : index
    %0 = vector.load %arg5[%c0, %c0_0] : memref<800x1xf32, #tpu.memory_space<vmem>>, vector<800x1xf32>
    %cst = arith.constant 0.000000e+00 : f32
    %1 = vector.broadcast %cst : f32 to vector<800x1xf32>
    %2 = arith.cmpf one, %0, %1 : vector<800x1xf32>
    %c0_1 = arith.constant 0 : index
    %c0_2 = arith.constant 0 : index
    %3 = vector.load %arg1[%c0_1, %c0_2] : memref<800x4xbf16, #tpu.memory_space<vmem>>, vector<800x4xbf16>
    %cst_3 = arith.constant 0.000000e+00 : bf16
    %4 = vector.broadcast %cst_3 : bf16 to vector<16x4xbf16>
    %c0_4 = arith.constant 0 : index
    %c0_5 = arith.constant 0 : index
    %5 = vector.load %arg8[%c0_4, %c0_5] : memref<832x4xbf16, #tpu.memory_space<vmem>>, vector<16x4xbf16>
    tpu.vector_store %arg8[%c0_4, %c0_5], %4 {strides = array<i32>} : memref<832x4xbf16, #tpu.memory_space<vmem>>, vector<16x4xbf16>,
    %c16 = arith.constant 16 : index
    %c0_6 = arith.constant 0 : index
    %6 = vector.load %arg8[%c16, %c0_6] : memref<832x4xbf16, #tpu.memory_space<vmem>>, vector<800x4xbf16>
    tpu.vector_store %arg8[%c16, %c0_6], %3 {strides = array<i32>} : memref<832x4xbf16, #tpu.memory_space<vmem>>, vector<800x4xbf16>,
    %cst_7 = arith.constant 0.000000e+00 : bf16
    %7 = vector.broadcast %cst_7 : bf16 to vector<16x4xbf16>
    %c816 = arith.constant 816 : index
    %c0_8 = arith.constant 0 : index
    %8 = vector.load %arg8[%c816, %c0_8] : memref<832x4xbf16, #tpu.memory_space<vmem>>, vector<16x4xbf16>
    tpu.vector_store %arg8[%c816, %c0_8], %7 {strides = array<i32>} : memref<832x4xbf16, #tpu.memory_space<vmem>>, vector<16x4xbf16>,
    %c5 = arith.constant 5 : index
    %c0_9 = arith.constant 0 : index
    %9 = vector.load %arg8[%c5, %c0_9] : memref<832x4xbf16, #tpu.memory_space<vmem>>, vector<800x4xbf16>
    %c6 = arith.constant 6 : index
    %c0_10 = arith.constant 0 : index
    %10 = vector.load %arg8[%c6, %c0_10] : memref<832x4xbf16, #tpu.memory_space<vmem>>, vector<800x4xbf16>
    %c7 = arith.constant 7 : index
    %c0_11 = arith.constant 0 : index
    %11 = vector.load %arg8[%c7, %c0_11] : memref<832x4xbf16, #tpu.memory_space<vmem>>, vector<800x4xbf16>
    %c15 = arith.constant 15 : index
    %c0_12 = arith.constant 0 : index
    %12 = vector.load %arg8[%c15, %c0_12] : memref<832x4xbf16, #tpu.memory_space<vmem>>, vector<800x4xbf16>
    %c16_13 = arith.constant 16 : index
    %c0_14 = arith.constant 0 : index
    %13 = vector.load %arg8[%c16_13, %c0_14] : memref<832x4xbf16, #tpu.memory_space<vmem>>, vector<800x4xbf16>
    %c17 = arith.constant 17 : index
    %c0_15 = arith.constant 0 : index
    %14 = vector.load %arg8[%c17, %c0_15] : memref<832x4xbf16, #tpu.memory_space<vmem>>, vector<800x4xbf16>
    %c25 = arith.constant 25 : index
    %c0_16 = arith.constant 0 : index
    %15 = vector.load %arg8[%c25, %c0_16] : memref<832x4xbf16, #tpu.memory_space<vmem>>, vector<800x4xbf16>
    %c26 = arith.constant 26 : index
    %c0_17 = arith.constant 0 : index
    %16 = vector.load %arg8[%c26, %c0_17] : memref<832x4xbf16, #tpu.memory_space<vmem>>, vector<800x4xbf16>
    %c27 = arith.constant 27 : index
    %c0_18 = arith.constant 0 : index
    %17 = vector.load %arg8[%c27, %c0_18] : memref<832x4xbf16, #tpu.memory_space<vmem>>, vector<800x4xbf16>
    %cst_19 = arith.constant 0.000000e+00 : bf16
    %18 = vector.broadcast %cst_19 : bf16 to vector<800x92xbf16>
    %19 = tpu.concatenate %9, %10, %11, %12, %13, %14, %15, %16, %17, %18 in 1 : vector<800x4xbf16>, vector<800x4xbf16>, vector<800x4xbf16>, vector<800x4xbf16>, vector<800x4xbf16>, vector<800x4xbf16>, vector<800x4xbf16>, vector<800x4xbf16>, vector<800x4xbf16>, vector<800x92xbf16> -> vector<800x128xbf16>
    %c0_20 = arith.constant 0 : index
    %c0_21 = arith.constant 0 : index
    %20 = vector.load %arg2[%c0_20, %c0_21] : memref<128x128xbf16, #tpu.memory_space<vmem>>, vector<128x128xbf16>
    %cst_22 = arith.constant dense<0.000000e+00> : vector<800x128xf32>
    %21 = tpu.matmul %19, %20, %cst_22 {dimension_numbers = #tpu.dot_dimension_numbers<[1], [0], [0], [1], [0, 0, 1, 1], [], []>} : vector<800x128xbf16>, vector<128x128xbf16>, vector<800x128xf32> -> vector<800x128xf32>
    %cst_23 = arith.constant 0.000000e+00 : f32
    %22 = vector.shape_cast %2 : vector<800x1xi1> to vector<800x1xi1>
    %23 = vector.broadcast %22 : vector<800x1xi1> to vector<800x128xi1>
    %24 = vector.broadcast %cst_23 : f32 to vector<800x128xf32>
    %25 = arith.select %23, %21, %24 : vector<800x128xi1>, vector<800x128xf32>
    %26 = arith.truncf %25 : vector<800x128xf32> to vector<800x128xbf16>
    %c0_24 = arith.constant 0 : index
    %c0_25 = arith.constant 0 : index
    %27 = vector.load %arg6[%c0_24, %c0_25] : memref<800x128xbf16, #tpu.memory_space<vmem>>, vector<800x128xbf16>
    tpu.vector_store %arg6[%c0_24, %c0_25], %26 {strides = array<i32>} : memref<800x128xbf16, #tpu.memory_space<vmem>>, vector<800x128xbf16>,
    %cst_26 = arith.constant dense<0.000000e+00> : vector<128xf32>
    %28 = vector.multi_reduction <add>, %25, %cst_26 [0] : vector<800x128xf32> to vector<128xf32>
    %29 = vector.shape_cast %28 : vector<128xf32> to vector<1x128xf32>
    %30 = arith.mulf %25, %25 : vector<800x128xf32>
    %cst_27 = arith.constant dense<0.000000e+00> : vector<128xf32>
    %31 = vector.multi_reduction <add>, %30, %cst_27 [0] : vector<800x128xf32> to vector<128xf32>
    %32 = vector.shape_cast %31 : vector<128xf32> to vector<1x128xf32>
    %cst_28 = arith.constant 0.000000e+00 : f32
    %33 = vector.broadcast %cst_28 : f32 to vector<6x128xf32>
    %34 = tpu.concatenate %29, %32, %33 in 0 : vector<1x128xf32>, vector<1x128xf32>, vector<6x128xf32> -> vector<8x128xf32>
    %c0_29 = arith.constant 0 : index
    %c0_30 = arith.constant 0 : index
    %35 = vector.load %arg7[%c0_29, %c0_30] : memref<8x128xf32, #tpu.memory_space<vmem>>, vector<8x128xf32>
    tpu.vector_store %arg7[%c0_29, %c0_30], %34 {strides = array<i32>} : memref<8x128xf32, #tpu.memory_space<vmem>>, vector<8x128xf32>,
    return
  }
  func.func @transform_0(%arg0: i32) -> (i32, i32) {
    %c0_i32 = arith.constant 0 : i32
    %c0_i32_0 = arith.constant 0 : i32
    return %arg0, %c0_i32 : i32, i32
  }
  func.func @transform_1(%arg0: i32) -> (i32, i32) {
    %c0_i32 = arith.constant 0 : i32
    %c0_i32_0 = arith.constant 0 : i32
    %c0_i32_1 = arith.constant 0 : i32
    return %c0_i32, %c0_i32_0 : i32, i32
  }
  func.func @transform_2(%arg0: i32) -> (i32, i32) {
    %c0_i32 = arith.constant 0 : i32
    %c0_i32_0 = arith.constant 0 : i32
    %c0_i32_1 = arith.constant 0 : i32
    return %c0_i32, %c0_i32_0 : i32, i32
  }
  func.func @transform_3(%arg0: i32) -> (i32, i32) {
    %c0_i32 = arith.constant 0 : i32
    %c0_i32_0 = arith.constant 0 : i32
    %c0_i32_1 = arith.constant 0 : i32
    return %c0_i32, %c0_i32_0 : i32, i32
  }
  func.func @transform_4(%arg0: i32) -> (i32, i32) {
    %c0_i32 = arith.constant 0 : i32
    %c0_i32_0 = arith.constant 0 : i32
    %c0_i32_1 = arith.constant 0 : i32
    return %c0_i32, %c0_i32_0 : i32, i32
  }
  func.func @transform_5(%arg0: i32) -> (i32, i32) {
    %c0_i32 = arith.constant 0 : i32
    %c0_i32_0 = arith.constant 0 : i32
    return %arg0, %c0_i32 : i32, i32
  }
  func.func @transform_6(%arg0: i32) -> (i32, i32) {
    %c0_i32 = arith.constant 0 : i32
    %c0_i32_0 = arith.constant 0 : i32
    return %arg0, %c0_i32 : i32, i32
  }
}

</mosaic_0001>

<bundles_post_ra>
// kernel: tpu_custom_call.1
= control target key start
LH: loop header
LB: loop body
LE: loop exit
PB: predicated region body
PF: predicated region fallthrough
CT: control target
= control target key end

     0   :  { %12 = vsyncpa [#allocation4], 0  ;;  %vm325_vm0 = vcmask 31744   ;;  %v13353_v1 = vmov 0   ;;  %vm738_vm1 = vsmask.f32 7424  ;;  %s13346_s0 = inlined_call_operand.vmem [shape: bf16[800,4], index: 0, kind: input, shape index: {}]   ;;  %s13347_s1 = inlined_call_operand.vmem [shape: bf16[128,128], index: 1, kind: input, shape index: {}]   ;;  %s13348_s2 = inlined_call_operand.vmem [shape: f32[1,4], index: 2, kind: input, shape index: {}]   ;;  %s13349_s3 = inlined_call_operand.vmem [shape: f32[1,4], index: 3, kind: input, shape index: {}]   ;;  %s13350_s4 = inlined_call_operand.vmem [shape: f32[800,1], index: 4, kind: input, shape index: {}]   ;;  %s13351_s5 = inlined_call_operand.hbm [shape: bf16[800,128], index: 5, kind: output, shape index: {0}]   ;;  %s13352_s6 = inlined_call_operand.hbm [shape: f32[8,128], index: 6, kind: output, shape index: {1}]  }
   0x1   :  { %v225_v0 = vld [vmem:[%s13346_s0] sm:$0xff]   ;;  %326 = vst.msk [vmem:[#allocation2] sm:$0xff] %vm325_vm0, %v13353_v1  ;;  %677 = vst.msk [vmem:[#allocation2 + $0x198] sm:$0xff] %vm325_vm0, %v13353_v1  ;;  %6984 = vset.pattern.permute.xlu0 %v13353_v1  ;;  %6985 = vset.pattern.permute.xlu1 %v13353_v1  ;;  %v6986_v2 = vld [vmem:[%s13346_s0 + $0x8] sm:$0xff]   ;;  %s7229_s2 = smov 4  }
   0x2   :  { %v6987_v3 = vld [vmem:[%s13346_s0 + $0x10] sm:$0xff]   ;;  %627 = vst.msk [vmem:[#allocation2 + $0x8] sm:$0xff] %vm325_vm0, %v225_v0  ;;  %v6988_v4 = vld [vmem:[%s13346_s0 + $0x18] sm:$0xff]   ;;  %628 = vst.msk [vmem:[#allocation2 + $0x10] sm:$0xff] %vm325_vm0, %v6986_v2 }
   0x3   :  { %629 = vst.msk [vmem:[#allocation2 + $0x18] sm:$0xff] %vm325_vm0, %v6987_v3  ;;  %v6989_v5 = vld [vmem:[%s13346_s0 + $0x20] sm:$0xff]   ;;  %630 = vst.msk [vmem:[#allocation2 + $0x20] sm:$0xff] %vm325_vm0, %v6988_v4  ;;  %v6990_v6 = vld [vmem:[%s13346_s0 + $0x28] sm:$0xff]  }
   0x4   :  { %631 = vst.msk [vmem:[#allocation2 + $0x28] sm:$0xff] %vm325_vm0, %v6989_v5  ;;  %v6991_v7 = vld [vmem:[%s13346_s0 + $0x30] sm:$0xff]   ;;  %632 = vst.msk [vmem:[#allocation2 + $0x30] sm:$0xff] %vm325_vm0, %v6990_v6  ;;  %v6992_v8 = vld [vmem:[%s13346_s0 + $0x38] sm:$0xff]  }
   0x5   :  { %633 = vst.msk [vmem:[#allocation2 + $0x38] sm:$0xff] %vm325_vm0, %v6991_v7  ;;  %634 = vst.msk [vmem:[#allocation2 + $0x40] sm:$0xff] %vm325_vm0, %v6992_v8  ;;  %v6993_v12 = vld [vmem:[%s13346_s0 + $0x40] sm:$0xff]   ;;  %v6994_v13 = vld [vmem:[%s13346_s0 + $0x48] sm:$0xff]  }
   0x6   :  { %635 = vst.msk [vmem:[#allocation2 + $0x48] sm:$0xff] %vm325_vm0, %v6993_v12  ;;  %636 = vst.msk [vmem:[#allocation2 + $0x50] sm:$0xff] %vm325_vm0, %v6994_v13  ;;  %v6995_v20 = vld [vmem:[%s13346_s0 + $0x50] sm:$0xff]   ;;  %v6996_v26 = vld [vmem:[%s13346_s0 + $0x58] sm:$0xff]  }
   0x7   :  { %637 = vst.msk [vmem:[#allocation2 + $0x58] sm:$0xff] %vm325_vm0, %v6995_v20  ;;  %638 = vst.msk [vmem:[#allocation2 + $0x60] sm:$0xff] %vm325_vm0, %v6996_v26  ;;  %v6997_v36 = vld [vmem:[%s13346_s0 + $0x60] sm:$0xff]   ;;  %v6998_v42 = vld [vmem:[%s13346_s0 + $0x68] sm:$0xff]  }
   0x8   :  { %v729_v9 = vld [vmem:[#allocation2] sm:$0xf8]  ;;  %639 = vst.msk [vmem:[#allocation2 + $0x68] sm:$0xff] %vm325_vm0, %v6997_v36  ;;  %640 = vst.msk [vmem:[#allocation2 + $0x70] sm:$0xff] %vm325_vm0, %v6998_v42  ;;  %v7000_v60 = vld [vmem:[%s13346_s0 + $0x78] sm:$0xff]  }
   0x9   :  { %v740_v10 = vshrl.u32 %v729_v9, 16  ;;  %v742_v11 = vshll.u32 %v729_v9, 16  ;;  %v7319_v14 = vld [vmem:[#allocation2 + $0x8] sm:$0xff]  ;;  %v680_v17 = vld [vmem:[#allocation2 + $0x10] sm:$0xff]  ;;  %v6999_v48 = vld [vmem:[%s13346_s0 + $0x70] sm:$0xff]   ;;  %642 = vst.msk [vmem:[#allocation2 + $0x80] sm:$0xff] %vm325_vm0, %v7000_v60 }
   0xa   :  { %v13356_v16 = vshll.u32 %v7319_v14, 16  ;;  %v681_v18 = vld [vmem:[#allocation2 + $0x18] sm:$0xff]  ;;  %v13355_v19 = vshrl.u32 %v7319_v14, 16  ;;  %v7328_v21 = vshll.u32 %v680_v17, 16  ;;  %v7330_v22 = vshrl.u32 %v680_v17, 16  ;;  %v682_v24 = vld [vmem:[#allocation2 + $0x20] sm:$0xff] }
   0xb   :  { %v744_v15 = vrot.slane %v742_v11, 1  ;;  %v7332_v23 = vshll.u32 %v681_v18, 16  ;;  %v7334_v25 = vshrl.u32 %v681_v18, 16  ;;  %v7341_v29 = vshll.u32 %v682_v24, 16  ;;  %v683_v30 = vld [vmem:[#allocation2 + $0x28] sm:$0xff]  ;;  %v684_v35 = vld [vmem:[#allocation2 + $0x30] sm:$0xff] }
   0xc   :  { %v749_v28 = vrot.slane %v13356_v16, 1  ;;  %v757_v31 = vrot.slane %v7328_v21, 1  ;;  %v7346_v33 = vshrl.u32 %v682_v24, 16  ;;  %v7348_v34 = vshll.u32 %v683_v30, 16  ;;  %v685_v41 = vld [vmem:[#allocation2 + $0x38] sm:$0xff]  ;;  %v7369_v47 = vld [vmem:[#allocation2 + $0x40] sm:$0xff] }
   0xd   :  { %13571 = vst [vmem:[#allocation9_spill] sm:$0xff] %v7332_v23  ;;  %13572 = vst [vmem:[#allocation10_spill] sm:$0xff] %v7334_v25  ;;  %v745_v27 = vor.u32 %v744_v15, %v740_v10  ;;  %v765_v32 = vrot.slane %v7332_v23, 1  ;;  %v773_v39 = vrot.slane %v7341_v29, 1  ;;  %v7358_v40 = vshrl.u32 %v683_v30, 16  ;;  %v7384_v55 = vld [vmem:[#allocation2 + $0x48] sm:$0xff] }
   0xe   :  { %13573 = vst [vmem:[#allocation11_spill] sm:$0xff] %v7341_v29  ;;  %13574 = vst [vmem:[#allocation12_spill] sm:$0xff] %v7346_v33  ;;  %v753_v38 = vor.u32 %v13355_v19, %v749_v28  ;;  %v761_v43 = vor.u32 %v7330_v22, %v757_v31  ;;  %v781_v45 = vrot.slane %v7348_v34, 1  ;;  %v7367_v46 = vshll.u32 %v684_v35, 16  ;;  %v7386_v56 = vld [vmem:[#allocation2 + $0x50] sm:$0xff]  ;;  %v7406_v2 = vld [vmem:[#allocation2 + $0x58] sm:$0xff] }
   0xf   :  { %13575 = vst [vmem:[#allocation13_spill] sm:$0xff] %v7348_v34  ;;  %v750_v37 = vsel %vm738_vm1, %v745_v27, %v749_v28  ;;  %13576 = vst [vmem:[#allocation14_spill] sm:$0xff] %v7358_v40  ;;  %v769_v44 = vor.u32 %v7334_v25, %v765_v32  ;;  %v777_v50 = vor.u32 %v7346_v33, %v773_v39  ;;  %v7377_v51 = vshrl.u32 %v684_v35, 16  ;;  %v7001_v3 = vld [vmem:[%s13346_s0 + $0x80] sm:$0xff]   ;;  %v7419_v8 = vld [vmem:[#allocation2 + $0x60] sm:$0xff] }
  0x10   :  { %1146 = vrot.lane.b32.xlu0 %v750_v37, %s7229_s2  ;;  %13577 = vst [vmem:[#allocation15_spill] sm:$0xff] %v7367_v46  ;;  %v758_v49 = vsel %vm738_vm1, %v753_v38, %v757_v31  ;;  %v7379_v52 = vshll.u32 %v685_v41, 16  ;;  %v766_v53 = vsel %vm738_vm1, %v761_v43, %v765_v32  ;;  %v789_v54 = vrot.slane %v7367_v46, 1  ;;  %641 = vst.msk [vmem:[#allocation2 + $0x78] sm:$0xff] %vm325_vm0, %v6999_v48  ;;  %v7002_v9 = vld [vmem:[%s13346_s0 + $0x88] sm:$0xff]   ;;  %v7003_v13 = vld [vmem:[%s13346_s0 + $0x90] sm:$0xff]  }
  0x11   :  { %13578 = vst [vmem:[#allocation16_spill] sm:$0xff] %v7377_v51  ;;  %1150 = vrot.lane.b32.xlu1 %v766_v53, %s7229_s2  ;;  %v774_v57 = vsel %vm738_vm1, %v769_v44, %v773_v39  ;;  %v7393_v59 = vshll.u32 %v7369_v47, 16  ;;  %v782_v61 = vsel %vm738_vm1, %v777_v50, %v781_v45  ;;  %v785_v62 = vor.u32 %v7358_v40, %v781_v45  ;;  %v7450_v28 = vld [vmem:[#allocation2 + $0x68] sm:$0xff]  ;;  %v7456_v31 = vld [vmem:[#allocation2 + $0x70] sm:$0xff]  ;;  %v7006_v44 = vld [vmem:[%s13346_s0 + $0xa8] sm:$0xff]  }
  0x12   :  { %13579 = vst [vmem:[#allocation17_spill] sm:$0xff] %v7379_v52  ;;  %v797_v58 = vrot.slane %v7379_v52, 1  ;;  %v7401_v63 = vshrl.u32 %v685_v41, 16  ;;  %v7404_v0 = vshll.u32 %v7384_v55, 16  ;;  %v793_v4 = vor.u32 %v7377_v51, %v789_v54  ;;  %643 = vst.msk [vmem:[#allocation2 + $0x88] sm:$0xff] %vm325_vm0, %v7001_v3  ;;  %v7004_v30 = vld [vmem:[%s13346_s0 + $0x98] sm:$0xff]  }
  0x13   :  { %13580 = vst [vmem:[#allocation18_spill] sm:$0xff] %v7393_v59  ;;  %v805_v5 = vrot.slane %v7393_v59, 1  ;;  %v7414_v6 = vshrl.u32 %v7369_v47, 16  ;;  %v7417_v7 = vshll.u32 %v7386_v56, 16  ;;  %v7429_v11 = vshrl.u32 %v7384_v55, 16  ;;  %644 = vst.msk [vmem:[#allocation2 + $0x90] sm:$0xff] %vm325_vm0, %v7002_v9 }
  0x14   :  { %1148 = vrot.lane.b32.xlu0 %v758_v49, %s7229_s2  ;;  %13581 = vst [vmem:[#allocation19_spill] sm:$0xff] %v7401_v63  ;;  %13582 = vst [vmem:[#allocation20_spill] sm:$0xff] %v7404_v0  ;;  %v813_v10 = vrot.slane %v7404_v0, 1  ;;  %v7432_v12 = vshll.u32 %v7406_v2, 16  ;;  %v790_v15 = vsel %vm738_vm1, %v785_v62, %v789_v54  ;;  %v801_v17 = vor.u32 %v7401_v63, %v797_v58  ;;  %v7005_v38 = vld [vmem:[%s13346_s0 + $0xa0] sm:$0xff]   ;;  %v7491_v53 = vld [vmem:[#allocation2 + $0x80] sm:$0xff] }
  0x15   :  { %13583 = vst [vmem:[#allocation21_spill] sm:$0xff] %v7414_v6  ;;  %13584 = vst [vmem:[#allocation22_spill] sm:$0xff] %v7417_v7  ;;  %1152 = vrot.lane.b32.xlu1 %v774_v57, %s7229_s2  ;;  %v7441_v18 = vshll.u32 %v7419_v8, 16  ;;  %v798_v20 = vsel %vm738_vm1, %v793_v4, %v797_v58  ;;  %v809_v24 = vor.u32 %v7414_v6, %v805_v5  ;;  %v821_v26 = vrot.slane %v7417_v7, 1 }
  0x16   :  { %13585 = vst [vmem:[#allocation23_spill] sm:$0xff] %v7429_v11  ;;  %13586 = vst [vmem:[#allocation24_spill] sm:$0xff] %v7432_v12  ;;  %v7448_v27 = vshrl.u32 %v7386_v56, 16  ;;  %v817_v32 = vor.u32 %v7429_v11, %v813_v10  ;;  %v829_v35 = vrot.slane %v7432_v12, 1  ;;  %v7462_v36 = vshrl.u32 %v7406_v2, 16 }
  0x17   :  { %13587 = vst [vmem:[#allocation25_spill] sm:$0xff] %v7441_v18  ;;  %645 = vst.msk [vmem:[#allocation2 + $0x98] sm:$0xff] %vm325_vm0, %v7003_v13  ;;  %v7465_v37 = vshrl.u32 %v7419_v8, 16  ;;  %v806_v39 = vsel %vm738_vm1, %v801_v17, %v805_v5  ;;  %v837_v41 = vrot.slane %v7441_v18, 1  ;;  %v7475_v42 = vshll.u32 %v7450_v28, 16  ;;  %v7477_v43 = vld [vmem:[#allocation2 + $0x78] sm:$0xff] }
  0x18   :  { %1154 = vrot.lane.b32.xlu0 %v782_v61, %s7229_s2  ;;  %13588 = vst [vmem:[#allocation26_spill] sm:$0xff] %v7448_v27  ;;  %13589 = vst [vmem:[#allocation27_spill] sm:$0xff] %v7462_v36  ;;  %v814_v45 = vsel %vm738_vm1, %v809_v24, %v813_v10  ;;  %v825_v48 = vor.u32 %v7448_v27, %v821_v26  ;;  %v7485_v49 = vshll.u32 %v7456_v31, 16  ;;  %v7489_v50 = vshrl.u32 %v7450_v28, 16  ;;  %v7008_v24 = vld [vmem:[%s13346_s0 + $0xb8] sm:$0xff]  }
  0x19   :  { %1156 = vrot.lane.b32.xlu1 %v790_v15, %s7229_s2  ;;  %13590 = vst [vmem:[#allocation28_spill] sm:$0xff] %v7465_v37  ;;  %646 = vst.msk [vmem:[#allocation2 + $0xa0] sm:$0xff] %vm325_vm0, %v7004_v30  ;;  %v822_v54 = vsel %vm738_vm1, %v817_v32, %v821_v26  ;;  %v7497_v57 = vshll.u32 %v7477_v43, 16  ;;  %v7499_v58 = vld [vmem:[#allocation2 + $0x88] sm:$0xff]  ;;  %v833_v60 = vor.u32 %v7462_v36, %v829_v35  ;;  %v845_v62 = vrot.slane %v7475_v42, 1  ;;  %v7007_v15 = vld [vmem:[%s13346_s0 + $0xb0] sm:$0xff]  }
  0x1a   :  { %13591 = vst [vmem:[#allocation29_spill] sm:$0xff] %v7475_v42  ;;  %13592 = vst [vmem:[#allocation30_spill] sm:$0xff] %v7485_v49  ;;  %v841_v61 = vor.u32 %v7465_v37, %v837_v41  ;;  %v7506_v3 = vshrl.u32 %v7456_v31, 16  ;;  %v830_v4 = vsel %vm738_vm1, %v825_v48, %v829_v35  ;;  %v853_v5 = vrot.slane %v7485_v49, 1  ;;  %v7516_v13 = vld [vmem:[#allocation2 + $0x90] sm:$0xff] }
  0x1b   :  { %647 = vst.msk [vmem:[#allocation2 + $0xa8] sm:$0xff] %vm325_vm0, %v7005_v38  ;;  %13593 = vst [vmem:[#allocation31_spill] sm:$0xff] %v7489_v50  ;;  %v7511_v9 = vshll.u32 %v7491_v53, 16  ;;  %v7514_v10 = vshll.u32 %v7499_v58, 16  ;;  %v861_v17 = vrot.slane %v7497_v57, 1  ;;  %v838_v26 = vsel %vm738_vm1, %v833_v60, %v837_v41  ;;  %v7010_v60 = vld [vmem:[%s13346_s0 + $0xc8] sm:$0xff]  }
  0x1c   :  { %1158 = vrot.lane.b32.xlu0 %v798_v20, %s7229_s2  ;;  %648 = vst.msk [vmem:[#allocation2 + $0xb0] sm:$0xff] %vm325_vm0, %v7006_v44  ;;  %13594 = vst [vmem:[#allocation32_spill] sm:$0xff] %v7497_v57  ;;  %v7524_v20 = vshrl.u32 %v7477_v43, 16  ;;  %v846_v30 = vsel %vm738_vm1, %v841_v61, %v845_v62  ;;  %v849_v32 = vor.u32 %v7489_v50, %v845_v62  ;;  %v7534_v35 = vshrl.u32 %v7491_v53, 16  ;;  %v7023_v50 = vld [vmem:[%s13346_s0 + $0x130] sm:$0xff]  }
  0x1d   :  { %1160 = vrot.lane.b32.xlu1 %v806_v39, %s7229_s2  ;;  %13595 = vst [vmem:[#allocation33_spill] sm:$0xff] %v7506_v3  ;;  %13596 = vst [vmem:[#allocation34_spill] sm:$0xff] %v7511_v9  ;;  %v857_v39 = vor.u32 %v7506_v3, %v853_v5  ;;  %v869_v44 = vrot.slane %v7511_v9, 1  ;;  %v7545_v41 = vshll.u32 %v7516_v13, 16  ;;  %v877_v61 = vrot.slane %v7514_v10, 1 }
  0x1e   :  { %13597 = vst [vmem:[#allocation35_spill] sm:$0xff] %v7514_v10  ;;  %13598 = vst [vmem:[#allocation36_spill] sm:$0xff] %v7524_v20  ;;  %v7536_v38 = vld [vmem:[#allocation2 + $0x98] sm:$0xff]  ;;  %v7558_v62 = vshrl.u32 %v7516_v13, 16  ;;  %v854_v1 = vsel %vm738_vm1, %v849_v32, %v853_v5  ;;  %v865_v19 = vor.u32 %v7524_v20, %v861_v17  ;;  %v7013_v5 = vld [vmem:[%s13346_s0 + $0xe0] sm:$0xff]  }
  0x1f   :  { %13599 = vst [vmem:[#allocation37_spill] sm:$0xff] %v7534_v35  ;;  %649 = vst.msk [vmem:[#allocation2 + $0xb8] sm:$0xff] %vm325_vm0, %v7007_v15  ;;  %v873_v10 = vor.u32 %v7534_v35, %v869_v44  ;;  %v885_v9 = vrot.slane %v7545_v41, 1  ;;  %v7014_v32 = vld [vmem:[%s13346_s0 + $0xe8] sm:$0xff]  }
  0x20   :  { %1162 = vrot.lane.b32.xlu0 %v814_v45, %s7229_s2  ;;  %v7542_v45 = vshrl.u32 %v7499_v58, 16  ;;  %13601 = vst [vmem:[#allocation39_spill] sm:$0xff] %v7545_v41  ;;  %v7547_v48 = vld [vmem:[#allocation2 + $0xa0] sm:$0xff]  ;;  %650 = vst.msk [vmem:[#allocation2 + $0xc0] sm:$0xff] %vm325_vm0, %v7008_v24 }
  0x21   :  { %1164 = vrot.lane.b32.xlu1 %v822_v54, %s7229_s2  ;;  %v7009_v54 = vld [vmem:[%s13346_s0 + $0xc0] sm:$0xff]   ;;  %13602 = vst [vmem:[#allocation40_spill] sm:$0xff] %v7558_v62  ;;  %652 = vst.msk [vmem:[#allocation2 + $0xd0] sm:$0xff] %vm325_vm0, %v7010_v60  ;;  %v7011_v24 = vld [vmem:[%s13346_s0 + $0xd0] sm:$0xff]   ;;  %v862_v60 = vsel %vm738_vm1, %v857_v39, %v861_v17  ;;  %v7599_v39 = vshrl.u32 %v7547_v48, 16 }
  0x22   :  { %13600 = vst [vmem:[#allocation38_spill] sm:$0xff] %v7542_v45  ;;  %v7564_v15 = vld [vmem:[#allocation2 + $0xa8] sm:$0xff]  ;;  %651 = vst.msk [vmem:[#allocation2 + $0xc8] sm:$0xff] %vm325_vm0, %v7009_v54  ;;  %v881_v41 = vor.u32 %v7542_v45, %v877_v61 }
  0x23   :  { %v7577_v16 = vld [vmem:[#allocation2 + $0xb0] sm:$0xff]  ;;  %v7012_v54 = vld [vmem:[%s13346_s0 + $0xd8] sm:$0xff]   ;;  %653 = vst.msk [vmem:[#allocation2 + $0xd8] sm:$0xff] %vm325_vm0, %v7011_v24  ;;  %13606 = vst [vmem:[#allocation44_spill] sm:$0xff] %v7599_v39  ;;  %v870_v24 = vsel %vm738_vm1, %v865_v19, %v869_v44  ;;  %v7607_v35 = vshll.u32 %v7564_v15, 16 }
  0x24   :  { %1166 = vrot.lane.b32.xlu0 %v830_v4, %s7229_s2  ;;  %v7562_v4 = vshll.u32 %v7536_v38, 16  ;;  %654 = vst.msk [vmem:[#allocation2 + $0xe0] sm:$0xff] %vm325_vm0, %v7012_v54  ;;  %655 = vst.msk [vmem:[#allocation2 + $0xe8] sm:$0xff] %vm325_vm0, %v7013_v5  ;;  %v878_v5 = vsel %vm738_vm1, %v873_v10, %v877_v61  ;;  %v7618_v19 = vshll.u32 %v7577_v16, 16  ;;  %v7016_v44 = vld [vmem:[%s13346_s0 + $0xf8] sm:$0xff]   ;;  %v7632_v61 = vshrl.u32 %v7564_v15, 16 }
  0x25   :  { %1168 = vrot.lane.b32.xlu1 %v838_v26, %s7229_s2  ;;  %v7575_v26 = vshll.u32 %v7547_v48, 16  ;;  %13607 = vst [vmem:[#allocation45_spill] sm:$0xff] %v7607_v35  ;;  %656 = vst.msk [vmem:[#allocation2 + $0xf0] sm:$0xff] %vm325_vm0, %v7014_v32  ;;  %v909_v45 = vrot.slane %v7607_v35, 1  ;;  %v7646_v20 = vshrl.u32 %v7577_v16, 16 }
  0x26   :  { %13603 = vst [vmem:[#allocation41_spill] sm:$0xff] %v7562_v4  ;;  %v893_v17 = vrot.slane %v7562_v4, 1  ;;  %v7609_v57 = vld [vmem:[#allocation2 + $0xb8] sm:$0xff]  ;;  %13608 = vst [vmem:[#allocation46_spill] sm:$0xff] %v7618_v19  ;;  %v886_v4 = vsel %vm738_vm1, %v881_v41, %v885_v9  ;;  %v7019_v41 = vld [vmem:[%s13346_s0 + $0x110] sm:$0xff]  }
  0x27   :  { %13604 = vst [vmem:[#allocation42_spill] sm:$0xff] %v7575_v26  ;;  %v901_v54 = vrot.slane %v7575_v26, 1  ;;  %v7017_v26 = vld [vmem:[%s13346_s0 + $0x100] sm:$0xff]   ;;  %v7626_v32 = vld [vmem:[#allocation2 + $0xc0] sm:$0xff]  ;;  %13609 = vst [vmem:[#allocation47_spill] sm:$0xff] %v7632_v61  ;;  %v913_v35 = vor.u32 %v7632_v61, %v909_v45 }
  0x28   :  { %1170 = vrot.lane.b32.xlu0 %v846_v30, %s7229_s2  ;;  %v7590_v30 = vshrl.u32 %v7536_v38, 16  ;;  %658 = vst.msk [vmem:[#allocation2 + $0x100] sm:$0xff] %vm325_vm0, %v7016_v44  ;;  %659 = vst.msk [vmem:[#allocation2 + $0x108] sm:$0xff] %vm325_vm0, %v7017_v26  ;;  %v7649_v26 = vshll.u32 %v7626_v32, 16  ;;  %v7659_v44 = vld [vmem:[#allocation2 + $0xd0] sm:$0xff]  ;;  %v7022_v61 = vld [vmem:[%s13346_s0 + $0x128] sm:$0xff]  }
  0x29   :  { %1172 = vrot.lane.b32.xlu1 %v854_v1, %s7229_s2  ;;  %v7015_v1 = vld [vmem:[%s13346_s0 + $0xf0] sm:$0xff]   ;;  %13611 = vst [vmem:[#allocation49_spill] sm:$0xff] %v7646_v20  ;;  %661 = vst.msk [vmem:[#allocation2 + $0x118] sm:$0xff] %vm325_vm0, %v7019_v41  ;;  %v7682_v41 = vshrl.u32 %v7626_v32, 16 }
  0x2a   :  { %13605 = vst [vmem:[#allocation43_spill] sm:$0xff] %v7590_v30  ;;  %657 = vst.msk [vmem:[#allocation2 + $0xf8] sm:$0xff] %vm325_vm0, %v7015_v1  ;;  %v897_v10 = vor.u32 %v7590_v30, %v893_v17  ;;  %v7641_v1 = vshll.u32 %v7609_v57, 16  ;;  %v917_v30 = vrot.slane %v7618_v19, 1 }
  0x2b   :  { %13612 = vst [vmem:[#allocation50_spill] sm:$0xff] %v7649_v26  ;;  %13615 = vst [vmem:[#allocation53_spill] sm:$0xff] %v7682_v41 }
  0x2c   :  { %1174 = vrot.lane.b32.xlu0 %v862_v60, %s7229_s2  ;;  %v889_v60 = vor.u32 %v7558_v62, %v885_v9  ;;  %v905_v62 = vor.u32 %v7599_v39, %v901_v54  ;;  %13610 = vst [vmem:[#allocation48_spill] sm:$0xff] %v7641_v1  ;;  %v7018_v9 = vld [vmem:[%s13346_s0 + $0x108] sm:$0xff]   ;;  %v925_v39 = vrot.slane %v7641_v1, 1  ;;  %v918_v3 = vsel %vm738_vm1, %v913_v35, %v917_v30  ;;  %v7721_v35 = vld [vmem:[#allocation2 + $0xe8] sm:$0xff] }
  0x2d   :  { %1176 = vrot.lane.b32.xlu1 %v870_v24, %s7229_s2  ;;  %660 = vst.msk [vmem:[#allocation2 + $0x110] sm:$0xff] %vm325_vm0, %v7018_v9  ;;  %v933_v9 = vrot.slane %v7649_v26, 1  ;;  %664 = vst.msk [vmem:[#allocation2 + $0x130] sm:$0xff] %vm325_vm0, %v7022_v61 }
  0x2e   :  { %v894_v24 = vsel %vm738_vm1, %v889_v60, %v893_v17  ;;  %v902_v17 = vsel %vm738_vm1, %v897_v10, %v901_v54  ;;  %v7664_v60 = vshrl.u32 %v7609_v57, 16  ;;  %v910_v19 = vsel %vm738_vm1, %v905_v62, %v909_v45  ;;  %v7677_v54 = vld [vmem:[#allocation2 + $0xe0] sm:$0xff]  ;;  %v7020_v45 = vld [vmem:[%s13346_s0 + $0x118] sm:$0xff]   ;;  %665 = vst.msk [vmem:[#allocation2 + $0x138] sm:$0xff] %vm325_vm0, %v7023_v50 }
  0x2f   :  { %v921_v10 = vor.u32 %v7646_v20, %v917_v30  ;;  %v7685_v62 = vshll.u32 %v7659_v44, 16  ;;  %v7701_v20 = vshll.u32 %v7677_v54, 16  ;;  %662 = vst.msk [vmem:[#allocation2 + $0x120] sm:$0xff] %vm325_vm0, %v7020_v45  ;;  %v937_v18 = vor.u32 %v7682_v41, %v933_v9  ;;  %v7024_v30 = vld [vmem:[%s13346_s0 + $0x138] sm:$0xff]   ;;  %v7025_v41 = vld [vmem:[%s13346_s0 + $0x140] sm:$0xff]  }
  0x30   :  { %1178 = vrot.lane.b32.xlu0 %v878_v5, %s7229_s2  ;;  %v7651_v5 = vld [vmem:[#allocation2 + $0xc8] sm:$0xff]  ;;  %13613 = vst [vmem:[#allocation51_spill] sm:$0xff] %v7664_v60  ;;  %666 = vst.msk [vmem:[#allocation2 + $0x140] sm:$0xff] %vm325_vm0, %v7024_v30 }
  0x31   :  { %1180 = vrot.lane.b32.xlu1 %v886_v4, %s7229_s2  ;;  %v7673_v49 = vshll.u32 %v7651_v5, 16  ;;  %v7675_v4 = vld [vmem:[#allocation2 + $0xd8] sm:$0xff]  ;;  %13616 = vst [vmem:[#allocation54_spill] sm:$0xff] %v7685_v62  ;;  %v7695_v1 = vshrl.u32 %v7651_v5, 16  ;;  %13619 = vst [vmem:[#allocation57_spill] sm:$0xff] %v7701_v20  ;;  %v926_v45 = vsel %vm738_vm1, %v921_v10, %v925_v39  ;;  %v949_v37 = vrot.slane %v7685_v62, 1 }
  0x32   :  { %v7698_v26 = vshll.u32 %v7675_v4, 16  ;;  %v7733_v10 = vld [vmem:[#allocation2 + $0xf0] sm:$0xff]  ;;  %v965_v61 = vrot.slane %v7701_v20, 1  ;;  %667 = vst.msk [vmem:[#allocation2 + $0x148] sm:$0xff] %vm325_vm0, %v7025_v41 }
  0x33   :  { %13614 = vst [vmem:[#allocation52_spill] sm:$0xff] %v7673_v49  ;;  %13617 = vst [vmem:[#allocation55_spill] sm:$0xff] %v7695_v1  ;;  %v941_v42 = vrot.slane %v7673_v49, 1  ;;  %v7739_v49 = vld [vmem:[#allocation2 + $0xf8] sm:$0xff]  ;;  %v7756_v30 = vshll.u32 %v7733_v10, 16 }
  0x34   :  { %1182 = vrot.lane.b32.xlu0 %v894_v24, %s7229_s2  ;;  %v7021_v24 = vld [vmem:[%s13346_s0 + $0x120] sm:$0xff]   ;;  %13618 = vst [vmem:[#allocation56_spill] sm:$0xff] %v7698_v26  ;;  %v957_v62 = vrot.slane %v7698_v26, 1  ;;  %v7751_v26 = vld [vmem:[#allocation2 + $0x100] sm:$0xff] }
  0x35   :  { %1184 = vrot.lane.b32.xlu1 %v902_v17, %s7229_s2  ;;  %v929_v17 = vor.u32 %v7664_v60, %v925_v39  ;;  %663 = vst.msk [vmem:[#allocation2 + $0x128] sm:$0xff] %vm325_vm0, %v7021_v24  ;;  %v7728_v24 = vshrl.u32 %v7675_v4, 16  ;;  %v7731_v39 = vshrl.u32 %v7677_v54, 16  ;;  %v945_v50 = vor.u32 %v7695_v1, %v941_v42  ;;  %13624 = vst [vmem:[#allocation62_spill] sm:$0xff] %v7756_v30  ;;  %v7780_v1 = vld [vmem:[#allocation2 + $0x108] sm:$0xff]  ;;  %v7859_v6 = vld [vmem:[#allocation2 + $0x130] sm:$0xff] }
  0x36   :  { %v942_v20 = vsel %vm738_vm1, %v937_v18, %v941_v42  ;;  %v7027_v18 = vld [vmem:[%s13346_s0 + $0x150] sm:$0xff]  }
  0x37   :  { %13621 = vst [vmem:[#allocation59_spill] sm:$0xff] %v7728_v24  ;;  %13622 = vst [vmem:[#allocation60_spill] sm:$0xff] %v7731_v39  ;;  %v934_v60 = vsel %vm738_vm1, %v929_v17, %v933_v9  ;;  %v7026_v9 = vld [vmem:[%s13346_s0 + $0x148] sm:$0xff]   ;;  %v7764_v17 = vshrl.u32 %v7721_v35, 16  ;;  %v950_v42 = vsel %vm738_vm1, %v945_v50, %v949_v37  ;;  %v961_v41 = vor.u32 %v7728_v24, %v957_v62  ;;  %v7031_v24 = vld [vmem:[%s13346_s0 + $0x170] sm:$0xff]  }
  0x38   :  { %1186 = vrot.lane.b32.xlu0 %v910_v19, %s7229_s2  ;;  %v7719_v19 = vshrl.u32 %v7659_v44, 16  ;;  %668 = vst.msk [vmem:[#allocation2 + $0x150] sm:$0xff] %vm325_vm0, %v7026_v9  ;;  %v7028_v9 = vld [vmem:[%s13346_s0 + $0x158] sm:$0xff]   ;;  %v969_v7 = vor.u32 %v7731_v39, %v965_v61  ;;  %669 = vst.msk [vmem:[#allocation2 + $0x158] sm:$0xff] %vm325_vm0, %v7027_v18  ;;  %v7793_v50 = vshrl.u32 %v7739_v49, 16  ;;  %v7030_v18 = vld [vmem:[%s13346_s0 + $0x168] sm:$0xff]  }
  0x39   :  { %1188 = vrot.lane.b32.xlu1 %v918_v3, %s7229_s2  ;;  %v7749_v3 = vshll.u32 %v7721_v35, 16  ;;  %13625 = vst [vmem:[#allocation63_spill] sm:$0xff] %v7764_v17  ;;  %670 = vst.msk [vmem:[#allocation2 + $0x160] sm:$0xff] %vm325_vm0, %v7028_v9  ;;  %v966_v39 = vsel %vm738_vm1, %v961_v41, %v965_v61  ;;  %v7829_v61 = vshrl.u32 %v7780_v1, 16  ;;  %v7831_v41 = vld [vmem:[#allocation2 + $0x120] sm:$0xff] }
  0x3a   :  { %13620 = vst [vmem:[#allocation58_spill] sm:$0xff] %v7719_v19  ;;  %v953_v12 = vor.u32 %v7719_v19, %v949_v37  ;;  %v7778_v19 = vshll.u32 %v7751_v26, 16  ;;  %v7789_v37 = vshrl.u32 %v7733_v10, 16  ;;  %13629 = vst [vmem:[#allocation67_spill] sm:$0xff] %v7793_v50  ;;  %v7857_v59 = vshll.u32 %v7831_v41, 16 }
  0x3b   :  { %13623 = vst [vmem:[#allocation61_spill] sm:$0xff] %v7749_v3  ;;  %672 = vst.msk [vmem:[#allocation2 + $0x170] sm:$0xff] %vm325_vm0, %v7030_v18  ;;  %v7033_v18 = vld [vmem:[%s13346_s0 + $0x180] sm:$0xff]  }
  0x3c   :  { %1190 = vrot.lane.b32.xlu0 %v926_v45, %s7229_s2  ;;  %v7767_v45 = vshll.u32 %v7739_v49, 16  ;;  %13627 = vst [vmem:[#allocation65_spill] sm:$0xff] %v7778_v19  ;;  %v958_v36 = vsel %vm738_vm1, %v953_v12, %v957_v62  ;;  %13628 = vst [vmem:[#allocation66_spill] sm:$0xff] %v7789_v37  ;;  %v7801_v62 = vshll.u32 %v7780_v1, 16 }
  0x3d   :  { %1192 = vrot.lane.b32.xlu1 %v934_v60, %s7229_s2  ;;  %v973_v60 = vrot.slane %v7749_v3, 1  ;;  %v7795_v3 = vld [vmem:[#allocation2 + $0x110] sm:$0xff]  ;;  %13633 = vst [vmem:[#allocation71_spill] sm:$0xff] %v7829_v61  ;;  %673 = vst.msk [vmem:[#allocation2 + $0x178] sm:$0xff] %vm325_vm0, %v7031_v24 }
  0x3e   :  { %13626 = vst [vmem:[#allocation64_spill] sm:$0xff] %v7767_v45  ;;  %v989_v12 = vrot.slane %v7767_v45, 1  ;;  %13630 = vst [vmem:[#allocation68_spill] sm:$0xff] %v7801_v62  ;;  %v7814_v45 = vshrl.u32 %v7751_v26, 16  ;;  %v7822_v11 = vshll.u32 %v7795_v3, 16 }
  0x3f   :  { %v977_v9 = vor.u32 %v7764_v17, %v973_v60  ;;  %v974_v27 = vsel %vm738_vm1, %v969_v7, %v973_v60  ;;  %v1005_v60 = vrot.slane %v7801_v62, 1  ;;  %13636 = vst [vmem:[#allocation74_spill] sm:$0xff] %v7857_v59  ;;  %675 = vst.msk [vmem:[#allocation2 + $0x188] sm:$0xff] %vm325_vm0, %v7033_v18  ;;  %v7879_v18 = vshll.u32 %v7859_v6, 16  ;;  %v7913_v63 = vld [vmem:[#allocation2 + $0x150] sm:$0xff]  ;;  %v7935_v51 = vld [vmem:[#allocation2 + $0x158] sm:$0xff] }
  0x40   :  { %1194 = vrot.lane.b32.xlu0 %v942_v20, %s7229_s2  ;;  %v981_v20 = vrot.slane %v7756_v30, 1  ;;  %v7029_v30 = vld [vmem:[%s13346_s0 + $0x160] sm:$0xff]   ;;  %13631 = vst [vmem:[#allocation69_spill] sm:$0xff] %v7814_v45  ;;  %13632 = vst [vmem:[#allocation70_spill] sm:$0xff] %v7822_v11  ;;  %v993_v7 = vor.u32 %v7793_v50, %v989_v12  ;;  %v7851_v50 = vld [vmem:[#allocation2 + $0x128] sm:$0xff]  ;;  %v1013_v17 = vrot.slane %v7822_v11, 1 }
  0x41   :  { %1196 = vrot.lane.b32.xlu1 %v950_v42, %s7229_s2  ;;  %v997_v42 = vrot.slane %v7778_v19, 1  ;;  %671 = vst.msk [vmem:[#allocation2 + $0x168] sm:$0xff] %vm325_vm0, %v7029_v30  ;;  %v7838_v19 = vshrl.u32 %v7795_v3, 16  ;;  %v7032_v30 = vld [vmem:[%s13346_s0 + $0x178] sm:$0xff]   ;;  %13639 = vst [vmem:[#allocation77_spill] sm:$0xff] %v7879_v18  ;;  %v7937_v34 = vld [vmem:[#allocation2 + $0x160] sm:$0xff] }
  0x42   :  { %v985_v0 = vor.u32 %v7789_v37, %v981_v20  ;;  %v982_v24 = vsel %vm738_vm1, %v977_v9, %v981_v20  ;;  %674 = vst.msk [vmem:[#allocation2 + $0x180] sm:$0xff] %vm325_vm0, %v7032_v30  ;;  %v1009_v20 = vor.u32 %v7829_v61, %v1005_v60  ;;  %v7876_v30 = vshll.u32 %v7851_v50, 16 }
  0x43   :  { %13634 = vst [vmem:[#allocation72_spill] sm:$0xff] %v7838_v19  ;;  %v1001_v37 = vor.u32 %v7814_v45, %v997_v42  ;;  %v7894_v61 = vshrl.u32 %v7851_v50, 16 }
  0x44   :  { %1198 = vrot.lane.b32.xlu0 %v958_v36, %s7229_s2  ;;  %v7824_v36 = vld [vmem:[#allocation2 + $0x118] sm:$0xff]  ;;  %v990_v62 = vsel %vm738_vm1, %v985_v0, %v989_v12  ;;  %v998_v0 = vsel %vm738_vm1, %v993_v7, %v997_v42  ;;  %13638 = vst [vmem:[#allocation76_spill] sm:$0xff] %v7876_v30  ;;  %v1017_v7 = vor.u32 %v7838_v19, %v1013_v17  ;;  %v7904_v19 = vshrl.u32 %v7859_v6, 16 }
  0x45   :  { %1200 = vrot.lane.b32.xlu1 %v966_v39, %s7229_s2  ;;  %v7849_v39 = vshll.u32 %v7824_v36, 16  ;;  %v7873_v9 = vshrl.u32 %v7824_v36, 16  ;;  %v1006_v42 = vsel %vm738_vm1, %v1001_v37, %v1005_v60  ;;  %v1014_v11 = vsel %vm738_vm1, %v1009_v20, %v1013_v17  ;;  %13641 = vst [vmem:[#allocation79_spill] sm:$0xff] %v7894_v61 }
  0x46   :  { %v1037_v60 = vrot.slane %v7876_v30, 1  ;;  %13643 = vst [vmem:[#allocation81_spill] sm:$0xff] %v7904_v19 }
  0x47   :  { %13635 = vst [vmem:[#allocation73_spill] sm:$0xff] %v7849_v39  ;;  %v1021_v12 = vrot.slane %v7849_v39, 1  ;;  %13637 = vst [vmem:[#allocation75_spill] sm:$0xff] %v7873_v9  ;;  %v7889_v39 = vld [vmem:[#allocation2 + $0x140] sm:$0xff] }
  0x48   :  { %1202 = vrot.lane.b32.xlu0 %v974_v27, %s7229_s2  ;;  %v7034_v27 = vld [vmem:[%s13346_s0 + $0x188] sm:$0xff]   ;;  %v7911_v52 = vshll.u32 %v7889_v39, 16 }
  0x49   :  { %1204 = vrot.lane.b32.xlu1 %v982_v24, %s7229_s2  ;;  %676 = vst.msk [vmem:[#allocation2 + $0x190] sm:$0xff] %vm325_vm0, %v7034_v27  ;;  %v7881_v24 = vld [vmem:[#allocation2 + $0x138] sm:$0xff]  ;;  %v1029_v27 = vrot.slane %v7857_v59, 1  ;;  %v1025_v37 = vor.u32 %v7873_v9, %v1021_v12  ;;  %v1045_v59 = vrot.slane %v7879_v18, 1  ;;  %v1022_v17 = vsel %vm738_vm1, %v1017_v7, %v1021_v12 }
  0x4a   :  { %v7897_v45 = vshll.u32 %v7881_v24, 16  ;;  %13644 = vst [vmem:[#allocation82_spill] sm:$0xff] %v7911_v52  ;;  %v7918_v18 = vshrl.u32 %v7881_v24, 16  ;;  %v1041_v7 = vor.u32 %v7894_v61, %v1037_v60  ;;  %v7930_v9 = vshll.u32 %v7913_v63, 16 }
  0x4b   :  { %v1030_v12 = vsel %vm738_vm1, %v1025_v37, %v1029_v27  ;;  %v1061_v46 = vrot.slane %v7911_v52, 1  ;;  %v7949_v52 = vshrl.u32 %v7913_v63, 16 }
  0x4c   :  { %1206 = vrot.lane.b32.xlu0 %v990_v62, %s7229_s2  ;;  %v7887_v62 = vshrl.u32 %v7831_v41, 16  ;;  %13642 = vst [vmem:[#allocation80_spill] sm:$0xff] %v7897_v45  ;;  %13645 = vst [vmem:[#allocation83_spill] sm:$0xff] %v7918_v18 }
  0x4d   :  { %1208 = vrot.lane.b32.xlu1 %v998_v0, %s7229_s2  ;;  %v7906_v0 = vld [vmem:[#allocation2 + $0x148] sm:$0xff]  ;;  %13648 = vst [vmem:[#allocation86_spill] sm:$0xff] %v7930_v9  ;;  %13650 = vst [vmem:[#allocation88_spill] sm:$0xff] %v7949_v52 }
  0x4e   :  { %13640 = vst [vmem:[#allocation78_spill] sm:$0xff] %v7887_v62  ;;  %v1033_v20 = vor.u32 %v7887_v62, %v1029_v27  ;;  %v7921_v30 = vshll.u32 %v7906_v0, 16  ;;  %v7927_v62 = vshrl.u32 %v7889_v39, 16 }
  0x50   :  { %1210 = vrot.lane.b32.xlu0 %v1006_v42, %s7229_s2  ;;  %v1053_v42 = vrot.slane %v7897_v45, 1  ;;  %13646 = vst [vmem:[#allocation84_spill] sm:$0xff] %v7921_v30  ;;  %13647 = vst [vmem:[#allocation85_spill] sm:$0xff] %v7927_v62  ;;  %v1049_v45 = vor.u32 %v7904_v19, %v1045_v59  ;;  %v1069_v37 = vrot.slane %v7921_v30, 1  ;;  %v7952_v19 = vshll.u32 %v7935_v51, 16 }
  0x51   :  { %1212 = vrot.lane.b32.xlu1 %v1014_v11, %s7229_s2  ;;  %v1038_v11 = vsel %vm738_vm1, %v1033_v20, %v1037_v60  ;;  %v1046_v60 = vsel %vm738_vm1, %v1041_v7, %v1045_v59  ;;  %v1077_v20 = vrot.slane %v7930_v9, 1 }
  0x52   :  { %v1057_v27 = vor.u32 %v7918_v18, %v1053_v42  ;;  %13651 = vst [vmem:[#allocation89_spill] sm:$0xff] %v7952_v19 }
  0x54   :  { %1214 = vrot.lane.b32.xlu0 %v1022_v17, %s7229_s2  ;;  %v7943_v17 = vshrl.u32 %v7906_v0, 16 }
  0x55   :  { %1216 = vrot.lane.b32.xlu1 %v1030_v12, %s7229_s2 }
  0x56   :  { %13649 = vst [vmem:[#allocation87_spill] sm:$0xff] %v7943_v17 }
  0x58   :  { %1218 = vrot.lane.b32.xlu0 %v1038_v11, %s7229_s2 }
  0x59   :  { %13 = vsyncpa [#allocation6], 0  ;;  %v1054_v12 = vsel %vm738_vm1, %v1049_v45, %v1053_v42  ;;  %v1065_v30 = vor.u32 %v7927_v62, %v1061_v46  ;;  %v7957_v18 = vshll.u32 %v7937_v34, 16  ;;  %v7959_v61 = vld [vmem:[#allocation2 + $0x168] sm:$0xff]  ;;  %v7961_v11 = vld [vmem:[#allocation2 + $0x170] sm:$0xff]  ;;  %1220 = vrot.lane.b32.xlu1 %v1046_v60, %s7229_s2  ;;  %v1062_v59 = vsel %vm738_vm1, %v1057_v27, %v1061_v46  ;;  %s7230_s0 = smov 8  }
  0x5a   :  { %v1073_v7 = vor.u32 %v7943_v17, %v1069_v37  ;;  %v1081_v9 = vor.u32 %v7949_v52, %v1077_v20  ;;  %v1085_v45 = vrot.slane %v7952_v19, 1  ;;  %v7970_v42 = vshrl.u32 %v7935_v51, 16  ;;  %v7975_v40 = vld [vmem:[#allocation2 + $0x178] sm:$0xff]  ;;  %v7985_v52 = vld [vmem:[#allocation2 + $0x180] sm:$0xff]  ;;  %v728_v25 = vld [vmem:[#allocation2 + $0x190] sm:$0x7] }
  0x5b   :  { %13652 = vst [vmem:[#allocation90_spill] sm:$0xff] %v7957_v18  ;;  %v7973_v62 = vshll.u32 %v7959_v61, 16  ;;  %v1070_v60 = vsel %vm738_vm1, %v1065_v30, %v1069_v37  ;;  %v1093_v46 = vrot.slane %v7957_v18, 1  ;;  %v7980_v27 = vshrl.u32 %v7937_v34, 16  ;;  %s7231_s20 = smov 12   ;;  %s7232_s21 = smov 16  }
  0x5c   :  { %1222 = vrot.lane.b32.xlu0 %v1054_v12, %s7229_s2  ;;  %13653 = vst [vmem:[#allocation91_spill] sm:$0xff] %v7970_v42  ;;  %v7983_v12 = vshll.u32 %v7961_v11, 16  ;;  %v1078_v19 = vsel %vm738_vm1, %v1073_v7, %v1077_v20  ;;  %v7990_v17 = vshll.u32 %v7975_v40, 16  ;;  %v1086_v30 = vsel %vm738_vm1, %v1081_v9, %v1085_v45  ;;  %s7233_s22 = smov 20   ;;  %s7234_s3 = smov 24  }
  0x5d   :  { %13654 = vst [vmem:[#allocation92_spill] sm:$0xff] %v7973_v62  ;;  %13655 = vst [vmem:[#allocation93_spill] sm:$0xff] %v7980_v27  ;;  %1224 = vrot.lane.b32.xlu1 %v1062_v59, %s7229_s2  ;;  %v1089_v37 = vor.u32 %v7970_v42, %v1085_v45  ;;  %v1101_v18 = vrot.slane %v7973_v62, 1  ;;  %v7997_v29 = vshrl.u32 %v7959_v61, 16  ;;  %v1097_v33 = vor.u32 %v7980_v27, %v1093_v46  ;;  %s7235_s23 = smov 28  }
  0x5e   :  { %13656 = vst [vmem:[#allocation94_spill] sm:$0xff] %v7983_v12  ;;  %13657 = vst [vmem:[#allocation95_spill] sm:$0xff] %v7990_v17  ;;  %v1109_v59 = vrot.slane %v7983_v12, 1  ;;  %v8002_v20 = vshrl.u32 %v7961_v11, 16  ;;  %v8005_v7 = vshll.u32 %v7985_v52, 16  ;;  %v1117_v9 = vrot.slane %v7990_v17, 1 }
  0x5f   :  { %v8012_v45 = vshrl.u32 %v7975_v40, 16  ;;  %v1094_v62 = vsel %vm738_vm1, %v1089_v37, %v1093_v46  ;;  %v1105_v12 = vor.u32 %v7997_v29, %v1101_v18  ;;  %v1102_v42 = vsel %vm738_vm1, %v1097_v33, %v1101_v18 }
  0x60   :  { %1226 = vrot.lane.b32.xlu0 %v1070_v60, %s7229_s2  ;;  %13658 = vst [vmem:[#allocation96_spill] sm:$0xff] %v8002_v20  ;;  %13659 = vst [vmem:[#allocation97_spill] sm:$0xff] %v8005_v7  ;;  %v8007_v60 = vld [vmem:[#allocation2 + $0x188] sm:$0xff]  ;;  %v1113_v23 = vor.u32 %v8002_v20, %v1109_v59  ;;  %v8024_v17 = vshrl.u32 %v7985_v52, 16  ;;  %v1139_v18 = vshll.u32 %v728_v25, 16  ;;  %vm1299_vm2 = vcmask 1046528  }
  0x61   :  { %1228 = vrot.lane.b32.xlu1 %v1078_v19, %s7229_s2  ;;  %13660 = vst [vmem:[#allocation98_spill] sm:$0xff] %v8012_v45  ;;  %v8018_v27 = vshll.u32 %v8007_v60, 16  ;;  %v1125_v19 = vrot.slane %v8005_v7, 1  ;;  %v1110_v46 = vsel %vm738_vm1, %v1105_v12, %v1109_v59  ;;  %v8032_v33 = vshrl.u32 %v8007_v60, 16 }
  0x62   :  { %13662 = vst [vmem:[#allocation100_spill] sm:$0xff] %v8024_v17  ;;  %v1118_v7 = vsel %vm738_vm1, %v1113_v23, %v1117_v9  ;;  %v1143_v12 = vshrl.u32 %v728_v25, 16  ;;  %vm1505_vm3 = vcmask 1042432   ;;  %vm1709_vm4 = vsmask.f32 2304 }
  0x63   :  { %13661 = vst [vmem:[#allocation99_spill] sm:$0xff] %v8018_v27  ;;  %v1133_v37 = vrot.slane %v8018_v27, 1  ;;  %13663 = vst [vmem:[#allocation101_spill] sm:$0xff] %v8032_v33  ;;  %v1129_v20 = vor.u32 %v8024_v17, %v1125_v19  ;;  %v7044_v27 = vld [vmem:[#allocation2] sm:$0xf8]  ;;  %vm13568_vm5 = vcmask 1041408  }
  0x64   :  { %1230 = vrot.lane.b32.xlu0 %v1086_v30, %s7229_s2  ;;  %v1121_v30 = vor.u32 %v8012_v45, %v1117_v9  ;;  %v1141_v45 = vrot.slane %v1139_v18, 1  ;;  %v1300_v17 = vrot.slane %v7044_v27, 1  ;;  %vm2223_vm6 = vcmask 1045504  }
  0x65   :  { %1232 = vrot.lane.b32.xlu1 %v1094_v62, %s7229_s2  ;;  %v1134_v59 = vsel %vm738_vm1, %v1129_v20, %v1133_v37  ;;  %vm2427_vm7 = vsmask.f32 5376  ;;  %vm2745_vm8 = vcmask 1044480   ;;  %vm3052_vm9 = vcmask 64512  }
  0x66   :  { %v1126_v62 = vsel %vm738_vm1, %v1121_v30, %v1125_v19  ;;  %v1145_v9 = vor.u32 %v1143_v12, %v1141_v45  ;;  %v8047_v19 = vld [vmem:[#allocation2 + $0x10] sm:$0xff]  ;;  %v8053_v30 = vld [vmem:[#allocation2 + $0x18] sm:$0xff]  ;;  %vm3155_vm10 = vcmask 97280   ;;  %vm3258_vm11 = vcmask 130048  }
  0x67   :  { %v1303_v25 = vrot.slane %v8047_v19, 1  ;;  %vm3361_vm12 = vcmask 162816   ;;  %vm3464_vm13 = vcmask 195584  }
  0x68   :  { %1234 = vrot.lane.b32.xlu0 %v1102_v42, %s7229_s2  ;;  %v1137_v42 = vor.u32 %v8032_v33, %v1133_v37  ;;  %v8057_v37 = vld [vmem:[#allocation2 + $0x20] sm:$0xff] }
  0x69   :  { %1236 = vrot.lane.b32.xlu1 %v1110_v46, %s7229_s2  ;;  %v8044_v46 = vld [vmem:[#allocation2 + $0x8] sm:$0xff]  ;;  %v1307_v18 = vrot.slane %v8057_v37, 1 }
  0x6a   :  { %v1142_v23 = vsel %vm738_vm1, %v1137_v42, %v1141_v45  ;;  %v1305_v45 = vrot.slane %v8053_v30, 1  ;;  %v8063_v42 = vld [vmem:[#allocation2 + $0x28] sm:$0xff] }
  0x6c   :  { %1238 = vrot.lane.b32.xlu0 %v1118_v7, %s7229_s2  ;;  %v1301_v7 = vrot.slane %v8044_v46, 1  ;;  %v1308_v12 = vsel %vm1299_vm2, %v1305_v45, %v1307_v18 }
  0x6d   :  { %1240 = vrot.lane.b32.xlu1 %v1126_v62, %s7229_s2  ;;  %v1306_v62 = vsel %vm1299_vm2, %v1303_v25, %v1305_v45 }
  0x6e   :  { %v1302_v20 = vsel %vm1299_vm2, %v1300_v17, %v1301_v7  ;;  %v1304_v27 = vsel %vm1299_vm2, %v1301_v7, %v1303_v25  ;;  %v1309_v17 = vrot.slane %v8063_v42, 1  ;;  %v8073_v7 = vld [vmem:[#allocation2 + $0x38] sm:$0xff] }
  0x6f   :  { %v1313_v25 = vrot.slane %v8073_v7, 1 }
  0x70   :  { %1242 = vrot.lane.b32.xlu0 %v1134_v59, %s7229_s2  ;;  %v8067_v59 = vld [vmem:[#allocation2 + $0x30] sm:$0xff] }
  0x71   :  { %1244 = vrot.lane.b32.xlu1 %v1142_v23, %s7229_s2  ;;  %v1311_v23 = vrot.slane %v8067_v59, 1 }
  0x73   :  { %v1314_v45 = vsel %vm1299_vm2, %v1311_v23, %v1313_v25 }
  0x74   :  { %1246 = vrot.lane.b32.xlu0 %v1145_v9, %s7229_s2  ;;  %v1310_v9 = vsel %vm1299_vm2, %v1307_v18, %v1309_v17  ;;  %v1319_v18 = vrot.slane %v7386_v56, 1 }
  0x75   :  { %1401 = vrot.lane.b32.xlu1 %v1302_v20, %s7230_s0  ;;  %v1312_v20 = vsel %vm1299_vm2, %v1309_v17, %v1311_v23  ;;  %v1321_v17 = vrot.slane %v7406_v2, 1 }
  0x77   :  { %v1322_v56 = vsel %vm1299_vm2, %v1319_v18, %v1321_v17 }
  0x78   :  { %1403 = vrot.lane.b32.xlu0 %v1304_v27, %s7230_s0  ;;  %v1315_v27 = vrot.slane %v7369_v47, 1 }
  0x79   :  { %1405 = vrot.lane.b32.xlu1 %v1306_v62, %s7230_s0  ;;  %v1317_v62 = vrot.slane %v7384_v55, 1  ;;  %v1323_v55 = vrot.slane %v7419_v8, 1 }
  0x7b   :  { %v1318_v47 = vsel %vm1299_vm2, %v1315_v27, %v1317_v62  ;;  %v1320_v23 = vsel %vm1299_vm2, %v1317_v62, %v1319_v18  ;;  %v1324_v2 = vsel %vm1299_vm2, %v1321_v17, %v1323_v55  ;;  %v1329_v62 = vrot.slane %v7477_v43, 1 }
  0x7c   :  { %1407 = vrot.lane.b32.xlu0 %v1308_v12, %s7230_s0  ;;  %v1316_v12 = vsel %vm1299_vm2, %v1313_v25, %v1315_v27  ;;  %v1325_v25 = vrot.slane %v7450_v28, 1  ;;  %v1327_v27 = vrot.slane %v7456_v31, 1  ;;  %v1331_v18 = vrot.slane %v7491_v53, 1 }
  0x7d   :  { %1409 = vrot.lane.b32.xlu1 %v1310_v9, %s7230_s0  ;;  %v1333_v17 = vrot.slane %v7499_v58, 1 }
  0x7e   :  { %v1326_v8 = vsel %vm1299_vm2, %v1323_v55, %v1325_v25  ;;  %v1328_v28 = vsel %vm1299_vm2, %v1325_v25, %v1327_v27  ;;  %v1330_v31 = vsel %vm1299_vm2, %v1327_v27, %v1329_v62  ;;  %v1332_v43 = vsel %vm1299_vm2, %v1329_v62, %v1331_v18 }
  0x7f   :  { %v1335_v55 = vrot.slane %v7516_v13, 1  ;;  %v1334_v53 = vsel %vm1299_vm2, %v1331_v18, %v1333_v17  ;;  %v1337_v25 = vrot.slane %v7536_v38, 1  ;;  %v1339_v27 = vrot.slane %v7547_v48, 1 }
  0x80   :  { %1411 = vrot.lane.b32.xlu0 %v1312_v20, %s7230_s0  ;;  %v1341_v62 = vrot.slane %v7564_v15, 1  ;;  %v1343_v18 = vrot.slane %v7577_v16, 1 }
  0x81   :  { %1413 = vrot.lane.b32.xlu1 %v1314_v45, %s7230_s0  ;;  %v1336_v58 = vsel %vm1299_vm2, %v1333_v17, %v1335_v55  ;;  %v1338_v13 = vsel %vm1299_vm2, %v1335_v55, %v1337_v25  ;;  %v1340_v38 = vsel %vm1299_vm2, %v1337_v25, %v1339_v27  ;;  %v1345_v17 = vrot.slane %v7609_v57, 1 }
  0x82   :  { %v8084_v33 = vpop.permute.xlu0 %1146  ;;  %v1342_v48 = vsel %vm1299_vm2, %v1339_v27, %v1341_v62  ;;  %v1344_v15 = vsel %vm1299_vm2, %v1341_v62, %v1343_v18  ;;  %v1347_v55 = vrot.slane %v7626_v32, 1  ;;  %v1349_v25 = vrot.slane %v7651_v5, 1 }
  0x83   :  { %13664 = vst [vmem:[#allocation102_spill] sm:$0xff] %v8084_v33  ;;  %v8090_v9 = vpop.permute.xlu1 %1150  ;;  %v1346_v16 = vsel %vm1299_vm2, %v1343_v18, %v1345_v17  ;;  %v1351_v27 = vrot.slane %v7659_v44, 1  ;;  %v1353_v62 = vrot.slane %v7675_v4, 1  ;;  %v1355_v18 = vrot.slane %v7677_v54, 1 }
  0x84   :  { %1415 = vrot.lane.b32.xlu0 %v1316_v12, %s7230_s0  ;;  %13665 = vst [vmem:[#allocation103_spill] sm:$0xff] %v8090_v9  ;;  %v1348_v57 = vsel %vm1299_vm2, %v1345_v17, %v1347_v55  ;;  %v1350_v32 = vsel %vm1299_vm2, %v1347_v55, %v1349_v25  ;;  %v1357_v17 = vrot.slane %v7721_v35, 1  ;;  %v1359_v55 = vrot.slane %v7733_v10, 1 }
  0x85   :  { %1417 = vrot.lane.b32.xlu1 %v1318_v47, %s7230_s0  ;;  %v1352_v5 = vsel %vm1299_vm2, %v1349_v25, %v1351_v27  ;;  %v1354_v44 = vsel %vm1299_vm2, %v1351_v27, %v1353_v62  ;;  %v1356_v4 = vsel %vm1299_vm2, %v1353_v62, %v1355_v18  ;;  %v1361_v25 = vrot.slane %v7739_v49, 1 }
  0x86   :  { %v8094_v20 = vpop.permute.xlu0 %1148  ;;  %v1358_v54 = vsel %vm1299_vm2, %v1355_v18, %v1357_v17  ;;  %v1360_v35 = vsel %vm1299_vm2, %v1357_v17, %v1359_v55  ;;  %v1363_v27 = vrot.slane %v7751_v26, 1  ;;  %v1365_v62 = vrot.slane %v7780_v1, 1 }
  0x87   :  { %13666 = vst [vmem:[#allocation104_spill] sm:$0xff] %v8094_v20  ;;  %v8100_v45 = vpop.permute.xlu1 %1152  ;;  %v1362_v10 = vsel %vm1299_vm2, %v1359_v55, %v1361_v25  ;;  %v1367_v18 = vrot.slane %v7795_v3, 1  ;;  %v1369_v17 = vrot.slane %v7824_v36, 1  ;;  %v1371_v55 = vrot.slane %v7831_v41, 1 }
  0x88   :  { %1419 = vrot.lane.b32.xlu0 %v1320_v23, %s7230_s0  ;;  %13667 = vst [vmem:[#allocation105_spill] sm:$0xff] %v8100_v45  ;;  %v1364_v49 = vsel %vm1299_vm2, %v1361_v25, %v1363_v27  ;;  %v1366_v26 = vsel %vm1299_vm2, %v1363_v27, %v1365_v62  ;;  %v1373_v25 = vrot.slane %v7851_v50, 1 }
  0x89   :  { %1421 = vrot.lane.b32.xlu1 %v1322_v56, %s7230_s0  ;;  %v1368_v1 = vsel %vm1299_vm2, %v1365_v62, %v1367_v18  ;;  %v1370_v3 = vsel %vm1299_vm2, %v1367_v18, %v1369_v17  ;;  %v1372_v27 = vsel %vm1299_vm2, %v1369_v17, %v1371_v55 }
  0x8a   :  { %v8104_v12 = vpop.permute.xlu0 %1154  ;;  %v1374_v62 = vsel %vm1299_vm2, %v1371_v55, %v1373_v25 }
  0x8b   :  { %13668 = vst [vmem:[#allocation106_spill] sm:$0xff] %v8104_v12  ;;  %v8110_v47 = vpop.permute.xlu1 %1156 }
  0x8c   :  { %1423 = vrot.lane.b32.xlu0 %v1324_v2, %s7230_s0  ;;  %13669 = vst [vmem:[#allocation107_spill] sm:$0xff] %v8110_v47 }
  0x8d   :  { %1425 = vrot.lane.b32.xlu1 %v1326_v8, %s7230_s0 }
  0x8e   :  { %v8114_v23 = vpop.permute.xlu0 %1158 }
  0x8f   :  { %13670 = vst [vmem:[#allocation108_spill] sm:$0xff] %v8114_v23  ;;  %v8120_v56 = vpop.permute.xlu1 %1160 }
  0x90   :  { %1427 = vrot.lane.b32.xlu0 %v1328_v28, %s7230_s0  ;;  %13671 = vst [vmem:[#allocation109_spill] sm:$0xff] %v8120_v56 }
  0x91   :  { %1429 = vrot.lane.b32.xlu1 %v1330_v31, %s7230_s0 }
  0x92   :  { %v8124_v2 = vpop.permute.xlu0 %1162 }
  0x93   :  { %13672 = vst [vmem:[#allocation110_spill] sm:$0xff] %v8124_v2  ;;  %v8130_v8 = vpop.permute.xlu1 %1164 }
  0x94   :  { %1431 = vrot.lane.b32.xlu0 %v1332_v43, %s7230_s0  ;;  %13673 = vst [vmem:[#allocation111_spill] sm:$0xff] %v8130_v8 }
  0x95   :  { %1433 = vrot.lane.b32.xlu1 %v1334_v53, %s7230_s0 }
  0x96   :  { %v8134_v28 = vpop.permute.xlu0 %1166 }
  0x97   :  { %13674 = vst [vmem:[#allocation112_spill] sm:$0xff] %v8134_v28  ;;  %v8140_v31 = vpop.permute.xlu1 %1168 }
  0x98   :  { %1435 = vrot.lane.b32.xlu0 %v1336_v58, %s7230_s0  ;;  %13675 = vst [vmem:[#allocation113_spill] sm:$0xff] %v8140_v31 }
  0x99   :  { %1437 = vrot.lane.b32.xlu1 %v1338_v13, %s7230_s0 }
  0x9a   :  { %v8144_v43 = vpop.permute.xlu0 %1170 }
  0x9b   :  { %13676 = vst [vmem:[#allocation114_spill] sm:$0xff] %v8144_v43  ;;  %v8150_v53 = vpop.permute.xlu1 %1172 }
  0x9c   :  { %1439 = vrot.lane.b32.xlu0 %v1340_v38, %s7230_s0  ;;  %13677 = vst [vmem:[#allocation115_spill] sm:$0xff] %v8150_v53 }
  0x9d   :  { %1441 = vrot.lane.b32.xlu1 %v1342_v48, %s7230_s0 }
  0x9e   :  { %v8154_v58 = vpop.permute.xlu0 %1174 }
  0x9f   :  { %13678 = vst [vmem:[#allocation116_spill] sm:$0xff] %v8154_v58  ;;  %v8160_v13 = vpop.permute.xlu1 %1176 }
  0xa0   :  { %1443 = vrot.lane.b32.xlu0 %v1344_v15, %s7230_s0  ;;  %13679 = vst [vmem:[#allocation117_spill] sm:$0xff] %v8160_v13 }
  0xa1   :  { %1445 = vrot.lane.b32.xlu1 %v1346_v16, %s7230_s0 }
  0xa2   :  { %v8164_v38 = vpop.permute.xlu0 %1178 }
  0xa3   :  { %13680 = vst [vmem:[#allocation118_spill] sm:$0xff] %v8164_v38  ;;  %v8170_v48 = vpop.permute.xlu1 %1180 }
  0xa4   :  { %1447 = vrot.lane.b32.xlu0 %v1348_v57, %s7230_s0  ;;  %13681 = vst [vmem:[#allocation119_spill] sm:$0xff] %v8170_v48 }
  0xa5   :  { %1449 = vrot.lane.b32.xlu1 %v1350_v32, %s7230_s0 }
  0xa6   :  { %v8174_v15 = vpop.permute.xlu0 %1182 }
  0xa7   :  { %13682 = vst [vmem:[#allocation120_spill] sm:$0xff] %v8174_v15  ;;  %v8180_v16 = vpop.permute.xlu1 %1184 }
  0xa8   :  { %1451 = vrot.lane.b32.xlu0 %v1352_v5, %s7230_s0  ;;  %13683 = vst [vmem:[#allocation121_spill] sm:$0xff] %v8180_v16 }
  0xa9   :  { %1453 = vrot.lane.b32.xlu1 %v1354_v44, %s7230_s0 }
  0xaa   :  { %v8184_v57 = vpop.permute.xlu0 %1186 }
  0xab   :  { %13684 = vst [vmem:[#allocation122_spill] sm:$0xff] %v8184_v57  ;;  %v8190_v32 = vpop.permute.xlu1 %1188 }
  0xac   :  { %1455 = vrot.lane.b32.xlu0 %v1356_v4, %s7230_s0  ;;  %13685 = vst [vmem:[#allocation123_spill] sm:$0xff] %v8190_v32 }
  0xad   :  { %1457 = vrot.lane.b32.xlu1 %v1358_v54, %s7230_s0 }
  0xae   :  { %v8194_v5 = vpop.permute.xlu0 %1190 }
  0xaf   :  { %13686 = vst [vmem:[#allocation124_spill] sm:$0xff] %v8194_v5  ;;  %v8200_v44 = vpop.permute.xlu1 %1192 }
  0xb0   :  { %1459 = vrot.lane.b32.xlu0 %v1360_v35, %s7230_s0  ;;  %13687 = vst [vmem:[#allocation125_spill] sm:$0xff] %v8200_v44  ;;  %v1507_v44 = vrot.slane %v8044_v46, 5 }
  0xb1   :  { %1461 = vrot.lane.b32.xlu1 %v1362_v10, %s7230_s0 }
  0xb2   :  { %v8204_v4 = vpop.permute.xlu0 %1194 }
  0xb3   :  { %13688 = vst [vmem:[#allocation126_spill] sm:$0xff] %v8204_v4  ;;  %v8210_v54 = vpop.permute.xlu1 %1196 }
  0xb4   :  { %1463 = vrot.lane.b32.xlu0 %v1364_v49, %s7230_s0  ;;  %13689 = vst [vmem:[#allocation127_spill] sm:$0xff] %v8210_v54  ;;  %v1375_v49 = vrot.slane %v7859_v6, 1 }
  0xb5   :  { %1465 = vrot.lane.b32.xlu1 %v1366_v26, %s7230_s0  ;;  %v1377_v26 = vrot.slane %v7881_v24, 1 }
  0xb6   :  { %v8214_v35 = vpop.permute.xlu0 %1198  ;;  %v1376_v18 = vsel %vm1299_vm2, %v1373_v25, %v1375_v49 }
  0xb7   :  { %13690 = vst [vmem:[#allocation128_spill] sm:$0xff] %v8214_v35  ;;  %v8220_v10 = vpop.permute.xlu1 %1200  ;;  %v1378_v17 = vsel %vm1299_vm2, %v1375_v49, %v1377_v26 }
  0xb8   :  { %1467 = vrot.lane.b32.xlu0 %v1368_v1, %s7230_s0  ;;  %13691 = vst [vmem:[#allocation129_spill] sm:$0xff] %v8220_v10  ;;  %v1379_v10 = vrot.slane %v7889_v39, 1 }
  0xb9   :  { %1469 = vrot.lane.b32.xlu1 %v1370_v3, %s7230_s0  ;;  %v1381_v3 = vrot.slane %v7906_v0, 1 }
  0xba   :  { %v8224_v54 = vpop.permute.xlu0 %1202  ;;  %v1380_v55 = vsel %vm1299_vm2, %v1377_v26, %v1379_v10 }
  0xbb   :  { %13692 = vst [vmem:[#allocation130_spill] sm:$0xff] %v8224_v54  ;;  %v8230_v1 = vpop.permute.xlu1 %1204  ;;  %v1382_v25 = vsel %vm1299_vm2, %v1379_v10, %v1381_v3 }
  0xbc   :  { %1471 = vrot.lane.b32.xlu0 %v1372_v27, %s7230_s0  ;;  %13693 = vst [vmem:[#allocation131_spill] sm:$0xff] %v8230_v1  ;;  %v1383_v1 = vrot.slane %v7913_v63, 1 }
  0xbd   :  { %1473 = vrot.lane.b32.xlu1 %v1374_v62, %s7230_s0  ;;  %v1385_v62 = vrot.slane %v7935_v51, 1 }
  0xbe   :  { %v8234_v35 = vpop.permute.xlu0 %1206  ;;  %v1384_v49 = vsel %vm1299_vm2, %v1381_v3, %v1383_v1 }
  0xbf   :  { %13694 = vst [vmem:[#allocation132_spill] sm:$0xff] %v8234_v35  ;;  %v8240_v27 = vpop.permute.xlu1 %1208  ;;  %v1386_v26 = vsel %vm1299_vm2, %v1383_v1, %v1385_v62 }
  0xc0   :  { %1475 = vrot.lane.b32.xlu0 %v1376_v18, %s7230_s0  ;;  %13695 = vst [vmem:[#allocation133_spill] sm:$0xff] %v8240_v27  ;;  %v1387_v27 = vrot.slane %v7937_v34, 1 }
  0xc1   :  { %1477 = vrot.lane.b32.xlu1 %v1378_v17, %s7230_s0  ;;  %v1389_v17 = vrot.slane %v7959_v61, 1 }
  0xc2   :  { %v8244_v54 = vpop.permute.xlu0 %1210  ;;  %v1388_v10 = vsel %vm1299_vm2, %v1385_v62, %v1387_v27  ;;  %v730_v62 = vld [vmem:[#allocation2 + $0x190] sm:$0xf] }
  0xc3   :  { %13696 = vst [vmem:[#allocation134_spill] sm:$0xff] %v8244_v54  ;;  %v8250_v18 = vpop.permute.xlu1 %1212  ;;  %v1390_v3 = vsel %vm1299_vm2, %v1387_v27, %v1389_v17 }
  0xc4   :  { %1479 = vrot.lane.b32.xlu0 %v1380_v55, %s7230_s0  ;;  %13697 = vst [vmem:[#allocation135_spill] sm:$0xff] %v8250_v18  ;;  %v1391_v18 = vrot.slane %v7961_v11, 1 }
  0xc5   :  { %1481 = vrot.lane.b32.xlu1 %v1382_v25, %s7230_s0  ;;  %v1393_v25 = vrot.slane %v7975_v40, 1 }
  0xc6   :  { %v8254_v35 = vpop.permute.xlu0 %1214  ;;  %v1392_v1 = vsel %vm1299_vm2, %v1389_v17, %v1391_v18  ;;  %v731_v17 = vld [vmem:[#allocation2] sm:$0x80] }
  0xc7   :  { %13698 = vst [vmem:[#allocation136_spill] sm:$0xff] %v8254_v35  ;;  %v8260_v55 = vpop.permute.xlu1 %1216 }
  0xc8   :  { %1483 = vrot.lane.b32.xlu0 %v1384_v49, %s7230_s0  ;;  %13699 = vst [vmem:[#allocation137_spill] sm:$0xff] %v8260_v55  ;;  %v1395_v55 = vrot.slane %v7985_v52, 1 }
  0xc9   :  { %1485 = vrot.lane.b32.xlu1 %v1386_v26, %s7230_s0  ;;  %v1394_v26 = vsel %vm1299_vm2, %v1391_v18, %v1393_v25 }
  0xca   :  { %v8264_v54 = vpop.permute.xlu0 %1218 }
  0xcb   :  { %13700 = vst [vmem:[#allocation138_spill] sm:$0xff] %v8264_v54  ;;  %v8270_v49 = vpop.permute.xlu1 %1220  ;;  %v1396_v54 = vsel %vm1299_vm2, %v1393_v25, %v1395_v55  ;;  %v1509_v25 = vrot.slane %v8047_v19, 5 }
  0xcc   :  { %1487 = vrot.lane.b32.xlu0 %v1388_v10, %s7230_s0  ;;  %13701 = vst [vmem:[#allocation139_spill] sm:$0xff] %v8270_v49  ;;  %v1397_v10 = vrot.slane %v8007_v60, 1  ;;  %v1399_v49 = vrot.slane %v730_v62, 1 }
  0xcd   :  { %1489 = vrot.lane.b32.xlu1 %v1390_v3, %s7230_s0  ;;  %v1510_v46 = vsel %vm1505_vm3, %v1507_v44, %v1509_v25 }
  0xce   :  { %v8274_v35 = vpop.permute.xlu0 %1222  ;;  %v1398_v3 = vsel %vm1299_vm2, %v1395_v55, %v1397_v10  ;;  %v1400_v18 = vsel %vm1299_vm2, %v1397_v10, %v1399_v49  ;;  %v1511_v55 = vrot.slane %v8053_v30, 5  ;;  %v1513_v10 = vrot.slane %v8057_v37, 5 }
  0xcf   :  { %13702 = vst [vmem:[#allocation140_spill] sm:$0xff] %v8274_v35  ;;  %v8280_v27 = vpop.permute.xlu1 %1224 }
  0xd0   :  { %1491 = vrot.lane.b32.xlu0 %v1392_v1, %s7230_s0  ;;  %13703 = vst [vmem:[#allocation141_spill] sm:$0xff] %v8280_v27  ;;  %v1506_v1 = vrot.slane %v731_v17, 5  ;;  %v1512_v19 = vsel %vm1505_vm3, %v1509_v25, %v1511_v55  ;;  %v1514_v30 = vsel %vm1505_vm3, %v1511_v55, %v1513_v10  ;;  %v8326_v25 = vld [vmem:[#allocation2 + $0x40] sm:$0xff] }
  0xd1   :  { %1493 = vrot.lane.b32.xlu1 %v1394_v26, %s7230_s0  ;;  %v1521_v55 = vrot.slane %v8326_v25, 5 }
  0xd2   :  { %v8283_v4 = vpop.permute.xlu0 %1226 }
  0xd3   :  { %13704 = vst [vmem:[#allocation142_spill] sm:$0xff] %v8283_v4  ;;  %v8288_v35 = vpop.permute.xlu1 %1228 }
  0xd4   :  { %1495 = vrot.lane.b32.xlu0 %v1396_v54, %s7230_s0  ;;  %13705 = vst [vmem:[#allocation143_spill] sm:$0xff] %v8288_v35  ;;  %v1508_v54 = vsel %vm1505_vm3, %v1506_v1, %v1507_v44  ;;  %v1519_v44 = vrot.slane %v8073_v7, 5 }
  0xd5   :  { %1497 = vrot.lane.b32.xlu1 %v1398_v3, %s7230_s0  ;;  %v1515_v3 = vrot.slane %v8063_v42, 5 }
  0xd6   :  { %v8292_v27 = vpop.permute.xlu0 %1230 }
  0xd7   :  { %13706 = vst [vmem:[#allocation144_spill] sm:$0xff] %v8292_v27  ;;  %v8297_v62 = vpop.permute.xlu1 %1232  ;;  %v1516_v37 = vsel %vm1505_vm3, %v1513_v10, %v1515_v3 }
  0xd8   :  { %1499 = vrot.lane.b32.xlu0 %v1400_v18, %s7230_s0  ;;  %13707 = vst [vmem:[#allocation145_spill] sm:$0xff] %v8297_v62 }
  0xd9   :  { %1501 = vrot.lane.b32.xlu1 %v1399_v49, %s7230_s0  ;;  %v1517_v49 = vrot.slane %v8067_v59, 5 }
  0xda   :  { %v8301_v26 = vpop.permute.xlu0 %1234 }
  0xdb   :  { %13708 = vst [vmem:[#allocation146_spill] sm:$0xff] %v8301_v26  ;;  %v8307_v17 = vpop.permute.xlu1 %1236  ;;  %v1518_v42 = vsel %vm1505_vm3, %v1515_v3, %v1517_v49  ;;  %v1520_v59 = vsel %vm1505_vm3, %v1517_v49, %v1519_v44  ;;  %v1522_v3 = vsel %vm1505_vm3, %v1519_v44, %v1521_v55 }
  0xdc   :  { %1607 = vrot.lane.b32.xlu0 %v1508_v54, %s7231_s20  ;;  %13709 = vst [vmem:[#allocation147_spill] sm:$0xff] %v8307_v17 }
  0xdd   :  { %1609 = vrot.lane.b32.xlu1 %v1510_v46, %s7231_s20 }
  0xde   :  { %v8311_v18 = vpop.permute.xlu0 %1238 }
  0xdf   :  { %13710 = vst [vmem:[#allocation148_spill] sm:$0xff] %v8311_v18  ;;  %v8317_v1 = vpop.permute.xlu1 %1240 }
  0xe0   :  { %1611 = vrot.lane.b32.xlu0 %v1512_v19, %s7231_s20  ;;  %13711 = vst [vmem:[#allocation149_spill] sm:$0xff] %v8317_v1  ;;  %v8332_v19 = vld [vmem:[#allocation2 + $0x48] sm:$0xff] }
  0xe1   :  { %1613 = vrot.lane.b32.xlu1 %v1514_v30, %s7231_s20  ;;  %v1523_v7 = vrot.slane %v8332_v19, 5  ;;  %v8340_v30 = vld [vmem:[#allocation2 + $0x50] sm:$0xff] }
  0xe2   :  { %v8321_v54 = vpop.permute.xlu0 %1242 }
  0xe3   :  { %13712 = vst [vmem:[#allocation150_spill] sm:$0xff] %v8321_v54  ;;  %v8329_v46 = vpop.permute.xlu1 %1244  ;;  %v1524_v49 = vsel %vm1505_vm3, %v1521_v55, %v1523_v7 }
  0xe4   :  { %1615 = vrot.lane.b32.xlu0 %v1516_v37, %s7231_s20  ;;  %13713 = vst [vmem:[#allocation151_spill] sm:$0xff] %v8329_v46  ;;  %v1525_v37 = vrot.slane %v8340_v30, 5  ;;  %v8346_v46 = vld [vmem:[#allocation2 + $0x58] sm:$0xff] }
  0xe5   :  { %1617 = vrot.lane.b32.xlu1 %v1518_v42, %s7231_s20  ;;  %v1527_v1 = vrot.slane %v8346_v46, 5  ;;  %v8354_v42 = vld [vmem:[#allocation2 + $0x60] sm:$0xff] }
  0xe6   :  { %v8335_v10 = vpop.permute.xlu0 %1246  ;;  %v1526_v44 = vsel %vm1505_vm3, %v1523_v7, %v1525_v37 }
  0xe7   :  { %13714 = vst [vmem:[#allocation152_spill] sm:$0xff] %v8335_v10  ;;  %v8343_v54 = vpop.permute.xlu1 %1401  ;;  %v1528_v55 = vsel %vm1505_vm3, %v1525_v37, %v1527_v1 }
  0xe8   :  { %1619 = vrot.lane.b32.xlu0 %v1520_v59, %s7231_s20  ;;  %13715 = vst [vmem:[#allocation153_spill] sm:$0xff] %v8343_v54  ;;  %v1529_v59 = vrot.slane %v8354_v42, 5  ;;  %v8360_v54 = vld [vmem:[#allocation2 + $0x68] sm:$0xff] }
  0xe9   :  { %1621 = vrot.lane.b32.xlu1 %v1522_v3, %s7231_s20  ;;  %v1531_v17 = vrot.slane %v8360_v54, 5  ;;  %v8368_v3 = vld [vmem:[#allocation2 + $0x70] sm:$0xff] }
  0xea   :  { %v8349_v18 = vpop.permute.xlu0 %1403  ;;  %v1530_v7 = vsel %vm1505_vm3, %v1527_v1, %v1529_v59 }
  0xeb   :  { %13716 = vst [vmem:[#allocation154_spill] sm:$0xff] %v8349_v18  ;;  %v8357_v10 = vpop.permute.xlu1 %1405  ;;  %v1532_v37 = vsel %vm1505_vm3, %v1529_v59, %v1531_v17 }
  0xec   :  { %1623 = vrot.lane.b32.xlu0 %v1524_v49, %s7231_s20  ;;  %13717 = vst [vmem:[#allocation155_spill] sm:$0xff] %v8357_v10  ;;  %v1533_v49 = vrot.slane %v8368_v3, 5  ;;  %v8374_v10 = vld [vmem:[#allocation2 + $0x78] sm:$0xff] }
  0xed   :  { %1625 = vrot.lane.b32.xlu1 %v1526_v44, %s7231_s20  ;;  %v1535_v62 = vrot.slane %v8374_v10, 5  ;;  %v8382_v44 = vld [vmem:[#allocation2 + $0x80] sm:$0xff] }
  0xee   :  { %v8363_v26 = vpop.permute.xlu0 %1407  ;;  %v1534_v1 = vsel %vm1505_vm3, %v1531_v17, %v1533_v49 }
  0xef   :  { %13718 = vst [vmem:[#allocation156_spill] sm:$0xff] %v8363_v26  ;;  %v8371_v18 = vpop.permute.xlu1 %1409  ;;  %v1536_v59 = vsel %vm1505_vm3, %v1533_v49, %v1535_v62 }
  0xf0   :  { %1627 = vrot.lane.b32.xlu0 %v1528_v55, %s7231_s20  ;;  %13719 = vst [vmem:[#allocation157_spill] sm:$0xff] %v8371_v18  ;;  %v1537_v55 = vrot.slane %v8382_v44, 5  ;;  %v8388_v18 = vld [vmem:[#allocation2 + $0x88] sm:$0xff] }
  0xf1   :  { %1629 = vrot.lane.b32.xlu1 %v1530_v7, %s7231_s20  ;;  %v1539_v35 = vrot.slane %v8388_v18, 5  ;;  %v8396_v7 = vld [vmem:[#allocation2 + $0x90] sm:$0xff] }
  0xf2   :  { %v8377_v27 = vpop.permute.xlu0 %1411  ;;  %v1538_v17 = vsel %vm1505_vm3, %v1535_v62, %v1537_v55 }
  0xf3   :  { %13720 = vst [vmem:[#allocation158_spill] sm:$0xff] %v8377_v27  ;;  %v8385_v26 = vpop.permute.xlu1 %1413  ;;  %v1540_v49 = vsel %vm1505_vm3, %v1537_v55, %v1539_v35 }
  0xf4   :  { %1631 = vrot.lane.b32.xlu0 %v1532_v37, %s7231_s20  ;;  %13721 = vst [vmem:[#allocation159_spill] sm:$0xff] %v8385_v26  ;;  %v1541_v37 = vrot.slane %v8396_v7, 5  ;;  %v8402_v26 = vld [vmem:[#allocation2 + $0x98] sm:$0xff] }
  0xf5   :  { %1633 = vrot.lane.b32.xlu1 %v1534_v1, %s7231_s20  ;;  %v1543_v5 = vrot.slane %v8402_v26, 5  ;;  %v8410_v1 = vld [vmem:[#allocation2 + $0xa0] sm:$0xff] }
  0xf6   :  { %v8391_v4 = vpop.permute.xlu0 %1415  ;;  %v1542_v62 = vsel %vm1505_vm3, %v1539_v35, %v1541_v37 }
  0xf7   :  { %13722 = vst [vmem:[#allocation160_spill] sm:$0xff] %v8391_v4  ;;  %v8399_v27 = vpop.permute.xlu1 %1417  ;;  %v1544_v55 = vsel %vm1505_vm3, %v1541_v37, %v1543_v5 }
  0xf8   :  { %1635 = vrot.lane.b32.xlu0 %v1536_v59, %s7231_s20  ;;  %13723 = vst [vmem:[#allocation161_spill] sm:$0xff] %v8399_v27  ;;  %v1545_v59 = vrot.slane %v8410_v1, 5  ;;  %v8416_v27 = vld [vmem:[#allocation2 + $0xa8] sm:$0xff] }
  0xf9   :  { %1637 = vrot.lane.b32.xlu1 %v1538_v17, %s7231_s20  ;;  %v1547_v57 = vrot.slane %v8416_v27, 5  ;;  %v8424_v17 = vld [vmem:[#allocation2 + $0xb0] sm:$0xff] }
  0xfa   :  { %v8405_v32 = vpop.permute.xlu0 %1419  ;;  %v1546_v35 = vsel %vm1505_vm3, %v1543_v5, %v1545_v59 }
  0xfb   :  { %13724 = vst [vmem:[#allocation162_spill] sm:$0xff] %v8405_v32  ;;  %v8413_v4 = vpop.permute.xlu1 %1421  ;;  %v1548_v37 = vsel %vm1505_vm3, %v1545_v59, %v1547_v57 }
  0xfc   :  { %1639 = vrot.lane.b32.xlu0 %v1540_v49, %s7231_s20  ;;  %13725 = vst [vmem:[#allocation163_spill] sm:$0xff] %v8413_v4  ;;  %v1549_v49 = vrot.slane %v8424_v17, 5  ;;  %v8430_v4 = vld [vmem:[#allocation2 + $0xb8] sm:$0xff] }
  0xfd   :  { %1641 = vrot.lane.b32.xlu1 %v1542_v62, %s7231_s20  ;;  %v1551_v15 = vrot.slane %v8430_v4, 5  ;;  %v8438_v62 = vld [vmem:[#allocation2 + $0xc0] sm:$0xff] }
  0xfe   :  { %v8419_v16 = vpop.permute.xlu0 %1423  ;;  %v1550_v5 = vsel %vm1505_vm3, %v1547_v57, %v1549_v49 }
  0xff   :  { %13726 = vst [vmem:[#allocation164_spill] sm:$0xff] %v8419_v16  ;;  %v8427_v32 = vpop.permute.xlu1 %1425  ;;  %v1552_v59 = vsel %vm1505_vm3, %v1549_v49, %v1551_v15 }
 0x100   :  { %1643 = vrot.lane.b32.xlu0 %v1544_v55, %s7231_s20  ;;  %13727 = vst [vmem:[#allocation165_spill] sm:$0xff] %v8427_v32  ;;  %v1553_v55 = vrot.slane %v8438_v62, 5  ;;  %v8444_v32 = vld [vmem:[#allocation2 + $0xc8] sm:$0xff] }
 0x101   :  { %1645 = vrot.lane.b32.xlu1 %v1546_v35, %s7231_s20  ;;  %v1555_v38 = vrot.slane %v8444_v32, 5  ;;  %v8452_v35 = vld [vmem:[#allocation2 + $0xd0] sm:$0xff] }
 0x102   :  { %v8433_v48 = vpop.permute.xlu0 %1427  ;;  %v1554_v57 = vsel %vm1505_vm3, %v1551_v15, %v1553_v55 }
 0x103   :  { %13728 = vst [vmem:[#allocation166_spill] sm:$0xff] %v8433_v48  ;;  %v8441_v16 = vpop.permute.xlu1 %1429  ;;  %v1556_v49 = vsel %vm1505_vm3, %v1553_v55, %v1555_v38 }
 0x104   :  { %1647 = vrot.lane.b32.xlu0 %v1548_v37, %s7231_s20  ;;  %13729 = vst [vmem:[#allocation167_spill] sm:$0xff] %v8441_v16  ;;  %v1557_v37 = vrot.slane %v8452_v35, 5  ;;  %v8458_v16 = vld [vmem:[#allocation2 + $0xd8] sm:$0xff] }
 0x105   :  { %1649 = vrot.lane.b32.xlu1 %v1550_v5, %s7231_s20  ;;  %v1559_v58 = vrot.slane %v8458_v16, 5  ;;  %v8466_v5 = vld [vmem:[#allocation2 + $0xe0] sm:$0xff] }
 0x106   :  { %v8447_v13 = vpop.permute.xlu0 %1431  ;;  %v1558_v15 = vsel %vm1505_vm3, %v1555_v38, %v1557_v37 }
 0x107   :  { %13730 = vst [vmem:[#allocation168_spill] sm:$0xff] %v8447_v13  ;;  %v8455_v48 = vpop.permute.xlu1 %1433  ;;  %v1560_v55 = vsel %vm1505_vm3, %v1557_v37, %v1559_v58 }
 0x108   :  { %1651 = vrot.lane.b32.xlu0 %v1552_v59, %s7231_s20  ;;  %13731 = vst [vmem:[#allocation169_spill] sm:$0xff] %v8455_v48  ;;  %v1561_v59 = vrot.slane %v8466_v5, 5  ;;  %v8472_v48 = vld [vmem:[#allocation2 + $0xe8] sm:$0xff] }
 0x109   :  { %1653 = vrot.lane.b32.xlu1 %v1554_v57, %s7231_s20  ;;  %v1563_v43 = vrot.slane %v8472_v48, 5  ;;  %v8480_v57 = vld [vmem:[#allocation2 + $0xf0] sm:$0xff] }
 0x10a   :  { %v8461_v53 = vpop.permute.xlu0 %1435  ;;  %v1562_v38 = vsel %vm1505_vm3, %v1559_v58, %v1561_v59 }
 0x10b   :  { %13732 = vst [vmem:[#allocation170_spill] sm:$0xff] %v8461_v53  ;;  %v8469_v13 = vpop.permute.xlu1 %1437  ;;  %v1564_v37 = vsel %vm1505_vm3, %v1561_v59, %v1563_v43 }
 0x10c   :  { %1655 = vrot.lane.b32.xlu0 %v1556_v49, %s7231_s20  ;;  %13733 = vst [vmem:[#allocation171_spill] sm:$0xff] %v8469_v13  ;;  %v1565_v49 = vrot.slane %v8480_v57, 5  ;;  %v8486_v13 = vld [vmem:[#allocation2 + $0xf8] sm:$0xff] }
 0x10d   :  { %1657 = vrot.lane.b32.xlu1 %v1558_v15, %s7231_s20  ;;  %v1567_v28 = vrot.slane %v8486_v13, 5  ;;  %v8494_v15 = vld [vmem:[#allocation2 + $0x100] sm:$0xff] }
 0x10e   :  { %v8475_v31 = vpop.permute.xlu0 %1439  ;;  %v1566_v58 = vsel %vm1505_vm3, %v1563_v43, %v1565_v49 }
 0x10f   :  { %13734 = vst [vmem:[#allocation172_spill] sm:$0xff] %v8475_v31  ;;  %v8483_v53 = vpop.permute.xlu1 %1441  ;;  %v1568_v59 = vsel %vm1505_vm3, %v1565_v49, %v1567_v28 }
 0x110   :  { %1659 = vrot.lane.b32.xlu0 %v1560_v55, %s7231_s20  ;;  %13735 = vst [vmem:[#allocation173_spill] sm:$0xff] %v8483_v53  ;;  %v1569_v55 = vrot.slane %v8494_v15, 5  ;;  %v8500_v53 = vld [vmem:[#allocation2 + $0x108] sm:$0xff] }
 0x111   :  { %1661 = vrot.lane.b32.xlu1 %v1562_v38, %s7231_s20  ;;  %v1571_v2 = vrot.slane %v8500_v53, 5  ;;  %v8508_v38 = vld [vmem:[#allocation2 + $0x110] sm:$0xff] }
 0x112   :  { %v8489_v8 = vpop.permute.xlu0 %1443  ;;  %v1570_v43 = vsel %vm1505_vm3, %v1567_v28, %v1569_v55  ;;  %v1577_v28 = vrot.slane %v7831_v41, 5 }
 0x113   :  { %13736 = vst [vmem:[#allocation174_spill] sm:$0xff] %v8489_v8  ;;  %v8497_v31 = vpop.permute.xlu1 %1445  ;;  %v1572_v49 = vsel %vm1505_vm3, %v1569_v55, %v1571_v2  ;;  %v1581_v55 = vrot.slane %v7859_v6, 5 }
 0x114   :  { %1663 = vrot.lane.b32.xlu0 %v1564_v37, %s7231_s20  ;;  %13737 = vst [vmem:[#allocation175_spill] sm:$0xff] %v8497_v31  ;;  %v1573_v37 = vrot.slane %v8508_v38, 5  ;;  %v1575_v31 = vrot.slane %v7824_v36, 5 }
 0x115   :  { %1665 = vrot.lane.b32.xlu1 %v1566_v58, %s7231_s20 }
 0x116   :  { %v8503_v56 = vpop.permute.xlu0 %1447  ;;  %v1574_v58 = vsel %vm1505_vm3, %v1571_v2, %v1573_v37  ;;  %v1578_v36 = vsel %vm1505_vm3, %v1575_v31, %v1577_v28  ;;  %v1583_v2 = vrot.slane %v7881_v24, 5 }
 0x117   :  { %13738 = vst [vmem:[#allocation176_spill] sm:$0xff] %v8503_v56  ;;  %v8511_v8 = vpop.permute.xlu1 %1449  ;;  %v1576_v56 = vsel %vm1505_vm3, %v1573_v37, %v1575_v31  ;;  %v1587_v31 = vrot.slane %v7906_v0, 5 }
 0x118   :  { %1667 = vrot.lane.b32.xlu0 %v1568_v59, %s7231_s20  ;;  %13739 = vst [vmem:[#allocation177_spill] sm:$0xff] %v8511_v8  ;;  %v1579_v8 = vrot.slane %v7851_v50, 5  ;;  %v1584_v6 = vsel %vm1505_vm3, %v1581_v55, %v1583_v2 }
 0x119   :  { %1669 = vrot.lane.b32.xlu1 %v1570_v43, %s7231_s20 }
 0x11a   :  { %v8515_v23 = vpop.permute.xlu0 %1451  ;;  %v1580_v41 = vsel %vm1505_vm3, %v1577_v28, %v1579_v8  ;;  %v1582_v50 = vsel %vm1505_vm3, %v1579_v8, %v1581_v55  ;;  %v1589_v28 = vrot.slane %v7913_v63, 5  ;;  %v1591_v8 = vrot.slane %v7935_v51, 5 }
 0x11b   :  { %13740 = vst [vmem:[#allocation178_spill] sm:$0xff] %v8515_v23  ;;  %v8521_v59 = vpop.permute.xlu1 %1453  ;;  %v1593_v55 = vrot.slane %v7937_v34, 5  ;;  %v13774_v23 = vld [vmem:[#allocation21_spill] sm:$0xff] }
 0x11c   :  { %1671 = vrot.lane.b32.xlu0 %v1572_v49, %s7231_s20  ;;  %13741 = vst [vmem:[#allocation179_spill] sm:$0xff] %v8521_v59  ;;  %v1590_v0 = vsel %vm1505_vm3, %v1587_v31, %v1589_v28  ;;  %v1592_v63 = vsel %vm1505_vm3, %v1589_v28, %v1591_v8  ;;  %v1601_v28 = vrot.slane %v7985_v52, 5  ;;  %v1737_v12 = vrot.slane %v13774_v23, 5 }
 0x11d   :  { %1673 = vrot.lane.b32.xlu1 %v1574_v58, %s7231_s20  ;;  %v1594_v51 = vsel %vm1505_vm3, %v1591_v8, %v1593_v55  ;;  %v1603_v8 = vrot.slane %v8007_v60, 5  ;;  %v1714_v60 = vrot.slane %v7328_v21, 6 }
 0x11e   :  { %v8525_v47 = vpop.permute.xlu0 %1455 }
 0x11f   :  { %13742 = vst [vmem:[#allocation180_spill] sm:$0xff] %v8525_v47  ;;  %v8531_v43 = vpop.permute.xlu1 %1457  ;;  %v1604_v52 = vsel %vm1505_vm3, %v1601_v28, %v1603_v8  ;;  %v13769_v47 = vld [vmem:[#allocation15_spill] sm:$0xff] }
 0x120   :  { %1675 = vrot.lane.b32.xlu0 %v1576_v56, %s7231_s20  ;;  %13743 = vst [vmem:[#allocation181_spill] sm:$0xff] %v8531_v43  ;;  %v1585_v56 = vrot.slane %v7889_v39, 5 }
 0x121   :  { %1677 = vrot.lane.b32.xlu1 %v1578_v36, %s7231_s20 }
 0x122   :  { %v8535_v49 = vpop.permute.xlu0 %1459  ;;  %v1586_v24 = vsel %vm1505_vm3, %v1583_v2, %v1585_v56  ;;  %v1588_v39 = vsel %vm1505_vm3, %v1585_v56, %v1587_v31  ;;  %v1595_v2 = vrot.slane %v7959_v61, 5  ;;  %v1597_v56 = vrot.slane %v7961_v11, 5 }
 0x123   :  { %13744 = vst [vmem:[#allocation182_spill] sm:$0xff] %v8535_v49  ;;  %v8541_v37 = vpop.permute.xlu1 %1461  ;;  %v1599_v31 = vrot.slane %v7975_v40, 5 }
 0x124   :  { %1679 = vrot.lane.b32.xlu0 %v1580_v41, %s7231_s20  ;;  %13745 = vst [vmem:[#allocation183_spill] sm:$0xff] %v8541_v37  ;;  %v1596_v34 = vsel %vm1505_vm3, %v1593_v55, %v1595_v2  ;;  %v1598_v61 = vsel %vm1505_vm3, %v1595_v2, %v1597_v56 }
 0x125   :  { %1681 = vrot.lane.b32.xlu1 %v1582_v50, %s7231_s20  ;;  %v1600_v11 = vsel %vm1505_vm3, %v1597_v56, %v1599_v31  ;;  %v1602_v40 = vsel %vm1505_vm3, %v1599_v31, %v1601_v28  ;;  %v1713_v56 = vrot.slane %v7330_v22, 5 }
 0x126   :  { %v8545_v58 = vpop.permute.xlu0 %1463 }
 0x127   :  { %13746 = vst [vmem:[#allocation184_spill] sm:$0xff] %v8545_v58  ;;  %v8551_v36 = vpop.permute.xlu1 %1465 }
 0x128   :  { %1683 = vrot.lane.b32.xlu0 %v1584_v6, %s7231_s20  ;;  %13747 = vst [vmem:[#allocation185_spill] sm:$0xff] %v8551_v36  ;;  %v13763_v36 = vld [vmem:[#allocation11_spill] sm:$0xff] }
 0x129   :  { %1685 = vrot.lane.b32.xlu1 %v1586_v24, %s7231_s20 }
 0x12a   :  { %v8555_v41 = vpop.permute.xlu0 %1467 }
 0x12b   :  { %13748 = vst [vmem:[#allocation186_spill] sm:$0xff] %v8555_v41  ;;  %v8561_v50 = vpop.permute.xlu1 %1469 }
 0x12c   :  { %1687 = vrot.lane.b32.xlu0 %v1588_v39, %s7231_s20  ;;  %13749 = vst [vmem:[#allocation187_spill] sm:$0xff] %v8561_v50  ;;  %v1715_v50 = vor.u32 %v1714_v60, %v1713_v56 }
 0x12d   :  { %1689 = vrot.lane.b32.xlu1 %v1590_v0, %s7231_s20 }
 0x12e   :  { %v8565_v6 = vpop.permute.xlu0 %1471 }
 0x12f   :  { %13750 = vst [vmem:[#allocation188_spill] sm:$0xff] %v8565_v6  ;;  %v8571_v24 = vpop.permute.xlu1 %1473 }
 0x130   :  { %1691 = vrot.lane.b32.xlu0 %v1592_v63, %s7231_s20  ;;  %13751 = vst [vmem:[#allocation189_spill] sm:$0xff] %v8571_v24  ;;  %v8585_v63 = vld [vmem:[#allocation2 + $0x190] sm:$0xff] }
 0x131   :  { %1693 = vrot.lane.b32.xlu1 %v1594_v51, %s7231_s20  ;;  %v1605_v2 = vrot.slane %v8585_v63, 5 }
 0x132   :  { %v8575_v39 = vpop.permute.xlu0 %1475 }
 0x133   :  { %13752 = vst [vmem:[#allocation190_spill] sm:$0xff] %v8575_v39  ;;  %v8581_v0 = vpop.permute.xlu1 %1477  ;;  %v13760_v39 = vld [vmem:[#allocation9_spill] sm:$0xff] }
 0x134   :  { %1695 = vrot.lane.b32.xlu0 %v1596_v34, %s7231_s20  ;;  %13753 = vst [vmem:[#allocation191_spill] sm:$0xff] %v8581_v0  ;;  %v1718_v24 = vrot.slane %v13760_v39, 6 }
 0x135   :  { %1697 = vrot.lane.b32.xlu1 %v1598_v61, %s7231_s20  ;;  %v13758_v61 = vshrl.u32 %v7319_v14, 16 }
 0x136   :  { %v8587_v55 = vpop.permute.xlu0 %1479 }
 0x137   :  { %13754 = vst [vmem:[#allocation192_spill] sm:$0xff] %v8587_v55  ;;  %v8593_v51 = vpop.permute.xlu1 %1481  ;;  %v13757_v55 = vshll.u32 %v7319_v14, 16  ;;  %v1710_v31 = vrot.slane %v13758_v61, 5  ;;  %v13766_v61 = vld [vmem:[#allocation13_spill] sm:$0xff] }
 0x138   :  { %1699 = vrot.lane.b32.xlu0 %v1600_v11, %s7231_s20  ;;  %13755 = vst [vmem:[#allocation193_spill] sm:$0xff] %v8593_v51  ;;  %v1606_v11 = vsel %vm1505_vm3, %v1603_v8, %v1605_v2  ;;  %v13759_v51 = vld [vmem:[#allocation10_spill] sm:$0xff]  ;;  %v1726_v37 = vrot.slane %v13766_v61, 6 }
 0x139   :  { %v1711_v0 = vrot.slane %v13757_v55, 6  ;;  %1701 = vrot.lane.b32.xlu1 %v1602_v40, %s7231_s20  ;;  %v1717_v28 = vrot.slane %v13759_v51, 5  ;;  %v1722_v55 = vrot.slane %v13763_v36, 6  ;;  %v13765_v40 = vld [vmem:[#allocation14_spill] sm:$0xff] }
 0x13a   :  { %v8598_v34 = vpop.permute.xlu0 %1483 }
 0x13b   :  { %13756 = vst [vmem:[#allocation194_spill] sm:$0xff] %v8598_v34  ;;  %v8609_v6 = vpop.permute.xlu1 %1485  ;;  %v13762_v34 = vld [vmem:[#allocation12_spill] sm:$0xff]  ;;  %v1712_v14 = vor.u32 %v1711_v0, %v1710_v31  ;;  %v1719_v8 = vor.u32 %v1718_v24, %v1717_v28 }
 0x13c   :  { %1703 = vrot.lane.b32.xlu0 %v1604_v52, %s7231_s20  ;;  %13761 = vst [vmem:[#allocation10_spill] sm:$0xff] %v8609_v6  ;;  %v1721_v41 = vrot.slane %v13762_v34, 5  ;;  %v1725_v52 = vrot.slane %v13765_v40, 5  ;;  %v13768_v6 = vld [vmem:[#allocation16_spill] sm:$0xff] }
 0x13d   :  { %1705 = vrot.lane.b32.xlu1 %v1606_v11, %s7231_s20  ;;  %v1716_v56 = vsel %vm1709_vm4, %v1712_v14, %v1715_v50  ;;  %v1729_v43 = vrot.slane %v13768_v6, 5  ;;  %v1720_v24 = vsel %vm1709_vm4, %v1715_v50, %v1719_v8  ;;  %v13772_v11 = vld [vmem:[#allocation17_spill] sm:$0xff] }
 0x13e   :  { %v8613_v58 = vpop.permute.xlu0 %1487  ;;  %v1723_v60 = vor.u32 %v1722_v55, %v1721_v41  ;;  %v1727_v0 = vor.u32 %v1726_v37, %v1725_v52  ;;  %v1734_v28 = vrot.slane %v13772_v11, 6 }
 0x13f   :  { %13764 = vst [vmem:[#allocation9_spill] sm:$0xff] %v8613_v58  ;;  %v8619_v49 = vpop.permute.xlu1 %1489  ;;  %v1730_v58 = vrot.slane %v13769_v47, 6 }
 0x140   :  { %1707 = vrot.lane.b32.xlu0 %v1605_v2, %s7231_s20  ;;  %13767 = vst [vmem:[#allocation12_spill] sm:$0xff] %v8619_v49  ;;  %v13771_v2 = vld [vmem:[#allocation19_spill] sm:$0xff]  ;;  %v1724_v41 = vsel %vm1709_vm4, %v1719_v8, %v1723_v60  ;;  %v1728_v37 = vsel %vm1709_vm4, %v1723_v60, %v1727_v0  ;;  %v13780_v8 = vld [vmem:[#allocation26_spill] sm:$0xff] }
 0x141   :  { %1914 = vrot.lane.b32.xlu1 %v1712_v14, %s7232_s21  ;;  %v1733_v31 = vrot.slane %v13771_v2, 5  ;;  %v1731_v55 = vor.u32 %v1730_v58, %v1729_v43  ;;  %v13777_v14 = vld [vmem:[#allocation23_spill] sm:$0xff]  ;;  %v1745_v33 = vrot.slane %v13780_v8, 5  ;;  %v13787_v8 = vld [vmem:[#allocation25_spill] sm:$0xff] }
 0x142   :  { %v8624_v59 = vpop.permute.xlu0 %1491  ;;  %v1741_v52 = vrot.slane %v13777_v14, 5 }
 0x143   :  { %13770 = vst [vmem:[#allocation11_spill] sm:$0xff] %v8624_v59  ;;  %v8631_v49 = vpop.permute.xlu1 %1493  ;;  %v13775_v59 = vld [vmem:[#allocation18_spill] sm:$0xff]  ;;  %v1735_v50 = vor.u32 %v1734_v28, %v1733_v31  ;;  %v1732_v43 = vsel %vm1709_vm4, %v1727_v0, %v1731_v55  ;;  %v13783_v31 = vld [vmem:[#allocation27_spill] sm:$0xff]  ;;  %v13786_v0 = vld [vmem:[#allocation28_spill] sm:$0xff] }
 0x144   :  { %1916 = vrot.lane.b32.xlu0 %v1716_v56, %s7232_s21  ;;  %13773 = vst [vmem:[#allocation14_spill] sm:$0xff] %v8631_v49  ;;  %v1738_v45 = vrot.slane %v13775_v59, 6  ;;  %v13778_v56 = vld [vmem:[#allocation20_spill] sm:$0xff]  ;;  %v13781_v59 = vld [vmem:[#allocation22_spill] sm:$0xff]  ;;  %v1749_v28 = vrot.slane %v13783_v31, 5 }
 0x145   :  { %1918 = vrot.lane.b32.xlu1 %v1720_v24, %s7232_s21  ;;  %v1742_v49 = vrot.slane %v13778_v56, 6  ;;  %v1736_v60 = vsel %vm1709_vm4, %v1731_v55, %v1735_v50 }
 0x146   :  { %v8636_v20 = vpop.permute.xlu0 %1495  ;;  %v1739_v58 = vor.u32 %v1738_v45, %v1737_v12 }
 0x147   :  { %13776 = vst [vmem:[#allocation13_spill] sm:$0xff] %v8636_v20  ;;  %v8643_v9 = vpop.permute.xlu1 %1497  ;;  %v1746_v20 = vrot.slane %v13781_v59, 6  ;;  %v1743_v24 = vor.u32 %v1742_v49, %v1741_v52  ;;  %v1753_v59 = vrot.slane %v13786_v0, 5  ;;  %v13793_v0 = vld [vmem:[#allocation30_spill] sm:$0xff] }
 0x148   :  { %1920 = vrot.lane.b32.xlu0 %v1724_v41, %s7232_s21  ;;  %13779 = vst [vmem:[#allocation16_spill] sm:$0xff] %v8643_v9  ;;  %v13784_v41 = vld [vmem:[#allocation24_spill] sm:$0xff]  ;;  %v1740_v45 = vsel %vm1709_vm4, %v1735_v50, %v1739_v58  ;;  %v13792_v50 = vld [vmem:[#allocation33_spill] sm:$0xff] }
 0x149   :  { %1922 = vrot.lane.b32.xlu1 %v1728_v37, %s7232_s21  ;;  %v1750_v9 = vrot.slane %v13784_v41, 6  ;;  %v1747_v12 = vor.u32 %v1746_v20, %v1745_v33  ;;  %v1744_v49 = vsel %vm1709_vm4, %v1739_v58, %v1743_v24  ;;  %v13789_v37 = vld [vmem:[#allocation31_spill] sm:$0xff] }
 0x14a   :  { %v8648_v23 = vpop.permute.xlu0 %1499  ;;  %v1757_v52 = vrot.slane %v13789_v37, 5 }
 0x14b   :  { %13782 = vst [vmem:[#allocation15_spill] sm:$0xff] %v8648_v23  ;;  %v8655_v56 = vpop.permute.xlu1 %1501  ;;  %v1754_v23 = vrot.slane %v13787_v8, 6  ;;  %v1751_v55 = vor.u32 %v1750_v9, %v1749_v28  ;;  %v1748_v33 = vsel %vm1709_vm4, %v1743_v24, %v1747_v12  ;;  %v1761_v8 = vrot.slane %v13792_v50, 5  ;;  %v13798_v24 = vld [vmem:[#allocation37_spill] sm:$0xff]  ;;  %v13799_v50 = vld [vmem:[#allocation34_spill] sm:$0xff] }
 0x14c   :  { %1924 = vrot.lane.b32.xlu0 %v1732_v43, %s7232_s21  ;;  %13785 = vst [vmem:[#allocation19_spill] sm:$0xff] %v8655_v56  ;;  %v13790_v43 = vld [vmem:[#allocation29_spill] sm:$0xff] }
 0x14d   :  { %1926 = vrot.lane.b32.xlu1 %v1736_v60, %s7232_s21  ;;  %v1758_v56 = vrot.slane %v13790_v43, 6  ;;  %v1755_v20 = vor.u32 %v1754_v23, %v1753_v59  ;;  %v1752_v9 = vsel %vm1709_vm4, %v1747_v12, %v1751_v55  ;;  %v13795_v60 = vld [vmem:[#allocation36_spill] sm:$0xff] }
 0x14e   :  { %v8660_v14 = vpop.permute.xlu0 %1607  ;;  %v1765_v28 = vrot.slane %v13795_v60, 5 }
 0x14f   :  { %13788 = vst [vmem:[#allocation17_spill] sm:$0xff] %v8660_v14  ;;  %v8667_v41 = vpop.permute.xlu1 %1609  ;;  %v1762_v14 = vrot.slane %v13793_v0, 6  ;;  %v1759_v58 = vor.u32 %v1758_v56, %v1757_v52  ;;  %v1756_v23 = vsel %vm1709_vm4, %v1751_v55, %v1755_v20  ;;  %v1769_v0 = vrot.slane %v13798_v24, 5  ;;  %v13804_v55 = vld [vmem:[#allocation40_spill] sm:$0xff]  ;;  %v13805_v24 = vld [vmem:[#allocation39_spill] sm:$0xff] }
 0x150   :  { %1928 = vrot.lane.b32.xlu0 %v1740_v45, %s7232_s21  ;;  %13791 = vst [vmem:[#allocation195_spill] sm:$0xff] %v8667_v41  ;;  %v13796_v45 = vld [vmem:[#allocation32_spill] sm:$0xff] }
 0x151   :  { %1930 = vrot.lane.b32.xlu1 %v1744_v49, %s7232_s21  ;;  %v1766_v41 = vrot.slane %v13796_v45, 6  ;;  %v1763_v59 = vor.u32 %v1762_v14, %v1761_v8  ;;  %v1760_v56 = vsel %vm1709_vm4, %v1755_v20, %v1759_v58  ;;  %v13801_v49 = vld [vmem:[#allocation38_spill] sm:$0xff] }
 0x152   :  { %v8672_v31 = vpop.permute.xlu0 %1611  ;;  %v1773_v52 = vrot.slane %v13801_v49, 5 }
 0x153   :  { %13794 = vst [vmem:[#allocation196_spill] sm:$0xff] %v8672_v31  ;;  %v8679_v43 = vpop.permute.xlu1 %1613  ;;  %v1770_v31 = vrot.slane %v13799_v50, 6  ;;  %v1767_v12 = vor.u32 %v1766_v41, %v1765_v28  ;;  %v1764_v14 = vsel %vm1709_vm4, %v1759_v58, %v1763_v59  ;;  %v1777_v50 = vrot.slane %v13804_v55, 5  ;;  %v13810_v58 = vld [vmem:[#allocation44_spill] sm:$0xff]  ;;  %v13811_v55 = vld [vmem:[#allocation42_spill] sm:$0xff] }
 0x154   :  { %1932 = vrot.lane.b32.xlu0 %v1748_v33, %s7232_s21  ;;  %13797 = vst [vmem:[#allocation197_spill] sm:$0xff] %v8679_v43  ;;  %v13802_v33 = vld [vmem:[#allocation35_spill] sm:$0xff] }
 0x155   :  { %1934 = vrot.lane.b32.xlu1 %v1752_v9, %s7232_s21  ;;  %v1774_v43 = vrot.slane %v13802_v33, 6  ;;  %v1771_v8 = vor.u32 %v1770_v31, %v1769_v0  ;;  %v1768_v41 = vsel %vm1709_vm4, %v1763_v59, %v1767_v12  ;;  %v13807_v9 = vld [vmem:[#allocation43_spill] sm:$0xff] }
 0x156   :  { %v8684_v37 = vpop.permute.xlu0 %1615  ;;  %v1781_v28 = vrot.slane %v13807_v9, 5 }
 0x157   :  { %13800 = vst [vmem:[#allocation198_spill] sm:$0xff] %v8684_v37  ;;  %v8691_v45 = vpop.permute.xlu1 %1617  ;;  %v1778_v37 = vrot.slane %v13805_v24, 6  ;;  %v1775_v20 = vor.u32 %v1774_v43, %v1773_v52  ;;  %v1772_v31 = vsel %vm1709_vm4, %v1767_v12, %v1771_v8  ;;  %v1785_v24 = vrot.slane %v13810_v58, 5  ;;  %v13816_v12 = vld [vmem:[#allocation49_spill] sm:$0xff]  ;;  %v13817_v58 = vld [vmem:[#allocation46_spill] sm:$0xff] }
 0x158   :  { %1936 = vrot.lane.b32.xlu0 %v1756_v23, %s7232_s21  ;;  %13803 = vst [vmem:[#allocation199_spill] sm:$0xff] %v8691_v45  ;;  %v13808_v23 = vld [vmem:[#allocation41_spill] sm:$0xff] }
 0x159   :  { %1938 = vrot.lane.b32.xlu1 %v1760_v56, %s7232_s21  ;;  %v1782_v45 = vrot.slane %v13808_v23, 6  ;;  %v1779_v0 = vor.u32 %v1778_v37, %v1777_v50  ;;  %v1776_v43 = vsel %vm1709_vm4, %v1771_v8, %v1775_v20  ;;  %v13813_v56 = vld [vmem:[#allocation47_spill] sm:$0xff] }
 0x15a   :  { %v8696_v60 = vpop.permute.xlu0 %1619  ;;  %v1789_v52 = vrot.slane %v13813_v56, 5 }
 0x15b   :  { %13806 = vst [vmem:[#allocation200_spill] sm:$0xff] %v8696_v60  ;;  %v8703_v33 = vpop.permute.xlu1 %1621  ;;  %v1786_v60 = vrot.slane %v13811_v55, 6  ;;  %v1783_v59 = vor.u32 %v1782_v45, %v1781_v28  ;;  %v1780_v37 = vsel %vm1709_vm4, %v1775_v20, %v1779_v0  ;;  %v1793_v55 = vrot.slane %v13816_v12, 5  ;;  %v13822_v20 = vld [vmem:[#allocation53_spill] sm:$0xff]  ;;  %v13823_v12 = vld [vmem:[#allocation50_spill] sm:$0xff] }
 0x15c   :  { %1940 = vrot.lane.b32.xlu0 %v1764_v14, %s7232_s21  ;;  %13809 = vst [vmem:[#allocation201_spill] sm:$0xff] %v8703_v33  ;;  %v13814_v14 = vld [vmem:[#allocation45_spill] sm:$0xff] }
 0x15d   :  { %1942 = vrot.lane.b32.xlu1 %v1768_v41, %s7232_s21  ;;  %v1790_v33 = vrot.slane %v13814_v14, 6  ;;  %v1787_v50 = vor.u32 %v1786_v60, %v1785_v24  ;;  %v1784_v45 = vsel %vm1709_vm4, %v1779_v0, %v1783_v59  ;;  %v13819_v41 = vld [vmem:[#allocation51_spill] sm:$0xff] }
 0x15e   :  { %v8708_v49 = vpop.permute.xlu0 %1623  ;;  %v1797_v28 = vrot.slane %v13819_v41, 5 }
 0x15f   :  { %13812 = vst [vmem:[#allocation202_spill] sm:$0xff] %v8708_v49  ;;  %v8715_v23 = vpop.permute.xlu1 %1625  ;;  %v1794_v49 = vrot.slane %v13817_v58, 6  ;;  %v1791_v8 = vor.u32 %v1790_v33, %v1789_v52  ;;  %v1788_v60 = vsel %vm1709_vm4, %v1783_v59, %v1787_v50  ;;  %v1801_v58 = vrot.slane %v13822_v20, 5  ;;  %v13828_v59 = vld [vmem:[#allocation58_spill] sm:$0xff] }
 0x160   :  { %1944 = vrot.lane.b32.xlu0 %v1772_v31, %s7232_s21  ;;  %13815 = vst [vmem:[#allocation203_spill] sm:$0xff] %v8715_v23  ;;  %v13820_v31 = vld [vmem:[#allocation48_spill] sm:$0xff]  ;;  %v13829_v20 = vld [vmem:[#allocation54_spill] sm:$0xff] }
 0x161   :  { %1946 = vrot.lane.b32.xlu1 %v1776_v43, %s7232_s21  ;;  %v1798_v23 = vrot.slane %v13820_v31, 6  ;;  %v1795_v24 = vor.u32 %v1794_v49, %v1793_v55  ;;  %v1792_v33 = vsel %vm1709_vm4, %v1787_v50, %v1791_v8  ;;  %v13825_v43 = vld [vmem:[#allocation55_spill] sm:$0xff] }
 0x162   :  { %v8720_v9 = vpop.permute.xlu0 %1627  ;;  %v1805_v52 = vrot.slane %v13825_v43, 5 }
 0x163   :  { %13818 = vst [vmem:[#allocation204_spill] sm:$0xff] %v8720_v9  ;;  %v8727_v14 = vpop.permute.xlu1 %1629  ;;  %v1802_v9 = vrot.slane %v13823_v12, 6  ;;  %v1799_v0 = vor.u32 %v1798_v23, %v1797_v28  ;;  %v1796_v49 = vsel %vm1709_vm4, %v1791_v8, %v1795_v24  ;;  %v1809_v12 = vrot.slane %v13828_v59, 5  ;;  %v13834_v8 = vld [vmem:[#allocation60_spill] sm:$0xff]  ;;  %v13835_v59 = vld [vmem:[#allocation57_spill] sm:$0xff] }
 0x164   :  { %1948 = vrot.lane.b32.xlu0 %v1780_v37, %s7232_s21  ;;  %13821 = vst [vmem:[#allocation205_spill] sm:$0xff] %v8727_v14  ;;  %v13826_v37 = vld [vmem:[#allocation52_spill] sm:$0xff] }
 0x165   :  { %1950 = vrot.lane.b32.xlu1 %v1784_v45, %s7232_s21  ;;  %v1806_v14 = vrot.slane %v13826_v37, 6  ;;  %v1803_v55 = vor.u32 %v1802_v9, %v1801_v58  ;;  %v1800_v23 = vsel %vm1709_vm4, %v1795_v24, %v1799_v0  ;;  %v13831_v45 = vld [vmem:[#allocation59_spill] sm:$0xff] }
 0x166   :  { %v8732_v56 = vpop.permute.xlu0 %1631  ;;  %v1813_v28 = vrot.slane %v13831_v45, 5 }
 0x167   :  { %13824 = vst [vmem:[#allocation206_spill] sm:$0xff] %v8732_v56  ;;  %v8739_v31 = vpop.permute.xlu1 %1633  ;;  %v1810_v56 = vrot.slane %v13829_v20, 6  ;;  %v1807_v50 = vor.u32 %v1806_v14, %v1805_v52  ;;  %v1804_v9 = vsel %vm1709_vm4, %v1799_v0, %v1803_v55  ;;  %v1817_v20 = vrot.slane %v13834_v8, 5  ;;  %v13840_v0 = vld [vmem:[#allocation66_spill] sm:$0xff] }
 0x168   :  { %1952 = vrot.lane.b32.xlu0 %v1788_v60, %s7232_s21  ;;  %13827 = vst [vmem:[#allocation207_spill] sm:$0xff] %v8739_v31  ;;  %v13832_v60 = vld [vmem:[#allocation56_spill] sm:$0xff]  ;;  %v13841_v8 = vld [vmem:[#allocation62_spill] sm:$0xff] }
 0x169   :  { %1954 = vrot.lane.b32.xlu1 %v1792_v33, %s7232_s21  ;;  %v1814_v31 = vrot.slane %v13832_v60, 6  ;;  %v1811_v58 = vor.u32 %v1810_v56, %v1809_v12  ;;  %v1808_v14 = vsel %vm1709_vm4, %v1803_v55, %v1807_v50  ;;  %v13837_v33 = vld [vmem:[#allocation63_spill] sm:$0xff] }
 0x16a   :  { %v8744_v41 = vpop.permute.xlu0 %1635  ;;  %v1821_v52 = vrot.slane %v13837_v33, 5 }
 0x16b   :  { %13830 = vst [vmem:[#allocation208_spill] sm:$0xff] %v8744_v41  ;;  %v8751_v37 = vpop.permute.xlu1 %1637  ;;  %v1818_v41 = vrot.slane %v13835_v59, 6  ;;  %v1815_v24 = vor.u32 %v1814_v31, %v1813_v28  ;;  %v1812_v56 = vsel %vm1709_vm4, %v1807_v50, %v1811_v58  ;;  %v1825_v59 = vrot.slane %v13840_v0, 5  ;;  %v13846_v50 = vld [vmem:[#allocation69_spill] sm:$0xff] }
 0x16c   :  { %1956 = vrot.lane.b32.xlu0 %v1796_v49, %s7232_s21  ;;  %13833 = vst [vmem:[#allocation209_spill] sm:$0xff] %v8751_v37  ;;  %v13838_v49 = vld [vmem:[#allocation61_spill] sm:$0xff] }
 0x16d   :  { %1958 = vrot.lane.b32.xlu1 %v1800_v23, %s7232_s21  ;;  %v1822_v37 = vrot.slane %v13838_v49, 6  ;;  %v1819_v12 = vor.u32 %v1818_v41, %v1817_v20  ;;  %v1816_v31 = vsel %vm1709_vm4, %v1811_v58, %v1815_v24  ;;  %v13843_v23 = vld [vmem:[#allocation67_spill] sm:$0xff]  ;;  %v13847_v0 = vld [vmem:[#allocation65_spill] sm:$0xff] }
 0x16e   :  { %v8756_v43 = vpop.permute.xlu0 %1639  ;;  %v1829_v28 = vrot.slane %v13843_v23, 5 }
 0x16f   :  { %13836 = vst [vmem:[#allocation210_spill] sm:$0xff] %v8756_v43  ;;  %v8763_v60 = vpop.permute.xlu1 %1641  ;;  %v1826_v43 = vrot.slane %v13841_v8, 6  ;;  %v1823_v55 = vor.u32 %v1822_v37, %v1821_v52  ;;  %v1820_v41 = vsel %vm1709_vm4, %v1815_v24, %v1819_v12  ;;  %v1833_v8 = vrot.slane %v13846_v50, 5  ;;  %v13852_v24 = vld [vmem:[#allocation72_spill] sm:$0xff]  ;;  %v13853_v50 = vld [vmem:[#allocation70_spill] sm:$0xff] }
 0x170   :  { %1960 = vrot.lane.b32.xlu0 %v1804_v9, %s7232_s21  ;;  %13839 = vst [vmem:[#allocation211_spill] sm:$0xff] %v8763_v60  ;;  %v13844_v9 = vld [vmem:[#allocation64_spill] sm:$0xff] }
 0x171   :  { %1962 = vrot.lane.b32.xlu1 %v1808_v14, %s7232_s21  ;;  %v1830_v60 = vrot.slane %v13844_v9, 6  ;;  %v1827_v20 = vor.u32 %v1826_v43, %v1825_v59  ;;  %v1824_v37 = vsel %vm1709_vm4, %v1819_v12, %v1823_v55  ;;  %v13849_v14 = vld [vmem:[#allocation71_spill] sm:$0xff] }
 0x172   :  { %v8768_v45 = vpop.permute.xlu0 %1643  ;;  %v1837_v52 = vrot.slane %v13849_v14, 5 }
 0x173   :  { %13842 = vst [vmem:[#allocation212_spill] sm:$0xff] %v8768_v45  ;;  %v8775_v49 = vpop.permute.xlu1 %1645  ;;  %v1834_v45 = vrot.slane %v13847_v0, 6  ;;  %v1831_v58 = vor.u32 %v1830_v60, %v1829_v28  ;;  %v1828_v43 = vsel %vm1709_vm4, %v1823_v55, %v1827_v20  ;;  %v1841_v0 = vrot.slane %v13852_v24, 5  ;;  %v13858_v55 = vld [vmem:[#allocation78_spill] sm:$0xff] }
 0x174   :  { %1964 = vrot.lane.b32.xlu0 %v1812_v56, %s7232_s21  ;;  %13845 = vst [vmem:[#allocation213_spill] sm:$0xff] %v8775_v49  ;;  %v13850_v56 = vld [vmem:[#allocation68_spill] sm:$0xff]  ;;  %v13859_v24 = vld [vmem:[#allocation74_spill] sm:$0xff] }
 0x175   :  { %1966 = vrot.lane.b32.xlu1 %v1816_v31, %s7232_s21  ;;  %v1838_v49 = vrot.slane %v13850_v56, 6  ;;  %v1835_v59 = vor.u32 %v1834_v45, %v1833_v8  ;;  %v1832_v60 = vsel %vm1709_vm4, %v1827_v20, %v1831_v58  ;;  %v13855_v31 = vld [vmem:[#allocation75_spill] sm:$0xff] }
 0x176   :  { %v8780_v33 = vpop.permute.xlu0 %1647  ;;  %v1845_v28 = vrot.slane %v13855_v31, 5 }
 0x177   :  { %13848 = vst [vmem:[#allocation214_spill] sm:$0xff] %v8780_v33  ;;  %v8787_v9 = vpop.permute.xlu1 %1649  ;;  %v1842_v33 = vrot.slane %v13853_v50, 6  ;;  %v1839_v12 = vor.u32 %v1838_v49, %v1837_v52  ;;  %v1836_v45 = vsel %vm1709_vm4, %v1831_v58, %v1835_v59  ;;  %v1849_v50 = vrot.slane %v13858_v55, 5  ;;  %v13864_v58 = vld [vmem:[#allocation81_spill] sm:$0xff] }
 0x178   :  { %1968 = vrot.lane.b32.xlu0 %v1820_v41, %s7232_s21  ;;  %13851 = vst [vmem:[#allocation215_spill] sm:$0xff] %v8787_v9  ;;  %v13856_v41 = vld [vmem:[#allocation73_spill] sm:$0xff] }
 0x179   :  { %1970 = vrot.lane.b32.xlu1 %v1824_v37, %s7232_s21  ;;  %v1846_v9 = vrot.slane %v13856_v41, 6  ;;  %v1843_v8 = vor.u32 %v1842_v33, %v1841_v0  ;;  %v1840_v49 = vsel %vm1709_vm4, %v1835_v59, %v1839_v12  ;;  %v13861_v37 = vld [vmem:[#allocation79_spill] sm:$0xff]  ;;  %v13865_v55 = vld [vmem:[#allocation77_spill] sm:$0xff] }
 0x17a   :  { %v8792_v23 = vpop.permute.xlu0 %1651  ;;  %v1853_v52 = vrot.slane %v13861_v37, 5 }
 0x17b   :  { %13854 = vst [vmem:[#allocation216_spill] sm:$0xff] %v8792_v23  ;;  %v8799_v56 = vpop.permute.xlu1 %1653  ;;  %v1850_v23 = vrot.slane %v13859_v24, 6  ;;  %v1847_v20 = vor.u32 %v1846_v9, %v1845_v28  ;;  %v1844_v33 = vsel %vm1709_vm4, %v1839_v12, %v1843_v8  ;;  %v1857_v24 = vrot.slane %v13864_v58, 5  ;;  %v13870_v12 = vld [vmem:[#allocation85_spill] sm:$0xff]  ;;  %v13871_v58 = vld [vmem:[#allocation82_spill] sm:$0xff] }
 0x17c   :  { %1972 = vrot.lane.b32.xlu0 %v1828_v43, %s7232_s21  ;;  %13857 = vst [vmem:[#allocation217_spill] sm:$0xff] %v8799_v56  ;;  %v13862_v43 = vld [vmem:[#allocation76_spill] sm:$0xff] }
 0x17d   :  { %1974 = vrot.lane.b32.xlu1 %v1832_v60, %s7232_s21  ;;  %v1854_v56 = vrot.slane %v13862_v43, 6  ;;  %v1851_v0 = vor.u32 %v1850_v23, %v1849_v50  ;;  %v1848_v9 = vsel %vm1709_vm4, %v1843_v8, %v1847_v20  ;;  %v13867_v60 = vld [vmem:[#allocation83_spill] sm:$0xff] }
 0x17e   :  { %v8804_v14 = vpop.permute.xlu0 %1655  ;;  %v1861_v28 = vrot.slane %v13867_v60, 5 }
 0x17f   :  { %13860 = vst [vmem:[#allocation218_spill] sm:$0xff] %v8804_v14  ;;  %v8811_v41 = vpop.permute.xlu1 %1657  ;;  %v1858_v14 = vrot.slane %v13865_v55, 6  ;;  %v1855_v59 = vor.u32 %v1854_v56, %v1853_v52  ;;  %v1852_v23 = vsel %vm1709_vm4, %v1847_v20, %v1851_v0  ;;  %v1865_v55 = vrot.slane %v13870_v12, 5  ;;  %v13876_v20 = vld [vmem:[#allocation88_spill] sm:$0xff]  ;;  %v13877_v12 = vld [vmem:[#allocation86_spill] sm:$0xff] }
 0x180   :  { %1976 = vrot.lane.b32.xlu0 %v1836_v45, %s7232_s21  ;;  %13863 = vst [vmem:[#allocation219_spill] sm:$0xff] %v8811_v41  ;;  %v13868_v45 = vld [vmem:[#allocation80_spill] sm:$0xff] }
 0x181   :  { %1978 = vrot.lane.b32.xlu1 %v1840_v49, %s7232_s21  ;;  %v1862_v41 = vrot.slane %v13868_v45, 6  ;;  %v1859_v50 = vor.u32 %v1858_v14, %v1857_v24  ;;  %v1856_v56 = vsel %vm1709_vm4, %v1851_v0, %v1855_v59  ;;  %v13873_v49 = vld [vmem:[#allocation87_spill] sm:$0xff] }
 0x182   :  { %v8816_v31 = vpop.permute.xlu0 %1659  ;;  %v1869_v52 = vrot.slane %v13873_v49, 5 }
 0x183   :  { %13866 = vst [vmem:[#allocation220_spill] sm:$0xff] %v8816_v31  ;;  %v8823_v43 = vpop.permute.xlu1 %1661  ;;  %v1866_v31 = vrot.slane %v13871_v58, 6  ;;  %v1863_v8 = vor.u32 %v1862_v41, %v1861_v28  ;;  %v1860_v14 = vsel %vm1709_vm4, %v1855_v59, %v1859_v50  ;;  %v1873_v58 = vrot.slane %v13876_v20, 5  ;;  %v13880_v41 = vld [vmem:[#allocation89_spill] sm:$0xff] }
 0x184   :  { %1980 = vrot.lane.b32.xlu0 %v1844_v33, %s7232_s21  ;;  %13869 = vst [vmem:[#allocation221_spill] sm:$0xff] %v8823_v43  ;;  %v13874_v33 = vld [vmem:[#allocation84_spill] sm:$0xff]  ;;  %v1878_v28 = vrot.slane %v13880_v41, 6  ;;  %v1885_v41 = vrot.slane %v7997_v29, 5 }
 0x185   :  { %1982 = vrot.lane.b32.xlu1 %v1848_v9, %s7232_s21  ;;  %v1870_v43 = vrot.slane %v13874_v33, 6  ;;  %v1867_v24 = vor.u32 %v1866_v31, %v1865_v55  ;;  %v13879_v9 = vld [vmem:[#allocation91_spill] sm:$0xff]  ;;  %v13881_v33 = vld [vmem:[#allocation93_spill] sm:$0xff]  ;;  %v13882_v31 = vld [vmem:[#allocation90_spill] sm:$0xff] }
 0x186   :  { %v8828_v37 = vpop.permute.xlu0 %1663  ;;  %v1877_v0 = vrot.slane %v13879_v9, 5  ;;  %v1881_v59 = vrot.slane %v13881_v33, 5  ;;  %v1882_v55 = vrot.slane %v13882_v31, 6 }
 0x187   :  { %13872 = vst [vmem:[#allocation222_spill] sm:$0xff] %v8828_v37  ;;  %v8835_v45 = vpop.permute.xlu1 %1665  ;;  %v1874_v37 = vrot.slane %v13877_v12, 6  ;;  %v1868_v12 = vsel %vm1709_vm4, %v1863_v8, %v1867_v24 }
 0x188   :  { %1984 = vrot.lane.b32.xlu0 %v1852_v23, %s7232_s21  ;;  %13875 = vst [vmem:[#allocation223_spill] sm:$0xff] %v8835_v45  ;;  %v1864_v23 = vsel %vm1709_vm4, %v1859_v50, %v1863_v8  ;;  %v1871_v45 = vor.u32 %v1870_v43, %v1869_v52  ;;  %v1883_v50 = vor.u32 %v1882_v55, %v1881_v59  ;;  %v13886_v52 = vld [vmem:[#allocation96_spill] sm:$0xff]  ;;  %v13891_v55 = vld [vmem:[#allocation95_spill] sm:$0xff] }
 0x189   :  { %1986 = vrot.lane.b32.xlu1 %v1856_v56, %s7232_s21  ;;  %v1879_v56 = vor.u32 %v1878_v28, %v1877_v0  ;;  %v1889_v31 = vrot.slane %v13886_v52, 5  ;;  %v13894_v52 = vld [vmem:[#allocation97_spill] sm:$0xff] }
 0x18a   :  { %v8840_v60 = vpop.permute.xlu0 %1667  ;;  %v1872_v43 = vsel %vm1709_vm4, %v1867_v24, %v1871_v45 }
 0x18b   :  { %13878 = vst [vmem:[#allocation224_spill] sm:$0xff] %v8840_v60  ;;  %v8849_v20 = vpop.permute.xlu1 %1669  ;;  %v1875_v60 = vor.u32 %v1874_v37, %v1873_v58 }
 0x18c   :  { %1988 = vrot.lane.b32.xlu0 %v1860_v14, %s7232_s21  ;;  %13883 = vst [vmem:[#allocation225_spill] sm:$0xff] %v8849_v20  ;;  %v13885_v14 = vld [vmem:[#allocation92_spill] sm:$0xff]  ;;  %v13887_v20 = vld [vmem:[#allocation94_spill] sm:$0xff] }
 0x18d   :  { %1990 = vrot.lane.b32.xlu1 %v1864_v23, %s7232_s21  ;;  %v1886_v9 = vrot.slane %v13885_v14, 6  ;;  %v1890_v33 = vrot.slane %v13887_v20, 6  ;;  %v1876_v37 = vsel %vm1709_vm4, %v1871_v45, %v1875_v60  ;;  %v1880_v0 = vsel %vm1709_vm4, %v1875_v60, %v1879_v56  ;;  %v13890_v23 = vld [vmem:[#allocation98_spill] sm:$0xff] }
 0x18e   :  { %v8852_v49 = vpop.permute.xlu0 %1671  ;;  %v1893_v59 = vrot.slane %v13890_v23, 5  ;;  %v13899_v60 = vshrl.u32 %v8585_v63, 16 }
 0x18f   :  { %13884 = vst [vmem:[#allocation226_spill] sm:$0xff] %v8852_v49  ;;  %v8861_v8 = vpop.permute.xlu1 %1673  ;;  %v1887_v28 = vor.u32 %v1886_v9, %v1885_v41  ;;  %v1891_v24 = vor.u32 %v1890_v33, %v1889_v31  ;;  %v1894_v49 = vrot.slane %v13891_v55, 6  ;;  %v13896_v31 = vld [vmem:[#allocation101_spill] sm:$0xff] }
 0x190   :  { %1992 = vrot.lane.b32.xlu0 %v1868_v12, %s7232_s21  ;;  %13888 = vst [vmem:[#allocation92_spill] sm:$0xff] %v8861_v8  ;;  %v1884_v12 = vsel %vm1709_vm4, %v1879_v56, %v1883_v50  ;;  %v13893_v8 = vld [vmem:[#allocation100_spill] sm:$0xff]  ;;  %v1901_v56 = vrot.slane %v13896_v31, 5  ;;  %v1908_v55 = vrot.slane %v13899_v60, 5 }
 0x191   :  { %1994 = vrot.lane.b32.xlu1 %v1872_v43, %s7232_s21  ;;  %v1897_v45 = vrot.slane %v13893_v8, 5  ;;  %v1888_v33 = vsel %vm1709_vm4, %v1883_v50, %v1887_v28  ;;  %v1895_v41 = vor.u32 %v1894_v49, %v1893_v59 }
 0x192   :  { %v8864_v58 = vpop.permute.xlu0 %1675 }
 0x193   :  { %13889 = vst [vmem:[#allocation227_spill] sm:$0xff] %v8864_v58  ;;  %v8872_v20 = vpop.permute.xlu1 %1677  ;;  %v1898_v58 = vrot.slane %v13894_v52, 6  ;;  %v1892_v52 = vsel %vm1709_vm4, %v1887_v28, %v1891_v24  ;;  %v1896_v49 = vsel %vm1709_vm4, %v1891_v24, %v1895_v41 }
 0x194   :  { %1996 = vrot.lane.b32.xlu0 %v1876_v37, %s7232_s21  ;;  %13892 = vst [vmem:[#allocation228_spill] sm:$0xff] %v8872_v20  ;;  %v13897_v37 = vld [vmem:[#allocation99_spill] sm:$0xff] }
 0x195   :  { %1998 = vrot.lane.b32.xlu1 %v1880_v0, %s7232_s21  ;;  %v1902_v20 = vrot.slane %v13897_v37, 6  ;;  %v1899_v43 = vor.u32 %v1898_v58, %v1897_v45 }
 0x196   :  { %v8878_v9 = vpop.permute.xlu0 %1679 }
 0x197   :  { %13895 = vst [vmem:[#allocation229_spill] sm:$0xff] %v8878_v9  ;;  %v8885_v8 = vpop.permute.xlu1 %1681  ;;  %v13900_v9 = vshll.u32 %v8585_v63, 16  ;;  %v1903_v50 = vor.u32 %v1902_v20, %v1901_v56  ;;  %v1900_v28 = vsel %vm1709_vm4, %v1895_v41, %v1899_v43  ;;  %v7079_v20 = vld [vmem:[#allocation2 + $0x8] sm:$0xff] }
 0x198   :  { %2000 = vrot.lane.b32.xlu0 %v1884_v12, %s7232_s21  ;;  %13898 = vst [vmem:[#allocation101_spill] sm:$0xff] %v8885_v8  ;;  %v2018_v24 = vrot.slane %v7079_v20, 6  ;;  %v8931_v20 = vld [vmem:[#allocation2 + $0x28] sm:$0xff]  ;;  %v10003_v8 = vld [vmem:[#allocation2 + $0xf8] sm:$0xff] }
 0x199   :  { %v1911_v0 = vrot.slane %v13900_v9, 6  ;;  %2002 = vrot.lane.b32.xlu1 %v1888_v33, %s7232_s21  ;;  %v1904_v45 = vsel %vm1709_vm4, %v1899_v43, %v1903_v50  ;;  %v8917_v43 = vld [vmem:[#allocation2 + $0x18] sm:$0xff] }
 0x19a   :  { %v8892_v23 = vpop.permute.xlu0 %1683  ;;  %v2021_v56 = vrot.slane %v8917_v43, 6 }
 0x19b   :  { %13901 = vst [vmem:[#allocation99_spill] sm:$0xff] %v8892_v23  ;;  %v8897_v12 = vpop.permute.xlu1 %1685  ;;  %v1912_v58 = vor.u32 %v1911_v0, %v1908_v55  ;;  %v8912_v55 = vld [vmem:[#allocation2 + $0x10] sm:$0xff] }
 0x19c   :  { %2004 = vrot.lane.b32.xlu0 %v1892_v52, %s7232_s21  ;;  %13902 = vst [vmem:[#allocation230_spill] sm:$0xff] %v8897_v12  ;;  %v2019_v33 = vrot.slane %v8912_v55, 6  ;;  %v14188_v23 = vld [vmem:[#allocation132_spill] sm:$0xff] }
 0x19d   :  { %2006 = vrot.lane.b32.xlu1 %v1896_v49, %s7232_s21  ;;  %v1913_v52 = vsel %vm1709_vm4, %v1903_v50, %v1912_v58  ;;  %v8925_v50 = vld [vmem:[#allocation2 + $0x20] sm:$0xff]  ;;  %vm3567_vm4 = vcmask 228352  }
 0x19e   :  { %v8900_v59 = vpop.permute.xlu0 %1687  ;;  %v2020_v49 = vsel %vm13568_vm5, %v2018_v24, %v2019_v33 }
 0x19f   :  { %13903 = vst [vmem:[#allocation231_spill] sm:$0xff] %v8900_v59  ;;  %v8905_v60 = vpop.permute.xlu1 %1689 }
 0x1a0   :  { %2008 = vrot.lane.b32.xlu0 %v1900_v28, %s7232_s21  ;;  %13904 = vst [vmem:[#allocation232_spill] sm:$0xff] %v8905_v60  ;;  %v2023_v28 = vrot.slane %v8925_v50, 6 }
 0x1a1   :  { %2010 = vrot.lane.b32.xlu1 %v1904_v45, %s7232_s21 }
 0x1a2   :  { %v8908_v9 = vpop.permute.xlu0 %1691 }
 0x1a3   :  { %13905 = vst [vmem:[#allocation233_spill] sm:$0xff] %v8908_v9  ;;  %v8915_v41 = vpop.permute.xlu1 %1693 }
 0x1a4   :  { %2012 = vrot.lane.b32.xlu0 %v1913_v52, %s7232_s21  ;;  %13906 = vst [vmem:[#allocation234_spill] sm:$0xff] %v8915_v41  ;;  %v2022_v52 = vsel %vm13568_vm5, %v2019_v33, %v2021_v56  ;;  %v2025_v41 = vrot.slane %v8931_v20, 6 }
 0x1a5   :  { %2014 = vrot.lane.b32.xlu1 %v1912_v58, %s7232_s21  ;;  %v2024_v58 = vsel %vm13568_vm5, %v2021_v56, %v2023_v28 }
 0x1a6   :  { %v8920_v0 = vpop.permute.xlu0 %1695  ;;  %v2026_v33 = vsel %vm13568_vm5, %v2023_v28, %v2025_v41  ;;  %v2033_v28 = vrot.slane %v8332_v19, 6 }
 0x1a7   :  { %13907 = vst [vmem:[#allocation235_spill] sm:$0xff] %v8920_v0  ;;  %v8928_v45 = vpop.permute.xlu1 %1697 }
 0x1a8   :  { %2119 = vrot.lane.b32.xlu0 %v2018_v24, %s7233_s22  ;;  %13908 = vst [vmem:[#allocation236_spill] sm:$0xff] %v8928_v45  ;;  %v8939_v24 = vld [vmem:[#allocation2 + $0x30] sm:$0xff]  ;;  %v8945_v45 = vld [vmem:[#allocation2 + $0x38] sm:$0xff] }
 0x1a9   :  { %2121 = vrot.lane.b32.xlu1 %v2020_v49, %s7233_s22  ;;  %v2027_v9 = vrot.slane %v8939_v24, 6  ;;  %v2029_v59 = vrot.slane %v8945_v45, 6  ;;  %v2031_v49 = vrot.slane %v8326_v25, 6 }
 0x1aa   :  { %v8934_v0 = vpop.permute.xlu0 %1699 }
 0x1ab   :  { %13909 = vst [vmem:[#allocation237_spill] sm:$0xff] %v8934_v0  ;;  %v8942_v60 = vpop.permute.xlu1 %1701  ;;  %v2028_v56 = vsel %vm13568_vm5, %v2025_v41, %v2027_v9  ;;  %v2034_v25 = vsel %vm13568_vm5, %v2031_v49, %v2033_v28  ;;  %v2037_v41 = vrot.slane %v8346_v46, 6 }
 0x1ac   :  { %2123 = vrot.lane.b32.xlu0 %v2022_v52, %s7233_s22  ;;  %13910 = vst [vmem:[#allocation238_spill] sm:$0xff] %v8942_v60  ;;  %v2030_v60 = vsel %vm13568_vm5, %v2027_v9, %v2029_v59 }
 0x1ad   :  { %2125 = vrot.lane.b32.xlu1 %v2024_v58, %s7233_s22  ;;  %v2032_v58 = vsel %vm13568_vm5, %v2029_v59, %v2031_v49  ;;  %v2041_v59 = vrot.slane %v8360_v54, 6  ;;  %v2043_v49 = vrot.slane %v8368_v3, 6 }
 0x1ae   :  { %v8948_v12 = vpop.permute.xlu0 %1703 }
 0x1af   :  { %13911 = vst [vmem:[#allocation239_spill] sm:$0xff] %v8948_v12  ;;  %v8954_v52 = vpop.permute.xlu1 %1705  ;;  %v2044_v54 = vsel %vm13568_vm5, %v2041_v59, %v2043_v49 }
 0x1b0   :  { %2127 = vrot.lane.b32.xlu0 %v2026_v33, %s7233_s22  ;;  %13912 = vst [vmem:[#allocation240_spill] sm:$0xff] %v8954_v52  ;;  %v2035_v33 = vrot.slane %v8340_v30, 6 }
 0x1b1   :  { %2129 = vrot.lane.b32.xlu1 %v2028_v56, %s7233_s22 }
 0x1b2   :  { %v8958_v0 = vpop.permute.xlu0 %1707  ;;  %v2036_v19 = vsel %vm13568_vm5, %v2033_v28, %v2035_v33  ;;  %v2038_v30 = vsel %vm13568_vm5, %v2035_v33, %v2037_v41  ;;  %v2045_v28 = vrot.slane %v8374_v10, 6  ;;  %v2047_v33 = vrot.slane %v8382_v44, 6 }
 0x1b3   :  { %13913 = vst [vmem:[#allocation241_spill] sm:$0xff] %v8958_v0  ;;  %v8964_v12 = vpop.permute.xlu1 %1914 }
 0x1b4   :  { %2131 = vrot.lane.b32.xlu0 %v2030_v60, %s7233_s22  ;;  %13914 = vst [vmem:[#allocation242_spill] sm:$0xff] %v8964_v12  ;;  %v2039_v60 = vrot.slane %v8354_v42, 6  ;;  %v2046_v3 = vsel %vm13568_vm5, %v2043_v49, %v2045_v28  ;;  %v2048_v10 = vsel %vm13568_vm5, %v2045_v28, %v2047_v33  ;;  %v2055_v49 = vrot.slane %v8410_v1, 6 }
 0x1b5   :  { %2133 = vrot.lane.b32.xlu1 %v2032_v58, %s7233_s22  ;;  %v2057_v28 = vrot.slane %v8416_v27, 6 }
 0x1b6   :  { %v8968_v52 = vpop.permute.xlu0 %1916  ;;  %v2040_v46 = vsel %vm13568_vm5, %v2037_v41, %v2039_v60  ;;  %v2042_v42 = vsel %vm13568_vm5, %v2039_v60, %v2041_v59  ;;  %v2049_v41 = vrot.slane %v8388_v18, 6  ;;  %v2051_v60 = vrot.slane %v8396_v7, 6 }
 0x1b7   :  { %13915 = vst [vmem:[#allocation243_spill] sm:$0xff] %v8968_v52  ;;  %v8974_v9 = vpop.permute.xlu1 %1918  ;;  %v2053_v59 = vrot.slane %v8402_v26, 6  ;;  %v2058_v1 = vsel %vm13568_vm5, %v2055_v49, %v2057_v28  ;;  %v14185_v52 = vld [vmem:[#allocation131_spill] sm:$0xff] }
 0x1b8   :  { %2135 = vrot.lane.b32.xlu0 %v2034_v25, %s7233_s22  ;;  %13916 = vst [vmem:[#allocation244_spill] sm:$0xff] %v8974_v9  ;;  %v2050_v44 = vsel %vm13568_vm5, %v2047_v33, %v2049_v41  ;;  %v2052_v18 = vsel %vm13568_vm5, %v2049_v41, %v2051_v60  ;;  %v2059_v33 = vrot.slane %v8424_v17, 6  ;;  %v2061_v41 = vrot.slane %v8430_v4, 6  ;;  %v9985_v9 = vld [vmem:[#allocation2 + $0xe8] sm:$0xff] }
 0x1b9   :  { %2137 = vrot.lane.b32.xlu1 %v2036_v19, %s7233_s22  ;;  %v2054_v7 = vsel %vm13568_vm5, %v2051_v60, %v2053_v59  ;;  %v2056_v26 = vsel %vm13568_vm5, %v2053_v59, %v2055_v49  ;;  %v2063_v60 = vrot.slane %v8438_v62, 6  ;;  %v2065_v59 = vrot.slane %v8444_v32, 6 }
 0x1ba   :  { %v8978_v56 = vpop.permute.xlu0 %1920  ;;  %v2060_v27 = vsel %vm13568_vm5, %v2057_v28, %v2059_v33  ;;  %v2062_v17 = vsel %vm13568_vm5, %v2059_v33, %v2061_v41  ;;  %v2067_v49 = vrot.slane %v8452_v35, 6  ;;  %v2069_v28 = vrot.slane %v8458_v16, 6 }
 0x1bb   :  { %13917 = vst [vmem:[#allocation245_spill] sm:$0xff] %v8978_v56  ;;  %v8984_v58 = vpop.permute.xlu1 %1922  ;;  %v2064_v4 = vsel %vm13568_vm5, %v2061_v41, %v2063_v60  ;;  %v2066_v62 = vsel %vm13568_vm5, %v2063_v60, %v2065_v59  ;;  %v2071_v33 = vrot.slane %v8466_v5, 6  ;;  %v2073_v41 = vrot.slane %v8472_v48, 6  ;;  %v14183_v56 = vld [vmem:[#allocation130_spill] sm:$0xff] }
 0x1bc   :  { %2139 = vrot.lane.b32.xlu0 %v2038_v30, %s7233_s22  ;;  %13918 = vst [vmem:[#allocation246_spill] sm:$0xff] %v8984_v58  ;;  %v2068_v32 = vsel %vm13568_vm5, %v2065_v59, %v2067_v49  ;;  %v2070_v35 = vsel %vm13568_vm5, %v2067_v49, %v2069_v28  ;;  %v2075_v60 = vrot.slane %v8480_v57, 6  ;;  %v2077_v59 = vrot.slane %v8486_v13, 6  ;;  %v9978_v58 = vld [vmem:[#allocation2 + $0xe0] sm:$0xff] }
 0x1bd   :  { %2141 = vrot.lane.b32.xlu1 %v2040_v46, %s7233_s22  ;;  %v2072_v16 = vsel %vm13568_vm5, %v2069_v28, %v2071_v33  ;;  %v2074_v5 = vsel %vm13568_vm5, %v2071_v33, %v2073_v41  ;;  %v2079_v49 = vrot.slane %v8494_v15, 6  ;;  %v2081_v28 = vrot.slane %v8500_v53, 6 }
 0x1be   :  { %v8988_v25 = vpop.permute.xlu0 %1924  ;;  %v2076_v48 = vsel %vm13568_vm5, %v2073_v41, %v2075_v60  ;;  %v2078_v57 = vsel %vm13568_vm5, %v2075_v60, %v2077_v59  ;;  %v2083_v33 = vrot.slane %v8508_v38, 6  ;;  %v9087_v41 = vld [vmem:[#allocation2 + $0x118] sm:$0xff] }
 0x1bf   :  { %13919 = vst [vmem:[#allocation247_spill] sm:$0xff] %v8988_v25  ;;  %v8994_v19 = vpop.permute.xlu1 %1926  ;;  %v2080_v13 = vsel %vm13568_vm5, %v2077_v59, %v2079_v49  ;;  %v2082_v15 = vsel %vm13568_vm5, %v2079_v49, %v2081_v28  ;;  %v2085_v60 = vrot.slane %v9087_v41, 6 }
 0x1c0   :  { %2143 = vrot.lane.b32.xlu0 %v2042_v42, %s7233_s22  ;;  %13920 = vst [vmem:[#allocation248_spill] sm:$0xff] %v8994_v19  ;;  %v2084_v53 = vsel %vm13568_vm5, %v2081_v28, %v2083_v33  ;;  %v9968_v19 = vld [vmem:[#allocation2 + $0xd8] sm:$0xff] }
 0x1c1   :  { %2145 = vrot.lane.b32.xlu1 %v2044_v54, %s7233_s22  ;;  %v2086_v49 = vsel %vm13568_vm5, %v2083_v33, %v2085_v60 }
 0x1c2   :  { %v8998_v30 = vpop.permute.xlu0 %1928 }
 0x1c3   :  { %13921 = vst [vmem:[#allocation249_spill] sm:$0xff] %v8998_v30  ;;  %v9004_v46 = vpop.permute.xlu1 %1930 }
 0x1c4   :  { %2147 = vrot.lane.b32.xlu0 %v2046_v3, %s7233_s22  ;;  %13922 = vst [vmem:[#allocation250_spill] sm:$0xff] %v9004_v46 }
 0x1c5   :  { %2149 = vrot.lane.b32.xlu1 %v2048_v10, %s7233_s22 }
 0x1c6   :  { %v9008_v42 = vpop.permute.xlu0 %1932 }
 0x1c7   :  { %13923 = vst [vmem:[#allocation251_spill] sm:$0xff] %v9008_v42  ;;  %v9014_v54 = vpop.permute.xlu1 %1934 }
 0x1c8   :  { %2151 = vrot.lane.b32.xlu0 %v2050_v44, %s7233_s22  ;;  %13924 = vst [vmem:[#allocation252_spill] sm:$0xff] %v9014_v54  ;;  %v734_v54 = vld [vmem:[#allocation2 + $0x8] sm:$0xf0] }
 0x1c9   :  { %2153 = vrot.lane.b32.xlu1 %v2052_v18, %s7233_s22 }
 0x1ca   :  { %v9018_v3 = vpop.permute.xlu0 %1936 }
 0x1cb   :  { %13925 = vst [vmem:[#allocation253_spill] sm:$0xff] %v9018_v3  ;;  %v9024_v10 = vpop.permute.xlu1 %1938 }
 0x1cc   :  { %2155 = vrot.lane.b32.xlu0 %v2054_v7, %s7233_s22  ;;  %13926 = vst [vmem:[#allocation254_spill] sm:$0xff] %v9024_v10 }
 0x1cd   :  { %2157 = vrot.lane.b32.xlu1 %v2056_v26, %s7233_s22 }
 0x1ce   :  { %v9028_v44 = vpop.permute.xlu0 %1940 }
 0x1cf   :  { %13927 = vst [vmem:[#allocation255_spill] sm:$0xff] %v9028_v44  ;;  %v9034_v18 = vpop.permute.xlu1 %1942 }
 0x1d0   :  { %2159 = vrot.lane.b32.xlu0 %v2058_v1, %s7233_s22  ;;  %13928 = vst [vmem:[#allocation256_spill] sm:$0xff] %v9034_v18 }
 0x1d1   :  { %2161 = vrot.lane.b32.xlu1 %v2060_v27, %s7233_s22 }
 0x1d2   :  { %v9038_v7 = vpop.permute.xlu0 %1944 }
 0x1d3   :  { %13929 = vst [vmem:[#allocation257_spill] sm:$0xff] %v9038_v7  ;;  %v9044_v26 = vpop.permute.xlu1 %1946 }
 0x1d4   :  { %2163 = vrot.lane.b32.xlu0 %v2062_v17, %s7233_s22  ;;  %13930 = vst [vmem:[#allocation258_spill] sm:$0xff] %v9044_v26 }
 0x1d5   :  { %2165 = vrot.lane.b32.xlu1 %v2064_v4, %s7233_s22 }
 0x1d6   :  { %v9048_v1 = vpop.permute.xlu0 %1948 }
 0x1d7   :  { %13931 = vst [vmem:[#allocation259_spill] sm:$0xff] %v9048_v1  ;;  %v9054_v27 = vpop.permute.xlu1 %1950 }
 0x1d8   :  { %2167 = vrot.lane.b32.xlu0 %v2066_v62, %s7233_s22  ;;  %13932 = vst [vmem:[#allocation260_spill] sm:$0xff] %v9054_v27 }
 0x1d9   :  { %2169 = vrot.lane.b32.xlu1 %v2068_v32, %s7233_s22 }
 0x1da   :  { %v9058_v17 = vpop.permute.xlu0 %1952 }
 0x1db   :  { %13933 = vst [vmem:[#allocation261_spill] sm:$0xff] %v9058_v17  ;;  %v9064_v4 = vpop.permute.xlu1 %1954 }
 0x1dc   :  { %2171 = vrot.lane.b32.xlu0 %v2070_v35, %s7233_s22  ;;  %13934 = vst [vmem:[#allocation262_spill] sm:$0xff] %v9064_v4 }
 0x1dd   :  { %2173 = vrot.lane.b32.xlu1 %v2072_v16, %s7233_s22 }
 0x1de   :  { %v9068_v62 = vpop.permute.xlu0 %1956 }
 0x1df   :  { %13935 = vst [vmem:[#allocation263_spill] sm:$0xff] %v9068_v62  ;;  %v9074_v32 = vpop.permute.xlu1 %1958 }
 0x1e0   :  { %2175 = vrot.lane.b32.xlu0 %v2074_v5, %s7233_s22  ;;  %13936 = vst [vmem:[#allocation264_spill] sm:$0xff] %v9074_v32 }
 0x1e1   :  { %2177 = vrot.lane.b32.xlu1 %v2076_v48, %s7233_s22  ;;  %v9095_v48 = vld [vmem:[#allocation2 + $0x120] sm:$0xff] }
 0x1e2   :  { %v9078_v35 = vpop.permute.xlu0 %1960  ;;  %v2087_v38 = vrot.slane %v9095_v48, 6 }
 0x1e3   :  { %13937 = vst [vmem:[#allocation265_spill] sm:$0xff] %v9078_v35  ;;  %v9084_v16 = vpop.permute.xlu1 %1962 }
 0x1e4   :  { %2179 = vrot.lane.b32.xlu0 %v2078_v57, %s7233_s22  ;;  %13938 = vst [vmem:[#allocation266_spill] sm:$0xff] %v9084_v16  ;;  %v9101_v57 = vld [vmem:[#allocation2 + $0x128] sm:$0xff]  ;;  %v2088_v28 = vsel %vm13568_vm5, %v2085_v60, %v2087_v38 }
 0x1e5   :  { %2181 = vrot.lane.b32.xlu1 %v2080_v13, %s7233_s22  ;;  %v2089_v0 = vrot.slane %v9101_v57, 6  ;;  %v9109_v13 = vld [vmem:[#allocation2 + $0x130] sm:$0xff] }
 0x1e6   :  { %v9090_v5 = vpop.permute.xlu0 %1964 }
 0x1e7   :  { %13939 = vst [vmem:[#allocation267_spill] sm:$0xff] %v9090_v5  ;;  %v9098_v59 = vpop.permute.xlu1 %1966  ;;  %v2090_v33 = vsel %vm13568_vm5, %v2087_v38, %v2089_v0 }
 0x1e8   :  { %2183 = vrot.lane.b32.xlu0 %v2082_v15, %s7233_s22  ;;  %13940 = vst [vmem:[#allocation268_spill] sm:$0xff] %v9098_v59  ;;  %v2091_v15 = vrot.slane %v9109_v13, 6  ;;  %v9115_v59 = vld [vmem:[#allocation2 + $0x138] sm:$0xff] }
 0x1e9   :  { %2185 = vrot.lane.b32.xlu1 %v2084_v53, %s7233_s22  ;;  %v2093_v35 = vrot.slane %v9115_v59, 6  ;;  %v9123_v53 = vld [vmem:[#allocation2 + $0x140] sm:$0xff] }
 0x1ea   :  { %v9104_v16 = vpop.permute.xlu0 %1968  ;;  %v2092_v60 = vsel %vm13568_vm5, %v2089_v0, %v2091_v15 }
 0x1eb   :  { %13941 = vst [vmem:[#allocation269_spill] sm:$0xff] %v9104_v16  ;;  %v9112_v5 = vpop.permute.xlu1 %1970  ;;  %v2094_v38 = vsel %vm13568_vm5, %v2091_v15, %v2093_v35 }
 0x1ec   :  { %2187 = vrot.lane.b32.xlu0 %v2086_v49, %s7233_s22  ;;  %13942 = vst [vmem:[#allocation270_spill] sm:$0xff] %v9112_v5  ;;  %v2095_v49 = vrot.slane %v9123_v53, 6  ;;  %v9129_v5 = vld [vmem:[#allocation2 + $0x148] sm:$0xff] }
 0x1ed   :  { %2189 = vrot.lane.b32.xlu1 %v2088_v28, %s7233_s22  ;;  %v2097_v62 = vrot.slane %v9129_v5, 6  ;;  %v9137_v28 = vld [vmem:[#allocation2 + $0x150] sm:$0xff] }
 0x1ee   :  { %v9118_v32 = vpop.permute.xlu0 %1972  ;;  %v2096_v0 = vsel %vm13568_vm5, %v2093_v35, %v2095_v49 }
 0x1ef   :  { %13943 = vst [vmem:[#allocation271_spill] sm:$0xff] %v9118_v32  ;;  %v9126_v16 = vpop.permute.xlu1 %1974  ;;  %v2098_v15 = vsel %vm13568_vm5, %v2095_v49, %v2097_v62 }
 0x1f0   :  { %2191 = vrot.lane.b32.xlu0 %v2090_v33, %s7233_s22  ;;  %13944 = vst [vmem:[#allocation272_spill] sm:$0xff] %v9126_v16  ;;  %v2099_v33 = vrot.slane %v9137_v28, 6  ;;  %v9143_v16 = vld [vmem:[#allocation2 + $0x158] sm:$0xff] }
 0x1f1   :  { %2193 = vrot.lane.b32.xlu1 %v2092_v60, %s7233_s22  ;;  %v2101_v17 = vrot.slane %v9143_v16, 6  ;;  %v9151_v60 = vld [vmem:[#allocation2 + $0x160] sm:$0xff] }
 0x1f2   :  { %v9132_v4 = vpop.permute.xlu0 %1976  ;;  %v2100_v35 = vsel %vm13568_vm5, %v2097_v62, %v2099_v33 }
 0x1f3   :  { %13945 = vst [vmem:[#allocation273_spill] sm:$0xff] %v9132_v4  ;;  %v9140_v32 = vpop.permute.xlu1 %1978  ;;  %v2102_v49 = vsel %vm13568_vm5, %v2099_v33, %v2101_v17 }
 0x1f4   :  { %2195 = vrot.lane.b32.xlu0 %v2094_v38, %s7233_s22  ;;  %13946 = vst [vmem:[#allocation274_spill] sm:$0xff] %v9140_v32  ;;  %v2103_v38 = vrot.slane %v9151_v60, 6  ;;  %v9157_v32 = vld [vmem:[#allocation2 + $0x168] sm:$0xff] }
 0x1f5   :  { %2197 = vrot.lane.b32.xlu1 %v2096_v0, %s7233_s22  ;;  %v2105_v1 = vrot.slane %v9157_v32, 6  ;;  %v9165_v0 = vld [vmem:[#allocation2 + $0x170] sm:$0xff] }
 0x1f6   :  { %v9146_v27 = vpop.permute.xlu0 %1980  ;;  %v2104_v62 = vsel %vm13568_vm5, %v2101_v17, %v2103_v38 }
 0x1f7   :  { %13947 = vst [vmem:[#allocation275_spill] sm:$0xff] %v9146_v27  ;;  %v9154_v4 = vpop.permute.xlu1 %1982  ;;  %v2106_v33 = vsel %vm13568_vm5, %v2103_v38, %v2105_v1 }
 0x1f8   :  { %2199 = vrot.lane.b32.xlu0 %v2098_v15, %s7233_s22  ;;  %13948 = vst [vmem:[#allocation276_spill] sm:$0xff] %v9154_v4  ;;  %v2107_v15 = vrot.slane %v9165_v0, 6  ;;  %v9171_v4 = vld [vmem:[#allocation2 + $0x178] sm:$0xff] }
 0x1f9   :  { %2201 = vrot.lane.b32.xlu1 %v2100_v35, %s7233_s22  ;;  %v2109_v7 = vrot.slane %v9171_v4, 6  ;;  %v9179_v35 = vld [vmem:[#allocation2 + $0x180] sm:$0xff] }
 0x1fa   :  { %v9160_v26 = vpop.permute.xlu0 %1984  ;;  %v2108_v17 = vsel %vm13568_vm5, %v2105_v1, %v2107_v15 }
 0x1fb   :  { %13949 = vst [vmem:[#allocation277_spill] sm:$0xff] %v9160_v26  ;;  %v9168_v27 = vpop.permute.xlu1 %1986  ;;  %v2110_v38 = vsel %vm13568_vm5, %v2107_v15, %v2109_v7 }
 0x1fc   :  { %2203 = vrot.lane.b32.xlu0 %v2102_v49, %s7233_s22  ;;  %13950 = vst [vmem:[#allocation278_spill] sm:$0xff] %v9168_v27  ;;  %v2111_v49 = vrot.slane %v9179_v35, 6  ;;  %v9185_v27 = vld [vmem:[#allocation2 + $0x188] sm:$0xff] }
 0x1fd   :  { %2205 = vrot.lane.b32.xlu1 %v2104_v62, %s7233_s22  ;;  %v2113_v44 = vrot.slane %v9185_v27, 6  ;;  %v9193_v62 = vld [vmem:[#allocation2 + $0x190] sm:$0xff] }
 0x1fe   :  { %v9174_v18 = vpop.permute.xlu0 %1988  ;;  %v2112_v1 = vsel %vm13568_vm5, %v2109_v7, %v2111_v49  ;;  %v2225_v7 = vrot.slane %v8912_v55, 2 }
 0x1ff   :  { %13951 = vst [vmem:[#allocation279_spill] sm:$0xff] %v9174_v18  ;;  %v9182_v26 = vpop.permute.xlu1 %1990  ;;  %v733_v18 = vld [vmem:[#allocation2 + $0x198] sm:$0x1]  ;;  %v2114_v15 = vsel %vm13568_vm5, %v2111_v49, %v2113_v44  ;;  %v2227_v49 = vrot.slane %v8917_v43, 2 }
 0x200   :  { %2207 = vrot.lane.b32.xlu0 %v2106_v33, %s7233_s22  ;;  %13952 = vst [vmem:[#allocation280_spill] sm:$0xff] %v9182_v26  ;;  %v2115_v33 = vrot.slane %v9193_v62, 6  ;;  %v2117_v3 = vrot.slane %v733_v18, 6 }
 0x201   :  { %2209 = vrot.lane.b32.xlu1 %v2108_v17, %s7233_s22  ;;  %v2228_v55 = vsel %vm2223_vm6, %v2225_v7, %v2227_v49 }
 0x202   :  { %v9188_v10 = vpop.permute.xlu0 %1992  ;;  %v2116_v17 = vsel %vm13568_vm5, %v2113_v44, %v2115_v33  ;;  %v2118_v46 = vsel %vm13568_vm5, %v2115_v33, %v2117_v3  ;;  %v2229_v44 = vrot.slane %v8925_v50, 2  ;;  %vm3670_vm5 = vcmask 261120  }
 0x203   :  { %13953 = vst [vmem:[#allocation281_spill] sm:$0xff] %v9188_v10  ;;  %v9196_v26 = vpop.permute.xlu1 %1994 }
 0x204   :  { %2211 = vrot.lane.b32.xlu0 %v2110_v38, %s7233_s22  ;;  %13954 = vst [vmem:[#allocation282_spill] sm:$0xff] %v9196_v26  ;;  %v2224_v38 = vrot.slane %v734_v54, 2  ;;  %v2230_v43 = vsel %vm2223_vm6, %v2227_v49, %v2229_v44  ;;  %v7103_v49 = vld [vmem:[#allocation2 + $0x48] sm:$0xff]  ;;  %v9961_v26 = vld [vmem:[#allocation2 + $0xd0] sm:$0xff] }
 0x205   :  { %2213 = vrot.lane.b32.xlu1 %v2112_v1, %s7233_s22 }
 0x206   :  { %v9199_v42 = vpop.permute.xlu0 %1996  ;;  %v2226_v1 = vsel %vm2223_vm6, %v2224_v38, %v2225_v7  ;;  %v7102_v7 = vld [vmem:[#allocation2 + $0x40] sm:$0xff] }
 0x207   :  { %13955 = vst [vmem:[#allocation283_spill] sm:$0xff] %v9199_v42  ;;  %v9205_v10 = vpop.permute.xlu1 %1998  ;;  %v14177_v42 = vld [vmem:[#allocation127_spill] sm:$0xff] }
 0x208   :  { %2215 = vrot.lane.b32.xlu0 %v2114_v15, %s7233_s22  ;;  %13956 = vst [vmem:[#allocation284_spill] sm:$0xff] %v9205_v10  ;;  %v2231_v15 = vrot.slane %v8931_v20, 2  ;;  %v9953_v10 = vld [vmem:[#allocation2 + $0xc8] sm:$0xff] }
 0x209   :  { %2217 = vrot.lane.b32.xlu1 %v2116_v17, %s7233_s22  ;;  %v2235_v17 = vrot.slane %v8945_v45, 2 }
 0x20a   :  { %v9209_v18 = vpop.permute.xlu0 %2000  ;;  %v2232_v50 = vsel %vm2223_vm6, %v2229_v44, %v2231_v15  ;;  %v7104_v44 = vld [vmem:[#allocation2 + $0x50] sm:$0xff] }
 0x20b   :  { %13957 = vst [vmem:[#allocation285_spill] sm:$0xff] %v9209_v18  ;;  %v9215_v54 = vpop.permute.xlu1 %2002  ;;  %v9946_v18 = vld [vmem:[#allocation2 + $0xc0] sm:$0xff] }
 0x20c   :  { %2219 = vrot.lane.b32.xlu0 %v2118_v46, %s7233_s22  ;;  %13958 = vst [vmem:[#allocation286_spill] sm:$0xff] %v9215_v54  ;;  %v2233_v46 = vrot.slane %v8939_v24, 2 }
 0x20d   :  { %2325 = vrot.lane.b32.xlu1 %v2226_v1, %s7234_s3  ;;  %v2237_v1 = vrot.slane %v7102_v7, 2  ;;  %v7105_v7 = vld [vmem:[#allocation2 + $0x58] sm:$0xff] }
 0x20e   :  { %v9219_v3 = vpop.permute.xlu0 %2004  ;;  %v2234_v20 = vsel %vm2223_vm6, %v2231_v15, %v2233_v46  ;;  %v2236_v24 = vsel %vm2223_vm6, %v2233_v46, %v2235_v17 }
 0x20f   :  { %13959 = vst [vmem:[#allocation287_spill] sm:$0xff] %v9219_v3  ;;  %v9225_v33 = vpop.permute.xlu1 %2006  ;;  %v2238_v45 = vsel %vm2223_vm6, %v2235_v17, %v2237_v1 }
 0x210   :  { %2327 = vrot.lane.b32.xlu0 %v2228_v55, %s7234_s3  ;;  %13960 = vst [vmem:[#allocation288_spill] sm:$0xff] %v9225_v33  ;;  %v2239_v33 = vrot.slane %v7103_v49, 2 }
 0x211   :  { %2329 = vrot.lane.b32.xlu1 %v2230_v43, %s7234_s3  ;;  %v2241_v43 = vrot.slane %v7104_v44, 2  ;;  %v7107_v44 = vld [vmem:[#allocation2 + $0x68] sm:$0xff] }
 0x212   :  { %v9229_v38 = vpop.permute.xlu0 %2008  ;;  %v2240_v15 = vsel %vm2223_vm6, %v2237_v1, %v2239_v33 }
 0x213   :  { %13961 = vst [vmem:[#allocation289_spill] sm:$0xff] %v9229_v38  ;;  %v9234_v55 = vpop.permute.xlu1 %2010  ;;  %v2242_v46 = vsel %vm2223_vm6, %v2239_v33, %v2241_v43 }
 0x214   :  { %2331 = vrot.lane.b32.xlu0 %v2232_v50, %s7234_s3  ;;  %13962 = vst [vmem:[#allocation290_spill] sm:$0xff] %v9234_v55  ;;  %v2243_v55 = vrot.slane %v7105_v7, 2 }
 0x215   :  { %2333 = vrot.lane.b32.xlu1 %v2234_v20, %s7234_s3  ;;  %v7106_v20 = vld [vmem:[#allocation2 + $0x60] sm:$0xff] }
 0x216   :  { %v9237_v3 = vpop.permute.xlu0 %2012  ;;  %v2244_v17 = vsel %vm2223_vm6, %v2241_v43, %v2243_v55 }
 0x217   :  { %13963 = vst [vmem:[#allocation291_spill] sm:$0xff] %v9237_v3  ;;  %v9242_v50 = vpop.permute.xlu1 %2014 }
 0x218   :  { %2335 = vrot.lane.b32.xlu0 %v2236_v24, %s7234_s3  ;;  %13964 = vst [vmem:[#allocation292_spill] sm:$0xff] %v9242_v50  ;;  %v2245_v24 = vrot.slane %v7106_v20, 2  ;;  %v2247_v50 = vrot.slane %v7107_v44, 2  ;;  %v7109_v20 = vld [vmem:[#allocation2 + $0x78] sm:$0xff] }
 0x219   :  { %2337 = vrot.lane.b32.xlu1 %v2238_v45, %s7234_s3  ;;  %v7108_v45 = vld [vmem:[#allocation2 + $0x70] sm:$0xff] }
 0x21a   :  { %v9245_v38 = vpop.permute.xlu0 %2119  ;;  %v2246_v1 = vsel %vm2223_vm6, %v2243_v55, %v2245_v24  ;;  %v2248_v33 = vsel %vm2223_vm6, %v2245_v24, %v2247_v50 }
 0x21b   :  { %13965 = vst [vmem:[#allocation293_spill] sm:$0xff] %v9245_v38  ;;  %v9250_v49 = vpop.permute.xlu1 %2121 }
 0x21c   :  { %2339 = vrot.lane.b32.xlu0 %v2240_v15, %s7234_s3  ;;  %13966 = vst [vmem:[#allocation294_spill] sm:$0xff] %v9250_v49  ;;  %v2249_v15 = vrot.slane %v7108_v45, 2  ;;  %v2251_v49 = vrot.slane %v7109_v20, 2  ;;  %v7111_v45 = vld [vmem:[#allocation2 + $0x88] sm:$0xff] }
 0x21d   :  { %2341 = vrot.lane.b32.xlu1 %v2242_v46, %s7234_s3  ;;  %v7110_v46 = vld [vmem:[#allocation2 + $0x80] sm:$0xff] }
 0x21e   :  { %v9253_v3 = vpop.permute.xlu0 %2123  ;;  %v2250_v43 = vsel %vm2223_vm6, %v2247_v50, %v2249_v15  ;;  %v2252_v55 = vsel %vm2223_vm6, %v2249_v15, %v2251_v49 }
 0x21f   :  { %13967 = vst [vmem:[#allocation295_spill] sm:$0xff] %v9253_v3  ;;  %v9258_v7 = vpop.permute.xlu1 %2125 }
 0x220   :  { %2343 = vrot.lane.b32.xlu0 %v2244_v17, %s7234_s3  ;;  %13968 = vst [vmem:[#allocation296_spill] sm:$0xff] %v9258_v7  ;;  %v2253_v17 = vrot.slane %v7110_v46, 2  ;;  %v2255_v7 = vrot.slane %v7111_v45, 2  ;;  %v7113_v46 = vld [vmem:[#allocation2 + $0x98] sm:$0xff] }
 0x221   :  { %2345 = vrot.lane.b32.xlu1 %v2246_v1, %s7234_s3  ;;  %v7112_v1 = vld [vmem:[#allocation2 + $0x90] sm:$0xff] }
 0x222   :  { %v9261_v38 = vpop.permute.xlu0 %2127  ;;  %v2254_v24 = vsel %vm2223_vm6, %v2251_v49, %v2253_v17  ;;  %v2256_v50 = vsel %vm2223_vm6, %v2253_v17, %v2255_v7 }
 0x223   :  { %13969 = vst [vmem:[#allocation297_spill] sm:$0xff] %v9261_v38  ;;  %v9266_v44 = vpop.permute.xlu1 %2129 }
 0x224   :  { %2347 = vrot.lane.b32.xlu0 %v2248_v33, %s7234_s3  ;;  %13970 = vst [vmem:[#allocation298_spill] sm:$0xff] %v9266_v44  ;;  %v2257_v33 = vrot.slane %v7112_v1, 2  ;;  %v2259_v44 = vrot.slane %v7113_v46, 2  ;;  %v7115_v1 = vld [vmem:[#allocation2 + $0xa8] sm:$0xff] }
 0x225   :  { %2349 = vrot.lane.b32.xlu1 %v2250_v43, %s7234_s3  ;;  %v7114_v43 = vld [vmem:[#allocation2 + $0xa0] sm:$0xff] }
 0x226   :  { %v9269_v3 = vpop.permute.xlu0 %2131  ;;  %v2258_v15 = vsel %vm2223_vm6, %v2255_v7, %v2257_v33  ;;  %v2260_v49 = vsel %vm2223_vm6, %v2257_v33, %v2259_v44 }
 0x227   :  { %13971 = vst [vmem:[#allocation299_spill] sm:$0xff] %v9269_v3  ;;  %v9274_v20 = vpop.permute.xlu1 %2133 }
 0x228   :  { %2351 = vrot.lane.b32.xlu0 %v2252_v55, %s7234_s3  ;;  %13972 = vst [vmem:[#allocation300_spill] sm:$0xff] %v9274_v20  ;;  %v2261_v55 = vrot.slane %v7114_v43, 2  ;;  %v2263_v20 = vrot.slane %v7115_v1, 2  ;;  %v7117_v43 = vld [vmem:[#allocation2 + $0xb8] sm:$0xff] }
 0x229   :  { %2353 = vrot.lane.b32.xlu1 %v2254_v24, %s7234_s3  ;;  %v7116_v24 = vld [vmem:[#allocation2 + $0xb0] sm:$0xff] }
 0x22a   :  { %v9277_v38 = vpop.permute.xlu0 %2135  ;;  %v2262_v17 = vsel %vm2223_vm6, %v2259_v44, %v2261_v55  ;;  %v2264_v7 = vsel %vm2223_vm6, %v2261_v55, %v2263_v20 }
 0x22b   :  { %13973 = vst [vmem:[#allocation301_spill] sm:$0xff] %v9277_v38  ;;  %v9282_v45 = vpop.permute.xlu1 %2137 }
 0x22c   :  { %2355 = vrot.lane.b32.xlu0 %v2256_v50, %s7234_s3  ;;  %13974 = vst [vmem:[#allocation302_spill] sm:$0xff] %v9282_v45  ;;  %v2265_v50 = vrot.slane %v7116_v24, 2  ;;  %v2267_v45 = vrot.slane %v7117_v43, 2  ;;  %v7119_v24 = vld [vmem:[#allocation2 + $0xc8] sm:$0xff] }
 0x22d   :  { %2357 = vrot.lane.b32.xlu1 %v2258_v15, %s7234_s3  ;;  %v7118_v15 = vld [vmem:[#allocation2 + $0xc0] sm:$0xff] }
 0x22e   :  { %v9285_v3 = vpop.permute.xlu0 %2139  ;;  %v2266_v33 = vsel %vm2223_vm6, %v2263_v20, %v2265_v50  ;;  %v2268_v44 = vsel %vm2223_vm6, %v2265_v50, %v2267_v45 }
 0x22f   :  { %13975 = vst [vmem:[#allocation303_spill] sm:$0xff] %v9285_v3  ;;  %v9290_v46 = vpop.permute.xlu1 %2141 }
 0x230   :  { %2359 = vrot.lane.b32.xlu0 %v2260_v49, %s7234_s3  ;;  %13976 = vst [vmem:[#allocation304_spill] sm:$0xff] %v9290_v46  ;;  %v2269_v49 = vrot.slane %v7118_v15, 2  ;;  %v2271_v46 = vrot.slane %v7119_v24, 2  ;;  %v7121_v15 = vld [vmem:[#allocation2 + $0xd8] sm:$0xff] }
 0x231   :  { %2361 = vrot.lane.b32.xlu1 %v2262_v17, %s7234_s3  ;;  %v7120_v17 = vld [vmem:[#allocation2 + $0xd0] sm:$0xff] }
 0x232   :  { %v9293_v38 = vpop.permute.xlu0 %2143  ;;  %v2270_v55 = vsel %vm2223_vm6, %v2267_v45, %v2269_v49  ;;  %v2272_v20 = vsel %vm2223_vm6, %v2269_v49, %v2271_v46 }
 0x233   :  { %13977 = vst [vmem:[#allocation305_spill] sm:$0xff] %v9293_v38  ;;  %v9298_v1 = vpop.permute.xlu1 %2145 }
 0x234   :  { %2363 = vrot.lane.b32.xlu0 %v2264_v7, %s7234_s3  ;;  %13978 = vst [vmem:[#allocation306_spill] sm:$0xff] %v9298_v1  ;;  %v2273_v7 = vrot.slane %v7120_v17, 2  ;;  %v2275_v1 = vrot.slane %v7121_v15, 2  ;;  %v7123_v17 = vld [vmem:[#allocation2 + $0xe8] sm:$0xff] }
 0x235   :  { %2365 = vrot.lane.b32.xlu1 %v2266_v33, %s7234_s3  ;;  %v7122_v33 = vld [vmem:[#allocation2 + $0xe0] sm:$0xff] }
 0x236   :  { %v9301_v3 = vpop.permute.xlu0 %2147  ;;  %v2274_v50 = vsel %vm2223_vm6, %v2271_v46, %v2273_v7  ;;  %v2276_v45 = vsel %vm2223_vm6, %v2273_v7, %v2275_v1 }
 0x237   :  { %13979 = vst [vmem:[#allocation307_spill] sm:$0xff] %v9301_v3  ;;  %v9306_v43 = vpop.permute.xlu1 %2149 }
 0x238   :  { %2367 = vrot.lane.b32.xlu0 %v2268_v44, %s7234_s3  ;;  %13980 = vst [vmem:[#allocation308_spill] sm:$0xff] %v9306_v43  ;;  %v2277_v44 = vrot.slane %v7122_v33, 2  ;;  %v2279_v43 = vrot.slane %v7123_v17, 2  ;;  %v7125_v33 = vld [vmem:[#allocation2 + $0xf8] sm:$0xff] }
 0x239   :  { %2369 = vrot.lane.b32.xlu1 %v2270_v55, %s7234_s3  ;;  %v7124_v55 = vld [vmem:[#allocation2 + $0xf0] sm:$0xff] }
 0x23a   :  { %v9309_v38 = vpop.permute.xlu0 %2151  ;;  %v2278_v49 = vsel %vm2223_vm6, %v2275_v1, %v2277_v44  ;;  %v2280_v46 = vsel %vm2223_vm6, %v2277_v44, %v2279_v43 }
 0x23b   :  { %13981 = vst [vmem:[#allocation309_spill] sm:$0xff] %v9309_v38  ;;  %v9314_v24 = vpop.permute.xlu1 %2153 }
 0x23c   :  { %2371 = vrot.lane.b32.xlu0 %v2272_v20, %s7234_s3  ;;  %13982 = vst [vmem:[#allocation310_spill] sm:$0xff] %v9314_v24  ;;  %v2281_v20 = vrot.slane %v7124_v55, 2  ;;  %v2283_v24 = vrot.slane %v7125_v33, 2  ;;  %v9336_v55 = vld [vmem:[#allocation2 + $0x108] sm:$0xff] }
 0x23d   :  { %2373 = vrot.lane.b32.xlu1 %v2274_v50, %s7234_s3  ;;  %v9330_v50 = vld [vmem:[#allocation2 + $0x100] sm:$0xff]  ;;  %v2287_v44 = vrot.slane %v9336_v55, 2 }
 0x23e   :  { %v9317_v3 = vpop.permute.xlu0 %2155  ;;  %v2282_v7 = vsel %vm2223_vm6, %v2279_v43, %v2281_v20  ;;  %v2285_v1 = vrot.slane %v9330_v50, 2  ;;  %v2284_v17 = vsel %vm2223_vm6, %v2281_v20, %v2283_v24 }
 0x23f   :  { %13983 = vst [vmem:[#allocation311_spill] sm:$0xff] %v9317_v3  ;;  %v9322_v15 = vpop.permute.xlu1 %2157 }
 0x240   :  { %2375 = vrot.lane.b32.xlu0 %v2276_v45, %s7234_s3  ;;  %13984 = vst [vmem:[#allocation312_spill] sm:$0xff] %v9322_v15  ;;  %v2286_v43 = vsel %vm2223_vm6, %v2283_v24, %v2285_v1  ;;  %v2288_v20 = vsel %vm2223_vm6, %v2285_v1, %v2287_v44  ;;  %v2293_v24 = vrot.slane %v9095_v48, 2  ;;  %v2297_v1 = vrot.slane %v9109_v13, 2 }
 0x241   :  { %2377 = vrot.lane.b32.xlu1 %v2278_v49, %s7234_s3  ;;  %v9344_v49 = vld [vmem:[#allocation2 + $0x110] sm:$0xff] }
 0x242   :  { %v9325_v38 = vpop.permute.xlu0 %2159 }
 0x243   :  { %13985 = vst [vmem:[#allocation313_spill] sm:$0xff] %v9325_v38  ;;  %v9333_v45 = vpop.permute.xlu1 %2161 }
 0x244   :  { %2379 = vrot.lane.b32.xlu0 %v2280_v46, %s7234_s3  ;;  %13986 = vst [vmem:[#allocation314_spill] sm:$0xff] %v9333_v45  ;;  %v2289_v46 = vrot.slane %v9344_v49, 2  ;;  %v2291_v45 = vrot.slane %v9087_v41, 2 }
 0x245   :  { %2381 = vrot.lane.b32.xlu1 %v2282_v7, %s7234_s3 }
 0x246   :  { %v9339_v33 = vpop.permute.xlu0 %2163  ;;  %v2290_v7 = vsel %vm2223_vm6, %v2287_v44, %v2289_v46  ;;  %v2294_v41 = vsel %vm2223_vm6, %v2291_v45, %v2293_v24  ;;  %v2299_v44 = vrot.slane %v9115_v59, 2 }
 0x247   :  { %13987 = vst [vmem:[#allocation315_spill] sm:$0xff] %v9339_v33  ;;  %v9347_v38 = vpop.permute.xlu1 %2165  ;;  %v2292_v33 = vsel %vm2223_vm6, %v2289_v46, %v2291_v45  ;;  %v2303_v45 = vrot.slane %v9129_v5, 2 }
 0x248   :  { %2383 = vrot.lane.b32.xlu0 %v2284_v17, %s7234_s3  ;;  %13988 = vst [vmem:[#allocation316_spill] sm:$0xff] %v9347_v38  ;;  %v2295_v38 = vrot.slane %v9101_v57, 2  ;;  %v2300_v13 = vsel %vm2223_vm6, %v2297_v1, %v2299_v44 }
 0x249   :  { %2385 = vrot.lane.b32.xlu1 %v2286_v43, %s7234_s3 }
 0x24a   :  { %v9351_v15 = vpop.permute.xlu0 %2167  ;;  %v2296_v48 = vsel %vm2223_vm6, %v2293_v24, %v2295_v38  ;;  %v2298_v57 = vsel %vm2223_vm6, %v2295_v38, %v2297_v1  ;;  %v2305_v24 = vrot.slane %v9137_v28, 2  ;;  %v2307_v38 = vrot.slane %v9143_v16, 2 }
 0x24b   :  { %13989 = vst [vmem:[#allocation317_spill] sm:$0xff] %v9351_v15  ;;  %v9357_v17 = vpop.permute.xlu1 %2169  ;;  %v2309_v1 = vrot.slane %v9151_v60, 2  ;;  %v9939_v15 = vld [vmem:[#allocation2 + $0xb8] sm:$0xff] }
 0x24c   :  { %2387 = vrot.lane.b32.xlu0 %v2288_v20, %s7234_s3  ;;  %13990 = vst [vmem:[#allocation318_spill] sm:$0xff] %v9357_v17  ;;  %v2306_v5 = vsel %vm2223_vm6, %v2303_v45, %v2305_v24  ;;  %v2308_v28 = vsel %vm2223_vm6, %v2305_v24, %v2307_v38  ;;  %v9413_v24 = vld [vmem:[#allocation2 + $0x8] sm:$0xe0] }
 0x24d   :  { %2389 = vrot.lane.b32.xlu1 %v2290_v7, %s7234_s3  ;;  %v2310_v16 = vsel %vm2223_vm6, %v2307_v38, %v2309_v1  ;;  %v2317_v38 = vrot.slane %v9179_v35, 2 }
 0x24e   :  { %v9361_v3 = vpop.permute.xlu0 %2171 }
 0x24f   :  { %13991 = vst [vmem:[#allocation319_spill] sm:$0xff] %v9361_v3  ;;  %v9367_v43 = vpop.permute.xlu1 %2173  ;;  %v9932_v3 = vld [vmem:[#allocation2 + $0xb0] sm:$0xff] }
 0x250   :  { %2391 = vrot.lane.b32.xlu0 %v2292_v33, %s7234_s3  ;;  %13992 = vst [vmem:[#allocation320_spill] sm:$0xff] %v9367_v43  ;;  %v2301_v33 = vrot.slane %v9123_v53, 2 }
 0x251   :  { %2393 = vrot.lane.b32.xlu1 %v2294_v41, %s7234_s3 }
 0x252   :  { %v9371_v20 = vpop.permute.xlu0 %2175  ;;  %v2302_v59 = vsel %vm2223_vm6, %v2299_v44, %v2301_v33  ;;  %v2304_v53 = vsel %vm2223_vm6, %v2301_v33, %v2303_v45  ;;  %v2311_v44 = vrot.slane %v9157_v32, 2  ;;  %v2313_v33 = vrot.slane %v9165_v0, 2 }
 0x253   :  { %13993 = vst [vmem:[#allocation321_spill] sm:$0xff] %v9371_v20  ;;  %v9377_v46 = vpop.permute.xlu1 %2177  ;;  %v2315_v45 = vrot.slane %v9171_v4, 2  ;;  %v2319_v0 = vrot.slane %v9185_v27, 2  ;;  %v2429_v4 = vshrl.u32 %v9413_v24, 16  ;;  %v14168_v20 = vld [vmem:[#allocation123_spill] sm:$0xff] }
 0x254   :  { %2395 = vrot.lane.b32.xlu0 %v2296_v48, %s7234_s3  ;;  %13994 = vst [vmem:[#allocation322_spill] sm:$0xff] %v9377_v46  ;;  %v2312_v60 = vsel %vm2223_vm6, %v2309_v1, %v2311_v44  ;;  %v2314_v32 = vsel %vm2223_vm6, %v2311_v44, %v2313_v33  ;;  %v2321_v44 = vrot.slane %v9193_v62, 2  ;;  %v9916_v46 = vld [vmem:[#allocation2 + $0xa0] sm:$0xff] }
 0x255   :  { %2397 = vrot.lane.b32.xlu1 %v2298_v57, %s7234_s3  ;;  %v2316_v1 = vsel %vm2223_vm6, %v2313_v33, %v2315_v45  ;;  %v2318_v35 = vsel %vm2223_vm6, %v2315_v45, %v2317_v38  ;;  %v2320_v27 = vsel %vm2223_vm6, %v2317_v38, %v2319_v0  ;;  %v2441_v38 = vrot.slane %v13760_v39, 3 }
 0x256   :  { %v9381_v7 = vpop.permute.xlu0 %2179  ;;  %v2322_v45 = vsel %vm2223_vm6, %v2319_v0, %v2321_v44  ;;  %v2449_v39 = vrot.slane %v13766_v61, 3  ;;  %v2456_v61 = vrot.slane %v13771_v2, 2 }
 0x257   :  { %13995 = vst [vmem:[#allocation323_spill] sm:$0xff] %v9381_v7  ;;  %v9387_v41 = vpop.permute.xlu1 %2181  ;;  %v14166_v7 = vld [vmem:[#allocation121_spill] sm:$0xff] }
 0x258   :  { %2399 = vrot.lane.b32.xlu0 %v2300_v13, %s7234_s3  ;;  %13996 = vst [vmem:[#allocation324_spill] sm:$0xff] %v9387_v41  ;;  %v9909_v41 = vld [vmem:[#allocation2 + $0x98] sm:$0xff] }
 0x259   :  { %2401 = vrot.lane.b32.xlu1 %v2302_v59, %s7234_s3 }
 0x25a   :  { %v9391_v48 = vpop.permute.xlu0 %2183 }
 0x25b   :  { %13997 = vst [vmem:[#allocation325_spill] sm:$0xff] %v9391_v48  ;;  %v9397_v57 = vpop.permute.xlu1 %2185  ;;  %v14165_v48 = vld [vmem:[#allocation120_spill] sm:$0xff] }
 0x25c   :  { %2403 = vrot.lane.b32.xlu0 %v2304_v53, %s7234_s3  ;;  %13998 = vst [vmem:[#allocation326_spill] sm:$0xff] %v9397_v57 }
 0x25d   :  { %2405 = vrot.lane.b32.xlu1 %v2306_v5, %s7234_s3 }
 0x25e   :  { %v9401_v13 = vpop.permute.xlu0 %2187 }
 0x25f   :  { %13999 = vst [vmem:[#allocation327_spill] sm:$0xff] %v9401_v13  ;;  %v9407_v59 = vpop.permute.xlu1 %2189  ;;  %v2436_v13 = vrot.slane %v7330_v22, 2 }
 0x260   :  { %2407 = vrot.lane.b32.xlu0 %v2308_v28, %s7234_s3  ;;  %14000 = vst [vmem:[#allocation328_spill] sm:$0xff] %v9407_v59  ;;  %v9423_v28 = vld [vmem:[#allocation2 + $0x198] sm:$0x1f] }
 0x261   :  { %2409 = vrot.lane.b32.xlu1 %v2310_v16, %s7234_s3  ;;  %v2323_v16 = vrot.slane %v9423_v28, 2 }
 0x262   :  { %v9411_v53 = vpop.permute.xlu0 %2191 }
 0x263   :  { %14001 = vst [vmem:[#allocation329_spill] sm:$0xff] %v9411_v53  ;;  %v9420_v5 = vpop.permute.xlu1 %2193  ;;  %v2432_v53 = vshll.u32 %v9413_v24, 16  ;;  %v2324_v62 = vsel %vm2223_vm6, %v2321_v44, %v2323_v16  ;;  %v2457_v44 = vrot.slane %v13772_v11, 3 }
 0x264   :  { %2411 = vrot.lane.b32.xlu0 %v2312_v60, %s7234_s3  ;;  %14002 = vst [vmem:[#allocation330_spill] sm:$0xff] %v9420_v5  ;;  %v2431_v60 = vrot.slane %v2429_v4, 2  ;;  %v2445_v4 = vrot.slane %v13763_v36, 3  ;;  %v2453_v36 = vrot.slane %v13769_v47, 3  ;;  %v14011_v47 = vld [vmem:[#allocation21_spill] sm:$0xff] }
 0x265   :  { %2413 = vrot.lane.b32.xlu1 %v2314_v32, %s7234_s3  ;;  %v2434_v5 = vrot.slane %v2432_v53, 3  ;;  %v2440_v32 = vrot.slane %v13759_v51, 2  ;;  %v2448_v51 = vrot.slane %v13765_v40, 2  ;;  %v2458_v2 = vor.u32 %v2457_v44, %v2456_v61  ;;  %v14020_v61 = vld [vmem:[#allocation27_spill] sm:$0xff] }
 0x266   :  { %v9427_v59 = vpop.permute.xlu0 %2195  ;;  %v2472_v44 = vrot.slane %v14020_v61, 2 }
 0x267   :  { %14003 = vst [vmem:[#allocation331_spill] sm:$0xff] %v9427_v59  ;;  %v9435_v33 = vpop.permute.xlu1 %2197  ;;  %v2437_v59 = vrot.slane %v7328_v21, 3  ;;  %v2435_v53 = vor.u32 %v2434_v5, %v2431_v60  ;;  %v2444_v21 = vrot.slane %v13762_v34, 2  ;;  %v2442_v0 = vor.u32 %v2441_v38, %v2440_v32  ;;  %v14012_v32 = vld [vmem:[#allocation18_spill] sm:$0xff] }
 0x268   :  { %2415 = vrot.lane.b32.xlu0 %v2316_v1, %s7234_s3  ;;  %14004 = vst [vmem:[#allocation332_spill] sm:$0xff] %v9435_v33  ;;  %v2452_v34 = vrot.slane %v13768_v6, 2  ;;  %v2461_v38 = vrot.slane %v14012_v32, 3 }
 0x269   :  { %2417 = vrot.lane.b32.xlu1 %v2318_v35, %s7234_s3  ;;  %v2438_v22 = vor.u32 %v2437_v59, %v2436_v13  ;;  %v2446_v59 = vor.u32 %v2445_v4, %v2444_v21  ;;  %v14015_v21 = vld [vmem:[#allocation20_spill] sm:$0xff] }
 0x26a   :  { %v9439_v57 = vpop.permute.xlu0 %2199  ;;  %v2465_v4 = vrot.slane %v14015_v21, 3 }
 0x26b   :  { %14005 = vst [vmem:[#allocation333_spill] sm:$0xff] %v9439_v57  ;;  %v9447_v1 = vpop.permute.xlu1 %2201  ;;  %v2439_v13 = vsel %vm2427_vm7, %v2435_v53, %v2438_v22  ;;  %v2443_v40 = vsel %vm2427_vm7, %v2438_v22, %v2442_v0  ;;  %v2447_v6 = vsel %vm2427_vm7, %v2442_v0, %v2446_v59  ;;  %v14014_v22 = vld [vmem:[#allocation23_spill] sm:$0xff] }
 0x26c   :  { %2419 = vrot.lane.b32.xlu0 %v2320_v27, %s7234_s3  ;;  %14006 = vst [vmem:[#allocation334_spill] sm:$0xff] %v9447_v1  ;;  %v2450_v27 = vor.u32 %v2449_v39, %v2448_v51  ;;  %v2464_v11 = vrot.slane %v14014_v22, 2  ;;  %v14163_v1 = vld [vmem:[#allocation119_spill] sm:$0xff] }
 0x26d   :  { %2421 = vrot.lane.b32.xlu1 %v2322_v45, %s7234_s3  ;;  %v2454_v45 = vor.u32 %v2453_v36, %v2452_v34  ;;  %v14018_v36 = vld [vmem:[#allocation22_spill] sm:$0xff] }
 0x26e   :  { %v9451_v57 = vpop.permute.xlu0 %2203  ;;  %v2451_v53 = vsel %vm2427_vm7, %v2446_v59, %v2450_v27 }
 0x26f   :  { %14007 = vst [vmem:[#allocation335_spill] sm:$0xff] %v9451_v57  ;;  %v9457_v35 = vpop.permute.xlu1 %2205  ;;  %v2455_v0 = vsel %vm2427_vm7, %v2450_v27, %v2454_v45  ;;  %v2459_v59 = vsel %vm2427_vm7, %v2454_v45, %v2458_v2 }
 0x270   :  { %2423 = vrot.lane.b32.xlu0 %v2324_v62, %s7234_s3  ;;  %14008 = vst [vmem:[#allocation336_spill] sm:$0xff] %v9457_v35  ;;  %v2460_v62 = vrot.slane %v14011_v47, 2  ;;  %v2469_v47 = vrot.slane %v14018_v36, 3  ;;  %v14024_v36 = vld [vmem:[#allocation25_spill] sm:$0xff]  ;;  %v14162_v35 = vld [vmem:[#allocation118_spill] sm:$0xff] }
 0x271   :  { %2425 = vrot.lane.b32.xlu1 %v2323_v16, %s7234_s3 }
 0x272   :  { %v9462_v5 = vpop.permute.xlu0 %2207  ;;  %v2462_v39 = vor.u32 %v2461_v38, %v2460_v62  ;;  %v14023_v38 = vld [vmem:[#allocation28_spill] sm:$0xff] }
 0x273   :  { %14009 = vst [vmem:[#allocation337_spill] sm:$0xff] %v9462_v5  ;;  %v9469_v60 = vpop.permute.xlu1 %2209 }
 0x274   :  { %2641 = vrot.lane.b32.xlu0 %v2439_v13, %s7235_s23  ;;  %14010 = vst [vmem:[#allocation338_spill] sm:$0xff] %v9469_v60  ;;  %v14017_v13 = vld [vmem:[#allocation26_spill] sm:$0xff]  ;;  %v2463_v27 = vsel %vm2427_vm7, %v2458_v2, %v2462_v39 }
 0x275   :  { %2643 = vrot.lane.b32.xlu1 %v2443_v40, %s7235_s23  ;;  %v2468_v34 = vrot.slane %v14017_v13, 2  ;;  %v2466_v40 = vor.u32 %v2465_v4, %v2464_v11  ;;  %v2476_v13 = vrot.slane %v14023_v38, 2  ;;  %v14026_v11 = vld [vmem:[#allocation31_spill] sm:$0xff] }
 0x276   :  { %v9474_v16 = vpop.permute.xlu0 %2211  ;;  %v2480_v4 = vrot.slane %v14026_v11, 2 }
 0x277   :  { %14013 = vst [vmem:[#allocation21_spill] sm:$0xff] %v9474_v16  ;;  %v9481_v51 = vpop.permute.xlu1 %2213  ;;  %v2470_v62 = vor.u32 %v2469_v47, %v2468_v34  ;;  %v2467_v45 = vsel %vm2427_vm7, %v2462_v39, %v2466_v40  ;;  %v14029_v47 = vld [vmem:[#allocation33_spill] sm:$0xff] }
 0x278   :  { %2645 = vrot.lane.b32.xlu0 %v2447_v6, %s7235_s23  ;;  %14016 = vst [vmem:[#allocation18_spill] sm:$0xff] %v9481_v51  ;;  %v14021_v6 = vld [vmem:[#allocation24_spill] sm:$0xff]  ;;  %v2484_v38 = vrot.slane %v14029_v47, 2 }
 0x279   :  { %2647 = vrot.lane.b32.xlu1 %v2451_v53, %s7235_s23  ;;  %v2473_v22 = vrot.slane %v14021_v6, 3  ;;  %v2471_v2 = vsel %vm2427_vm7, %v2466_v40, %v2470_v62 }
 0x27a   :  { %v9486_v32 = vpop.permute.xlu0 %2215 }
 0x27b   :  { %14019 = vst [vmem:[#allocation23_spill] sm:$0xff] %v9486_v32  ;;  %v9493_v21 = vpop.permute.xlu1 %2217  ;;  %v2477_v32 = vrot.slane %v14024_v36, 3  ;;  %v2474_v53 = vor.u32 %v2473_v22, %v2472_v44  ;;  %v14030_v36 = vld [vmem:[#allocation30_spill] sm:$0xff]  ;;  %v14032_v44 = vld [vmem:[#allocation36_spill] sm:$0xff] }
 0x27c   :  { %2649 = vrot.lane.b32.xlu0 %v2455_v0, %s7235_s23  ;;  %14022 = vst [vmem:[#allocation20_spill] sm:$0xff] %v9493_v21  ;;  %v14027_v0 = vld [vmem:[#allocation29_spill] sm:$0xff]  ;;  %v2488_v22 = vrot.slane %v14032_v44, 2 }
 0x27d   :  { %2651 = vrot.lane.b32.xlu1 %v2459_v59, %s7235_s23  ;;  %v2481_v61 = vrot.slane %v14027_v0, 3  ;;  %v2478_v34 = vor.u32 %v2477_v32, %v2476_v13  ;;  %v2475_v39 = vsel %vm2427_vm7, %v2470_v62, %v2474_v53  ;;  %v14035_v13 = vld [vmem:[#allocation37_spill] sm:$0xff] }
 0x27e   :  { %v9498_v51 = vpop.permute.xlu0 %2219  ;;  %v2492_v47 = vrot.slane %v14035_v13, 2 }
 0x27f   :  { %14025 = vst [vmem:[#allocation26_spill] sm:$0xff] %v9498_v51  ;;  %v9505_v6 = vpop.permute.xlu1 %2325  ;;  %v2485_v51 = vrot.slane %v14030_v36, 3  ;;  %v2482_v59 = vor.u32 %v2481_v61, %v2480_v4  ;;  %v2479_v32 = vsel %vm2427_vm7, %v2474_v53, %v2478_v34  ;;  %v14036_v36 = vld [vmem:[#allocation34_spill] sm:$0xff] }
 0x280   :  { %2653 = vrot.lane.b32.xlu0 %v2463_v27, %s7235_s23  ;;  %14028 = vst [vmem:[#allocation22_spill] sm:$0xff] %v9505_v6  ;;  %v14033_v27 = vld [vmem:[#allocation32_spill] sm:$0xff]  ;;  %v2493_v16 = vrot.slane %v14036_v36, 3  ;;  %v14038_v4 = vld [vmem:[#allocation38_spill] sm:$0xff]  ;;  %v14042_v36 = vld [vmem:[#allocation39_spill] sm:$0xff] }
 0x281   :  { %2655 = vrot.lane.b32.xlu1 %v2467_v45, %s7235_s23  ;;  %v2489_v11 = vrot.slane %v14033_v27, 3  ;;  %v2486_v40 = vor.u32 %v2485_v51, %v2484_v38  ;;  %v2483_v62 = vsel %vm2427_vm7, %v2478_v34, %v2482_v59  ;;  %v2496_v61 = vrot.slane %v14038_v4, 2  ;;  %v14041_v38 = vld [vmem:[#allocation40_spill] sm:$0xff] }
 0x282   :  { %v9510_v21 = vpop.permute.xlu0 %2327  ;;  %v2494_v53 = vor.u32 %v2493_v16, %v2492_v47  ;;  %v2500_v13 = vrot.slane %v14041_v38, 2  ;;  %v2501_v5 = vrot.slane %v14042_v36, 3  ;;  %v14047_v47 = vld [vmem:[#allocation44_spill] sm:$0xff]  ;;  %v14048_v36 = vld [vmem:[#allocation42_spill] sm:$0xff] }
 0x283   :  { %14031 = vst [vmem:[#allocation27_spill] sm:$0xff] %v9510_v21  ;;  %v9517_v0 = vpop.permute.xlu1 %2329  ;;  %v2490_v45 = vor.u32 %v2489_v11, %v2488_v22  ;;  %v2487_v51 = vsel %vm2427_vm7, %v2482_v59, %v2486_v40  ;;  %v14044_v22 = vld [vmem:[#allocation43_spill] sm:$0xff]  ;;  %v2508_v38 = vrot.slane %v14047_v47, 2 }
 0x284   :  { %2657 = vrot.lane.b32.xlu0 %v2471_v2, %s7235_s23  ;;  %14034 = vst [vmem:[#allocation24_spill] sm:$0xff] %v9517_v0  ;;  %v14039_v2 = vld [vmem:[#allocation35_spill] sm:$0xff]  ;;  %v2504_v11 = vrot.slane %v14044_v22, 2  ;;  %v2502_v59 = vor.u32 %v2501_v5, %v2500_v13  ;;  %v14053_v13 = vld [vmem:[#allocation49_spill] sm:$0xff] }
 0x285   :  { %2659 = vrot.lane.b32.xlu1 %v2475_v39, %s7235_s23  ;;  %v2497_v44 = vrot.slane %v14039_v2, 3  ;;  %v2491_v34 = vsel %vm2427_vm7, %v2486_v40, %v2490_v45  ;;  %v2495_v16 = vsel %vm2427_vm7, %v2490_v45, %v2494_v53  ;;  %v2516_v47 = vrot.slane %v14053_v13, 2  ;;  %v9875_v0 = vld [vmem:[#allocation2 + $0x78] sm:$0xff] }
 0x286   :  { %v9522_v60 = vpop.permute.xlu0 %2331 }
 0x287   :  { %14037 = vst [vmem:[#allocation28_spill] sm:$0xff] %v9522_v60  ;;  %v9529_v27 = vpop.permute.xlu1 %2333  ;;  %v2498_v39 = vor.u32 %v2497_v44, %v2496_v61  ;;  %v14050_v61 = vld [vmem:[#allocation47_spill] sm:$0xff] }
 0x288   :  { %2661 = vrot.lane.b32.xlu0 %v2479_v32, %s7235_s23  ;;  %14040 = vst [vmem:[#allocation25_spill] sm:$0xff] %v9529_v27  ;;  %v14045_v32 = vld [vmem:[#allocation41_spill] sm:$0xff]  ;;  %v2512_v44 = vrot.slane %v14050_v61, 2 }
 0x289   :  { %2663 = vrot.lane.b32.xlu1 %v2483_v62, %s7235_s23  ;;  %v2505_v4 = vrot.slane %v14045_v32, 3  ;;  %v2499_v40 = vsel %vm2427_vm7, %v2494_v53, %v2498_v39  ;;  %v2503_v5 = vsel %vm2427_vm7, %v2498_v39, %v2502_v59 }
 0x28a   :  { %v9534_v60 = vpop.permute.xlu0 %2335 }
 0x28b   :  { %14043 = vst [vmem:[#allocation31_spill] sm:$0xff] %v9534_v60  ;;  %v9541_v2 = vpop.permute.xlu1 %2337  ;;  %v2509_v60 = vrot.slane %v14048_v36, 3  ;;  %v2506_v62 = vor.u32 %v2505_v4, %v2504_v11  ;;  %v14054_v36 = vld [vmem:[#allocation46_spill] sm:$0xff]  ;;  %v14056_v11 = vld [vmem:[#allocation51_spill] sm:$0xff] }
 0x28c   :  { %2665 = vrot.lane.b32.xlu0 %v2487_v51, %s7235_s23  ;;  %14046 = vst [vmem:[#allocation29_spill] sm:$0xff] %v9541_v2  ;;  %v14051_v51 = vld [vmem:[#allocation45_spill] sm:$0xff]  ;;  %v2520_v4 = vrot.slane %v14056_v11, 2 }
 0x28d   :  { %2667 = vrot.lane.b32.xlu1 %v2491_v34, %s7235_s23  ;;  %v2513_v22 = vrot.slane %v14051_v51, 3  ;;  %v2510_v45 = vor.u32 %v2509_v60, %v2508_v38  ;;  %v2507_v53 = vsel %vm2427_vm7, %v2502_v59, %v2506_v62  ;;  %v14059_v38 = vld [vmem:[#allocation53_spill] sm:$0xff] }
 0x28e   :  { %v9546_v27 = vpop.permute.xlu0 %2339  ;;  %v2524_v13 = vrot.slane %v14059_v38, 2 }
 0x28f   :  { %14049 = vst [vmem:[#allocation33_spill] sm:$0xff] %v9546_v27  ;;  %v9553_v32 = vpop.permute.xlu1 %2341  ;;  %v2517_v27 = vrot.slane %v14054_v36, 3  ;;  %v2514_v34 = vor.u32 %v2513_v22, %v2512_v44  ;;  %v2511_v60 = vsel %vm2427_vm7, %v2506_v62, %v2510_v45  ;;  %v14060_v36 = vld [vmem:[#allocation50_spill] sm:$0xff]  ;;  %v14062_v44 = vld [vmem:[#allocation55_spill] sm:$0xff] }
 0x290   :  { %2669 = vrot.lane.b32.xlu0 %v2495_v16, %s7235_s23  ;;  %14052 = vst [vmem:[#allocation30_spill] sm:$0xff] %v9553_v32  ;;  %v14057_v16 = vld [vmem:[#allocation48_spill] sm:$0xff]  ;;  %v2528_v22 = vrot.slane %v14062_v44, 2 }
 0x291   :  { %2671 = vrot.lane.b32.xlu1 %v2499_v40, %s7235_s23  ;;  %v2521_v61 = vrot.slane %v14057_v16, 3  ;;  %v2518_v39 = vor.u32 %v2517_v27, %v2516_v47  ;;  %v2515_v59 = vsel %vm2427_vm7, %v2510_v45, %v2514_v34  ;;  %v14065_v47 = vld [vmem:[#allocation58_spill] sm:$0xff] }
 0x292   :  { %v9558_v2 = vpop.permute.xlu0 %2343  ;;  %v2532_v38 = vrot.slane %v14065_v47, 2 }
 0x293   :  { %14055 = vst [vmem:[#allocation36_spill] sm:$0xff] %v9558_v2  ;;  %v9565_v51 = vpop.permute.xlu1 %2345  ;;  %v2525_v2 = vrot.slane %v14060_v36, 3  ;;  %v2522_v40 = vor.u32 %v2521_v61, %v2520_v4  ;;  %v2519_v27 = vsel %vm2427_vm7, %v2514_v34, %v2518_v39  ;;  %v14066_v36 = vld [vmem:[#allocation54_spill] sm:$0xff]  ;;  %v14068_v4 = vld [vmem:[#allocation59_spill] sm:$0xff] }
 0x294   :  { %2673 = vrot.lane.b32.xlu0 %v2503_v5, %s7235_s23  ;;  %14058 = vst [vmem:[#allocation32_spill] sm:$0xff] %v9565_v51  ;;  %v14063_v5 = vld [vmem:[#allocation52_spill] sm:$0xff]  ;;  %v2536_v61 = vrot.slane %v14068_v4, 2 }
 0x295   :  { %2675 = vrot.lane.b32.xlu1 %v2507_v53, %s7235_s23  ;;  %v2529_v11 = vrot.slane %v14063_v5, 3  ;;  %v2526_v62 = vor.u32 %v2525_v2, %v2524_v13  ;;  %v2523_v45 = vsel %vm2427_vm7, %v2518_v39, %v2522_v40  ;;  %v14071_v13 = vld [vmem:[#allocation60_spill] sm:$0xff] }
 0x296   :  { %v9570_v32 = vpop.permute.xlu0 %2347  ;;  %v2540_v47 = vrot.slane %v14071_v13, 2 }
 0x297   :  { %14061 = vst [vmem:[#allocation37_spill] sm:$0xff] %v9570_v32  ;;  %v9577_v16 = vpop.permute.xlu1 %2349  ;;  %v2533_v32 = vrot.slane %v14066_v36, 3  ;;  %v2530_v53 = vor.u32 %v2529_v11, %v2528_v22  ;;  %v2527_v2 = vsel %vm2427_vm7, %v2522_v40, %v2526_v62  ;;  %v14072_v36 = vld [vmem:[#allocation57_spill] sm:$0xff]  ;;  %v14074_v22 = vld [vmem:[#allocation63_spill] sm:$0xff] }
 0x298   :  { %2677 = vrot.lane.b32.xlu0 %v2511_v60, %s7235_s23  ;;  %14064 = vst [vmem:[#allocation34_spill] sm:$0xff] %v9577_v16  ;;  %v14069_v60 = vld [vmem:[#allocation56_spill] sm:$0xff]  ;;  %v2544_v11 = vrot.slane %v14074_v22, 2 }
 0x299   :  { %2679 = vrot.lane.b32.xlu1 %v2515_v59, %s7235_s23  ;;  %v2537_v44 = vrot.slane %v14069_v60, 3  ;;  %v2534_v34 = vor.u32 %v2533_v32, %v2532_v38  ;;  %v2531_v39 = vsel %vm2427_vm7, %v2526_v62, %v2530_v53  ;;  %v14077_v38 = vld [vmem:[#allocation66_spill] sm:$0xff] }
 0x29a   :  { %v9582_v51 = vpop.permute.xlu0 %2351  ;;  %v2548_v13 = vrot.slane %v14077_v38, 2 }
 0x29b   :  { %14067 = vst [vmem:[#allocation38_spill] sm:$0xff] %v9582_v51  ;;  %v9589_v5 = vpop.permute.xlu1 %2353  ;;  %v2541_v51 = vrot.slane %v14072_v36, 3  ;;  %v2538_v59 = vor.u32 %v2537_v44, %v2536_v61  ;;  %v2535_v32 = vsel %vm2427_vm7, %v2530_v53, %v2534_v34  ;;  %v14078_v36 = vld [vmem:[#allocation62_spill] sm:$0xff]  ;;  %v14080_v61 = vld [vmem:[#allocation67_spill] sm:$0xff] }
 0x29c   :  { %2681 = vrot.lane.b32.xlu0 %v2519_v27, %s7235_s23  ;;  %14070 = vst [vmem:[#allocation35_spill] sm:$0xff] %v9589_v5  ;;  %v14075_v27 = vld [vmem:[#allocation61_spill] sm:$0xff]  ;;  %v2552_v44 = vrot.slane %v14080_v61, 2 }
 0x29d   :  { %2683 = vrot.lane.b32.xlu1 %v2523_v45, %s7235_s23  ;;  %v2545_v4 = vrot.slane %v14075_v27, 3  ;;  %v2542_v40 = vor.u32 %v2541_v51, %v2540_v47  ;;  %v2539_v62 = vsel %vm2427_vm7, %v2534_v34, %v2538_v59  ;;  %v14083_v47 = vld [vmem:[#allocation69_spill] sm:$0xff] }
 0x29e   :  { %v9594_v16 = vpop.permute.xlu0 %2355  ;;  %v2556_v38 = vrot.slane %v14083_v47, 2 }
 0x29f   :  { %14073 = vst [vmem:[#allocation40_spill] sm:$0xff] %v9594_v16  ;;  %v9601_v60 = vpop.permute.xlu1 %2357  ;;  %v2549_v16 = vrot.slane %v14078_v36, 3  ;;  %v2546_v45 = vor.u32 %v2545_v4, %v2544_v11  ;;  %v2543_v51 = vsel %vm2427_vm7, %v2538_v59, %v2542_v40  ;;  %v14084_v36 = vld [vmem:[#allocation65_spill] sm:$0xff]  ;;  %v14086_v11 = vld [vmem:[#allocation71_spill] sm:$0xff] }
 0x2a0   :  { %2685 = vrot.lane.b32.xlu0 %v2527_v2, %s7235_s23  ;;  %14076 = vst [vmem:[#allocation39_spill] sm:$0xff] %v9601_v60  ;;  %v14081_v2 = vld [vmem:[#allocation64_spill] sm:$0xff]  ;;  %v2560_v4 = vrot.slane %v14086_v11, 2 }
 0x2a1   :  { %2687 = vrot.lane.b32.xlu1 %v2531_v39, %s7235_s23  ;;  %v2553_v22 = vrot.slane %v14081_v2, 3  ;;  %v2550_v53 = vor.u32 %v2549_v16, %v2548_v13  ;;  %v2547_v34 = vsel %vm2427_vm7, %v2542_v40, %v2546_v45  ;;  %v14089_v13 = vld [vmem:[#allocation72_spill] sm:$0xff] }
 0x2a2   :  { %v9606_v5 = vpop.permute.xlu0 %2359  ;;  %v2564_v47 = vrot.slane %v14089_v13, 2 }
 0x2a3   :  { %14079 = vst [vmem:[#allocation43_spill] sm:$0xff] %v9606_v5  ;;  %v9613_v27 = vpop.permute.xlu1 %2361  ;;  %v2557_v5 = vrot.slane %v14084_v36, 3  ;;  %v2554_v39 = vor.u32 %v2553_v22, %v2552_v44  ;;  %v2551_v16 = vsel %vm2427_vm7, %v2546_v45, %v2550_v53  ;;  %v14090_v36 = vld [vmem:[#allocation70_spill] sm:$0xff]  ;;  %v14092_v44 = vld [vmem:[#allocation75_spill] sm:$0xff] }
 0x2a4   :  { %2689 = vrot.lane.b32.xlu0 %v2535_v32, %s7235_s23  ;;  %14082 = vst [vmem:[#allocation41_spill] sm:$0xff] %v9613_v27  ;;  %v14087_v32 = vld [vmem:[#allocation68_spill] sm:$0xff]  ;;  %v2568_v22 = vrot.slane %v14092_v44, 2 }
 0x2a5   :  { %2691 = vrot.lane.b32.xlu1 %v2539_v62, %s7235_s23  ;;  %v2561_v61 = vrot.slane %v14087_v32, 3  ;;  %v2558_v59 = vor.u32 %v2557_v5, %v2556_v38  ;;  %v2555_v40 = vsel %vm2427_vm7, %v2550_v53, %v2554_v39  ;;  %v14095_v38 = vld [vmem:[#allocation78_spill] sm:$0xff] }
 0x2a6   :  { %v9618_v60 = vpop.permute.xlu0 %2363  ;;  %v2572_v13 = vrot.slane %v14095_v38, 2  ;;  %14172 = vst [vmem:[#allocation78_spill] sm:$0xff] %v9939_v15 }
 0x2a7   :  { %14085 = vst [vmem:[#allocation44_spill] sm:$0xff] %v9618_v60  ;;  %v9625_v2 = vpop.permute.xlu1 %2365  ;;  %v2565_v60 = vrot.slane %v14090_v36, 3  ;;  %v2562_v62 = vor.u32 %v2561_v61, %v2560_v4  ;;  %v2559_v5 = vsel %vm2427_vm7, %v2554_v39, %v2558_v59  ;;  %v14096_v36 = vld [vmem:[#allocation74_spill] sm:$0xff]  ;;  %v14098_v4 = vld [vmem:[#allocation79_spill] sm:$0xff] }
 0x2a8   :  { %2693 = vrot.lane.b32.xlu0 %v2543_v51, %s7235_s23  ;;  %14088 = vst [vmem:[#allocation42_spill] sm:$0xff] %v9625_v2  ;;  %v14093_v51 = vld [vmem:[#allocation73_spill] sm:$0xff]  ;;  %v2576_v61 = vrot.slane %v14098_v4, 2  ;;  %14174 = vst [vmem:[#allocation74_spill] sm:$0xff] %v9946_v18 }
 0x2a9   :  { %2695 = vrot.lane.b32.xlu1 %v2547_v34, %s7235_s23  ;;  %v2569_v11 = vrot.slane %v14093_v51, 3  ;;  %v2566_v45 = vor.u32 %v2565_v60, %v2564_v47  ;;  %v2563_v53 = vsel %vm2427_vm7, %v2558_v59, %v2562_v62  ;;  %v14101_v47 = vld [vmem:[#allocation81_spill] sm:$0xff]  ;;  %14170 = vst [vmem:[#allocation73_spill] sm:$0xff] %v9932_v3  ;;  %14176 = vst [vmem:[#allocation79_spill] sm:$0xff] %v9953_v10 }
 0x2aa   :  { %v9630_v27 = vpop.permute.xlu0 %2367  ;;  %v2580_v38 = vrot.slane %v14101_v47, 2  ;;  %14180 = vst [vmem:[#allocation81_spill] sm:$0xff] %v9968_v19 }
 0x2ab   :  { %14091 = vst [vmem:[#allocation47_spill] sm:$0xff] %v9630_v27  ;;  %v9637_v32 = vpop.permute.xlu1 %2369  ;;  %v2573_v27 = vrot.slane %v14096_v36, 3  ;;  %v2570_v34 = vor.u32 %v2569_v11, %v2568_v22  ;;  %v2567_v60 = vsel %vm2427_vm7, %v2562_v62, %v2566_v45  ;;  %v14102_v36 = vld [vmem:[#allocation77_spill] sm:$0xff]  ;;  %v14104_v22 = vld [vmem:[#allocation83_spill] sm:$0xff] }
 0x2ac   :  { %2697 = vrot.lane.b32.xlu0 %v2551_v16, %s7235_s23  ;;  %14094 = vst [vmem:[#allocation45_spill] sm:$0xff] %v9637_v32  ;;  %v14099_v16 = vld [vmem:[#allocation76_spill] sm:$0xff]  ;;  %v2584_v11 = vrot.slane %v14104_v22, 2  ;;  %14182 = vst [vmem:[#allocation77_spill] sm:$0xff] %v9978_v58 }
 0x2ad   :  { %2699 = vrot.lane.b32.xlu1 %v2555_v40, %s7235_s23  ;;  %v2577_v44 = vrot.slane %v14099_v16, 3  ;;  %v2574_v39 = vor.u32 %v2573_v27, %v2572_v13  ;;  %v2571_v59 = vsel %vm2427_vm7, %v2566_v45, %v2570_v34  ;;  %v14107_v13 = vld [vmem:[#allocation85_spill] sm:$0xff]  ;;  %14178 = vst [vmem:[#allocation76_spill] sm:$0xff] %v9961_v26  ;;  %14184 = vst [vmem:[#allocation83_spill] sm:$0xff] %v9985_v9 }
 0x2ae   :  { %v9642_v2 = vpop.permute.xlu0 %2371  ;;  %v2588_v47 = vrot.slane %v14107_v13, 2 }
 0x2af   :  { %14097 = vst [vmem:[#allocation49_spill] sm:$0xff] %v9642_v2  ;;  %v9649_v51 = vpop.permute.xlu1 %2373  ;;  %v2581_v2 = vrot.slane %v14102_v36, 3  ;;  %v2578_v40 = vor.u32 %v2577_v44, %v2576_v61  ;;  %v2575_v27 = vsel %vm2427_vm7, %v2570_v34, %v2574_v39  ;;  %v14108_v36 = vld [vmem:[#allocation82_spill] sm:$0xff]  ;;  %v14110_v61 = vld [vmem:[#allocation87_spill] sm:$0xff] }
 0x2b0   :  { %2701 = vrot.lane.b32.xlu0 %v2559_v5, %s7235_s23  ;;  %14100 = vst [vmem:[#allocation46_spill] sm:$0xff] %v9649_v51  ;;  %v14105_v5 = vld [vmem:[#allocation80_spill] sm:$0xff]  ;;  %v2592_v44 = vrot.slane %v14110_v61, 2  ;;  %14189 = vst [vmem:[#allocation82_spill] sm:$0xff] %v10003_v8 }
 0x2b1   :  { %2703 = vrot.lane.b32.xlu1 %v2563_v53, %s7235_s23  ;;  %v2585_v4 = vrot.slane %v14105_v5, 3  ;;  %v2582_v62 = vor.u32 %v2581_v2, %v2580_v38  ;;  %v2579_v45 = vsel %vm2427_vm7, %v2574_v39, %v2578_v40  ;;  %v14113_v38 = vld [vmem:[#allocation88_spill] sm:$0xff] }
 0x2b2   :  { %v9654_v32 = vpop.permute.xlu0 %2375  ;;  %v2596_v13 = vrot.slane %v14113_v38, 2 }
 0x2b3   :  { %14103 = vst [vmem:[#allocation51_spill] sm:$0xff] %v9654_v32  ;;  %v9661_v16 = vpop.permute.xlu1 %2377  ;;  %v2589_v32 = vrot.slane %v14108_v36, 3  ;;  %v2586_v53 = vor.u32 %v2585_v4, %v2584_v11  ;;  %v2583_v2 = vsel %vm2427_vm7, %v2578_v40, %v2582_v62  ;;  %v14114_v36 = vld [vmem:[#allocation86_spill] sm:$0xff]  ;;  %v14116_v40 = vld [vmem:[#allocation91_spill] sm:$0xff]  ;;  %v14117_v4 = vld [vmem:[#allocation89_spill] sm:$0xff] }
 0x2b4   :  { %2705 = vrot.lane.b32.xlu0 %v2567_v60, %s7235_s23  ;;  %14106 = vst [vmem:[#allocation48_spill] sm:$0xff] %v9661_v16  ;;  %v14111_v60 = vld [vmem:[#allocation84_spill] sm:$0xff] }
 0x2b5   :  { %2707 = vrot.lane.b32.xlu1 %v2571_v59, %s7235_s23  ;;  %v2593_v22 = vrot.slane %v14111_v60, 3  ;;  %v2590_v34 = vor.u32 %v2589_v32, %v2588_v47  ;;  %v7035_v59 = vld [vmem:[%s13347_s1] sm:$0xff]   ;;  %v2587_v39 = vsel %vm2427_vm7, %v2582_v62, %v2586_v53  ;;  %v2600_v32 = vrot.slane %v14116_v40, 2 }
 0x2b6   :  { %v9666_v51 = vpop.permute.xlu0 %2379  ;;  %6840 = vmatprep.subr.bf16.mxu0 %v7035_v59  ;;  %v2601_v47 = vrot.slane %v14117_v4, 3  ;;  %6956 = vmatprep.subr.bf16.mxu1 %v7035_v59  ;;  %v14123_v4 = vld [vmem:[#allocation96_spill] sm:$0xff] }
 0x2b7   :  { %14109 = vst [vmem:[#allocation53_spill] sm:$0xff] %v9666_v51  ;;  %v9673_v5 = vpop.permute.xlu1 %2381  ;;  %v2597_v51 = vrot.slane %v14114_v36, 3  ;;  %v2594_v11 = vor.u32 %v2593_v22, %v2592_v44  ;;  %6841 = vmatpush3.bf16.msra.mxu0 %v7035_v59  ;;  %v2591_v60 = vsel %vm2427_vm7, %v2586_v53, %v2590_v34  ;;  %v14119_v36 = vld [vmem:[#allocation93_spill] sm:$0xff]  ;;  %6964 = vmatpush3.bf16.msra.mxu1 %v7035_v59  ;;  %v2608_v44 = vrot.slane %v7997_v29, 2  ;;  %v7037_v29 = vld [vmem:[%s13347_s1 + $0x10] sm:$0xff]  }
 0x2b8   :  { %2709 = vrot.lane.b32.xlu0 %v2575_v27, %s7235_s23  ;;  %14112 = vst [vmem:[#allocation50_spill] sm:$0xff] %v9673_v5  ;;  %v14120_v5 = vld [vmem:[#allocation90_spill] sm:$0xff]  ;;  %v2609_v22 = vrot.slane %v13885_v14, 3  ;;  %v2602_v53 = vor.u32 %v2601_v47, %v2600_v32  ;;  %v2612_v59 = vrot.slane %v14123_v4, 2 }
 0x2b9   :  { %2711 = vrot.lane.b32.xlu1 %v2579_v45, %s7235_s23  ;;  %v2598_v38 = vor.u32 %v2597_v51, %v2596_v13  ;;  %v2605_v45 = vrot.slane %v14120_v5, 3  ;;  %v2595_v51 = vsel %vm2427_vm7, %v2590_v34, %v2594_v11  ;;  %v14126_v32 = vld [vmem:[#allocation98_spill] sm:$0xff] }
 0x2ba   :  { %v9681_v27 = vpop.permute.xlu0 %2383  ;;  %v2610_v34 = vor.u32 %v2609_v22, %v2608_v44  ;;  %v2616_v47 = vrot.slane %v14126_v32, 2  ;;  %v7038_v44 = vld [vmem:[%s13347_s1 + $0x18] sm:$0xff]  }
 0x2bb   :  { %14115 = vst [vmem:[#allocation55_spill] sm:$0xff] %v9681_v27  ;;  %v9688_v61 = vpop.permute.xlu1 %2385  ;;  %v2604_v27 = vrot.slane %v14119_v36, 2  ;;  %v2599_v13 = vsel %vm2427_vm7, %v2594_v11, %v2598_v38  ;;  %v14124_v36 = vld [vmem:[#allocation94_spill] sm:$0xff] }
 0x2bc   :  { %2713 = vrot.lane.b32.xlu0 %v2583_v2, %s7235_s23  ;;  %14118 = vst [vmem:[#allocation52_spill] sm:$0xff] %v9688_v61  ;;  %v7036_v2 = vld [vmem:[%s13347_s1 + $0x8] sm:$0xff]   ;;  %v9868_v61 = vld [vmem:[#allocation2 + $0x70] sm:$0xff] }
 0x2bd   :  { %2715 = vrot.lane.b32.xlu1 %v2587_v39, %s7235_s23  ;;  %6842 = vmatprep.subr.bf16.mxu0 %v7036_v2  ;;  %v2606_v40 = vor.u32 %v2605_v45, %v2604_v27  ;;  %v2613_v39 = vrot.slane %v14124_v36, 3  ;;  %v2603_v27 = vsel %vm2427_vm7, %v2598_v38, %v2602_v53 }
 0x2be   :  { %v9696_v62 = vpop.permute.xlu0 %2387  ;;  %6843 = vmatpush3.bf16.msra.mxu0 %v7036_v2  ;;  %6957 = vmatprep.subr.bf16.mxu1 %v7036_v2 }
 0x2bf   :  { %14121 = vst [vmem:[#allocation58_spill] sm:$0xff] %v9696_v62  ;;  %v9703_v5 = vpop.permute.xlu1 %2389  ;;  %6965 = vmatpush3.bf16.msra.mxu1 %v7036_v2  ;;  %6844 = vmatprep.subr.bf16.mxu0 %v7037_v29  ;;  %v2607_v4 = vsel %vm2427_vm7, %v2602_v53, %v2606_v40  ;;  %v2614_v36 = vor.u32 %v2613_v39, %v2612_v59  ;;  %v2624_v53 = vrot.slane %v13896_v31, 2  ;;  %v2633_v59 = vshrl.u32 %v9423_v28, 16  ;;  %v7039_v31 = vld [vmem:[%s13347_s1 + $0x20] sm:$0xff]   ;;  %v14159_v62 = vld [vmem:[#allocation115_spill] sm:$0xff] }
 0x2c0   :  { %2717 = vrot.lane.b32.xlu0 %v2591_v60, %s7235_s23  ;;  %14122 = vst [vmem:[#allocation54_spill] sm:$0xff] %v9703_v5  ;;  %v14127_v60 = vld [vmem:[#allocation95_spill] sm:$0xff]  ;;  %v14130_v5 = vld [vmem:[#allocation97_spill] sm:$0xff]  ;;  %6958 = vmatprep.subr.bf16.mxu1 %v7037_v29  ;;  %v2611_v38 = vsel %vm2427_vm7, %v2606_v40, %v2610_v34  ;;  %v2636_v39 = vshll.u32 %v9423_v28, 16  ;;  %v14133_v40 = vshrl.u32 %v8585_v63, 16 }
 0x2c1   :  { %2719 = vrot.lane.b32.xlu1 %v2595_v51, %s7235_s23  ;;  %v2617_v11 = vrot.slane %v14127_v60, 3  ;;  %v2621_v51 = vrot.slane %v14130_v5, 3  ;;  %v2625_v5 = vrot.slane %v13897_v37, 3  ;;  %v14134_v60 = vshll.u32 %v8585_v63, 16 }
 0x2c2   :  { %v9711_v14 = vpop.permute.xlu0 %2391  ;;  %6845 = vmatpush3.bf16.msra.mxu0 %v7037_v29 }
 0x2c3   :  { %14125 = vst [vmem:[#allocation59_spill] sm:$0xff] %v9711_v14  ;;  %v9718_v45 = vpop.permute.xlu1 %2393  ;;  %v14129_v14 = vld [vmem:[#allocation100_spill] sm:$0xff]  ;;  %6966 = vmatpush3.bf16.msra.mxu1 %v7037_v29  ;;  %6846 = vmatprep.subr.bf16.mxu0 %v7038_v44  ;;  %v2615_v29 = vsel %vm2427_vm7, %v2610_v34, %v2614_v36  ;;  %v2626_v34 = vor.u32 %v2625_v5, %v2624_v53 }
 0x2c4   :  { %2721 = vrot.lane.b32.xlu0 %v2599_v13, %s7235_s23  ;;  %14128 = vst [vmem:[#allocation56_spill] sm:$0xff] %v9718_v45  ;;  %v2620_v2 = vrot.slane %v14129_v14, 2  ;;  %v2618_v13 = vor.u32 %v2617_v11, %v2616_v47  ;;  %v2628_v47 = vrot.slane %v14133_v40, 2  ;;  %v2629_v11 = vrot.slane %v14134_v60, 3  ;;  %6959 = vmatprep.subr.bf16.mxu1 %v7038_v44  ;;  %v7129_v40 = vld [vmem:[#allocation2 + $0x10] sm:$0xff]  ;;  %v9860_v45 = vld [vmem:[#allocation2 + $0x68] sm:$0xff] }
 0x2c5   :  { %2723 = vrot.lane.b32.xlu1 %v2603_v27, %s7235_s23  ;;  %v2635_v27 = vrot.slane %v2633_v59, 2  ;;  %v7041_v59 = vld [vmem:[%s13347_s1 + $0x30] sm:$0xff]  }
 0x2c6   :  { %v9726_v22 = vpop.permute.xlu0 %2395  ;;  %6847 = vmatpush3.bf16.msra.mxu0 %v7038_v44  ;;  %v2622_v32 = vor.u32 %v2621_v51, %v2620_v2  ;;  %v2619_v28 = vsel %vm2427_vm7, %v2614_v36, %v2618_v13  ;;  %v2630_v51 = vor.u32 %v2629_v11, %v2628_v47  ;;  %v2747_v47 = vrot.slane %v7129_v40, 3  ;;  %v7130_v11 = vld [vmem:[#allocation2 + $0x18] sm:$0xff] }
 0x2c7   :  { %14131 = vst [vmem:[#allocation60_spill] sm:$0xff] %v9726_v22  ;;  %v9735_v14 = vpop.permute.xlu1 %2397  ;;  %6967 = vmatpush3.bf16.msra.mxu1 %v7038_v44  ;;  %6848 = vmatprep.subr.bf16.mxu0 %v7039_v31  ;;  %v7040_v44 = vld [vmem:[%s13347_s1 + $0x28] sm:$0xff]   ;;  %v9853_v22 = vld [vmem:[#allocation2 + $0x60] sm:$0xff] }
 0x2c8   :  { %2725 = vrot.lane.b32.xlu0 %v2607_v4, %s7235_s23  ;;  %14132 = vst [vmem:[#allocation57_spill] sm:$0xff] %v9735_v14  ;;  %v2638_v4 = vrot.slane %v2636_v39, 3  ;;  %v2623_v2 = vsel %vm2427_vm7, %v2618_v13, %v2622_v32  ;;  %6960 = vmatprep.subr.bf16.mxu1 %v7039_v31  ;;  %v2627_v36 = vsel %vm2427_vm7, %v2622_v32, %v2626_v34  ;;  %v2746_v32 = vrot.slane %v9413_v24, 3  ;;  %v678_v24 = vld [vmem:[#allocation2] sm:$0xfc] }
 0x2c9   :  { %2727 = vrot.lane.b32.xlu1 %v2611_v38, %s7235_s23  ;;  %v2631_v13 = vsel %vm2427_vm7, %v2626_v34, %v2630_v51 }
 0x2ca   :  { %v9745_v37 = vpop.permute.xlu0 %2399  ;;  %6849 = vmatpush3.bf16.msra.mxu0 %v7039_v31  ;;  %v2639_v53 = vor.u32 %v2638_v4, %v2635_v27  ;;  %v2748_v27 = vsel %vm2745_vm8, %v2746_v32, %v2747_v47  ;;  %v7131_v4 = vld [vmem:[#allocation2 + $0x20] sm:$0xff] }
 0x2cb   :  { %14135 = vst [vmem:[#allocation63_spill] sm:$0xff] %v9745_v37  ;;  %v9750_v63 = vpop.permute.xlu1 %2401  ;;  %6968 = vmatpush3.bf16.msra.mxu1 %v7039_v31  ;;  %6850 = vmatprep.subr.bf16.mxu0 %v7040_v44  ;;  %v2749_v31 = vrot.slane %v7130_v11, 3 }
 0x2cc   :  { %2729 = vrot.lane.b32.xlu0 %v2615_v29, %s7235_s23  ;;  %14136 = vst [vmem:[#allocation61_spill] sm:$0xff] %v9750_v63  ;;  %6961 = vmatprep.subr.bf16.mxu1 %v7040_v44  ;;  %v2640_v29 = vsel %vm2427_vm7, %v2630_v51, %v2639_v53 }
 0x2cd   :  { %2731 = vrot.lane.b32.xlu1 %v2619_v28, %s7235_s23  ;;  %v7042_v28 = vld [vmem:[%s13347_s1 + $0x38] sm:$0xff]   ;;  %s7236_s1 = smov 32  }
 0x2ce   :  { %v9756_v38 = vpop.permute.xlu0 %2403  ;;  %6851 = vmatpush3.bf16.msra.mxu0 %v7040_v44 }
 0x2cf   :  { %14137 = vst [vmem:[#allocation66_spill] sm:$0xff] %v9756_v38  ;;  %v9761_v5 = vpop.permute.xlu1 %2405  ;;  %6969 = vmatpush3.bf16.msra.mxu1 %v7040_v44  ;;  %6852 = vmatprep.subr.bf16.mxu0 %v7041_v59  ;;  %v2750_v44 = vsel %vm2745_vm8, %v2747_v47, %v2749_v31  ;;  %v14151_v38 = vld [vmem:[#allocation108_spill] sm:$0xff] }
 0x2d0   :  { %2733 = vrot.lane.b32.xlu0 %v2623_v2, %s7235_s23  ;;  %14138 = vst [vmem:[#allocation62_spill] sm:$0xff] %v9761_v5  ;;  %6962 = vmatprep.subr.bf16.mxu1 %v7041_v59  ;;  %v2751_v2 = vrot.slane %v7131_v4, 3 }
 0x2d1   :  { %2735 = vrot.lane.b32.xlu1 %v2627_v36, %s7235_s23  ;;  %v7132_v36 = vld [vmem:[#allocation2 + $0x28] sm:$0xff] }
 0x2d2   :  { %v9767_v39 = vpop.permute.xlu0 %2407  ;;  %6853 = vmatpush3.bf16.msra.mxu0 %v7041_v59 }
 0x2d3   :  { %14139 = vst [vmem:[#allocation67_spill] sm:$0xff] %v9767_v39  ;;  %v9773_v60 = vpop.permute.xlu1 %2409  ;;  %6970 = vmatpush3.bf16.msra.mxu1 %v7041_v59  ;;  %6854 = vmatprep.subr.bf16.mxu0 %v7042_v28  ;;  %v14144_v59 = vld [vmem:[#allocation102_spill] sm:$0xff]  ;;  %v14147_v39 = vld [vmem:[#allocation105_spill] sm:$0xff] }
 0x2d4   :  { %2737 = vrot.lane.b32.xlu0 %v2631_v13, %s7235_s23  ;;  %14140 = vst [vmem:[#allocation64_spill] sm:$0xff] %v9773_v60  ;;  %v2753_v13 = vrot.slane %v7132_v36, 3  ;;  %6963 = vmatprep.subr.bf16.mxu1 %v7042_v28  ;;  %v14146_v60 = vld [vmem:[#allocation104_spill] sm:$0xff] }
 0x2d5   :  { %2739 = vrot.lane.b32.xlu1 %v2640_v29, %s7235_s23  ;;  %v9790_v29 = vsel %vm325_vm0, %v678_v24, %v14144_v59  ;;  %v7134_v24 = vld [vmem:[#allocation2 + $0x30] sm:$0xff] }
 0x2d6   :  { %v9778_v34 = vpop.permute.xlu0 %2411  ;;  %6855 = vmatpush3.bf16.msra.mxu0 %v7042_v28  ;;  %v2755_v59 = vrot.slane %v7134_v24, 3 }
 0x2d7   :  { %14141 = vst [vmem:[#allocation69_spill] sm:$0xff] %v9778_v34  ;;  %v9783_v51 = vpop.permute.xlu1 %2413  ;;  %6971 = vmatpush3.bf16.msra.mxu1 %v7042_v28  ;;  %v2752_v28 = vsel %vm2745_vm8, %v2749_v31, %v2751_v2  ;;  %v14152_v31 = vld [vmem:[#allocation109_spill] sm:$0xff] }
 0x2d8   :  { %2741 = vrot.lane.b32.xlu0 %v2639_v53, %s7235_s23  ;;  %14142 = vst [vmem:[#allocation65_spill] sm:$0xff] %v9783_v51  ;;  %v14145_v53 = vld [vmem:[#allocation103_spill] sm:$0xff] }
 0x2d9   :  { %v9794_v32 = vsel %vm325_vm0, %v7129_v40, %v14145_v53  ;;  %2847 = vrot.lane.b32.xlu1 %v2748_v27, %s7236_s1  ;;  %v7133_v51 = vld [vmem:[#allocation2 + $0x8] sm:$0xff]  ;;  %v14148_v40 = vld [vmem:[#allocation106_spill] sm:$0xff] }
 0x2da   :  { %v9786_v34 = vpop.permute.xlu0 %2415  ;;  %v9799_v47 = vsel %vm325_vm0, %v7133_v51, %v14146_v60  ;;  %v9809_v53 = vsel %vm325_vm0, %v7131_v4, %v14148_v40  ;;  %v14149_v27 = vld [vmem:[#allocation107_spill] sm:$0xff]  ;;  %v2754_v51 = vsel %vm2745_vm8, %v2751_v2, %v2753_v13  ;;  %v7136_v4 = vld [vmem:[#allocation2 + $0x40] sm:$0xff] }
 0x2db   :  { %14143 = vst [vmem:[#allocation71_spill] sm:$0xff] %v9786_v34  ;;  %v9803_v34 = vsel %vm325_vm0, %v7130_v11, %v14147_v39  ;;  %v9813_v5 = vsel %vm325_vm0, %v7132_v36, %v14149_v27  ;;  %v9815_v60 = vpop.permute.xlu1 %2417  ;;  %v7135_v39 = vld [vmem:[#allocation2 + $0x38] sm:$0xff]  ;;  %v14153_v40 = vld [vmem:[#allocation110_spill] sm:$0xff]  ;;  %v9830_v36 = vld [vmem:[#allocation2 + $0x48] sm:$0xff]  ;;  %v2759_v6 = vrot.slane %v7136_v4, 3 }
 0x2dc   :  { %2849 = vrot.lane.b32.xlu0 %v2750_v44, %s7236_s1  ;;  %14150 = vst [vmem:[#allocation68_spill] sm:$0xff] %v9815_v60  ;;  %v2757_v11 = vrot.slane %v7135_v39, 3  ;;  %v9820_v44 = vsel %vm325_vm0, %v7134_v24, %v14151_v38  ;;  %v9824_v63 = vsel %vm325_vm0, %v7135_v39, %v14152_v31  ;;  %v9828_v37 = vsel %vm325_vm0, %v7136_v4, %v14153_v40  ;;  %v14154_v27 = vld [vmem:[#allocation111_spill] sm:$0xff]  ;;  %v9839_v38 = vld [vmem:[#allocation2 + $0x50] sm:$0xff]  ;;  %v9846_v31 = vld [vmem:[#allocation2 + $0x58] sm:$0xff] }
 0x2dd   :  { %v9835_v2 = vsel %vm325_vm0, %v9830_v36, %v14154_v27  ;;  %v14156_v24 = vld [vmem:[#allocation112_spill] sm:$0xff]  ;;  %v14157_v40 = vld [vmem:[#allocation113_spill] sm:$0xff]  ;;  %v14158_v27 = vld [vmem:[#allocation114_spill] sm:$0xff]  ;;  %2851 = vrot.lane.b32.xlu1 %v2752_v28, %s7236_s1 }
 0x2de   :  { %v9837_v60 = vpop.permute.xlu0 %2419  ;;  %v9844_v39 = vsel %vm325_vm0, %v9839_v38, %v14156_v24  ;;  %v9851_v14 = vsel %vm325_vm0, %v9846_v31, %v14157_v40  ;;  %v9865_v24 = vsel %vm325_vm0, %v9860_v45, %v14159_v62  ;;  %v14160_v40 = vld [vmem:[#allocation116_spill] sm:$0xff]  ;;  %v2756_v62 = vsel %vm2745_vm8, %v2753_v13, %v2755_v59  ;;  %v9884_v28 = vld [vmem:[#allocation2 + $0x80] sm:$0xff] }
 0x2df   :  { %14155 = vst [vmem:[#allocation72_spill] sm:$0xff] %v9837_v60  ;;  %v9858_v60 = vsel %vm325_vm0, %v9853_v22, %v14158_v27  ;;  %v9873_v16 = vsel %vm325_vm0, %v9868_v61, %v14160_v40  ;;  %v14161_v27 = vld [vmem:[#allocation117_spill] sm:$0xff]  ;;  %v9889_v57 = vsel %vm325_vm0, %v9884_v28, %v14162_v35  ;;  %v9891_v40 = vld [vmem:[#allocation2 + $0x88] sm:$0xff]  ;;  %v2758_v13 = vsel %vm2745_vm8, %v2755_v59, %v2757_v11  ;;  %v9902_v4 = vld [vmem:[#allocation2 + $0x90] sm:$0xff] }
 0x2e0   :  { %v9880_v21 = vsel %vm325_vm0, %v9875_v0, %v14161_v27  ;;  %2853 = vrot.lane.b32.xlu0 %v2754_v51, %s7236_s1  ;;  %v9896_v33 = vsel %vm325_vm0, %v9891_v40, %v14163_v1  ;;  %v9898_v27 = vpop.permute.xlu1 %2421  ;;  %v2761_v51 = vrot.slane %v9830_v36, 3  ;;  %v9907_v35 = vsel %vm325_vm0, %v9902_v4, %v14165_v48  ;;  %v9923_v36 = vld [vmem:[#allocation2 + $0xa8] sm:$0xff] }
 0x2e1   :  { %14164 = vst [vmem:[#allocation70_spill] sm:$0xff] %v9898_v27  ;;  %v9914_v1 = vsel %vm325_vm0, %v9909_v41, %v14166_v7  ;;  %v14167_v27 = vld [vmem:[#allocation122_spill] sm:$0xff]  ;;  %v9928_v48 = vsel %vm325_vm0, %v9923_v36, %v14168_v20  ;;  %v14171_v7 = vld [vmem:[#allocation124_spill] sm:$0xff]  ;;  %2855 = vrot.lane.b32.xlu1 %v2756_v62, %s7236_s1  ;;  %v2763_v62 = vrot.slane %v9839_v38, 3  ;;  %v2765_v38 = vrot.slane %v9846_v31, 3  ;;  %v14192_v31 = vld [vmem:[#allocation135_spill] sm:$0xff] }
 0x2e2   :  { %v9921_v59 = vsel %vm325_vm0, %v9916_v46, %v14167_v27  ;;  %v9930_v43 = vpop.permute.xlu0 %2423  ;;  %v9937_v17 = vsel %vm325_vm0, %v9932_v3, %v14171_v7  ;;  %v14173_v27 = vld [vmem:[#allocation125_spill] sm:$0xff]  ;;  %v14175_v20 = vld [vmem:[#allocation126_spill] sm:$0xff]  ;;  %v9958_v7 = vsel %vm325_vm0, %v9953_v10, %v14177_v42  ;;  %v2760_v42 = vsel %vm2745_vm8, %v2757_v11, %v2759_v6  ;;  %v14213_v3 = vld [vmem:[#allocation144_spill] sm:$0xff] }
 0x2e3   :  { %14169 = vst [vmem:[#allocation75_spill] sm:$0xff] %v9930_v43  ;;  %v9944_v54 = vsel %vm325_vm0, %v9939_v15, %v14173_v27  ;;  %v9951_v43 = vsel %vm325_vm0, %v9946_v18, %v14175_v20  ;;  %v14179_v27 = vld [vmem:[#allocation128_spill] sm:$0xff]  ;;  %v14181_v20 = vld [vmem:[#allocation129_spill] sm:$0xff]  ;;  %v2762_v11 = vsel %vm2745_vm8, %v2759_v6, %v2761_v51  ;;  %v14206_v18 = vld [vmem:[#allocation142_spill] sm:$0xff] }
 0x2e4   :  { %v9966_v30 = vsel %vm325_vm0, %v9961_v26, %v14179_v27  ;;  %v9973_v25 = vsel %vm325_vm0, %v9968_v19, %v14181_v20  ;;  %2857 = vrot.lane.b32.xlu0 %v2758_v13, %s7236_s1  ;;  %v9983_v27 = vsel %vm325_vm0, %v9978_v58, %v14183_v56  ;;  %v9990_v20 = vsel %vm325_vm0, %v9985_v9, %v14185_v52  ;;  %v9992_v12 = vpop.permute.xlu1 %2425  ;;  %v9996_v13 = vld [vmem:[#allocation2 + $0xf0] sm:$0xff]  ;;  %v14190_v58 = vld [vmem:[#allocation133_spill] sm:$0xff]  ;;  %v14191_v9 = vld [vmem:[#allocation134_spill] sm:$0xff] }
 0x2e5   :  { %14186 = vst [vmem:[#allocation80_spill] sm:$0xff] %v9992_v12  ;;  %14187 = vst [vmem:[#allocation85_spill] sm:$0xff] %v9996_v13  ;;  %v10001_v56 = vsel %vm325_vm0, %v9996_v13, %v14188_v23  ;;  %v10008_v52 = vsel %vm325_vm0, %v10003_v8, %v14190_v58  ;;  %v10013_v6 = vsel %vm325_vm0, %v9330_v50, %v14191_v9  ;;  %v14194_v23 = vld [vmem:[#allocation136_spill] sm:$0xff]  ;;  %v10027_v26 = vld [vmem:[#allocation2 + $0x118] sm:$0xff]  ;;  %2859 = vrot.lane.b32.xlu1 %v2760_v42, %s7236_s1 }
 0x2e6   :  { %v10018_v12 = vsel %vm325_vm0, %v9336_v55, %v14192_v31  ;;  %v10020_v19 = vpop.permute.xlu0 %2641  ;;  %v10025_v13 = vsel %vm325_vm0, %v9344_v49, %v14194_v23  ;;  %14195 = vst [vmem:[#allocation84_spill] sm:$0xff] %v10027_v26  ;;  %v14196_v58 = vld [vmem:[#allocation137_spill] sm:$0xff]  ;;  %v10034_v9 = vld [vmem:[#allocation2 + $0x120] sm:$0xff]  ;;  %v10041_v31 = vld [vmem:[#allocation2 + $0x128] sm:$0xff]  ;;  %v2767_v42 = vrot.slane %v9853_v22, 3  ;;  %v2769_v22 = vrot.slane %v9860_v45, 3 }
 0x2e7   :  { %14193 = vst [vmem:[#allocation87_spill] sm:$0xff] %v10020_v19  ;;  %v10032_v8 = vsel %vm325_vm0, %v10027_v26, %v14196_v58  ;;  %14197 = vst [vmem:[#allocation88_spill] sm:$0xff] %v10034_v9  ;;  %v14198_v50 = vld [vmem:[#allocation138_spill] sm:$0xff]  ;;  %v14200_v19 = vld [vmem:[#allocation139_spill] sm:$0xff] }
 0x2e8   :  { %v10039_v55 = vsel %vm325_vm0, %v10034_v9, %v14198_v50  ;;  %14199 = vst [vmem:[#allocation86_spill] sm:$0xff] %v10041_v31  ;;  %v10046_v49 = vsel %vm325_vm0, %v10041_v31, %v14200_v19  ;;  %v10049_v23 = vld [vmem:[#allocation2 + $0x130] sm:$0xff]  ;;  %v10056_v10 = vld [vmem:[#allocation2 + $0x138] sm:$0xff]  ;;  %2861 = vrot.lane.b32.xlu0 %v2762_v11, %s7236_s1  ;;  %v2764_v19 = vsel %vm2745_vm8, %v2761_v51, %v2763_v62  ;;  %v10066_v31 = vld [vmem:[#allocation2 + $0x140] sm:$0xff] }
 0x2e9   :  { %14201 = vst [vmem:[#allocation91_spill] sm:$0xff] %v10049_v23  ;;  %v14202_v58 = vld [vmem:[#allocation140_spill] sm:$0xff]  ;;  %14203 = vst [vmem:[#allocation89_spill] sm:$0xff] %v10056_v10  ;;  %v14204_v50 = vld [vmem:[#allocation141_spill] sm:$0xff]  ;;  %v2766_v51 = vsel %vm2745_vm8, %v2763_v62, %v2765_v38  ;;  %2863 = vrot.lane.b32.xlu1 %v2764_v19, %s7236_s1 }
 0x2ea   :  { %v10054_v26 = vsel %vm325_vm0, %v10049_v23, %v14202_v58  ;;  %v10061_v9 = vsel %vm325_vm0, %v10056_v10, %v14204_v50  ;;  %14205 = vst [vmem:[#allocation93_spill] sm:$0xff] %v10066_v31  ;;  %v10071_v58 = vsel %vm325_vm0, %v10066_v31, %v14206_v18  ;;  %v10073_v23 = vld [vmem:[#allocation2 + $0x148] sm:$0xff]  ;;  %v10080_v10 = vpop.permute.xlu1 %2643  ;;  %v10084_v11 = vld [vmem:[#allocation2 + $0x150] sm:$0xff]  ;;  %v10091_v31 = vld [vmem:[#allocation2 + $0x158] sm:$0xff] }
 0x2eb   :  { %14207 = vst [vmem:[#allocation90_spill] sm:$0xff] %v10071_v58  ;;  %14208 = vst [vmem:[#allocation96_spill] sm:$0xff] %v10073_v23  ;;  %v14209_v15 = vld [vmem:[#allocation143_spill] sm:$0xff]  ;;  %v10089_v18 = vsel %vm325_vm0, %v10084_v11, %v14213_v3  ;;  %v14216_v58 = vld [vmem:[#allocation145_spill] sm:$0xff] }
 0x2ec   :  { %v10078_v50 = vsel %vm325_vm0, %v10073_v23, %v14209_v15  ;;  %14211 = vst [vmem:[#allocation98_spill] sm:$0xff] %v10080_v10  ;;  %14212 = vst [vmem:[#allocation95_spill] sm:$0xff] %v10084_v11  ;;  %v10096_v15 = vsel %vm325_vm0, %v10091_v31, %v14216_v58  ;;  %v10098_v23 = vld [vmem:[#allocation2 + $0x160] sm:$0xff]  ;;  %v10105_v62 = vld [vmem:[#allocation2 + $0x168] sm:$0xff]  ;;  %v10112_v11 = vpop.permute.xlu0 %2645  ;;  %2865 = vrot.lane.b32.xlu0 %v2766_v51, %s7236_s1  ;;  %v2773_v51 = vrot.slane %v9875_v0, 3 }
 0x2ed   :  { %14210 = vst [vmem:[#allocation94_spill] sm:$0xff] %v10078_v50  ;;  %14214 = vst [vmem:[#allocation100_spill] sm:$0xff] %v10089_v18  ;;  %v14219_v10 = vld [vmem:[#allocation146_spill] sm:$0xff]  ;;  %v14222_v50 = vld [vmem:[#allocation147_spill] sm:$0xff] }
 0x2ee   :  { %14215 = vst [vmem:[#allocation97_spill] sm:$0xff] %v10091_v31  ;;  %14217 = vst [vmem:[#allocation102_spill] sm:$0xff] %v10096_v15  ;;  %v10103_v45 = vsel %vm325_vm0, %v10098_v23, %v14219_v10  ;;  %v10110_v3 = vsel %vm325_vm0, %v10105_v62, %v14222_v50  ;;  %v10114_v18 = vld [vmem:[#allocation2 + $0x170] sm:$0xff]  ;;  %v10121_v15 = vld [vmem:[#allocation2 + $0x178] sm:$0xff] }
 0x2ef   :  { %14218 = vst [vmem:[#allocation103_spill] sm:$0xff] %v10098_v23  ;;  %14220 = vst [vmem:[#allocation104_spill] sm:$0xff] %v10103_v45  ;;  %v14226_v58 = vld [vmem:[#allocation148_spill] sm:$0xff]  ;;  %v14229_v10 = vld [vmem:[#allocation149_spill] sm:$0xff] }
 0x2f0   :  { %14221 = vst [vmem:[#allocation105_spill] sm:$0xff] %v10105_v62  ;;  %14223 = vst [vmem:[#allocation106_spill] sm:$0xff] %v10110_v3  ;;  %v10119_v31 = vsel %vm325_vm0, %v10114_v18, %v14226_v58  ;;  %v10126_v23 = vsel %vm325_vm0, %v10121_v15, %v14229_v10  ;;  %v10128_v45 = vld [vmem:[#allocation2 + $0x180] sm:$0xff]  ;;  %v10135_v62 = vld [vmem:[#allocation2 + $0x188] sm:$0xff]  ;;  %v10189_v0 = vpop.permute.xlu0 %2649 }
 0x2f1   :  { %14224 = vst [vmem:[#allocation107_spill] sm:$0xff] %v10112_v11  ;;  %14225 = vst [vmem:[#allocation108_spill] sm:$0xff] %v10114_v18  ;;  %v14232_v50 = vld [vmem:[#allocation150_spill] sm:$0xff]  ;;  %v14234_v3 = vld [vmem:[#allocation151_spill] sm:$0xff] }
 0x2f2   :  { %14227 = vst [vmem:[#allocation109_spill] sm:$0xff] %v10119_v31  ;;  %14228 = vst [vmem:[#allocation110_spill] sm:$0xff] %v10121_v15  ;;  %v10133_v11 = vsel %vm325_vm0, %v10128_v45, %v14232_v50  ;;  %v10140_v58 = vsel %vm325_vm0, %v10135_v62, %v14234_v3  ;;  %v7175_v18 = vld [vmem:[#allocation2 + $0x190] sm:$0x7]  ;;  %v14236_v15 = vld [vmem:[#allocation153_spill] sm:$0xff]  ;;  %v2768_v50 = vsel %vm2745_vm8, %v2765_v38, %v2767_v42 }
 0x2f3   :  { %14230 = vst [vmem:[#allocation111_spill] sm:$0xff] %v10126_v23  ;;  %14231 = vst [vmem:[#allocation112_spill] sm:$0xff] %v10128_v45  ;;  %v14235_v31 = vld [vmem:[#allocation152_spill] sm:$0xff]  ;;  %v10150_v23 = vsel %vm3052_vm9, %v9790_v29, %v14236_v15  ;;  %v2771_v45 = vrot.slane %v9868_v61, 3  ;;  %v14237_v3 = vld [vmem:[#allocation154_spill] sm:$0xff]  ;;  %v2770_v29 = vsel %vm2745_vm8, %v2767_v42, %v2769_v22  ;;  %2867 = vrot.lane.b32.xlu1 %v2768_v50, %s7236_s1 }
 0x2f4   :  { %14233 = vst [vmem:[#allocation113_spill] sm:$0xff] %v10135_v62  ;;  %v10145_v10 = vsel %vm325_vm0, %v7175_v18, %v14235_v31  ;;  %v10158_v19 = vsel %vm3052_vm9, %v9799_v47, %v14237_v3  ;;  %v14238_v62 = vld [vmem:[#allocation155_spill] sm:$0xff]  ;;  %v10165_v18 = vpop.permute.xlu1 %2647  ;;  %v14240_v15 = vld [vmem:[#allocation156_spill] sm:$0xff]  ;;  %v14241_v38 = vld [vmem:[#allocation157_spill] sm:$0xff]  ;;  %2869 = vrot.lane.b32.xlu0 %v2770_v29, %s7236_s1  ;;  %v2777_v29 = vrot.slane %v9891_v40, 3  ;;  %v10259_v40 = vpop.permute.xlu0 %2653 }
 0x2f5   :  { %v10163_v31 = vsel %vm3052_vm9, %v9794_v32, %v14238_v62  ;;  %14239 = vst [vmem:[#allocation114_spill] sm:$0xff] %v10165_v18  ;;  %v10172_v61 = vsel %vm3052_vm9, %v9803_v34, %v14240_v15  ;;  %v10177_v47 = vsel %vm3052_vm9, %v9809_v53, %v14241_v38  ;;  %v14242_v3 = vld [vmem:[#allocation158_spill] sm:$0xff]  ;;  %v14243_v62 = vld [vmem:[#allocation159_spill] sm:$0xff]  ;;  %14244 = vst [vmem:[#allocation115_spill] sm:$0xff] %v10189_v0 }
 0x2f6   :  { %v10182_v32 = vsel %vm3052_vm9, %v9813_v5, %v14242_v3  ;;  %v10187_v42 = vsel %vm3052_vm9, %v9820_v44, %v14243_v62  ;;  %v14245_v18 = vld [vmem:[#allocation160_spill] sm:$0xff]  ;;  %v14246_v15 = vld [vmem:[#allocation161_spill] sm:$0xff]  ;;  %v14247_v38 = vld [vmem:[#allocation162_spill] sm:$0xff]  ;;  %14258 = vst [vmem:[#allocation117_spill] sm:$0xff] %v10259_v40 }
 0x2f7   :  { %v10194_v34 = vsel %vm3052_vm9, %v9824_v63, %v14245_v18  ;;  %v10199_v53 = vsel %vm3052_vm9, %v9828_v37, %v14246_v15  ;;  %v10204_v5 = vsel %vm3052_vm9, %v9835_v2, %v14247_v38  ;;  %v14248_v3 = vld [vmem:[#allocation163_spill] sm:$0xff]  ;;  %v14249_v62 = vld [vmem:[#allocation164_spill] sm:$0xff]  ;;  %v14250_v18 = vld [vmem:[#allocation165_spill] sm:$0xff]  ;;  %v2772_v2 = vsel %vm2745_vm8, %v2769_v22, %v2771_v45 }
 0x2f8   :  { %v10209_v44 = vsel %vm3052_vm9, %v9844_v39, %v14248_v3  ;;  %v10215_v63 = vsel %vm3052_vm9, %v9851_v14, %v14249_v62  ;;  %v10220_v37 = vsel %vm3052_vm9, %v9858_v60, %v14250_v18  ;;  %v2775_v15 = vrot.slane %v9884_v28, 3  ;;  %v14251_v39 = vld [vmem:[#allocation166_spill] sm:$0xff]  ;;  %v14252_v38 = vld [vmem:[#allocation167_spill] sm:$0xff]  ;;  %v10235_v3 = vpop.permute.xlu1 %2651  ;;  %v14254_v62 = vld [vmem:[#allocation168_spill] sm:$0xff]  ;;  %2871 = vrot.lane.b32.xlu1 %v2772_v2, %s7236_s1 }
 0x2f9   :  { %v10228_v50 = vsel %vm3052_vm9, %v9865_v24, %v14251_v39  ;;  %v10233_v14 = vsel %vm3052_vm9, %v9873_v16, %v14252_v38  ;;  %14253 = vst [vmem:[#allocation116_spill] sm:$0xff] %v10235_v3  ;;  %v2774_v60 = vsel %vm2745_vm8, %v2771_v45, %v2773_v51  ;;  %v10242_v28 = vsel %vm3052_vm9, %v9880_v21, %v14254_v62  ;;  %v14255_v22 = vld [vmem:[#allocation169_spill] sm:$0xff]  ;;  %v14256_v18 = vld [vmem:[#allocation170_spill] sm:$0xff]  ;;  %v14257_v39 = vld [vmem:[#allocation171_spill] sm:$0xff] }
 0x2fa   :  { %v10247_v24 = vsel %vm3052_vm9, %v9889_v57, %v14255_v22  ;;  %v10252_v16 = vsel %vm3052_vm9, %v9896_v33, %v14256_v18  ;;  %v10257_v45 = vsel %vm3052_vm9, %v9907_v35, %v14257_v39  ;;  %v14259_v38 = vld [vmem:[#allocation172_spill] sm:$0xff]  ;;  %v14260_v62 = vld [vmem:[#allocation173_spill] sm:$0xff]  ;;  %v14261_v22 = vld [vmem:[#allocation174_spill] sm:$0xff]  ;;  %2873 = vrot.lane.b32.xlu0 %v2774_v60, %s7236_s1  ;;  %v2781_v60 = vrot.slane %v9909_v41, 3  ;;  %v10329_v41 = vpop.permute.xlu0 %2657 }
 0x2fb   :  { %v10264_v21 = vsel %vm3052_vm9, %v9914_v1, %v14259_v38  ;;  %v10269_v57 = vsel %vm3052_vm9, %v9921_v59, %v14260_v62  ;;  %v10274_v33 = vsel %vm3052_vm9, %v9928_v48, %v14261_v22  ;;  %v14262_v18 = vld [vmem:[#allocation175_spill] sm:$0xff]  ;;  %v14263_v1 = vld [vmem:[#allocation176_spill] sm:$0xff]  ;;  %v14264_v59 = vld [vmem:[#allocation177_spill] sm:$0xff]  ;;  %v2776_v48 = vsel %vm2745_vm8, %v2773_v51, %v2775_v15  ;;  %14272 = vst [vmem:[#allocation119_spill] sm:$0xff] %v10329_v41 }
 0x2fc   :  { %v10279_v35 = vsel %vm3052_vm9, %v9937_v17, %v14262_v18  ;;  %v10285_v39 = vsel %vm3052_vm9, %v9944_v54, %v14263_v1  ;;  %v10290_v38 = vsel %vm3052_vm9, %v9951_v43, %v14264_v59  ;;  %v2779_v17 = vrot.slane %v9902_v4, 3  ;;  %v14265_v62 = vld [vmem:[#allocation178_spill] sm:$0xff]  ;;  %v14266_v22 = vld [vmem:[#allocation179_spill] sm:$0xff]  ;;  %v10305_v18 = vpop.permute.xlu1 %2655  ;;  %v14268_v1 = vld [vmem:[#allocation180_spill] sm:$0xff]  ;;  %2875 = vrot.lane.b32.xlu1 %v2776_v48, %s7236_s1 }
 0x2fd   :  { %v10298_v2 = vsel %vm3052_vm9, %v9958_v7, %v14265_v62  ;;  %v10303_v54 = vsel %vm3052_vm9, %v9966_v30, %v14266_v22  ;;  %14267 = vst [vmem:[#allocation118_spill] sm:$0xff] %v10305_v18  ;;  %v2778_v43 = vsel %vm2745_vm8, %v2775_v15, %v2777_v29  ;;  %v10312_v4 = vsel %vm3052_vm9, %v9973_v25, %v14268_v1  ;;  %v14269_v51 = vld [vmem:[#allocation181_spill] sm:$0xff]  ;;  %v14270_v59 = vld [vmem:[#allocation182_spill] sm:$0xff]  ;;  %v14271_v62 = vld [vmem:[#allocation183_spill] sm:$0xff] }
 0x2fe   :  { %v10317_v7 = vsel %vm3052_vm9, %v9983_v27, %v14269_v51  ;;  %v10322_v30 = vsel %vm3052_vm9, %v9990_v20, %v14270_v59  ;;  %v10327_v15 = vsel %vm3052_vm9, %v10001_v56, %v14271_v62  ;;  %v14273_v22 = vld [vmem:[#allocation184_spill] sm:$0xff]  ;;  %v14274_v1 = vld [vmem:[#allocation185_spill] sm:$0xff]  ;;  %v14275_v51 = vld [vmem:[#allocation186_spill] sm:$0xff]  ;;  %2877 = vrot.lane.b32.xlu0 %v2778_v43, %s7236_s1  ;;  %v2785_v43 = vrot.slane %v9923_v36, 3  ;;  %v10399_v36 = vpop.permute.xlu0 %2661 }
 0x2ff   :  { %v10334_v25 = vsel %vm3052_vm9, %v10008_v52, %v14273_v22  ;;  %v10339_v27 = vsel %vm3052_vm9, %v10013_v6, %v14274_v1  ;;  %v10344_v20 = vsel %vm3052_vm9, %v10018_v12, %v14275_v51  ;;  %v14276_v59 = vld [vmem:[#allocation187_spill] sm:$0xff]  ;;  %v14277_v62 = vld [vmem:[#allocation188_spill] sm:$0xff]  ;;  %v14278_v22 = vld [vmem:[#allocation189_spill] sm:$0xff]  ;;  %v2780_v12 = vsel %vm2745_vm8, %v2777_v29, %v2779_v17  ;;  %14289 = vst [vmem:[#allocation121_spill] sm:$0xff] %v10399_v36 }
 0x300   :  { %v10349_v56 = vsel %vm3052_vm9, %v10025_v13, %v14276_v59  ;;  %v10355_v52 = vsel %vm3052_vm9, %v10032_v8, %v14277_v62  ;;  %v10360_v6 = vsel %vm3052_vm9, %v10039_v55, %v14278_v22  ;;  %v2783_v1 = vrot.slane %v9916_v46, 3  ;;  %v14279_v13 = vld [vmem:[#allocation190_spill] sm:$0xff]  ;;  %v14280_v51 = vld [vmem:[#allocation191_spill] sm:$0xff]  ;;  %v10375_v59 = vpop.permute.xlu1 %2659  ;;  %v14282_v62 = vld [vmem:[#allocation192_spill] sm:$0xff]  ;;  %2879 = vrot.lane.b32.xlu1 %v2780_v12, %s7236_s1 }
 0x301   :  { %v10368_v48 = vsel %vm3052_vm9, %v10046_v49, %v14279_v13  ;;  %v10373_v8 = vsel %vm3052_vm9, %v10054_v26, %v14280_v51  ;;  %14281 = vst [vmem:[#allocation120_spill] sm:$0xff] %v10375_v59  ;;  %v2782_v55 = vsel %vm2745_vm8, %v2779_v17, %v2781_v60  ;;  %v10382_v46 = vsel %vm3052_vm9, %v10061_v9, %v14282_v62  ;;  %v14283_v29 = vld [vmem:[#allocation193_spill] sm:$0xff]  ;;  %v14284_v22 = vld [vmem:[#allocation90_spill] sm:$0xff]  ;;  %v14288_v59 = vld [vmem:[#allocation100_spill] sm:$0xff] }
 0x302   :  { %v10387_v49 = vsel %vm3052_vm9, %v14284_v22, %v14283_v29  ;;  %v14285_v13 = vld [vmem:[#allocation194_spill] sm:$0xff]  ;;  %v14290_v18 = vld [vmem:[#allocation9_spill] sm:$0xff]  ;;  %v14293_v40 = vld [vmem:[#allocation12_spill] sm:$0xff]  ;;  %2881 = vrot.lane.b32.xlu0 %v2782_v55, %s7236_s1 }
 0x303   :  { %v14286_v41 = vld [vmem:[#allocation94_spill] sm:$0xff]  ;;  %v14294_v29 = vld [vmem:[#allocation104_spill] sm:$0xff]  ;;  %v14295_v3 = vld [vmem:[#allocation11_spill] sm:$0xff] }
 0x304   :  { %v10392_v26 = vsel %vm3052_vm9, %v14286_v41, %v14285_v13  ;;  %v14287_v51 = vld [vmem:[#allocation10_spill] sm:$0xff]  ;;  %v10409_v22 = vsel %vm3052_vm9, %v14294_v29, %v14293_v40  ;;  %v14299_v36 = vld [vmem:[#allocation13_spill] sm:$0xff] }
 0x305   :  { %v10397_v17 = vsel %vm3052_vm9, %v14288_v59, %v14287_v51  ;;  %v14291_v9 = vld [vmem:[#allocation102_spill] sm:$0xff]  ;;  %v14298_v59 = vld [vmem:[#allocation109_spill] sm:$0xff] }
 0x306   :  { %v10404_v62 = vsel %vm3052_vm9, %v14291_v9, %v14290_v18  ;;  %v14296_v41 = vld [vmem:[#allocation106_spill] sm:$0xff]  ;;  %v14300_v18 = vld [vmem:[#allocation111_spill] sm:$0xff]  ;;  %v14303_v29 = vld [vmem:[#allocation73_spill] sm:$0xff] }
 0x307   :  { %14292 = vst [vmem:[#allocation122_spill] sm:$0xff] %v10404_v62  ;;  %v10414_v13 = vsel %vm3052_vm9, %v14296_v41, %v14295_v3  ;;  %v14297_v0 = vld [vmem:[#allocation14_spill] sm:$0xff]  ;;  %v10425_v9 = vsel %vm3052_vm9, %v14300_v18, %v14299_v36  ;;  %v14301_v62 = vld [vmem:[#allocation16_spill] sm:$0xff]  ;;  %v2784_v3 = vsel %vm2745_vm8, %v2781_v60, %v2783_v1  ;;  %v2787_v41 = vrot.slane %v14303_v29, 3  ;;  %v10445_v18 = vpop.permute.xlu1 %2663  ;;  %v14310_v29 = vld [vmem:[#allocation195_spill] sm:$0xff] }
 0x308   :  { %v10419_v51 = vsel %vm3052_vm9, %v14298_v59, %v14297_v0  ;;  %v10430_v40 = vsel %vm3052_vm9, %v10133_v11, %v14301_v62  ;;  %v14304_v0 = vld [vmem:[#allocation15_spill] sm:$0xff]  ;;  %14307 = vst [vmem:[#allocation125_spill] sm:$0xff] %v10445_v18  ;;  %v2786_v11 = vsel %vm2745_vm8, %v2783_v1, %v2785_v43  ;;  %v14308_v62 = vld [vmem:[#allocation78_spill] sm:$0xff]  ;;  %2883 = vrot.lane.b32.xlu1 %v2784_v3, %s7236_s1 }
 0x309   :  { %14302 = vst [vmem:[#allocation123_spill] sm:$0xff] %v10430_v40  ;;  %v10438_v12 = vsel %vm3052_vm9, %v10140_v58, %v14304_v0  ;;  %v14305_v59 = vld [vmem:[#allocation19_spill] sm:$0xff]  ;;  %v2789_v55 = vrot.slane %v14308_v62, 3  ;;  %v14309_v40 = vld [vmem:[#allocation17_spill] sm:$0xff]  ;;  %v10457_v58 = vsel %vm3155_vm10, %v10158_v19, %v14310_v29  ;;  %v14311_v0 = vld [vmem:[#allocation196_spill] sm:$0xff]  ;;  %v10469_v62 = vpop.permute.xlu0 %2665  ;;  %2885 = vrot.lane.b32.xlu0 %v2786_v11, %s7236_s1 }
 0x30a   :  { %v10443_v36 = vsel %vm3052_vm9, %v10145_v10, %v14305_v59  ;;  %v10452_v60 = vsel %vm3155_vm10, %v10150_v23, %v14309_v40  ;;  %v10462_v10 = vsel %vm3155_vm10, %v10163_v31, %v14311_v0  ;;  %v14312_v59 = vld [vmem:[#allocation197_spill] sm:$0xff]  ;;  %14313 = vst [vmem:[#allocation126_spill] sm:$0xff] %v10469_v62  ;;  %v14315_v40 = vld [vmem:[#allocation199_spill] sm:$0xff]  ;;  %v14316_v29 = vld [vmem:[#allocation200_spill] sm:$0xff] }
 0x30b   :  { %14306 = vst [vmem:[#allocation124_spill] sm:$0xff] %v10443_v36  ;;  %v10467_v1 = vsel %vm3155_vm10, %v10172_v61, %v14312_v59  ;;  %v14314_v36 = vld [vmem:[#allocation198_spill] sm:$0xff]  ;;  %v10479_v19 = vsel %vm3155_vm10, %v10182_v32, %v14315_v40  ;;  %v10484_v31 = vsel %vm3155_vm10, %v10187_v42, %v14316_v29  ;;  %v14317_v0 = vld [vmem:[#allocation201_spill] sm:$0xff]  ;;  %v2788_v42 = vsel %vm2745_vm8, %v2785_v43, %v2787_v41  ;;  %v14375_v18 = vld [vmem:[#allocation239_spill] sm:$0xff] }
 0x30c   :  { %v10474_v23 = vsel %vm3155_vm10, %v10177_v47, %v14314_v36  ;;  %v10489_v61 = vsel %vm3155_vm10, %v10194_v34, %v14317_v0  ;;  %v14318_v59 = vld [vmem:[#allocation202_spill] sm:$0xff]  ;;  %v14319_v36 = vld [vmem:[#allocation203_spill] sm:$0xff]  ;;  %v14321_v34 = vld [vmem:[#allocation204_spill] sm:$0xff]  ;;  %2887 = vrot.lane.b32.xlu1 %v2788_v42, %s7236_s1 }
 0x30d   :  { %v10495_v47 = vsel %vm3155_vm10, %v10199_v53, %v14318_v59  ;;  %v10500_v32 = vsel %vm3155_vm10, %v10204_v5, %v14319_v36  ;;  %v14320_v40 = vld [vmem:[#allocation74_spill] sm:$0xff]  ;;  %v10508_v3 = vsel %vm3155_vm10, %v10209_v44, %v14321_v34  ;;  %v14322_v0 = vld [vmem:[#allocation205_spill] sm:$0xff]  ;;  %v10515_v59 = vpop.permute.xlu1 %2667  ;;  %v2790_v5 = vsel %vm2745_vm8, %v2787_v41, %v2789_v55  ;;  %v14324_v36 = vld [vmem:[#allocation79_spill] sm:$0xff] }
 0x30e   :  { %v2791_v29 = vrot.slane %v14320_v40, 3  ;;  %v10513_v53 = vsel %vm3155_vm10, %v10215_v63, %v14322_v0  ;;  %14323 = vst [vmem:[#allocation127_spill] sm:$0xff] %v10515_v59  ;;  %v2793_v11 = vrot.slane %v14324_v36, 3  ;;  %v14325_v62 = vld [vmem:[#allocation206_spill] sm:$0xff]  ;;  %v14326_v40 = vld [vmem:[#allocation207_spill] sm:$0xff]  ;;  %v14327_v34 = vld [vmem:[#allocation208_spill] sm:$0xff]  ;;  %v10539_v36 = vpop.permute.xlu0 %2669  ;;  %2889 = vrot.lane.b32.xlu0 %v2790_v5, %s7236_s1 }
 0x30f   :  { %v10522_v43 = vsel %vm3155_vm10, %v10220_v37, %v14325_v62  ;;  %v10527_v44 = vsel %vm3155_vm10, %v10228_v50, %v14326_v40  ;;  %v10532_v63 = vsel %vm3155_vm10, %v10233_v14, %v14327_v34  ;;  %v14328_v0 = vld [vmem:[#allocation209_spill] sm:$0xff]  ;;  %14329 = vst [vmem:[#allocation128_spill] sm:$0xff] %v10539_v36  ;;  %v14330_v59 = vld [vmem:[#allocation210_spill] sm:$0xff]  ;;  %v14331_v62 = vld [vmem:[#allocation211_spill] sm:$0xff] }
 0x310   :  { %v10537_v41 = vsel %vm3155_vm10, %v10242_v28, %v14328_v0  ;;  %v10544_v37 = vsel %vm3155_vm10, %v10247_v24, %v14330_v59  ;;  %v10549_v50 = vsel %vm3155_vm10, %v10252_v16, %v14331_v62  ;;  %v14332_v40 = vld [vmem:[#allocation212_spill] sm:$0xff]  ;;  %v14333_v34 = vld [vmem:[#allocation213_spill] sm:$0xff]  ;;  %v14334_v24 = vld [vmem:[#allocation214_spill] sm:$0xff] }
 0x311   :  { %v10554_v14 = vsel %vm3155_vm10, %v10257_v45, %v14332_v40  ;;  %v10559_v28 = vsel %vm3155_vm10, %v10264_v21, %v14333_v34  ;;  %v10565_v59 = vsel %vm3155_vm10, %v10269_v57, %v14334_v24  ;;  %v14335_v16 = vld [vmem:[#allocation215_spill] sm:$0xff]  ;;  %v2792_v45 = vsel %vm2745_vm8, %v2789_v55, %v2791_v29  ;;  %v14336_v62 = vld [vmem:[#allocation76_spill] sm:$0xff]  ;;  %v14338_v34 = vld [vmem:[#allocation217_spill] sm:$0xff]  ;;  %v10585_v24 = vpop.permute.xlu1 %2671 }
 0x312   :  { %v10570_v0 = vsel %vm3155_vm10, %v10274_v33, %v14335_v16  ;;  %v2795_v21 = vrot.slane %v14336_v62, 3  ;;  %v14337_v40 = vld [vmem:[#allocation216_spill] sm:$0xff]  ;;  %v10583_v57 = vsel %vm3155_vm10, %v10285_v39, %v14338_v34  ;;  %14339 = vst [vmem:[#allocation129_spill] sm:$0xff] %v10585_v24  ;;  %v2794_v33 = vsel %vm2745_vm8, %v2791_v29, %v2793_v11  ;;  %v14340_v16 = vld [vmem:[#allocation81_spill] sm:$0xff]  ;;  %v14341_v36 = vld [vmem:[#allocation218_spill] sm:$0xff]  ;;  %2891 = vrot.lane.b32.xlu1 %v2792_v45, %s7236_s1 }
 0x313   :  { %v10578_v42 = vsel %vm3155_vm10, %v10279_v35, %v14337_v40  ;;  %v2797_v5 = vrot.slane %v14340_v16, 3  ;;  %v10592_v55 = vsel %vm3155_vm10, %v10290_v38, %v14341_v36  ;;  %v14342_v62 = vld [vmem:[#allocation219_spill] sm:$0xff]  ;;  %v14343_v40 = vld [vmem:[#allocation220_spill] sm:$0xff]  ;;  %v14344_v34 = vld [vmem:[#allocation221_spill] sm:$0xff]  ;;  %v10609_v16 = vpop.permute.xlu0 %2673  ;;  %2893 = vrot.lane.b32.xlu0 %v2794_v33, %s7236_s1 }
 0x314   :  { %v10597_v35 = vsel %vm3155_vm10, %v10298_v2, %v14342_v62  ;;  %v10602_v39 = vsel %vm3155_vm10, %v10303_v54, %v14343_v40  ;;  %v10607_v29 = vsel %vm3155_vm10, %v10312_v4, %v14344_v34  ;;  %14345 = vst [vmem:[#allocation130_spill] sm:$0xff] %v10609_v16  ;;  %v14346_v24 = vld [vmem:[#allocation222_spill] sm:$0xff]  ;;  %v14347_v36 = vld [vmem:[#allocation223_spill] sm:$0xff]  ;;  %v14348_v62 = vld [vmem:[#allocation224_spill] sm:$0xff] }
 0x315   :  { %v10614_v38 = vsel %vm3155_vm10, %v10317_v7, %v14346_v24  ;;  %v10619_v2 = vsel %vm3155_vm10, %v10322_v30, %v14347_v36  ;;  %v10624_v54 = vsel %vm3155_vm10, %v10327_v15, %v14348_v62  ;;  %v14349_v40 = vld [vmem:[#allocation225_spill] sm:$0xff]  ;;  %v14350_v34 = vld [vmem:[#allocation226_spill] sm:$0xff]  ;;  %v14351_v24 = vld [vmem:[#allocation92_spill] sm:$0xff]  ;;  %v2796_v15 = vsel %vm2745_vm8, %v2793_v11, %v2795_v21 }
 0x316   :  { %v10629_v4 = vsel %vm3155_vm10, %v10334_v25, %v14349_v40  ;;  %v10635_v7 = vsel %vm3155_vm10, %v10339_v27, %v14350_v34  ;;  %v10640_v30 = vsel %vm3155_vm10, %v10344_v20, %v14351_v24  ;;  %v14352_v36 = vld [vmem:[#allocation77_spill] sm:$0xff]  ;;  %v14353_v25 = vld [vmem:[#allocation227_spill] sm:$0xff]  ;;  %v14354_v40 = vld [vmem:[#allocation228_spill] sm:$0xff]  ;;  %v10655_v34 = vpop.permute.xlu1 %2675  ;;  %v2798_v20 = vsel %vm2745_vm8, %v2795_v21, %v2797_v5  ;;  %2895 = vrot.lane.b32.xlu1 %v2796_v15, %s7236_s1 }
 0x317   :  { %v2799_v62 = vrot.slane %v14352_v36, 3  ;;  %v10648_v45 = vsel %vm3155_vm10, %v10349_v56, %v14353_v25  ;;  %v10653_v27 = vsel %vm3155_vm10, %v10355_v52, %v14354_v40  ;;  %14355 = vst [vmem:[#allocation131_spill] sm:$0xff] %v10655_v34  ;;  %v14356_v24 = vld [vmem:[#allocation83_spill] sm:$0xff]  ;;  %v14357_v16 = vld [vmem:[#allocation229_spill] sm:$0xff]  ;;  %v14360_v40 = vld [vmem:[#allocation230_spill] sm:$0xff]  ;;  %2897 = vrot.lane.b32.xlu0 %v2798_v20, %s7236_s1 }
 0x318   :  { %v2801_v33 = vrot.slane %v14356_v24, 3  ;;  %v10662_v11 = vsel %vm3155_vm10, %v10360_v6, %v14357_v16  ;;  %v14358_v36 = vld [vmem:[#allocation101_spill] sm:$0xff]  ;;  %v14359_v25 = vld [vmem:[#allocation99_spill] sm:$0xff]  ;;  %v10677_v21 = vsel %vm3155_vm10, %v10382_v46, %v14360_v40  ;;  %v10679_v24 = vpop.permute.xlu0 %2677  ;;  %v14363_v16 = vld [vmem:[#allocation232_spill] sm:$0xff] }
 0x319   :  { %v10667_v56 = vsel %vm3155_vm10, %v10368_v48, %v14358_v36  ;;  %v10672_v52 = vsel %vm3155_vm10, %v10373_v8, %v14359_v25  ;;  %14361 = vst [vmem:[#allocation132_spill] sm:$0xff] %v10679_v24  ;;  %v14362_v34 = vld [vmem:[#allocation231_spill] sm:$0xff]  ;;  %v10689_v48 = vsel %vm3155_vm10, %v10392_v26, %v14363_v16  ;;  %v14364_v36 = vld [vmem:[#allocation233_spill] sm:$0xff]  ;;  %v14365_v25 = vld [vmem:[#allocation234_spill] sm:$0xff] }
 0x31a   :  { %v10684_v6 = vsel %vm3155_vm10, %v10387_v49, %v14362_v34  ;;  %v10694_v8 = vsel %vm3155_vm10, %v10397_v17, %v14364_v36  ;;  %v14366_v46 = vld [vmem:[#allocation122_spill] sm:$0xff]  ;;  %v14367_v24 = vld [vmem:[#allocation235_spill] sm:$0xff]  ;;  %v14368_v34 = vld [vmem:[#allocation236_spill] sm:$0xff]  ;;  %v2800_v17 = vsel %vm2745_vm8, %v2797_v5, %v2799_v62 }
 0x31b   :  { %v10699_v40 = vsel %vm3155_vm10, %v14366_v46, %v14365_v25  ;;  %v10705_v49 = vsel %vm3155_vm10, %v10409_v22, %v14367_v24  ;;  %v10710_v26 = vsel %vm3155_vm10, %v10414_v13, %v14368_v34  ;;  %v14370_v16 = vld [vmem:[#allocation85_spill] sm:$0xff]  ;;  %v14372_v46 = vld [vmem:[#allocation238_spill] sm:$0xff]  ;;  %v10725_v24 = vpop.permute.xlu1 %2679  ;;  %v2802_v13 = vsel %vm2745_vm8, %v2799_v62, %v2801_v33  ;;  %v14376_v5 = vld [vmem:[#allocation123_spill] sm:$0xff]  ;;  %2899 = vrot.lane.b32.xlu1 %v2800_v17, %s7236_s1 }
 0x31c   :  { %14369 = vst [vmem:[#allocation133_spill] sm:$0xff] %v10710_v26  ;;  %v2803_v36 = vrot.slane %v14370_v16, 3  ;;  %v14371_v25 = vld [vmem:[#allocation237_spill] sm:$0xff]  ;;  %v10723_v22 = vsel %vm3155_vm10, %v10425_v9, %v14372_v46  ;;  %v14374_v34 = vld [vmem:[#allocation82_spill] sm:$0xff]  ;;  %v10732_v16 = vsel %vm3155_vm10, %v14376_v5, %v14375_v18  ;;  %v14378_v26 = vld [vmem:[#allocation240_spill] sm:$0xff]  ;;  %2901 = vrot.lane.b32.xlu0 %v2802_v13, %s7236_s1 }
 0x31d   :  { %v10718_v15 = vsel %vm3155_vm10, %v10419_v51, %v14371_v25  ;;  %14373 = vst [vmem:[#allocation134_spill] sm:$0xff] %v10723_v22  ;;  %v2805_v20 = vrot.slane %v14374_v34, 3  ;;  %14377 = vst [vmem:[#allocation135_spill] sm:$0xff] %v10732_v16  ;;  %v10737_v51 = vsel %vm3155_vm10, %v10438_v12, %v14378_v26  ;;  %v14380_v25 = vld [vmem:[#allocation242_spill] sm:$0xff]  ;;  %v14381_v46 = vld [vmem:[#allocation243_spill] sm:$0xff]  ;;  %v10749_v34 = vpop.permute.xlu0 %2681 }
 0x31e   :  { %14379 = vst [vmem:[#allocation136_spill] sm:$0xff] %v10737_v51  ;;  %v10742_v9 = vsel %vm3258_vm11, %v10452_v60, %v14380_v25  ;;  %v10747_v62 = vsel %vm3258_vm11, %v10457_v58, %v14381_v46  ;;  %v14382_v22 = vld [vmem:[#allocation244_spill] sm:$0xff]  ;;  %v14383_v5 = vld [vmem:[#allocation245_spill] sm:$0xff]  ;;  %v14384_v26 = vld [vmem:[#allocation246_spill] sm:$0xff] }
 0x31f   :  { %v10754_v18 = vsel %vm3258_vm11, %v10462_v10, %v14382_v22  ;;  %v10759_v12 = vsel %vm3258_vm11, %v10467_v1, %v14383_v5  ;;  %v10764_v60 = vsel %vm3258_vm11, %v10474_v23, %v14384_v26  ;;  %v14385_v25 = vld [vmem:[#allocation247_spill] sm:$0xff]  ;;  %v14386_v46 = vld [vmem:[#allocation248_spill] sm:$0xff]  ;;  %v14387_v22 = vld [vmem:[#allocation249_spill] sm:$0xff]  ;;  %v2804_v23 = vsel %vm2745_vm8, %v2801_v33, %v2803_v36 }
 0x320   :  { %v10769_v58 = vsel %vm3258_vm11, %v10479_v19, %v14385_v25  ;;  %v10775_v10 = vsel %vm3258_vm11, %v10484_v31, %v14386_v46  ;;  %v10780_v1 = vsel %vm3258_vm11, %v10489_v61, %v14387_v22  ;;  %v7176_v5 = vld [vmem:[#allocation2 + $0x100] sm:$0xff]  ;;  %v14389_v25 = vld [vmem:[#allocation251_spill] sm:$0xff]  ;;  %v10794_v46 = vpop.permute.xlu1 %2683  ;;  %v2806_v61 = vsel %vm2745_vm8, %v2803_v36, %v2805_v20  ;;  %v14391_v51 = vld [vmem:[#allocation252_spill] sm:$0xff]  ;;  %2903 = vrot.lane.b32.xlu1 %v2804_v23, %s7236_s1 }
 0x321   :  { %v2807_v26 = vrot.slane %v7176_v5, 3  ;;  %v14388_v19 = vld [vmem:[#allocation250_spill] sm:$0xff]  ;;  %v10792_v31 = vsel %vm3258_vm11, %v10500_v32, %v14389_v25  ;;  %14390 = vst [vmem:[#allocation137_spill] sm:$0xff] %v10794_v46  ;;  %v7177_v22 = vld [vmem:[#allocation2 + $0x108] sm:$0xff]  ;;  %v10800_v33 = vsel %vm3258_vm11, %v10508_v3, %v14391_v51  ;;  %v14392_v5 = vld [vmem:[#allocation253_spill] sm:$0xff]  ;;  %2905 = vrot.lane.b32.xlu0 %v2806_v61, %s7236_s1 }
 0x322   :  { %v10787_v17 = vsel %vm3258_vm11, %v10495_v47, %v14388_v19  ;;  %v2809_v13 = vrot.slane %v7177_v22, 3  ;;  %v10805_v47 = vsel %vm3258_vm11, %v10513_v53, %v14392_v5  ;;  %v14393_v19 = vld [vmem:[#allocation254_spill] sm:$0xff]  ;;  %v14394_v25 = vld [vmem:[#allocation255_spill] sm:$0xff]  ;;  %v10817_v22 = vpop.permute.xlu0 %2685  ;;  %v14396_v16 = vld [vmem:[#allocation256_spill] sm:$0xff] }
 0x323   :  { %v10810_v32 = vsel %vm3258_vm11, %v10522_v43, %v14393_v19  ;;  %v10815_v36 = vsel %vm3258_vm11, %v10527_v44, %v14394_v25  ;;  %14395 = vst [vmem:[#allocation138_spill] sm:$0xff] %v10817_v22  ;;  %v10822_v3 = vsel %vm3258_vm11, %v10532_v63, %v14396_v16  ;;  %v14397_v51 = vld [vmem:[#allocation257_spill] sm:$0xff]  ;;  %v14398_v5 = vld [vmem:[#allocation258_spill] sm:$0xff]  ;;  %v14399_v19 = vld [vmem:[#allocation259_spill] sm:$0xff] }
 0x324   :  { %v10827_v53 = vsel %vm3258_vm11, %v10537_v41, %v14397_v51  ;;  %v10832_v43 = vsel %vm3258_vm11, %v10544_v37, %v14398_v5  ;;  %v10837_v44 = vsel %vm3258_vm11, %v10549_v50, %v14399_v19  ;;  %v14400_v63 = vld [vmem:[#allocation260_spill] sm:$0xff]  ;;  %v14401_v41 = vld [vmem:[#allocation261_spill] sm:$0xff]  ;;  %v2808_v37 = vsel %vm2745_vm8, %v2805_v20, %v2807_v26  ;;  %v14402_v5 = vld [vmem:[#allocation262_spill] sm:$0xff] }
 0x325   :  { %v10843_v16 = vsel %vm3258_vm11, %v10554_v14, %v14400_v63  ;;  %v10848_v25 = vsel %vm3258_vm11, %v10559_v28, %v14401_v41  ;;  %v7178_v51 = vld [vmem:[#allocation2 + $0x110] sm:$0xff]  ;;  %v10855_v23 = vsel %vm3258_vm11, %v10565_v59, %v14402_v5  ;;  %v14403_v19 = vld [vmem:[#allocation263_spill] sm:$0xff]  ;;  %v10862_v63 = vpop.permute.xlu1 %2687  ;;  %v2810_v28 = vsel %vm2745_vm8, %v2807_v26, %v2809_v13  ;;  %v14408_v5 = vld [vmem:[#allocation266_spill] sm:$0xff]  ;;  %2907 = vrot.lane.b32.xlu1 %v2808_v37, %s7236_s1 }
 0x326   :  { %v2811_v50 = vrot.slane %v7178_v51, 3  ;;  %v10860_v14 = vsel %vm3258_vm11, %v10570_v0, %v14403_v19  ;;  %14404 = vst [vmem:[#allocation139_spill] sm:$0xff] %v10862_v63  ;;  %v14405_v41 = vld [vmem:[#allocation84_spill] sm:$0xff]  ;;  %v14407_v51 = vld [vmem:[#allocation265_spill] sm:$0xff]  ;;  %v10879_v0 = vsel %vm3258_vm11, %v10592_v55, %v14408_v5  ;;  %v14409_v19 = vld [vmem:[#allocation267_spill] sm:$0xff]  ;;  %2909 = vrot.lane.b32.xlu0 %v2810_v28, %s7236_s1 }
 0x327   :  { %v2813_v61 = vrot.slane %v14405_v41, 3  ;;  %v14406_v22 = vld [vmem:[#allocation264_spill] sm:$0xff]  ;;  %v10874_v59 = vsel %vm3258_vm11, %v10583_v57, %v14407_v51  ;;  %v10884_v26 = vsel %vm3258_vm11, %v10597_v35, %v14409_v19  ;;  %v10886_v41 = vpop.permute.xlu0 %2689  ;;  %v14413_v51 = vld [vmem:[#allocation270_spill] sm:$0xff]  ;;  %v14414_v5 = vld [vmem:[#allocation271_spill] sm:$0xff] }
 0x328   :  { %v10869_v20 = vsel %vm3258_vm11, %v10578_v42, %v14406_v22  ;;  %14410 = vst [vmem:[#allocation140_spill] sm:$0xff] %v10886_v41  ;;  %v14411_v63 = vld [vmem:[#allocation268_spill] sm:$0xff]  ;;  %v14412_v22 = vld [vmem:[#allocation269_spill] sm:$0xff]  ;;  %v10901_v55 = vsel %vm3258_vm11, %v10614_v38, %v14413_v51  ;;  %v10906_v35 = vsel %vm3258_vm11, %v10619_v2, %v14414_v5  ;;  %v2812_v38 = vsel %vm2745_vm8, %v2809_v13, %v2811_v50  ;;  %v14418_v2 = vld [vmem:[#allocation274_spill] sm:$0xff] }
 0x329   :  { %v10891_v42 = vsel %vm3258_vm11, %v10602_v39, %v14411_v63  ;;  %v10896_v57 = vsel %vm3258_vm11, %v10607_v29, %v14412_v22  ;;  %v14415_v19 = vld [vmem:[#allocation272_spill] sm:$0xff]  ;;  %v14416_v63 = vld [vmem:[#allocation273_spill] sm:$0xff]  ;;  %v10925_v37 = vsel %vm3258_vm11, %v10635_v7, %v14418_v2  ;;  %v14419_v5 = vld [vmem:[#allocation275_spill] sm:$0xff]  ;;  %2911 = vrot.lane.b32.xlu1 %v2812_v38, %s7236_s1 }
 0x32a   :  { %v10912_v39 = vsel %vm3258_vm11, %v10624_v54, %v14415_v19  ;;  %v10917_v29 = vsel %vm3258_vm11, %v10629_v4, %v14416_v63  ;;  %v14417_v22 = vld [vmem:[#allocation88_spill] sm:$0xff]  ;;  %v10930_v54 = vsel %vm3258_vm11, %v10640_v30, %v14419_v5  ;;  %v10932_v19 = vpop.permute.xlu1 %2691  ;;  %v2814_v4 = vsel %vm2745_vm8, %v2811_v50, %v2813_v61  ;;  %v14421_v63 = vld [vmem:[#allocation86_spill] sm:$0xff]  ;;  %v14425_v5 = vld [vmem:[#allocation279_spill] sm:$0xff] }
 0x32b   :  { %v2815_v51 = vrot.slane %v14417_v22, 3  ;;  %14420 = vst [vmem:[#allocation141_spill] sm:$0xff] %v10932_v19  ;;  %v2817_v28 = vrot.slane %v14421_v63, 3  ;;  %v14422_v41 = vld [vmem:[#allocation276_spill] sm:$0xff]  ;;  %v14423_v22 = vld [vmem:[#allocation277_spill] sm:$0xff]  ;;  %v14424_v2 = vld [vmem:[#allocation278_spill] sm:$0xff]  ;;  %v10954_v50 = vsel %vm3258_vm11, %v10667_v56, %v14425_v5  ;;  %v10956_v63 = vpop.permute.xlu0 %2693  ;;  %2913 = vrot.lane.b32.xlu0 %v2814_v4, %s7236_s1 }
 0x32c   :  { %v10939_v13 = vsel %vm3258_vm11, %v10648_v45, %v14422_v41  ;;  %v10944_v7 = vsel %vm3258_vm11, %v10653_v27, %v14423_v22  ;;  %v10949_v30 = vsel %vm3258_vm11, %v10662_v11, %v14424_v2  ;;  %14426 = vst [vmem:[#allocation142_spill] sm:$0xff] %v10956_v63  ;;  %v14427_v19 = vld [vmem:[#allocation280_spill] sm:$0xff]  ;;  %v14428_v41 = vld [vmem:[#allocation281_spill] sm:$0xff]  ;;  %v14429_v22 = vld [vmem:[#allocation282_spill] sm:$0xff] }
 0x32d   :  { %v10961_v45 = vsel %vm3258_vm11, %v10672_v52, %v14427_v19  ;;  %v10966_v27 = vsel %vm3258_vm11, %v10677_v21, %v14428_v41  ;;  %v10971_v11 = vsel %vm3258_vm11, %v10684_v6, %v14429_v22  ;;  %v14430_v2 = vld [vmem:[#allocation283_spill] sm:$0xff]  ;;  %v14431_v5 = vld [vmem:[#allocation284_spill] sm:$0xff]  ;;  %v14432_v19 = vld [vmem:[#allocation285_spill] sm:$0xff]  ;;  %v2816_v6 = vsel %vm2745_vm8, %v2813_v61, %v2815_v51 }
 0x32e   :  { %v10976_v56 = vsel %vm3258_vm11, %v10689_v48, %v14430_v2  ;;  %v10982_v52 = vsel %vm3258_vm11, %v10694_v8, %v14431_v5  ;;  %v10987_v21 = vsel %vm3258_vm11, %v10699_v40, %v14432_v19  ;;  %v14433_v41 = vld [vmem:[#allocation91_spill] sm:$0xff]  ;;  %v14434_v48 = vld [vmem:[#allocation286_spill] sm:$0xff]  ;;  %v14437_v63 = vld [vmem:[#allocation133_spill] sm:$0xff]  ;;  %v11002_v5 = vpop.permute.xlu1 %2695  ;;  %v2818_v40 = vsel %vm2745_vm8, %v2815_v51, %v2817_v28  ;;  %2915 = vrot.lane.b32.xlu1 %v2816_v6, %s7236_s1 }
 0x32f   :  { %v2819_v22 = vrot.slane %v14433_v41, 3  ;;  %v10995_v38 = vsel %vm3258_vm11, %v10705_v49, %v14434_v48  ;;  %v14436_v2 = vld [vmem:[#allocation287_spill] sm:$0xff]  ;;  %v14439_v19 = vld [vmem:[#allocation89_spill] sm:$0xff]  ;;  %v14440_v46 = vld [vmem:[#allocation288_spill] sm:$0xff]  ;;  %2917 = vrot.lane.b32.xlu0 %v2818_v40, %s7236_s1 }
 0x330   :  { %14435 = vst [vmem:[#allocation143_spill] sm:$0xff] %v10995_v38  ;;  %v11000_v8 = vsel %vm3258_vm11, %v14437_v63, %v14436_v2  ;;  %v2821_v4 = vrot.slane %v14439_v19, 3  ;;  %v11009_v61 = vsel %vm3258_vm11, %v10718_v15, %v14440_v46  ;;  %v14442_v41 = vld [vmem:[#allocation293_spill] sm:$0xff]  ;;  %v14443_v48 = vld [vmem:[#allocation294_spill] sm:$0xff]  ;;  %v14444_v2 = vld [vmem:[#allocation295_spill] sm:$0xff]  ;;  %v11026_v19 = vpop.permute.xlu0 %2697 }
 0x331   :  { %14438 = vst [vmem:[#allocation144_spill] sm:$0xff] %v11000_v8  ;;  %14441 = vst [vmem:[#allocation145_spill] sm:$0xff] %v11009_v61  ;;  %v11014_v49 = vsel %vm3361_vm12, %v10742_v9, %v14442_v41  ;;  %v11019_v63 = vsel %vm3361_vm12, %v10747_v62, %v14443_v48  ;;  %v11024_v51 = vsel %vm3361_vm12, %v10754_v18, %v14444_v2  ;;  %v14446_v8 = vld [vmem:[#allocation296_spill] sm:$0xff]  ;;  %v14447_v46 = vld [vmem:[#allocation297_spill] sm:$0xff] }
 0x332   :  { %14445 = vst [vmem:[#allocation146_spill] sm:$0xff] %v11026_v19  ;;  %v11031_v15 = vsel %vm3361_vm12, %v10759_v12, %v14446_v8  ;;  %v11036_v9 = vsel %vm3361_vm12, %v10764_v60, %v14447_v46  ;;  %v14448_v41 = vld [vmem:[#allocation298_spill] sm:$0xff]  ;;  %v14449_v48 = vld [vmem:[#allocation299_spill] sm:$0xff]  ;;  %v14450_v2 = vld [vmem:[#allocation300_spill] sm:$0xff] }
 0x333   :  { %v11041_v62 = vsel %vm3361_vm12, %v10769_v58, %v14448_v41  ;;  %v11046_v18 = vsel %vm3361_vm12, %v10775_v10, %v14449_v48  ;;  %v11052_v12 = vsel %vm3361_vm12, %v10780_v1, %v14450_v2  ;;  %v14451_v8 = vld [vmem:[#allocation301_spill] sm:$0xff]  ;;  %v2820_v58 = vsel %vm2745_vm8, %v2817_v28, %v2819_v22  ;;  %v14453_v10 = vld [vmem:[#allocation302_spill] sm:$0xff]  ;;  %v14454_v48 = vld [vmem:[#allocation303_spill] sm:$0xff]  ;;  %v11072_v2 = vpop.permute.xlu1 %2699 }
 0x334   :  { %v11057_v60 = vsel %vm3361_vm12, %v10787_v17, %v14451_v8  ;;  %v14452_v46 = vld [vmem:[#allocation93_spill] sm:$0xff]  ;;  %v11065_v6 = vsel %vm3361_vm12, %v10792_v31, %v14453_v10  ;;  %v11070_v1 = vsel %vm3361_vm12, %v10800_v33, %v14454_v48  ;;  %14455 = vst [vmem:[#allocation147_spill] sm:$0xff] %v11072_v2  ;;  %v2822_v17 = vsel %vm2745_vm8, %v2819_v22, %v2821_v4  ;;  %v14456_v40 = vld [vmem:[#allocation96_spill] sm:$0xff]  ;;  %v14459_v10 = vld [vmem:[#allocation306_spill] sm:$0xff] }
 0x335   :  { %v2823_v41 = vrot.slane %v14452_v46, 3  ;;  %v2825_v8 = vrot.slane %v14456_v40, 3  ;;  %v14457_v28 = vld [vmem:[#allocation304_spill] sm:$0xff]  ;;  %v14458_v61 = vld [vmem:[#allocation305_spill] sm:$0xff]  ;;  %v11089_v33 = vsel %vm3361_vm12, %v10815_v36, %v14459_v10  ;;  %v14460_v48 = vld [vmem:[#allocation307_spill] sm:$0xff]  ;;  %v11096_v40 = vpop.permute.xlu0 %2701  ;;  %2919 = vrot.lane.b32.xlu1 %v2820_v58, %s7236_s1  ;;  %2921 = vrot.lane.b32.xlu0 %v2822_v17, %s7236_s1 }
 0x336   :  { %v11079_v46 = vsel %vm3361_vm12, %v10805_v47, %v14457_v28  ;;  %v11084_v31 = vsel %vm3361_vm12, %v10810_v32, %v14458_v61  ;;  %v11094_v22 = vsel %vm3361_vm12, %v10822_v3, %v14460_v48  ;;  %14461 = vst [vmem:[#allocation148_spill] sm:$0xff] %v11096_v40  ;;  %v14462_v38 = vld [vmem:[#allocation308_spill] sm:$0xff]  ;;  %v14463_v28 = vld [vmem:[#allocation309_spill] sm:$0xff]  ;;  %v14464_v61 = vld [vmem:[#allocation310_spill] sm:$0xff] }
 0x337   :  { %v11101_v47 = vsel %vm3361_vm12, %v10827_v53, %v14462_v38  ;;  %v11106_v32 = vsel %vm3361_vm12, %v10832_v43, %v14463_v28  ;;  %v11111_v36 = vsel %vm3361_vm12, %v10837_v44, %v14464_v61  ;;  %v14465_v10 = vld [vmem:[#allocation311_spill] sm:$0xff]  ;;  %v14466_v48 = vld [vmem:[#allocation312_spill] sm:$0xff]  ;;  %v14467_v38 = vld [vmem:[#allocation313_spill] sm:$0xff]  ;;  %v2824_v44 = vsel %vm2745_vm8, %v2821_v4, %v2823_v41 }
 0x338   :  { %v11116_v3 = vsel %vm3361_vm12, %v10843_v16, %v14465_v10  ;;  %v11122_v53 = vsel %vm3361_vm12, %v10848_v25, %v14466_v48  ;;  %v11127_v43 = vsel %vm3361_vm12, %v10855_v23, %v14467_v38  ;;  %v14468_v28 = vld [vmem:[#allocation95_spill] sm:$0xff]  ;;  %v14469_v16 = vld [vmem:[#allocation314_spill] sm:$0xff]  ;;  %v11142_v48 = vpop.permute.xlu1 %2703  ;;  %v2826_v23 = vsel %vm2745_vm8, %v2823_v41, %v2825_v8  ;;  %v14472_v38 = vld [vmem:[#allocation97_spill] sm:$0xff] }
 0x339   :  { %v2827_v61 = vrot.slane %v14468_v28, 3  ;;  %v11135_v58 = vsel %vm3361_vm12, %v10860_v14, %v14469_v16  ;;  %v14470_v10 = vld [vmem:[#allocation315_spill] sm:$0xff]  ;;  %14471 = vst [vmem:[#allocation149_spill] sm:$0xff] %v11142_v48  ;;  %v2829_v17 = vrot.slane %v14472_v38, 3  ;;  %v14473_v40 = vld [vmem:[#allocation316_spill] sm:$0xff]  ;;  %v14474_v28 = vld [vmem:[#allocation317_spill] sm:$0xff]  ;;  %v11166_v38 = vpop.permute.xlu0 %2705  ;;  %2923 = vrot.lane.b32.xlu1 %v2824_v44, %s7236_s1  ;;  %2925 = vrot.lane.b32.xlu0 %v2826_v23, %s7236_s1 }
 0x33a   :  { %v11140_v25 = vsel %vm3361_vm12, %v10869_v20, %v14470_v10  ;;  %v11149_v4 = vsel %vm3361_vm12, %v10874_v59, %v14473_v40  ;;  %v11154_v14 = vsel %vm3361_vm12, %v10879_v0, %v14474_v28  ;;  %v14475_v16 = vld [vmem:[#allocation318_spill] sm:$0xff]  ;;  %v14476_v10 = vld [vmem:[#allocation319_spill] sm:$0xff]  ;;  %14477 = vst [vmem:[#allocation150_spill] sm:$0xff] %v11166_v38  ;;  %v14478_v48 = vld [vmem:[#allocation320_spill] sm:$0xff] }
 0x33b   :  { %v11159_v20 = vsel %vm3361_vm12, %v10884_v26, %v14475_v16  ;;  %v11164_v41 = vsel %vm3361_vm12, %v10891_v42, %v14476_v10  ;;  %v11171_v59 = vsel %vm3361_vm12, %v10896_v57, %v14478_v48  ;;  %v14479_v40 = vld [vmem:[#allocation321_spill] sm:$0xff]  ;;  %v14480_v28 = vld [vmem:[#allocation322_spill] sm:$0xff]  ;;  %v14481_v16 = vld [vmem:[#allocation323_spill] sm:$0xff] }
 0x33c   :  { %v11176_v0 = vsel %vm3361_vm12, %v10901_v55, %v14479_v40  ;;  %v11181_v26 = vsel %vm3361_vm12, %v10906_v35, %v14480_v28  ;;  %v11186_v42 = vsel %vm3361_vm12, %v10912_v39, %v14481_v16  ;;  %v14482_v10 = vld [vmem:[#allocation324_spill] sm:$0xff]  ;;  %v14483_v48 = vld [vmem:[#allocation325_spill] sm:$0xff]  ;;  %v2828_v35 = vsel %vm2745_vm8, %v2825_v8, %v2827_v61  ;;  %v14484_v40 = vld [vmem:[#allocation103_spill] sm:$0xff] }
 0x33d   :  { %v11192_v57 = vsel %vm3361_vm12, %v10917_v29, %v14482_v10  ;;  %v11197_v55 = vsel %vm3361_vm12, %v10925_v37, %v14483_v48  ;;  %v2831_v28 = vrot.slane %v14484_v40, 3  ;;  %v14485_v39 = vld [vmem:[#allocation326_spill] sm:$0xff]  ;;  %v14486_v16 = vld [vmem:[#allocation327_spill] sm:$0xff]  ;;  %v11212_v10 = vpop.permute.xlu1 %2707  ;;  %v2830_v37 = vsel %vm2745_vm8, %v2827_v61, %v2829_v17  ;;  %v14488_v48 = vld [vmem:[#allocation105_spill] sm:$0xff]  ;;  %2927 = vrot.lane.b32.xlu1 %v2828_v35, %s7236_s1 }
 0x33e   :  { %v11205_v44 = vsel %vm3361_vm12, %v10930_v54, %v14485_v39  ;;  %v11210_v29 = vsel %vm3361_vm12, %v10939_v13, %v14486_v16  ;;  %14487 = vst [vmem:[#allocation151_spill] sm:$0xff] %v11212_v10  ;;  %v2833_v23 = vrot.slane %v14488_v48, 3  ;;  %v14489_v38 = vld [vmem:[#allocation328_spill] sm:$0xff]  ;;  %v14490_v40 = vld [vmem:[#allocation329_spill] sm:$0xff]  ;;  %v14491_v39 = vld [vmem:[#allocation330_spill] sm:$0xff]  ;;  %v11236_v48 = vpop.permute.xlu0 %2709  ;;  %2929 = vrot.lane.b32.xlu0 %v2830_v37, %s7236_s1 }
 0x33f   :  { %v11219_v8 = vsel %vm3361_vm12, %v10944_v7, %v14489_v38  ;;  %v11224_v54 = vsel %vm3361_vm12, %v10949_v30, %v14490_v40  ;;  %v11229_v13 = vsel %vm3361_vm12, %v10954_v50, %v14491_v39  ;;  %v14492_v16 = vld [vmem:[#allocation331_spill] sm:$0xff]  ;;  %14493 = vst [vmem:[#allocation152_spill] sm:$0xff] %v11236_v48  ;;  %v14494_v10 = vld [vmem:[#allocation332_spill] sm:$0xff]  ;;  %v14495_v38 = vld [vmem:[#allocation333_spill] sm:$0xff] }
 0x340   :  { %v11234_v61 = vsel %vm3361_vm12, %v10961_v45, %v14492_v16  ;;  %v11241_v7 = vsel %vm3361_vm12, %v10966_v27, %v14494_v10  ;;  %v11246_v30 = vsel %vm3361_vm12, %v10971_v11, %v14495_v38  ;;  %v14496_v40 = vld [vmem:[#allocation334_spill] sm:$0xff]  ;;  %v14497_v39 = vld [vmem:[#allocation335_spill] sm:$0xff]  ;;  %v14499_v16 = vld [vmem:[#allocation336_spill] sm:$0xff] }
 0x341   :  { %v11251_v50 = vsel %vm3361_vm12, %v10976_v56, %v14496_v40  ;;  %v11256_v45 = vsel %vm3361_vm12, %v10982_v52, %v14497_v39  ;;  %v11262_v27 = vsel %vm3361_vm12, %v10987_v21, %v14499_v16  ;;  %v14501_v10 = vld [vmem:[#allocation22_spill] sm:$0xff]  ;;  %v2832_v56 = vsel %vm2745_vm8, %v2829_v17, %v2831_v28  ;;  %v14502_v38 = vld [vmem:[#allocation108_spill] sm:$0xff]  ;;  %v14503_v52 = vld [vmem:[#allocation27_spill] sm:$0xff]  ;;  %v11282_v16 = vpop.permute.xlu1 %2711 }
 0x342   :  { %14498 = vst [vmem:[#allocation153_spill] sm:$0xff] %v11256_v45  ;;  %14500 = vst [vmem:[#allocation154_spill] sm:$0xff] %v11262_v27  ;;  %v11267_v11 = vsel %vm3464_vm13, %v11014_v49, %v14501_v10  ;;  %v2835_v40 = vrot.slane %v14502_v38, 3  ;;  %v11275_v35 = vsel %vm3464_vm13, %v11019_v63, %v14503_v52  ;;  %v14504_v39 = vld [vmem:[#allocation24_spill] sm:$0xff]  ;;  %v2834_v49 = vsel %vm2745_vm8, %v2831_v28, %v2833_v23  ;;  %v14506_v10 = vld [vmem:[#allocation110_spill] sm:$0xff] }
 0x343   :  { %v11280_v21 = vsel %vm3464_vm13, %v11024_v51, %v14504_v39  ;;  %14505 = vst [vmem:[#allocation155_spill] sm:$0xff] %v11282_v16  ;;  %v2837_v37 = vrot.slane %v14506_v10, 3  ;;  %v14507_v27 = vld [vmem:[#allocation28_spill] sm:$0xff]  ;;  %v14508_v38 = vld [vmem:[#allocation25_spill] sm:$0xff]  ;;  %v14509_v52 = vld [vmem:[#allocation31_spill] sm:$0xff]  ;;  %v11306_v10 = vpop.permute.xlu0 %2713  ;;  %2931 = vrot.lane.b32.xlu1 %v2832_v56, %s7236_s1  ;;  %2933 = vrot.lane.b32.xlu0 %v2834_v49, %s7236_s1 }
 0x344   :  { %v11289_v17 = vsel %vm3464_vm13, %v11031_v15, %v14507_v27  ;;  %v11294_v63 = vsel %vm3464_vm13, %v11036_v9, %v14508_v38  ;;  %v11299_v51 = vsel %vm3464_vm13, %v11041_v62, %v14509_v52  ;;  %v14510_v39 = vld [vmem:[#allocation29_spill] sm:$0xff]  ;;  %14511 = vst [vmem:[#allocation156_spill] sm:$0xff] %v11306_v10  ;;  %v14513_v27 = vld [vmem:[#allocation30_spill] sm:$0xff]  ;;  %v14514_v38 = vld [vmem:[#allocation36_spill] sm:$0xff] }
 0x345   :  { %v11304_v28 = vsel %vm3464_vm13, %v11046_v18, %v14510_v39  ;;  %v14512_v45 = vld [vmem:[#allocation33_spill] sm:$0xff]  ;;  %v11316_v9 = vsel %vm3464_vm13, %v11057_v60, %v14513_v27  ;;  %v11321_v62 = vsel %vm3464_vm13, %v11065_v6, %v14514_v38  ;;  %v14515_v52 = vld [vmem:[#allocation32_spill] sm:$0xff]  ;;  %v2836_v6 = vsel %vm2745_vm8, %v2833_v23, %v2835_v40  ;;  %v14524_v16 = vld [vmem:[#allocation39_spill] sm:$0xff] }
 0x346   :  { %v11311_v15 = vsel %vm3464_vm13, %v11052_v12, %v14512_v45  ;;  %v11326_v18 = vsel %vm3464_vm13, %v11070_v1, %v14515_v52  ;;  %v14516_v39 = vld [vmem:[#allocation37_spill] sm:$0xff]  ;;  %v14517_v45 = vld [vmem:[#allocation34_spill] sm:$0xff]  ;;  %v14518_v27 = vld [vmem:[#allocation112_spill] sm:$0xff]  ;;  %v2838_v49 = vsel %vm2745_vm8, %v2835_v40, %v2837_v37 }
 0x347   :  { %v11332_v12 = vsel %vm3464_vm13, %v11079_v46, %v14516_v39  ;;  %v11337_v60 = vsel %vm3464_vm13, %v11084_v31, %v14517_v45  ;;  %v2839_v38 = vrot.slane %v14518_v27, 3  ;;  %v11342_v1 = vld [vmem:[#allocation2 + $0x198] sm:$0x3f]  ;;  %v14519_v52 = vld [vmem:[#allocation38_spill] sm:$0xff]  ;;  %v14520_v46 = vld [vmem:[#allocation35_spill] sm:$0xff]  ;;  %v11354_v31 = vpop.permute.xlu1 %2715  ;;  %2935 = vrot.lane.b32.xlu1 %v2836_v6, %s7236_s1  ;;  %2937 = vrot.lane.b32.xlu0 %v2838_v49, %s7236_s1 }
 0x348   :  { %v11347_v56 = vsel %vm3464_vm13, %v11089_v33, %v14519_v52  ;;  %v11352_v39 = vsel %vm3464_vm13, %v11094_v22, %v14520_v46  ;;  %14521 = vst [vmem:[#allocation157_spill] sm:$0xff] %v11354_v31  ;;  %v14522_v45 = vld [vmem:[#allocation113_spill] sm:$0xff]  ;;  %v14523_v10 = vld [vmem:[#allocation40_spill] sm:$0xff]  ;;  %v11366_v33 = vsel %vm3464_vm13, %v11106_v32, %v14524_v16  ;;  %v14525_v52 = vld [vmem:[#allocation43_spill] sm:$0xff] }
 0x349   :  { %v2841_v23 = vrot.slane %v14522_v45, 3  ;;  %v11361_v27 = vsel %vm3464_vm13, %v11101_v47, %v14523_v10  ;;  %v11371_v22 = vsel %vm3464_vm13, %v11111_v36, %v14525_v52  ;;  %v14526_v46 = vld [vmem:[#allocation41_spill] sm:$0xff]  ;;  %v11378_v45 = vpop.permute.xlu0 %2717  ;;  %v25_v47 = vld [vmem:[%s13350_s4] sm:$0xff]  ;;  %v14529_v16 = vld [vmem:[#allocation42_spill] sm:$0xff] }
 0x34a   :  { %v11376_v40 = vsel %vm3464_vm13, %v11116_v3, %v14526_v46  ;;  %14527 = vst [vmem:[#allocation158_spill] sm:$0xff] %v11378_v45  ;;  %v14528_v10 = vld [vmem:[#allocation44_spill] sm:$0xff]  ;;  %v11391_v36 = vsel %vm3464_vm13, %v11127_v43, %v14529_v16  ;;  %v26_v45 = vld [vmem:[%s13350_s4 + $0x8] sm:$0xff]  ;;  %v14530_v31 = vld [vmem:[#allocation47_spill] sm:$0xff]  ;;  %vm125_vm14 = vcmp.ne.f32.partialorder %v25_v47, 0.0 }
 0x34b   :  { %v11386_v32 = vsel %vm3464_vm13, %v11122_v53, %v14528_v10  ;;  %v7179_v3 = vld [vmem:[#allocation2 + $0x190] sm:$0xff]  ;;  %v11401_v53 = vsel %vm3464_vm13, %v11135_v58, %v14530_v31  ;;  %v14531_v10 = vld [vmem:[#allocation45_spill] sm:$0xff]  ;;  %v28_v46 = vld [vmem:[%s13350_s4 + $0x18] sm:$0xff]  ;;  %v2842_v49 = vsel %vm2745_vm8, %v2839_v38, %v2841_v23  ;;  %vm126_vm15 = vcmp.ne.f32.partialorder %v26_v45, 0.0 }
 0x34c   :  { %v2843_v52 = vrot.slane %v7179_v3, 3  ;;  %v11406_v43 = vsel %vm3464_vm13, %v11140_v25, %v14531_v10  ;;  %v14532_v16 = vld [vmem:[#allocation49_spill] sm:$0xff]  ;;  %v2840_v3 = vsel %vm2745_vm8, %v2837_v37, %v2839_v38  ;;  %v14533_v58 = vld [vmem:[#allocation46_spill] sm:$0xff]  ;;  %v14534_v25 = vld [vmem:[#allocation51_spill] sm:$0xff]  ;;  %vm128_vm0 = vcmp.ne.f32.partialorder %v28_v46, 0.0  ;;  %2941 = vrot.lane.b32.xlu0 %v2842_v49, %s7236_s1 }
 0x34d   :  { %v11411_v6 = vsel %vm3464_vm13, %v11149_v4, %v14532_v16  ;;  %v11421_v31 = vsel %vm3464_vm13, %v11154_v14, %v14533_v58  ;;  %v11426_v10 = vsel %vm3464_vm13, %v11159_v20, %v14534_v25  ;;  %v11428_v4 = vpop.permute.xlu1 %2719  ;;  %v27_v37 = vld [vmem:[%s13350_s4 + $0x10] sm:$0xff]  ;;  %v14536_v16 = vld [vmem:[#allocation48_spill] sm:$0xff]  ;;  %v14537_v14 = vld [vmem:[#allocation53_spill] sm:$0xff]  ;;  %v11449_v38 = vpop.permute.xlu0 %2721  ;;  %2939 = vrot.lane.b32.xlu1 %v2840_v3, %s7236_s1 }
 0x34e   :  { %14535 = vst [vmem:[#allocation159_spill] sm:$0xff] %v11428_v4  ;;  %v11437_v48 = vsel %vm3464_vm13, %v11164_v41, %v14536_v16  ;;  %v11442_v58 = vsel %vm3464_vm13, %v11171_v59, %v14537_v14  ;;  %v14538_v20 = vld [vmem:[#allocation50_spill] sm:$0xff]  ;;  %14540 = vst [vmem:[#allocation161_spill] sm:$0xff] %v11449_v38  ;;  %v30_v4 = vld [vmem:[%s13350_s4 + $0x28] sm:$0xff]  ;;  %v14543_v14 = vrot.slane %v11342_v1, 3  ;;  %vm127_vm1 = vcmp.ne.f32.partialorder %v27_v37, 0.0 }
 0x34f   :  { %v11447_v25 = vsel %vm3464_vm13, %v11176_v0, %v14538_v20  ;;  %v29_v41 = vld [vmem:[%s13350_s4 + $0x20] sm:$0xff]  ;;  %v14541_v16 = vld [vmem:[#allocation55_spill] sm:$0xff]  ;;  %v2844_v0 = vsel %vm2745_vm8, %v2841_v23, %v2843_v52  ;;  %v31_v2 = vld [vmem:[%s13350_s4 + $0x30] sm:$0xff]  ;;  %vm130_vm2 = vcmp.ne.f32.partialorder %v30_v4, 0.0 }
 0x350   :  { %14539 = vst [vmem:[#allocation160_spill] sm:$0xff] %v11447_v25  ;;  %v11460_v59 = vsel %vm3464_vm13, %v11181_v26, %v14541_v16  ;;  %v2846_v20 = vsel %vm2745_vm8, %v2843_v52, %v14543_v14  ;;  %v32_v38 = vld [vmem:[%s13350_s4 + $0x38] sm:$0xff]  ;;  %v14544_v25 = vld [vmem:[#allocation52_spill] sm:$0xff]  ;;  %v14546_v3 = vld [vmem:[#allocation58_spill] sm:$0xff]  ;;  %v14548_v52 = vmov 0   ;;  %vm129_vm3 = vcmp.ne.f32.partialorder %v29_v41, 0.0 }
 0x351   :  { %14542 = vst [vmem:[#allocation162_spill] sm:$0xff] %v11460_v59  ;;  %v11476_v26 = vsel %vm3464_vm13, %v11186_v42, %v14544_v25  ;;  %v11481_v23 = vsel %vm3464_vm13, %v11192_v57, %v14546_v3  ;;  %v4780_v16 = vsel %vm125_vm14, 1, %v14548_v52  ;;  %v34_v14 = vld [vmem:[%s13350_s4 + $0x48] sm:$0xff]  ;;  %v14549_v59 = vld [vmem:[#allocation54_spill] sm:$0xff]  ;;  %v11494_v25 = vpop.permute.xlu1 %2723  ;;  %v11498_v57 = vsel %vm126_vm15, 1, %v14548_v52  ;;  %v33_v47 = vld [vmem:[%s13350_s4 + $0x40] sm:$0xff]  ;;  %2943 = vrot.lane.b32.xlu1 %v2844_v0, %s7236_s1  ;;  %2945 = vrot.lane.b32.xlu0 %v2846_v20, %s7236_s1 }
 0x352   :  { %14545 = vst [vmem:[#allocation163_spill] sm:$0xff] %v11476_v26  ;;  %14547 = vst [vmem:[#allocation164_spill] sm:$0xff] %v11481_v23  ;;  %v11492_v42 = vsel %vm3464_vm13, %v11197_v55, %v14549_v59  ;;  %v14552_v49 = vld [vmem:[#allocation59_spill] sm:$0xff]  ;;  %v11508_v55 = vpop.permute.xlu0 %2725  ;;  %v11512_v59 = vsel %vm128_vm0, 1, %v14548_v52  ;;  %vm132_vm6 = vcmp.ne.f32.partialorder %v32_v38, 0.0  ;;  %vm131_vm8 = vcmp.ne.f32.partialorder %v31_v2, 0.0 }
 0x353   :  { %14550 = vst [vmem:[#allocation165_spill] sm:$0xff] %v11492_v42  ;;  %14551 = vst [vmem:[#allocation166_spill] sm:$0xff] %v11494_v25  ;;  %v11506_v3 = vsel %vm3464_vm13, %v11205_v44, %v14552_v49  ;;  %v14555_v45 = vld [vmem:[#allocation56_spill] sm:$0xff]  ;;  %v11527_v44 = vsel %vm127_vm1, 1, %v14548_v52  ;;  %vm134_vm9 = vcmp.ne.f32.partialorder %v34_v14, 0.0  ;;  %v36_v46 = vld [vmem:[%s13350_s4 + $0x58] sm:$0xff] }
 0x354   :  { %14553 = vst [vmem:[#allocation167_spill] sm:$0xff] %v11506_v3  ;;  %14554 = vst [vmem:[#allocation168_spill] sm:$0xff] %v11508_v55  ;;  %v11517_v25 = vsel %vm3464_vm13, %v11210_v29, %v14555_v45  ;;  %v14557_v42 = vld [vmem:[#allocation60_spill] sm:$0xff]  ;;  %v35_v29 = vld [vmem:[%s13350_s4 + $0x50] sm:$0xff]  ;;  %v11543_v37 = vsel %vm130_vm2, 1, %v14548_v52  ;;  %v11547_v0 = vsel %vm129_vm3, 1, %v14548_v52 }
 0x355   :  { %14556 = vst [vmem:[#allocation169_spill] sm:$0xff] %v11517_v25  ;;  %v11522_v23 = vsel %vm3464_vm13, %v11219_v8, %v14557_v42  ;;  %v14559_v49 = vld [vmem:[#allocation57_spill] sm:$0xff]  ;;  %vm133_vm14 = vcmp.ne.f32.partialorder %v33_v47, 0.0  ;;  %v14561_v45 = vld [vmem:[#allocation63_spill] sm:$0xff]  ;;  %v11569_v55 = vsel %vm132_vm6, 1, %v14548_v52  ;;  %vm136_vm15 = vcmp.ne.f32.partialorder %v36_v46, 0.0  ;;  %4881 = vperm.xlu0 %6984, %v4780_v16  }
 0x356   :  { %14558 = vst [vmem:[#allocation170_spill] sm:$0xff] %v11522_v23  ;;  %v11538_v8 = vsel %vm3464_vm13, %v11224_v54, %v14559_v49  ;;  %v38_v42 = vld [vmem:[%s13350_s4 + $0x68] sm:$0xff]  ;;  %v37_v54 = vld [vmem:[%s13350_s4 + $0x60] sm:$0xff]  ;;  %v11558_v20 = vsel %vm3464_vm13, %v11229_v13, %v14561_v45  ;;  %v11565_v49 = vpop.permute.xlu1 %2727  ;;  %v40_v13 = vld [vmem:[%s13350_s4 + $0x78] sm:$0xff]  ;;  %v11589_v2 = vpop.permute.xlu0 %2729  ;;  %vm135_vm0 = vcmp.ne.f32.partialorder %v35_v29, 0.0  ;;  %v14571_v14 = vrot.slane %v11342_v1, 3 }
 0x357   :  { %14560 = vst [vmem:[#allocation171_spill] sm:$0xff] %v11538_v8  ;;  %14562 = vst [vmem:[#allocation172_spill] sm:$0xff] %v11558_v20  ;;  %v14563_v4 = vld [vmem:[#allocation61_spill] sm:$0xff]  ;;  %v11573_v8 = vsel %vm131_vm8, 1, %v14548_v52  ;;  %v39_v45 = vld [vmem:[%s13350_s4 + $0x70] sm:$0xff]  ;;  %vm138_vm1 = vcmp.ne.f32.partialorder %v38_v42, 0.0 }
 0x358   :  { %v11563_v41 = vsel %vm3464_vm13, %v11234_v61, %v14563_v4  ;;  %14565 = vst [vmem:[#allocation174_spill] sm:$0xff] %v11565_v49  ;;  %v42_v61 = vld [vmem:[%s13350_s4 + $0x88] sm:$0xff]  ;;  %v14566_v4 = vld [vmem:[#allocation66_spill] sm:$0xff]  ;;  %14568 = vst [vmem:[#allocation176_spill] sm:$0xff] %v11589_v2  ;;  %v11593_v49 = vsel %vm134_vm9, 1, %v14548_v52  ;;  %2947 = vrot.lane.b32.xlu1 %v14571_v14, %s7236_s1  ;;  %vm137_vm2 = vcmp.ne.f32.partialorder %v37_v54, 0.0 }
 0x359   :  { %14564 = vst [vmem:[#allocation173_spill] sm:$0xff] %v11563_v41  ;;  %v11587_v38 = vsel %vm3464_vm13, %v11241_v7, %v14566_v4  ;;  %v41_v41 = vld [vmem:[%s13350_s4 + $0x80] sm:$0xff]  ;;  %v44_v20 = vld [vmem:[%s13350_s4 + $0x98] sm:$0xff]  ;;  %v14569_v23 = vld [vmem:[#allocation62_spill] sm:$0xff]  ;;  %v11611_v4 = vsel %vm133_vm14, 1, %v14548_v52  ;;  %vm140_vm3 = vcmp.ne.f32.partialorder %v40_v13, 0.0  ;;  %4890 = vperm.xlu0 %6984, %v11512_v59  }
 0x35a   :  { %14567 = vst [vmem:[#allocation175_spill] sm:$0xff] %v11587_v38  ;;  %v11604_v7 = vsel %vm3464_vm13, %v11246_v30, %v14569_v23  ;;  %v43_v2 = vld [vmem:[%s13350_s4 + $0x90] sm:$0xff]  ;;  %v46_v38 = vld [vmem:[%s13350_s4 + $0xa8] sm:$0xff]  ;;  %v14572_v30 = vld [vmem:[#allocation67_spill] sm:$0xff]  ;;  %vm139_vm6 = vcmp.ne.f32.partialorder %v39_v45, 0.0  ;;  %vm142_vm8 = vcmp.ne.f32.partialorder %v42_v61, 0.0  ;;  %v11627_v47 = vpop.permute.xlu1 %2731 }
 0x35b   :  { %14570 = vst [vmem:[#allocation177_spill] sm:$0xff] %v11604_v7  ;;  %v11622_v23 = vsel %vm3464_vm13, %v11251_v50, %v14572_v30  ;;  %v45_v1 = vld [vmem:[%s13350_s4 + $0xa0] sm:$0xff]  ;;  %14574 = vst [vmem:[#allocation179_spill] sm:$0xff] %v11627_v47  ;;  %v11631_v14 = vsel %vm136_vm15, 1, %v14548_v52  ;;  %v11635_v7 = vsel %vm135_vm0, 1, %v14548_v52  ;;  %vm141_vm9 = vcmp.ne.f32.partialorder %v41_v41, 0.0  ;;  %v11643_v30 = vpop.permute.xlu0 %2733 }
 0x35c   :  { %14573 = vst [vmem:[#allocation178_spill] sm:$0xff] %v11622_v23  ;;  %vm144_vm14 = vcmp.ne.f32.partialorder %v44_v20, 0.0  ;;  %v48_v50 = vld [vmem:[%s13350_s4 + $0xb8] sm:$0xff]  ;;  %v47_v16 = vld [vmem:[%s13350_s4 + $0xb0] sm:$0xff]  ;;  %14575 = vst [vmem:[#allocation180_spill] sm:$0xff] %v11643_v30  ;;  %v11647_v46 = vsel %vm138_vm1, 1, %v14548_v52  ;;  %4884 = vperm.xlu1 %6985, %v11498_v57  }
 0x35d   :  { %v11651_v29 = vsel %vm137_vm2, 1, %v14548_v52  ;;  %vm143_vm15 = vcmp.ne.f32.partialorder %v43_v2, 0.0  ;;  %vm146_vm0 = vcmp.ne.f32.partialorder %v46_v38, 0.0  ;;  %v11656_v47 = vsel %vm140_vm3, 1, %v14548_v52  ;;  %v50_v54 = vld [vmem:[%s13350_s4 + $0xc8] sm:$0xff]  ;;  %v49_v57 = vld [vmem:[%s13350_s4 + $0xc0] sm:$0xff]  ;;  %4896 = vperm.xlu0 %6984, %v11543_v37  }
 0x35e   :  { %v11660_v30 = vsel %vm139_vm6, 1, %v14548_v52  ;;  %v11664_v42 = vsel %vm142_vm8, 1, %v14548_v52  ;;  %vm145_vm1 = vcmp.ne.f32.partialorder %v45_v1, 0.0  ;;  %vm3773_vm2 = vcmask 293888   ;;  %v14576_v61 = vld [vmem:[#allocation87_spill] sm:$0xff]  ;;  %v14577_v25 = vld [vmem:[#allocation98_spill] sm:$0xff]  ;;  %v11687_v59 = vpop.permute.xlu1 %2735 }
 0x35f   :  { %v11675_v13 = vsel %vm141_vm9, 1, %v14548_v52  ;;  %v11679_v45 = vsel %vm144_vm14, 1, %v14548_v52  ;;  %vm148_vm3 = vcmp.ne.f32.partialorder %v48_v50, 0.0  ;;  %vm147_vm6 = vcmp.ne.f32.partialorder %v47_v16, 0.0  ;;  %14578 = vst [vmem:[#allocation181_spill] sm:$0xff] %v11687_v59  ;;  %v52_v26 = vld [vmem:[%s13350_s4 + $0xd8] sm:$0xff] }
 0x360   :  { %v3569_v23 = vsel %vm3567_vm4, %v11267_v11, %v14576_v61  ;;  %v3571_v3 = vsel %vm3567_vm4, %v11275_v35, %v14577_v25  ;;  %v11691_v41 = vsel %vm143_vm15, 1, %v14548_v52  ;;  %v11695_v20 = vsel %vm146_vm0, 1, %v14548_v52  ;;  %v51_v11 = vld [vmem:[%s13350_s4 + $0xd0] sm:$0xff]  ;;  %v14579_v61 = vld [vmem:[#allocation107_spill] sm:$0xff]  ;;  %v11708_v25 = vpop.permute.xlu0 %2737  ;;  %v54_v2 = vld [vmem:[%s13350_s4 + $0xe8] sm:$0xff]  ;;  %4887 = vperm.xlu1 %6985, %v11527_v44  }
 0x361   :  { %v11706_v35 = vsel %vm3567_vm4, %v11280_v21, %v14579_v61  ;;  %14580 = vst [vmem:[#allocation182_spill] sm:$0xff] %v11708_v25  ;;  %v11712_v38 = vsel %vm145_vm1, 1, %v14548_v52  ;;  %vm150_vm8 = vcmp.ne.f32.partialorder %v50_v54, 0.0  ;;  %vm149_vm9 = vcmp.ne.f32.partialorder %v49_v57, 0.0  ;;  %v53_v59 = vld [vmem:[%s13350_s4 + $0xe0] sm:$0xff]  ;;  %v14582_v19 = vld [vmem:[#allocation114_spill] sm:$0xff]  ;;  %4902 = vperm.xlu0 %6984, %v11569_v55  }
 0x362   :  { %14581 = vst [vmem:[#allocation183_spill] sm:$0xff] %v11712_v38  ;;  %v11723_v21 = vsel %vm3567_vm4, %v11289_v17, %v14582_v19  ;;  %v14583_v61 = vld [vmem:[#allocation115_spill] sm:$0xff]  ;;  %v11733_v25 = vsel %vm148_vm3, 1, %v14548_v52  ;;  %v11737_v38 = vsel %vm147_vm6, 1, %v14548_v52  ;;  %v55_v17 = vld [vmem:[%s13350_s4 + $0xf0] sm:$0xff]  ;;  %v14587_v50 = vld [vmem:[#allocation117_spill] sm:$0xff] }
 0x363   :  { %v11728_v1 = vsel %vm3567_vm4, %v11294_v63, %v14583_v61  ;;  %14584 = vst [vmem:[#allocation184_spill] sm:$0xff] %v11733_v25  ;;  %14585 = vst [vmem:[#allocation185_spill] sm:$0xff] %v11737_v38  ;;  %v56_v19 = vld [vmem:[%s13350_s4 + $0xf8] sm:$0xff]  ;;  %v14586_v63 = vld [vmem:[#allocation116_spill] sm:$0xff]  ;;  %v11753_v61 = vsel %vm3567_vm4, %v11304_v28, %v14587_v50  ;;  %vm152_vm14 = vcmp.ne.f32.partialorder %v52_v26, 0.0  ;;  %vm151_vm15 = vcmp.ne.f32.partialorder %v51_v11, 0.0  ;;  %v11759_v38 = vpop.permute.xlu1 %2739 }
 0x364   :  { %v11748_v44 = vsel %vm3567_vm4, %v11299_v51, %v14586_v63  ;;  %v58_v16 = vld [vmem:[%s13350_s4 + $0x108] sm:$0xff]  ;;  %14588 = vst [vmem:[#allocation186_spill] sm:$0xff] %v11759_v38  ;;  %v11763_v25 = vsel %vm150_vm8, 1, %v14548_v52  ;;  %v11767_v51 = vsel %vm149_vm9, 1, %v14548_v52  ;;  %vm154_vm0 = vcmp.ne.f32.partialorder %v54_v2, 0.0  ;;  %v57_v28 = vld [vmem:[%s13350_s4 + $0x100] sm:$0xff]  ;;  %v11782_v38 = vpop.permute.xlu0 %2741  ;;  %4893 = vperm.xlu1 %6985, %v11547_v0  }
 0x365   :  { %vm153_vm1 = vcmp.ne.f32.partialorder %v53_v59, 0.0  ;;  %v14589_v37 = vld [vmem:[#allocation118_spill] sm:$0xff]  ;;  %v14590_v50 = vld [vmem:[#allocation119_spill] sm:$0xff]  ;;  %14591 = vst [vmem:[#allocation187_spill] sm:$0xff] %v11782_v38  ;;  %vm156_vm3 = vcmp.ne.f32.partialorder %v56_v19, 0.0  ;;  %vm155_vm6 = vcmp.ne.f32.partialorder %v55_v17, 0.0  ;;  %4908 = vperm.xlu0 %6984, %v11593_v49  }
 0x366   :  { %v11775_v63 = vsel %vm3567_vm4, %v11311_v15, %v14589_v37  ;;  %v11780_v54 = vsel %vm3567_vm4, %v11316_v9, %v14590_v50  ;;  %v14592_v57 = vld [vmem:[#allocation120_spill] sm:$0xff]  ;;  %v11792_v15 = vsel %vm152_vm14, 1, %v14548_v52  ;;  %v11796_v2 = vsel %vm151_vm15, 1, %v14548_v52  ;;  %v14593_v9 = vld [vmem:[#allocation121_spill] sm:$0xff]  ;;  %v60_v26 = vld [vmem:[%s13350_s4 + $0x118] sm:$0xff] }
 0x367   :  { %v11787_v59 = vsel %vm3567_vm4, %v11321_v62, %v14592_v57  ;;  %vm158_vm8 = vcmp.ne.f32.partialorder %v58_v16, 0.0  ;;  %v11801_v37 = vsel %vm3567_vm4, %v11326_v18, %v14593_v9  ;;  %v11805_v62 = vsel %vm154_vm0, 1, %v14548_v52  ;;  %v14596_v11 = vld [vmem:[#allocation125_spill] sm:$0xff]  ;;  %v14597_v18 = vld [vmem:[#allocation126_spill] sm:$0xff]  ;;  %v2848_v57 = vpop.permute.xlu1 %2847 }
 0x368   :  { %14594 = vst [vmem:[#allocation188_spill] sm:$0xff] %v11805_v62  ;;  %v11808_v0 = vsel %vm153_vm1, 1, %v14548_v52  ;;  %vm157_vm9 = vcmp.ne.f32.partialorder %v57_v28, 0.0  ;;  %v11816_v50 = vsel %vm3567_vm4, %v11332_v12, %v14596_v11  ;;  %v11821_v55 = vsel %vm3567_vm4, %v11337_v60, %v14597_v18  ;;  %v14601_v12 = vld [vmem:[#allocation128_spill] sm:$0xff]  ;;  %v2850_v18 = vpop.permute.xlu0 %2849  ;;  %v59_v17 = vld [vmem:[%s13350_s4 + $0x110] sm:$0xff]  ;;  %4899 = vperm.xlu1 %6985, %v11573_v8  }
 0x369   :  { %14595 = vst [vmem:[#allocation189_spill] sm:$0xff] %v11808_v0  ;;  %v11825_v9 = vsel %vm156_vm3, 1, %v14548_v52  ;;  %v11829_v38 = vsel %vm155_vm6, 1, %v14548_v52  ;;  %v14600_v0 = vld [vmem:[#allocation127_spill] sm:$0xff]  ;;  %v11839_v11 = vsel %vm3567_vm4, %v11352_v39, %v14601_v12  ;;  %v3672_v60 = vsel %vm3670_vm5, %v3569_v23, %v2848_v57  ;;  %v14604_v23 = vld [vmem:[#allocation129_spill] sm:$0xff]  ;;  %4914 = vperm.xlu0 %6984, %v11631_v14  }
 0x36a   :  { %14598 = vst [vmem:[#allocation190_spill] sm:$0xff] %v11825_v9  ;;  %14599 = vst [vmem:[#allocation191_spill] sm:$0xff] %v11829_v38  ;;  %v11834_v62 = vsel %vm3567_vm4, %v11347_v56, %v14600_v0  ;;  %v11844_v19 = vsel %vm158_vm8, 1, %v14548_v52  ;;  %v3775_v38 = vsel %vm3773_vm2, %v3672_v60, 0  ;;  %v3674_v56 = vsel %vm3670_vm5, %v3571_v3, %v2850_v18  ;;  %v14605_v60 = vld [vmem:[#allocation130_spill] sm:$0xff] }
 0x36b   :  { %14602 = vst [vmem:[#allocation192_spill] sm:$0xff] %v11844_v19  ;;  %v11854_v39 = vsel %vm157_vm9, 1, %v14548_v52  ;;  %vm160_vm14 = vcmp.ne.f32.partialorder %v60_v26, 0.0  ;;  %v11859_v16 = vsel %vm3567_vm4, %v11361_v27, %v14604_v23  ;;  %v3842_v0 = vshrl.u32 %v3775_v38, 16  ;;  %v2852_v18 = vpop.permute.xlu1 %2851 }
 0x36c   :  { %14603 = vst [vmem:[#allocation193_spill] sm:$0xff] %v11854_v39  ;;  %v3845_v57 = vshll.u32 %v3775_v38, 16  ;;  %v3776_v12 = vsel %vm3773_vm2, %v3674_v56, 0  ;;  %v11866_v3 = vsel %vm3567_vm4, %v11366_v33, %v14605_v60  ;;  %vm159_vm15 = vcmp.ne.f32.partialorder %v59_v17, 0.0  ;;  %v2854_v23 = vpop.permute.xlu0 %2853  ;;  %4905 = vperm.xlu1 %6985, %v11611_v4  }
 0x36d   :  { %v3849_v8 = vshrl.u32 %v3776_v12, 16  ;;  %v3852_v28 = vshll.u32 %v3776_v12, 16  ;;  %v3844_v26 = vrot.slane %v3842_v0, 2  ;;  %v3676_v27 = vsel %vm3670_vm5, %v11706_v35, %v2852_v18  ;;  %4920 = vperm.xlu0 %6984, %v11647_v46   ;;  %v64_v46 = vld [vmem:[%s13350_s4 + $0x138] sm:$0xff] }
 0x36e   :  { %v3847_v39 = vrot.slane %v3845_v57, 3  ;;  %v11871_v38 = vsel %vm160_vm14, 1, %v14548_v52  ;;  %v3777_v19 = vsel %vm3773_vm2, %v3676_v27, 0  ;;  %v3678_v33 = vsel %vm3670_vm5, %v11723_v21, %v2854_v23  ;;  %v14608_v57 = vld [vmem:[#allocation131_spill] sm:$0xff] }
 0x36f   :  { %14606 = vst [vmem:[#allocation90_spill] sm:$0xff] %v11871_v38  ;;  %v3851_v56 = vrot.slane %v3849_v8, 2  ;;  %v3854_v49 = vrot.slane %v3852_v28, 3  ;;  %v3857_v12 = vshrl.u32 %v3777_v19, 16  ;;  %v3860_v17 = vshll.u32 %v3777_v19, 16  ;;  %v2856_v18 = vpop.permute.xlu1 %2855 }
 0x370   :  { %v3778_v0 = vsel %vm3773_vm2, %v3678_v33, 0  ;;  %v11880_v35 = vsel %vm159_vm15, 1, %v14548_v52  ;;  %v11885_v60 = vsel %vm3567_vm4, %v11371_v22, %v14608_v57  ;;  %v3680_v19 = vsel %vm3670_vm5, %v11728_v1, %v2856_v18  ;;  %v2858_v23 = vpop.permute.xlu0 %2857  ;;  %4911 = vperm.xlu1 %6985, %v11635_v7   ;;  %v62_v22 = vld [vmem:[%s13350_s4 + $0x128] sm:$0xff]  ;;  %v14609_v57 = vld [vmem:[#allocation132_spill] sm:$0xff] }
 0x371   :  { %14607 = vst [vmem:[#allocation194_spill] sm:$0xff] %v11880_v35  ;;  %v3865_v8 = vshrl.u32 %v3778_v0, 16  ;;  %v3868_v28 = vshll.u32 %v3778_v0, 16  ;;  %v3855_v21 = vor.u32 %v3854_v49, %v3851_v56  ;;  %v3859_v27 = vrot.slane %v3857_v12, 2  ;;  %v61_v56 = vld [vmem:[%s13350_s4 + $0x120] sm:$0xff]  ;;  %4926 = vperm.xlu0 %6984, %v11656_v47  }
 0x372   :  { %v3862_v4 = vrot.slane %v3860_v17, 3  ;;  %v3848_v33 = vor.u32 %v3847_v39, %v3844_v26  ;;  %v3779_v35 = vsel %vm3773_vm2, %v3680_v19, 0  ;;  %v3682_v9 = vsel %vm3670_vm5, %v11748_v44, %v2858_v23 }
 0x373   :  { %v3867_v14 = vrot.slane %v3865_v8, 2  ;;  %v3870_v38 = vrot.slane %v3868_v28, 3  ;;  %v3873_v1 = vshrl.u32 %v3779_v35, 16  ;;  %v3876_v49 = vshll.u32 %v3779_v35, 16  ;;  %v2860_v17 = vpop.permute.xlu1 %2859 }
 0x374   :  { %v3780_v39 = vsel %vm3773_vm2, %v3682_v9, 0  ;;  %v3856_v26 = vsel %vm2427_vm7, %v3848_v33, %v3855_v21  ;;  %v3863_v7 = vor.u32 %v3862_v4, %v3859_v27  ;;  %v11905_v8 = vsel %vm3567_vm4, %v11376_v40, %v14609_v57  ;;  %v2862_v28 = vpop.permute.xlu0 %2861  ;;  %4917 = vperm.xlu1 %6985, %v11651_v29   ;;  %v63_v40 = vld [vmem:[%s13350_s4 + $0x130] sm:$0xff]  ;;  %v65_v29 = vld [vmem:[%s13350_s4 + $0x140] sm:$0xff] }
 0x375   :  { %v3881_v12 = vshrl.u32 %v3780_v39, 16  ;;  %v3884_v44 = vshll.u32 %v3780_v39, 16  ;;  %6856 = vmatprep.mubr.bf16.mxu0 %v3856_v26  ;;  %v3871_v0 = vor.u32 %v3870_v38, %v3867_v14  ;;  %v3684_v35 = vsel %vm3670_vm5, %v11753_v61, %v2860_v17  ;;  %v66_v61 = vld [vmem:[%s13350_s4 + $0x148] sm:$0xff]  ;;  %4932 = vperm.xlu0 %6984, %v11664_v42  }
 0x376   :  { %vm162_vm0 = vcmp.ne.f32.partialorder %v62_v22, 0.0  ;;  %vm161_vm1 = vcmp.ne.f32.partialorder %v61_v56, 0.0  ;;  %v3875_v9 = vrot.slane %v3873_v1, 2  ;;  %v3878_v18 = vrot.slane %v3876_v49, 3 }
 0x377   :  { %v3883_v19 = vrot.slane %v3881_v12, 2  ;;  %v3864_v38 = vsel %vm2427_vm7, %v3855_v21, %v3863_v7  ;;  %v3886_v27 = vrot.slane %v3884_v44, 3  ;;  %v3781_v4 = vsel %vm3773_vm2, %v3684_v35, 0  ;;  %v2864_v14 = vpop.permute.xlu1 %2863  ;;  %v68_v12 = vld [vmem:[%s13350_s4 + $0x158] sm:$0xff] }
 0x378   :  { %6857 = vmatmul.mubr.bf16.vlgmr.msra.gmra.mrb[0].mxu0 %v3864_v38  ;;  %v3686_v23 = vsel %vm3670_vm5, %v11775_v63, %v2862_v28  ;;  %v3872_v33 = vsel %vm2427_vm7, %v3863_v7, %v3871_v0  ;;  %v11931_v1 = vsel %vm162_vm0, 1, %v14548_v52  ;;  %v11935_v49 = vsel %vm161_vm1, 1, %v14548_v52  ;;  %v2866_v39 = vpop.permute.xlu0 %2865  ;;  %4923 = vperm.xlu1 %6985, %v11660_v30   ;;  %v14610_v30 = vld [vmem:[#allocation137_spill] sm:$0xff]  ;;  %v14611_v7 = vld [vmem:[#allocation138_spill] sm:$0xff]  ;;  %v69_v38 = vld [vmem:[%s13350_s4 + $0x160] sm:$0xff] }
 0x379   :  { %v3782_v21 = vsel %vm3773_vm2, %v3686_v23, 0  ;;  %6860 = vmatprep.mubr.bf16.mxu0 %v3872_v33  ;;  %vm164_vm3 = vcmp.ne.f32.partialorder %v64_v46, 0.0  ;;  %v11940_v47 = vsel %vm3567_vm4, %v11386_v32, %v10725_v24  ;;  %v11945_v63 = vsel %vm3567_vm4, %v11391_v36, %v10749_v34  ;;  %v67_v36 = vld [vmem:[%s13350_s4 + $0x150] sm:$0xff]  ;;  %4938 = vperm.xlu0 %6984, %v11679_v45   ;;  %v14613_v33 = vld [vmem:[#allocation140_spill] sm:$0xff] }
 0x37a   :  { %vm163_vm6 = vcmp.ne.f32.partialorder %v63_v40, 0.0  ;;  %vm166_vm8 = vcmp.ne.f32.partialorder %v66_v61, 0.0  ;;  %v3889_v22 = vshrl.u32 %v3781_v4, 16  ;;  %v3892_v26 = vshll.u32 %v3781_v4, 16 }
 0x37b   :  { %v3879_v56 = vor.u32 %v3878_v18, %v3875_v9  ;;  %vm165_vm9 = vcmp.ne.f32.partialorder %v65_v29, 0.0  ;;  %v3897_v24 = vshrl.u32 %v3782_v21, 16  ;;  %v3900_v32 = vshll.u32 %v3782_v21, 16  ;;  %v2868_v35 = vpop.permute.xlu1 %2867 }
 0x37c   :  { %v11952_v44 = vor.u32 %v3886_v27, %v3883_v19  ;;  %v11956_v34 = vsel %vm164_vm3, 1, %v14548_v52  ;;  %v11964_v17 = vsel %vm3567_vm4, %v11401_v53, %v14610_v30  ;;  %v11969_v57 = vsel %vm3567_vm4, %v11406_v43, %v14611_v7  ;;  %v2870_v9 = vpop.permute.xlu0 %2869  ;;  %4929 = vperm.xlu1 %6985, %v11675_v13   ;;  %v72_v13 = vld [vmem:[%s13350_s4 + $0x178] sm:$0xff]  ;;  %v14615_v7 = vld [vmem:[#allocation142_spill] sm:$0xff] }
 0x37d   :  { %v3688_v42 = vsel %vm3670_vm5, %v11780_v54, %v2864_v14  ;;  %v11975_v28 = vsel %vm163_vm6, 1, %v14548_v52  ;;  %v3690_v46 = vsel %vm3670_vm5, %v11787_v59, %v2866_v39  ;;  %v11981_v53 = vsel %vm166_vm8, 1, %v14548_v52  ;;  %v70_v59 = vld [vmem:[%s13350_s4 + $0x168] sm:$0xff]  ;;  %4944 = vperm.xlu0 %6984, %v11695_v20  }
 0x37e   :  { %v11985_v43 = vsel %vm165_vm9, 1, %v14548_v52  ;;  %vm168_vm14 = vcmp.ne.f32.partialorder %v68_v12, 0.0  ;;  %v3891_v18 = vrot.slane %v3889_v22, 2  ;;  %v3894_v54 = vrot.slane %v3892_v26, 3  ;;  %v14614_v39 = vld [vmem:[#allocation141_spill] sm:$0xff]  ;;  %v71_v12 = vld [vmem:[%s13350_s4 + $0x170] sm:$0xff] }
 0x37f   :  { %v3880_v19 = vsel %vm2427_vm7, %v3871_v0, %v3879_v56  ;;  %vm167_vm15 = vcmp.ne.f32.partialorder %v67_v36, 0.0  ;;  %v3899_v40 = vrot.slane %v3897_v24, 2  ;;  %v3902_v61 = vrot.slane %v3900_v32, 3  ;;  %v14612_v0 = vld [vmem:[#allocation139_spill] sm:$0xff]  ;;  %v2872_v14 = vpop.permute.xlu1 %2871 }
 0x380   :  { %v3783_v27 = vsel %vm3773_vm2, %v3688_v42, 0  ;;  %6861 = vmatmul.mubr.bf16.gmra.mrb[4].mxu0 %v3880_v19  ;;  %v3888_v4 = vsel %vm2427_vm7, %v3879_v56, %v11952_v44  ;;  %v12005_v23 = vsel %vm3567_vm4, %v11411_v6, %v14612_v0  ;;  %v12010_v29 = vsel %vm3567_vm4, %v11421_v31, %v14613_v33  ;;  %v2874_v6 = vpop.permute.xlu0 %2873  ;;  %4935 = vperm.xlu1 %6985, %v11691_v41   ;;  %v74_v19 = vld [vmem:[%s13350_s4 + $0x188] sm:$0xff]  ;;  %v14619_v33 = vld [vmem:[#allocation184_spill] sm:$0xff] }
 0x381   :  { %v3784_v21 = vsel %vm3773_vm2, %v3690_v46, 0  ;;  %6864 = vmatprep.mubr.bf16.mxu0 %v3888_v4  ;;  %v12015_v45 = vsel %vm168_vm14, 1, %v14548_v52  ;;  %v12020_v22 = vsel %vm3567_vm4, %v11426_v10, %v14614_v39  ;;  %v12024_v26 = vsel %vm167_vm15, 1, %v14548_v52  ;;  %4950 = vperm.xlu0 %6984, %v14619_v33   ;;  %v14621_v39 = vld [vmem:[#allocation162_spill] sm:$0xff] }
 0x382   :  { %vm170_vm0 = vcmp.ne.f32.partialorder %v70_v59, 0.0  ;;  %vm169_vm1 = vcmp.ne.f32.partialorder %v69_v38, 0.0  ;;  %v3905_v31 = vshrl.u32 %v3783_v27, 16  ;;  %v3908_v56 = vshll.u32 %v3783_v27, 16  ;;  %v73_v59 = vld [vmem:[%s13350_s4 + $0x180] sm:$0xff] }
 0x383   :  { %v3895_v24 = vor.u32 %v3894_v54, %v3891_v18  ;;  %vm172_vm3 = vcmp.ne.f32.partialorder %v72_v13, 0.0  ;;  %v3913_v32 = vshrl.u32 %v3784_v21, 16  ;;  %v3916_v10 = vshll.u32 %v3784_v21, 16  ;;  %v2876_v46 = vpop.permute.xlu1 %2875  ;;  %v14620_v21 = vld [vmem:[#allocation147_spill] sm:$0xff] }
 0x384   :  { %v3692_v30 = vsel %vm3670_vm5, %v11801_v37, %v2868_v35  ;;  %v3903_v36 = vor.u32 %v3902_v61, %v3899_v40  ;;  %v12036_v42 = vsel %vm3567_vm4, %v11437_v48, %v14615_v7  ;;  %v3694_v41 = vsel %vm3670_vm5, %v11816_v50, %v2870_v9  ;;  %v14616_v37 = vld [vmem:[#allocation146_spill] sm:$0xff]  ;;  %v14617_v48 = vld [vmem:[#allocation160_spill] sm:$0xff]  ;;  %v2878_v50 = vpop.permute.xlu0 %2877  ;;  %v14618_v61 = vld [vmem:[#allocation183_spill] sm:$0xff] }
 0x385   :  { %v12042_v18 = vsel %vm170_vm0, 1, %v14548_v52  ;;  %v12046_v54 = vsel %vm169_vm1, 1, %v14548_v52  ;;  %v12051_v20 = vsel %vm3567_vm4, %v11442_v58, %v11002_v5  ;;  %v12056_v35 = vsel %vm3567_vm4, %v14617_v48, %v14616_v37  ;;  %4941 = vperm.xlu1 %6985, %v14618_v61   ;;  %v76_v48 = vld [vmem:[%s13350_s4 + $0x198] sm:$0xff]  ;;  %4956 = vperm.xlu0 %6984, %v11763_v25  }
 0x386   :  { %v12059_v9 = vsel %vm172_vm3, 1, %v14548_v52  ;;  %vm171_vm6 = vcmp.ne.f32.partialorder %v71_v12, 0.0  ;;  %v3907_v5 = vrot.slane %v3905_v31, 2  ;;  %v3910_v58 = vrot.slane %v3908_v56, 3 }
 0x387   :  { %v3785_v38 = vsel %vm3773_vm2, %v3692_v30, 0  ;;  %v3896_v40 = vsel %vm2427_vm7, %v11952_v44, %v3895_v24  ;;  %v3915_v27 = vrot.slane %v3913_v32, 2  ;;  %v3918_v4 = vrot.slane %v3916_v10, 3  ;;  %v2880_v56 = vpop.permute.xlu1 %2879  ;;  %v14623_v32 = vld [vmem:[#allocation148_spill] sm:$0xff]  ;;  %v14624_v10 = vld [vmem:[#allocation163_spill] sm:$0xff] }
 0x388   :  { %v3786_v13 = vsel %vm3773_vm2, %v3694_v41, 0  ;;  %6865 = vmatmul.mubr.bf16.gmra.mrb[8].mxu0 %v3896_v40  ;;  %v3904_v0 = vsel %vm2427_vm7, %v3895_v24, %v3903_v36  ;;  %v12077_v31 = vsel %vm3567_vm4, %v14621_v39, %v14620_v21  ;;  %v12081_v44 = vsel %vm171_vm6, 1, %v14548_v52  ;;  %v2882_v37 = vpop.permute.xlu0 %2881  ;;  %v14626_v21 = vld [vmem:[#allocation149_spill] sm:$0xff]  ;;  %v14627_v39 = vld [vmem:[#allocation164_spill] sm:$0xff] }
 0x389   :  { %6868 = vmatprep.mubr.bf16.mxu0 %v3904_v0  ;;  %14622 = vst [vmem:[#allocation94_spill] sm:$0xff] %v12081_v44  ;;  %vm174_vm8 = vcmp.ne.f32.partialorder %v74_v19, 0.0  ;;  %vm173_vm9 = vcmp.ne.f32.partialorder %v73_v59, 0.0  ;;  %v12086_v30 = vsel %vm3567_vm4, %v14624_v10, %v14623_v32  ;;  %v3921_v24 = vshrl.u32 %v3785_v38, 16  ;;  %v14625_v0 = vld [vmem:[#allocation185_spill] sm:$0xff]  ;;  %4962 = vperm.xlu0 %6984, %v11792_v15  }
 0x38a   :  { %v3924_v7 = vshll.u32 %v3785_v38, 16  ;;  %v3696_v41 = vsel %vm3670_vm5, %v11821_v55, %v2872_v14  ;;  %v3929_v12 = vshrl.u32 %v3786_v13, 16  ;;  %v3932_v40 = vshll.u32 %v3786_v13, 16  ;;  %4947 = vperm.xlu1 %6985, %v14625_v0   ;;  %v75_v38 = vld [vmem:[%s13350_s4 + $0x190] sm:$0xff] }
 0x38b   :  { %v3698_v61 = vsel %vm3670_vm5, %v11834_v62, %v2874_v6  ;;  %v3911_v33 = vor.u32 %v3910_v58, %v3907_v5  ;;  %v12102_v55 = vsel %vm3567_vm4, %v14627_v39, %v14626_v21  ;;  %v3919_v14 = vor.u32 %v3918_v4, %v3915_v27  ;;  %v14630_v6 = vld [vmem:[#allocation150_spill] sm:$0xff]  ;;  %v14631_v5 = vld [vmem:[#allocation165_spill] sm:$0xff]  ;;  %v2884_v25 = vpop.permute.xlu1 %2883 }
 0x38c   :  { %v12107_v13 = vsel %vm174_vm8, 1, %v14548_v52  ;;  %v12111_v62 = vsel %vm173_vm9, 1, %v14548_v52  ;;  %v12116_v58 = vsel %vm3567_vm4, %v14631_v5, %v14630_v6  ;;  %v3787_v32 = vsel %vm3773_vm2, %v3696_v41, 0  ;;  %v12124_v4 = vpop.permute.xlu0 %2885 }
 0x38d   :  { %14628 = vst [vmem:[#allocation10_spill] sm:$0xff] %v12107_v13  ;;  %14629 = vst [vmem:[#allocation100_spill] sm:$0xff] %v12111_v62  ;;  %v3700_v10 = vsel %vm3670_vm5, %v11839_v11, %v2876_v46  ;;  %vm176_vm14 = vcmp.ne.f32.partialorder %v76_v48, 0.0  ;;  %v3923_v27 = vrot.slane %v3921_v24, 2  ;;  %v3788_v19 = vsel %vm3773_vm2, %v3698_v61, 0  ;;  %v78_v11 = vld [vmem:[%s13350_s4 + $0x1a8] sm:$0xff] }
 0x38e   :  { %v3702_v59 = vsel %vm3670_vm5, %v11859_v16, %v2878_v50  ;;  %vm175_vm15 = vcmp.ne.f32.partialorder %v75_v38, 0.0  ;;  %v3926_v0 = vrot.slane %v3924_v7, 3  ;;  %v3931_v21 = vrot.slane %v3929_v12, 2  ;;  %4953 = vperm.xlu1 %6985, %v11767_v51   ;;  %v14634_v61 = vld [vmem:[#allocation167_spill] sm:$0xff] }
 0x38f   :  { %v3934_v39 = vrot.slane %v3932_v40, 3  ;;  %v3912_v6 = vsel %vm2427_vm7, %v3903_v36, %v3911_v33  ;;  %v3937_v46 = vshrl.u32 %v3787_v32, 16  ;;  %v3789_v24 = vsel %vm3773_vm2, %v3700_v10, 0  ;;  %v12139_v12 = vpop.permute.xlu1 %2887  ;;  %v14633_v40 = vld [vmem:[#allocation151_spill] sm:$0xff]  ;;  %v14636_v10 = vld [vmem:[#allocation169_spill] sm:$0xff] }
 0x390   :  { %6869 = vmatmul.mubr.bf16.gmra.mrb[12].mxu0 %v3912_v6  ;;  %v3920_v16 = vsel %vm2427_vm7, %v3911_v33, %v3919_v14  ;;  %v12136_v50 = vsel %vm176_vm14, 1, %v14548_v52  ;;  %v3940_v7 = vshll.u32 %v3787_v32, 16  ;;  %v3945_v36 = vshrl.u32 %v3788_v19, 16  ;;  %v14635_v33 = vld [vmem:[#allocation152_spill] sm:$0xff]  ;;  %v12151_v48 = vpop.permute.xlu0 %2889 }
 0x391   :  { %14632 = vst [vmem:[#allocation9_spill] sm:$0xff] %v12136_v50  ;;  %v3948_v41 = vshll.u32 %v3788_v19, 16  ;;  %v3790_v51 = vsel %vm3773_vm2, %v3702_v59, 0  ;;  %6872 = vmatprep.mubr.bf16.mxu0 %v3920_v16  ;;  %v12144_v5 = vsel %vm3567_vm4, %v14634_v61, %v14633_v40  ;;  %v12149_v15 = vsel %vm3567_vm4, %v14636_v10, %v14635_v33  ;;  %v77_v40 = vld [vmem:[%s13350_s4 + $0x1a0] sm:$0xff]  ;;  %v80_v61 = vld [vmem:[%s13350_s4 + $0x1b8] sm:$0xff] }
 0x392   :  { %v12155_v32 = vsel %vm175_vm15, 1, %v14548_v52  ;;  %vm178_vm0 = vcmp.ne.f32.partialorder %v78_v11, 0.0  ;;  %v3953_v19 = vshrl.u32 %v3789_v24, 16  ;;  %v3704_v59 = vsel %vm3670_vm5, %v11866_v3, %v2880_v56  ;;  %4959 = vperm.xlu1 %6985, %v11796_v2   ;;  %v14638_v50 = vld [vmem:[#allocation188_spill] sm:$0xff] }
 0x393   :  { %14637 = vst [vmem:[#allocation102_spill] sm:$0xff] %v12155_v32  ;;  %v3927_v6 = vor.u32 %v3926_v0, %v3923_v27  ;;  %v3935_v16 = vor.u32 %v3934_v39, %v3931_v21  ;;  %v3956_v38 = vshll.u32 %v3789_v24, 16  ;;  %v3961_v33 = vshrl.u32 %v3790_v51, 16  ;;  %4968 = vperm.xlu0 %6984, %v14638_v50   ;;  %v12169_v0 = vpop.permute.xlu1 %2891 }
 0x394   :  { %v3964_v10 = vshll.u32 %v3790_v51, 16  ;;  %v3706_v32 = vsel %vm3670_vm5, %v11885_v60, %v2882_v37  ;;  %v3939_v3 = vrot.slane %v3937_v46, 2  ;;  %v3942_v2 = vrot.slane %v3940_v7, 3  ;;  %v12172_v39 = vpop.permute.xlu0 %2893  ;;  %v79_v60 = vld [vmem:[%s13350_s4 + $0x1b0] sm:$0xff]  ;;  %v14640_v7 = vld [vmem:[#allocation189_spill] sm:$0xff] }
 0x395   :  { %v3947_v56 = vrot.slane %v3945_v36, 2  ;;  %v3950_v27 = vrot.slane %v3948_v41, 3  ;;  %v3791_v21 = vsel %vm3773_vm2, %v3704_v59, 0  ;;  %v12176_v24 = vsel %vm178_vm0, 1, %v14548_v52 }
 0x396   :  { %14639 = vst [vmem:[#allocation12_spill] sm:$0xff] %v12176_v24  ;;  %vm177_vm1 = vcmp.ne.f32.partialorder %v77_v40, 0.0  ;;  %vm180_vm3 = vcmp.ne.f32.partialorder %v80_v61, 0.0  ;;  %v3955_v37 = vrot.slane %v3953_v19, 2  ;;  %v3792_v46 = vsel %vm3773_vm2, %v3706_v32, 0  ;;  %4965 = vperm.xlu1 %6985, %v14640_v7   ;;  %v14641_v24 = vld [vmem:[#allocation190_spill] sm:$0xff] }
 0x397   :  { %v3928_v50 = vsel %vm2427_vm7, %v3919_v14, %v3927_v6  ;;  %v3936_v36 = vsel %vm2427_vm7, %v3927_v6, %v3935_v16  ;;  %v3958_v41 = vrot.slane %v3956_v38, 3  ;;  %v3963_v51 = vrot.slane %v3961_v33, 2  ;;  %4974 = vperm.xlu0 %6984, %v14641_v24   ;;  %v12188_v19 = vpop.permute.xlu1 %2895  ;;  %v14645_v24 = vld [vmem:[#allocation171_spill] sm:$0xff] }
 0x398   :  { %v3966_v11 = vrot.slane %v3964_v10, 3  ;;  %v3708_v59 = vsel %vm3670_vm5, %v11905_v8, %v2884_v25  ;;  %6873 = vmatmul.mubr.bf16.gmra.mrb[16].mxu0 %v3928_v50  ;;  %v3969_v62 = vshrl.u32 %v3791_v21, 16  ;;  %v3943_v32 = vor.u32 %v3942_v2, %v3939_v3  ;;  %v12190_v6 = vpop.permute.xlu0 %2897  ;;  %v14642_v8 = vld [vmem:[#allocation155_spill] sm:$0xff]  ;;  %v14643_v25 = vld [vmem:[#allocation170_spill] sm:$0xff]  ;;  %v14644_v10 = vld [vmem:[#allocation156_spill] sm:$0xff] }
 0x399   :  { %6876 = vmatprep.mubr.bf16.mxu0 %v3936_v36  ;;  %v3951_v13 = vor.u32 %v3950_v27, %v3947_v56  ;;  %vm179_vm6 = vcmp.ne.f32.partialorder %v79_v60, 0.0  ;;  %v3972_v14 = vshll.u32 %v3791_v21, 16  ;;  %v3977_v7 = vshrl.u32 %v3792_v46, 16  ;;  %v14646_v56 = vld [vmem:[#allocation191_spill] sm:$0xff]  ;;  %v14647_v21 = vld [vmem:[#allocation192_spill] sm:$0xff]  ;;  %v14648_v36 = vld [vmem:[#allocation157_spill] sm:$0xff] }
 0x39a   :  { %v3980_v44 = vshll.u32 %v3792_v46, 16  ;;  %v12194_v38 = vsel %vm177_vm1, 1, %v14548_v52  ;;  %v12199_v33 = vsel %vm3567_vm4, %v14643_v25, %v14642_v8  ;;  %v12204_v3 = vsel %vm3567_vm4, %v14645_v24, %v14644_v10  ;;  %4971 = vperm.xlu1 %6985, %v14646_v56  }
 0x39b   :  { %v12207_v2 = vsel %vm3773_vm2, %v3708_v59, 0  ;;  %v12212_v40 = vsel %vm180_vm3, 1, %v14548_v52  ;;  %v3710_v27 = vsel %vm3670_vm5, %v11940_v47, %v12124_v4  ;;  %4980 = vperm.xlu0 %6984, %v14647_v21   ;;  %v3959_v60 = vor.u32 %v3958_v41, %v3955_v37  ;;  %v14649_v59 = vld [vmem:[#allocation172_spill] sm:$0xff]  ;;  %v2900_v25 = vpop.permute.xlu1 %2899  ;;  %v14652_v37 = vld [vmem:[#allocation194_spill] sm:$0xff] }
 0x39c   :  { %v12218_v46 = vor.u32 %v3966_v11, %v3963_v51  ;;  %v12221_v50 = vsel %vm179_vm6, 1, %v14548_v52  ;;  %v12226_v8 = vsel %vm3567_vm4, %v14649_v59, %v14648_v36  ;;  %v3971_v61 = vrot.slane %v3969_v62, 2  ;;  %v2902_v41 = vpop.permute.xlu0 %2901 }
 0x39d   :  { %v3944_v10 = vsel %vm2427_vm7, %v3935_v16, %v3943_v32  ;;  %v3952_v24 = vsel %vm2427_vm7, %v3943_v32, %v3951_v13  ;;  %v3974_v47 = vrot.slane %v3972_v14, 3  ;;  %v3979_v4 = vrot.slane %v3977_v7, 2  ;;  %v14650_v16 = vld [vmem:[#allocation193_spill] sm:$0xff]  ;;  %v14651_v14 = vld [vmem:[#allocation90_spill] sm:$0xff] }
 0x39e   :  { %v3982_v56 = vrot.slane %v3980_v44, 3  ;;  %v12233_v11 = vsel %vm3773_vm2, %v3710_v27, 0  ;;  %v3724_v21 = vsel %vm3670_vm5, %v12036_v42, %v2900_v25  ;;  %v3726_v62 = vsel %vm3670_vm5, %v12051_v20, %v2902_v41  ;;  %4977 = vperm.xlu1 %6985, %v14650_v16  }
 0x39f   :  { %v3801_v32 = vsel %vm3773_vm2, %v3724_v21, 0  ;;  %v3802_v44 = vsel %vm3773_vm2, %v3726_v62, 0  ;;  %4986 = vperm.xlu0 %6984, %v14651_v14   ;;  %v3960_v7 = vsel %vm2427_vm7, %v3951_v13, %v3959_v60  ;;  %v3968_v27 = vsel %vm2427_vm7, %v3959_v60, %v12218_v46  ;;  %v2904_v20 = vpop.permute.xlu1 %2903 }
 0x3a0   :  { %6877 = vmatmul.mubr.bf16.gmra.mrb[20].mxu0 %v3944_v10  ;;  %v4049_v36 = vshrl.u32 %v3801_v32, 16  ;;  %v4052_v59 = vshll.u32 %v3801_v32, 16  ;;  %v4057_v42 = vshrl.u32 %v3802_v44, 16  ;;  %v4060_v25 = vshll.u32 %v3802_v44, 16  ;;  %v2906_v62 = vpop.permute.xlu0 %2905 }
 0x3a1   :  { %6880 = vmatprep.mubr.bf16.mxu0 %v3952_v24  ;;  %v3993_v41 = vshrl.u32 %v12233_v11, 16  ;;  %v3996_v21 = vshll.u32 %v12233_v11, 16  ;;  %v3728_v10 = vsel %vm3670_vm5, %v12056_v35, %v2904_v20  ;;  %v12250_v16 = vor.u32 %v3974_v47, %v3971_v61 }
 0x3a2   :  { %v4051_v13 = vrot.slane %v4049_v36, 2  ;;  %v4054_v14 = vrot.slane %v4052_v59, 3  ;;  %v4059_v51 = vrot.slane %v4057_v42, 2  ;;  %v4062_v60 = vrot.slane %v4060_v25, 3  ;;  %4983 = vperm.xlu1 %6985, %v14652_v37  }
 0x3a3   :  { %v3712_v24 = vsel %vm3670_vm5, %v11945_v63, %v12139_v12  ;;  %v3714_v32 = vsel %vm3670_vm5, %v11964_v17, %v12151_v48  ;;  %v3803_v44 = vsel %vm3773_vm2, %v3728_v10, 0  ;;  %v3730_v35 = vsel %vm3670_vm5, %v12077_v31, %v2906_v62  ;;  %4992 = vperm.xlu0 %6984, %v11931_v1   ;;  %v2908_v37 = vpop.permute.xlu1 %2907 }
 0x3a4   :  { %v4065_v61 = vshrl.u32 %v3803_v44, 16  ;;  %v4068_v47 = vshll.u32 %v3803_v44, 16  ;;  %v3804_v36 = vsel %vm3773_vm2, %v3730_v35, 0  ;;  %v12264_v59 = vor.u32 %v4054_v14, %v4051_v13  ;;  %v2910_v17 = vpop.permute.xlu0 %2909 }
 0x3a5   :  { %v4073_v42 = vshrl.u32 %v3804_v36, 16  ;;  %v4076_v63 = vshll.u32 %v3804_v36, 16  ;;  %v3732_v12 = vsel %vm3670_vm5, %v12086_v30, %v2908_v37  ;;  %v4063_v48 = vor.u32 %v4062_v60, %v4059_v51 }
 0x3a6   :  { %v4067_v25 = vrot.slane %v4065_v61, 2  ;;  %v4070_v20 = vrot.slane %v4068_v47, 3  ;;  %v3805_v31 = vsel %vm3773_vm2, %v3732_v12, 0  ;;  %v3734_v1 = vsel %vm3670_vm5, %v12102_v55, %v2910_v17  ;;  %4989 = vperm.xlu1 %6985, %v11935_v49  }
 0x3a7   :  { %v4075_v10 = vrot.slane %v4073_v42, 2  ;;  %v4078_v62 = vrot.slane %v4076_v63, 3  ;;  %v4081_v13 = vshrl.u32 %v3805_v31, 16  ;;  %v4084_v14 = vshll.u32 %v3805_v31, 16  ;;  %4998 = vperm.xlu0 %6984, %v11956_v34   ;;  %v2912_v51 = vpop.permute.xlu1 %2911 }
 0x3a8   :  { %6881 = vmatmul.mubr.bf16.gmra.mrb[24].mxu0 %v3960_v7  ;;  %v3806_v30 = vsel %vm3773_vm2, %v3734_v1, 0  ;;  %v4064_v60 = vsel %vm2427_vm7, %v12264_v59, %v4063_v48  ;;  %v4071_v44 = vor.u32 %v4070_v20, %v4067_v25  ;;  %v12276_v35 = vor.u32 %v3982_v56, %v3979_v4  ;;  %v2914_v36 = vpop.permute.xlu0 %2913 }
 0x3a9   :  { %6884 = vmatprep.mubr.bf16.mxu0 %v3968_v27  ;;  %v4083_v55 = vrot.slane %v4081_v13, 2  ;;  %v4086_v61 = vrot.slane %v4084_v14, 3  ;;  %v4089_v49 = vshrl.u32 %v3806_v30, 16  ;;  %v4092_v47 = vshll.u32 %v3806_v30, 16  ;;  %6908 = vmatprep.mubr.bf16.mxu1 %v4064_v60 }
 0x3aa   :  { %v3736_v7 = vsel %vm3670_vm5, %v12116_v58, %v2912_v51  ;;  %v4072_v34 = vsel %vm2427_vm7, %v4063_v48, %v4071_v44  ;;  %v3738_v27 = vsel %vm3670_vm5, %v12144_v5, %v2914_v36  ;;  %4995 = vperm.xlu1 %6985, %v11975_v28   ;;  %v4079_v37 = vor.u32 %v4078_v62, %v4075_v10 }
 0x3ab   :  { %v3795_v4 = vsel %vm3773_vm2, %v3712_v24, 0  ;;  %v4091_v56 = vrot.slane %v4089_v49, 2  ;;  %v4094_v42 = vrot.slane %v4092_v47, 3  ;;  %v3807_v63 = vsel %vm3773_vm2, %v3736_v7, 0  ;;  %6909 = vmatmul.mubr.bf16.vlgmr.msra.gmra.mrb[0].mxu1 %v4072_v34  ;;  %5004 = vperm.xlu0 %6984, %v11981_v53   ;;  %v2916_v25 = vpop.permute.xlu1 %2915 }
 0x3ac   :  { %v14653_v12 = vshrl.u32 %v12207_v2, 16  ;;  %v14654_v17 = vshll.u32 %v12207_v2, 16  ;;  %v3808_v5 = vsel %vm3773_vm2, %v3738_v27, 0  ;;  %v3976_v28 = vsel %vm2427_vm7, %v12218_v46, %v12250_v16  ;;  %v2918_v1 = vpop.permute.xlu0 %2917 }
 0x3ad   :  { %v3995_v24 = vrot.slane %v3993_v41, 2  ;;  %v3998_v20 = vrot.slane %v3996_v21, 3  ;;  %v3796_v53 = vsel %vm3773_vm2, %v3714_v32, 0  ;;  %v4080_v31 = vsel %vm2427_vm7, %v4071_v44, %v4079_v37 }
 0x3ae   :  { %v3987_v58 = vrot.slane %v14653_v12, 2  ;;  %v3990_v48 = vrot.slane %v14654_v17, 3  ;;  %v4001_v2 = vshrl.u32 %v3795_v4, 16  ;;  %v4097_v10 = vshrl.u32 %v3807_v63, 16  ;;  %6912 = vmatprep.mubr.bf16.mxu1 %v4080_v31  ;;  %5001 = vperm.xlu1 %6985, %v11985_v43  }
 0x3af   :  { %v4100_v62 = vshll.u32 %v3807_v63, 16  ;;  %v4087_v13 = vor.u32 %v4086_v61, %v4083_v55  ;;  %v4105_v14 = vshrl.u32 %v3808_v5, 16  ;;  %v4108_v46 = vshll.u32 %v3808_v5, 16  ;;  %5010 = vperm.xlu0 %6984, %v12015_v45   ;;  %v2920_v60 = vpop.permute.xlu1 %2919 }
 0x3b0   :  { %6885 = vmatmul.mubr.bf16.gmra.mrb[28].mxu0 %v3976_v28  ;;  %v3984_v11 = vsel %vm2427_vm7, %v12250_v16, %v12276_v35  ;;  %v4095_v41 = vor.u32 %v4094_v42, %v4091_v56  ;;  %v4004_v21 = vshll.u32 %v3795_v4, 16  ;;  %v4009_v32 = vshrl.u32 %v3796_v53, 16  ;;  %v2922_v47 = vpop.permute.xlu0 %2921 }
 0x3b1   :  { %v4012_v30 = vshll.u32 %v3796_v53, 16  ;;  %v3740_v51 = vsel %vm3670_vm5, %v12149_v15, %v2916_v25  ;;  %6888 = vmatprep.mubr.bf16.mxu0 %v3984_v11  ;;  %v3716_v43 = vsel %vm3670_vm5, %v11969_v57, %v12169_v0  ;;  %v3742_v44 = vsel %vm3670_vm5, %v12199_v33, %v2918_v1  ;;  %v14657_v11 = vld [vmem:[#allocation158_spill] sm:$0xff] }
 0x3b2   :  { %v3991_v55 = vor.u32 %v3990_v48, %v3987_v58  ;;  %v12313_v16 = vor.u32 %v3998_v20, %v3995_v24  ;;  %v3718_v45 = vsel %vm3670_vm5, %v12005_v23, %v12172_v39  ;;  %v4099_v61 = vrot.slane %v4097_v10, 2  ;;  %5007 = vperm.xlu1 %6985, %v12024_v26  }
 0x3b3   :  { %v4102_v49 = vrot.slane %v4100_v62, 3  ;;  %v4088_v15 = vsel %vm2427_vm7, %v4079_v37, %v4087_v13  ;;  %v4107_v36 = vrot.slane %v4105_v14, 2  ;;  %v4110_v7 = vrot.slane %v4108_v46, 3  ;;  %5016 = vperm.xlu0 %6984, %v12042_v18   ;;  %v2924_v4 = vpop.permute.xlu1 %2923  ;;  %v14655_v62 = vld [vmem:[#allocation94_spill] sm:$0xff] }
 0x3b4   :  { %v3809_v57 = vsel %vm3773_vm2, %v3740_v51, 0  ;;  %6913 = vmatmul.mubr.bf16.gmra.mrb[4].mxu1 %v4088_v15  ;;  %v4096_v0 = vsel %vm2427_vm7, %v4087_v13, %v4095_v41  ;;  %v4003_v33 = vrot.slane %v4001_v2, 2  ;;  %v4006_v34 = vrot.slane %v4004_v21, 3  ;;  %v2926_v24 = vpop.permute.xlu0 %2925  ;;  %v14658_v21 = vld [vmem:[#allocation173_spill] sm:$0xff] }
 0x3b5   :  { %v3797_v23 = vsel %vm3773_vm2, %v3716_v43, 0  ;;  %v3810_v39 = vsel %vm3773_vm2, %v3742_v44, 0  ;;  %6916 = vmatprep.mubr.bf16.mxu1 %v4096_v0  ;;  %v4011_v27 = vrot.slane %v4009_v32, 2  ;;  %v4014_v37 = vrot.slane %v4012_v30, 3 }
 0x3b6   :  { %v3798_v26 = vsel %vm3773_vm2, %v3718_v45, 0  ;;  %v3992_v56 = vsel %vm2427_vm7, %v12276_v35, %v3991_v55  ;;  %v4113_v42 = vshrl.u32 %v3809_v57, 16  ;;  %v4116_v63 = vshll.u32 %v3809_v57, 16  ;;  %5013 = vperm.xlu1 %6985, %v12046_v54   ;;  %v14660_v57 = vld [vmem:[#allocation9_spill] sm:$0xff] }
 0x3b7   :  { %v4000_v18 = vsel %vm2427_vm7, %v3991_v55, %v12313_v16  ;;  %v4103_v12 = vor.u32 %v4102_v49, %v4099_v61  ;;  %v4017_v58 = vshrl.u32 %v3797_v23, 16  ;;  %v4121_v17 = vshrl.u32 %v3810_v39, 16  ;;  %5022 = vperm.xlu0 %6984, %v12059_v9   ;;  %v14659_v49 = vld [vmem:[#allocation100_spill] sm:$0xff] }
 0x3b8   :  { %v4124_v48 = vshll.u32 %v3810_v39, 16  ;;  %6889 = vmatmul.mubr.bf16.gmra.mrb[32].mxu0 %v3992_v56  ;;  %v4111_v5 = vor.u32 %v4110_v7, %v4107_v36  ;;  %v4020_v25 = vshll.u32 %v3797_v23, 16  ;;  %v4025_v28 = vshrl.u32 %v3798_v26, 16  ;;  %v12357_v45 = vpop.permute.xlu0 %2929 }
 0x3b9   :  { %v3744_v35 = vsel %vm3670_vm5, %v12204_v3, %v2920_v60  ;;  %6892 = vmatprep.mubr.bf16.mxu0 %v4000_v18  ;;  %v4007_v20 = vor.u32 %v4006_v34, %v4003_v33  ;;  %v4028_v54 = vshll.u32 %v3798_v26, 16  ;;  %v3720_v53 = vsel %vm3670_vm5, %v12010_v29, %v12188_v19  ;;  %v12347_v29 = vpop.permute.xlu1 %2927  ;;  %v14661_v33 = vld [vmem:[#allocation159_spill] sm:$0xff]  ;;  %v82_v18 = vld [vmem:[%s13350_s4 + $0x1c8] sm:$0xff] }
 0x3ba   :  { %v3746_v31 = vsel %vm3670_vm5, %v12226_v8, %v2922_v47  ;;  %v12339_v1 = vor.u32 %v4014_v37, %v4011_v27  ;;  %v3722_v9 = vsel %vm3670_vm5, %v12020_v22, %v12190_v6  ;;  %v4115_v2 = vrot.slane %v4113_v42, 2  ;;  %5019 = vperm.xlu1 %6985, %v14655_v62   ;;  %v14656_v8 = vld [vmem:[#allocation10_spill] sm:$0xff]  ;;  %v14662_v34 = vld [vmem:[#allocation175_spill] sm:$0xff] }
 0x3bb   :  { %v4118_v10 = vrot.slane %v4116_v63, 3  ;;  %v4104_v3 = vsel %vm2427_vm7, %v4095_v41, %v4103_v12  ;;  %v4123_v13 = vrot.slane %v4121_v17, 2  ;;  %v4126_v14 = vrot.slane %v4124_v48, 3  ;;  %5028 = vperm.xlu0 %6984, %v14656_v8   ;;  %v14663_v48 = vld [vmem:[#allocation102_spill] sm:$0xff] }
 0x3bc   :  { %v3811_v46 = vsel %vm3773_vm2, %v3744_v35, 0  ;;  %6917 = vmatmul.mubr.bf16.gmra.mrb[8].mxu1 %v4104_v3  ;;  %v4112_v19 = vsel %vm2427_vm7, %v4103_v12, %v4111_v5  ;;  %v3645_v22 = vsel %vm3567_vm4, %v14658_v21, %v14657_v11  ;;  %v4019_v6 = vrot.slane %v4017_v58, 2  ;;  %v81_v12 = vld [vmem:[%s13350_s4 + $0x1c0] sm:$0xff]  ;;  %v84_v11 = vld [vmem:[%s13350_s4 + $0x1d8] sm:$0xff]  ;;  %v83_v21 = vld [vmem:[%s13350_s4 + $0x1d0] sm:$0xff] }
 0x3bd   :  { %v4022_v32 = vrot.slane %v4020_v25, 3  ;;  %v3812_v41 = vsel %vm3773_vm2, %v3746_v31, 0  ;;  %6920 = vmatprep.mubr.bf16.mxu1 %v4112_v19  ;;  %v4027_v30 = vrot.slane %v4025_v28, 2  ;;  %v4030_v51 = vrot.slane %v4028_v54, 3  ;;  %v12370_v42 = vpop.permute.xlu1 %2931  ;;  %v14664_v54 = vld [vmem:[#allocation12_spill] sm:$0xff]  ;;  %v14666_v31 = vld [vmem:[#allocation177_spill] sm:$0xff] }
 0x3be   :  { %v3799_v60 = vsel %vm3773_vm2, %v3720_v53, 0  ;;  %v3800_v43 = vsel %vm3773_vm2, %v3722_v9, 0  ;;  %v4129_v44 = vshrl.u32 %v3811_v46, 16  ;;  %v4132_v55 = vshll.u32 %v3811_v46, 16  ;;  %5025 = vperm.xlu1 %6985, %v14659_v49   ;;  %v14665_v53 = vld [vmem:[#allocation161_spill] sm:$0xff] }
 0x3bf   :  { %v4008_v61 = vsel %vm2427_vm7, %v12313_v16, %v4007_v20  ;;  %v4119_v15 = vor.u32 %v4118_v10, %v4115_v2  ;;  %v4137_v47 = vshrl.u32 %v3812_v41, 16  ;;  %v4140_v36 = vshll.u32 %v3812_v41, 16  ;;  %5034 = vperm.xlu0 %6984, %v14660_v57   ;;  %v14667_v41 = vld [vmem:[#allocation166_spill] sm:$0xff] }
 0x3c0   :  { %6893 = vmatmul.mubr.bf16.gmra.mrb[36].mxu0 %v4008_v61  ;;  %v4016_v7 = vsel %vm2427_vm7, %v4007_v20, %v12339_v1  ;;  %v4127_v0 = vor.u32 %v4126_v14, %v4123_v13  ;;  %v3647_v23 = vsel %vm3567_vm4, %v14662_v34, %v14661_v33  ;;  %v4033_v39 = vshrl.u32 %v3799_v60, 16 }
 0x3c1   :  { %v4036_v27 = vshll.u32 %v3799_v60, 16  ;;  %v3748_v16 = vsel %vm3670_vm5, %v3645_v22, %v2924_v4  ;;  %6896 = vmatprep.mubr.bf16.mxu0 %v4016_v7  ;;  %v4041_v37 = vshrl.u32 %v3800_v43, 16  ;;  %v4044_v26 = vshll.u32 %v3800_v43, 16 }
 0x3c2   :  { %v3750_v56 = vsel %vm3670_vm5, %v3647_v23, %v2926_v24  ;;  %v4023_v63 = vor.u32 %v4022_v32, %v4019_v6  ;;  %v4131_v58 = vrot.slane %v4129_v44, 2  ;;  %v4134_v17 = vrot.slane %v4132_v55, 3  ;;  %5031 = vperm.xlu1 %6985, %v14663_v48   ;;  %v12400_v32 = vpop.permute.xlu1 %2935 }
 0x3c3   :  { %v4120_v4 = vsel %vm2427_vm7, %v4111_v5, %v4119_v15  ;;  %v12380_v25 = vor.u32 %v4030_v51, %v4027_v30  ;;  %v4139_v28 = vrot.slane %v4137_v47, 2  ;;  %v4142_v35 = vrot.slane %v4140_v36, 3  ;;  %5040 = vperm.xlu0 %6984, %v14664_v54   ;;  %v12389_v5 = vpop.permute.xlu0 %2933  ;;  %v14668_v30 = vld [vmem:[#allocation178_spill] sm:$0xff]  ;;  %v86_v36 = vld [vmem:[%s13350_s4 + $0x1e8] sm:$0xff] }
 0x3c4   :  { %v3813_v24 = vsel %vm3773_vm2, %v3748_v16, 0  ;;  %6921 = vmatmul.mubr.bf16.gmra.mrb[12].mxu1 %v4120_v4  ;;  %v4128_v20 = vsel %vm2427_vm7, %v4119_v15, %v4127_v0  ;;  %v3649_v9 = vsel %vm3567_vm4, %v14666_v31, %v14665_v53  ;;  %v3814_v2 = vsel %vm3773_vm2, %v3750_v56, 0  ;;  %v14673_v56 = vld [vmem:[#allocation168_spill] sm:$0xff]  ;;  %v87_v53 = vld [vmem:[%s13350_s4 + $0x1f0] sm:$0xff]  ;;  %v14674_v31 = vld [vmem:[#allocation289_spill] sm:$0xff] }
 0x3c5   :  { %6924 = vmatprep.mubr.bf16.mxu1 %v4128_v20  ;;  %vm182_vm8 = vcmp.ne.f32.partialorder %v82_v18, 0.0  ;;  %vm181_vm9 = vcmp.ne.f32.partialorder %v81_v12, 0.0  ;;  %v4035_v10 = vrot.slane %v4033_v39, 2  ;;  %v4038_v3 = vrot.slane %v4036_v27, 3  ;;  %v14671_v39 = vld [vmem:[#allocation69_spill] sm:$0xff]  ;;  %v14672_v27 = vld [vmem:[#allocation154_spill] sm:$0xff] }
 0x3c6   :  { %v4043_v62 = vrot.slane %v4041_v37, 2  ;;  %v4024_v13 = vsel %vm2427_vm7, %v12339_v1, %v4023_v63  ;;  %v4046_v14 = vrot.slane %v4044_v26, 3  ;;  %v4145_v46 = vshrl.u32 %v3813_v24, 16  ;;  %5037 = vperm.xlu1 %6985, %v12194_v38   ;;  %v12441_v18 = vpop.permute.xlu1 %2939 }
 0x3c7   :  { %v4148_v19 = vshll.u32 %v3813_v24, 16  ;;  %v4135_v8 = vor.u32 %v4134_v17, %v4131_v58  ;;  %v4153_v22 = vshrl.u32 %v3814_v2, 16  ;;  %v4156_v6 = vshll.u32 %v3814_v2, 16  ;;  %5046 = vperm.xlu0 %6984, %v12212_v40   ;;  %v12416_v15 = vpop.permute.xlu0 %2937  ;;  %v14676_v2 = vld [vmem:[#allocation174_spill] sm:$0xff] }
 0x3c8   :  { %6897 = vmatmul.mubr.bf16.gmra.mrb[40].mxu0 %v4024_v13  ;;  %v4032_v1 = vsel %vm2427_vm7, %v4023_v63, %v12380_v25  ;;  %v4143_v38 = vor.u32 %v4142_v35, %v4139_v28  ;;  %v3651_v51 = vsel %vm3567_vm4, %v14668_v30, %v14667_v41  ;;  %v3752_v60 = vsel %vm3670_vm5, %v3649_v9, %v12347_v29  ;;  %v88_v28 = vld [vmem:[%s13350_s4 + $0x1f8] sm:$0xff] }
 0x3c9   :  { %6900 = vmatprep.mubr.bf16.mxu0 %v4032_v1  ;;  %v4837_v43 = vsel %vm182_vm8, 1, %v14548_v52  ;;  %v4836_v44 = vsel %vm181_vm9, 1, %v14548_v52  ;;  %v3754_v55 = vsel %vm3670_vm5, %v3651_v51, %v12357_v45  ;;  %v4039_v61 = vor.u32 %v4038_v3, %v4035_v10  ;;  %v85_v45 = vld [vmem:[%s13350_s4 + $0x1e0] sm:$0xff] }
 0x3ca   :  { %vm184_vm14 = vcmp.ne.f32.partialorder %v84_v11, 0.0  ;;  %vm183_vm15 = vcmp.ne.f32.partialorder %v83_v21, 0.0  ;;  %v4147_v40 = vrot.slane %v4145_v46, 2  ;;  %v4150_v49 = vrot.slane %v4148_v19, 3  ;;  %5043 = vperm.xlu1 %6985, %v12221_v50   ;;  %v14670_v50 = vld [vmem:[#allocation153_spill] sm:$0xff]  ;;  %v14678_v46 = vld [vmem:[#allocation143_spill] sm:$0xff]  ;;  %v12478_v51 = vpop.permute.xlu1 %2943 }
 0x3cb   :  { %v4136_v47 = vsel %vm2427_vm7, %v4127_v0, %v4135_v8  ;;  %v12420_v29 = vor.u32 %v4046_v14, %v4043_v62  ;;  %v4155_v7 = vrot.slane %v4153_v22, 2  ;;  %v4158_v57 = vrot.slane %v4156_v6, 3  ;;  %5052 = vperm.xlu0 %6984, %v4837_v43   ;;  %v14669_v0 = vld [vmem:[#allocation64_spill] sm:$0xff]  ;;  %v12462_v62 = vpop.permute.xlu0 %2941  ;;  %v14677_v14 = vld [vmem:[#allocation337_spill] sm:$0xff] }
 0x3cc   :  { %v3815_v33 = vsel %vm3773_vm2, %v3752_v60, 0  ;;  %6925 = vmatmul.mubr.bf16.gmra.mrb[16].mxu1 %v4136_v47  ;;  %v4144_v34 = vsel %vm2427_vm7, %v4135_v8, %v4143_v38  ;;  %v3550_v23 = vsel %vm3464_vm13, %v14670_v50, %v14669_v0  ;;  %v3552_v16 = vsel %vm3464_vm13, %v14672_v27, %v14671_v39  ;;  %v90_v6 = vld [vmem:[%s13350_s4 + $0x208] sm:$0xff]  ;;  %v14679_v60 = vld [vmem:[#allocation338_spill] sm:$0xff]  ;;  %v14680_v43 = vld [vmem:[#allocation144_spill] sm:$0xff] }
 0x3cd   :  { %v3816_v37 = vsel %vm3773_vm2, %v3754_v55, 0  ;;  %6928 = vmatprep.mubr.bf16.mxu1 %v4144_v34  ;;  %v4839_v26 = vsel %vm184_vm14, 1, %v14548_v52  ;;  %v3653_v63 = vsel %vm3567_vm4, %v3550_v23, %v14673_v56  ;;  %v4838_v12 = vsel %vm183_vm15, 1, %v14548_v52  ;;  %v14682_v47 = vld [vmem:[#allocation71_spill] sm:$0xff] }
 0x3ce   :  { %vm186_vm0 = vcmp.ne.f32.partialorder %v86_v36, 0.0  ;;  %vm185_vm1 = vcmp.ne.f32.partialorder %v85_v45, 0.0  ;;  %v4161_v58 = vshrl.u32 %v3815_v33, 16  ;;  %v4164_v17 = vshll.u32 %v3815_v33, 16  ;;  %5049 = vperm.xlu1 %6985, %v4836_v44   ;;  %v14681_v44 = vld [vmem:[#allocation65_spill] sm:$0xff]  ;;  %v14683_v45 = vld [vmem:[#allocation176_spill] sm:$0xff] }
 0x3cf   :  { %v4040_v4 = vsel %vm2427_vm7, %v12380_v25, %v4039_v61  ;;  %v4151_v48 = vor.u32 %v4150_v49, %v4147_v40  ;;  %v4169_v35 = vshrl.u32 %v3816_v37, 16  ;;  %v4172_v24 = vshll.u32 %v3816_v37, 16  ;;  %5058 = vperm.xlu0 %6984, %v4839_v26   ;;  %v14675_v25 = vld [vmem:[#allocation134_spill] sm:$0xff]  ;;  %v89_v49 = vld [vmem:[%s13350_s4 + $0x200] sm:$0xff]  ;;  %v12498_v0 = vpop.permute.xlu0 %2945  ;;  %v92_v39 = vld [vmem:[%s13350_s4 + $0x218] sm:$0xff] }
 0x3d0   :  { %6901 = vmatmul.mubr.bf16.gmra.mrb[44].mxu0 %v4040_v4  ;;  %v4048_v20 = vsel %vm2427_vm7, %v4039_v61, %v12420_v29  ;;  %v4159_v54 = vor.u32 %v4158_v57, %v4155_v7  ;;  %v3354_v9 = vsel %vm3258_vm11, %v14675_v25, %v14674_v31  ;;  %v3655_v10 = vsel %vm3567_vm4, %v3552_v16, %v14676_v2  ;;  %v14684_v26 = vld [vmem:[#allocation290_spill] sm:$0xff]  ;;  %v14685_v56 = vld [vmem:[#allocation135_spill] sm:$0xff]  ;;  %v14688_v4 = vld [vmem:[#allocation145_spill] sm:$0xff] }
 0x3d1   :  { %v3756_v3 = vsel %vm3670_vm5, %v3653_v63, %v12370_v42  ;;  %6904 = vmatprep.mubr.bf16.mxu0 %v4048_v20  ;;  %v4841_v13 = vsel %vm186_vm0, 1, %v14548_v52  ;;  %v3451_v19 = vsel %vm3361_vm12, %v14678_v46, %v14677_v14  ;;  %v3758_v8 = vsel %vm3670_vm5, %v3655_v10, %v12389_v5  ;;  %v12522_v20 = vpop.permute.xlu1 %2947  ;;  %v14690_v46 = vld [vmem:[#allocation68_spill] sm:$0xff] }
 0x3d2   :  { %v4840_v11 = vsel %vm185_vm1, 1, %v14548_v52  ;;  %vm188_vm3 = vcmp.ne.f32.partialorder %v88_v28, 0.0  ;;  %v4163_v21 = vrot.slane %v4161_v58, 2  ;;  %v4166_v22 = vrot.slane %v4164_v17, 3  ;;  %5055 = vperm.xlu1 %6985, %v4838_v12   ;;  %v14686_v12 = vld [vmem:[#allocation179_spill] sm:$0xff]  ;;  %v14687_v17 = vld [vmem:[#allocation21_spill] sm:$0xff] }
 0x3d3   :  { %v4152_v42 = vsel %vm2427_vm7, %v4143_v38, %v4151_v48  ;;  %vm187_vm6 = vcmp.ne.f32.partialorder %v87_v53, 0.0  ;;  %v4171_v1 = vrot.slane %v4169_v35, 2  ;;  %v4174_v41 = vrot.slane %v4172_v24, 3  ;;  %5064 = vperm.xlu0 %6984, %v4841_v13   ;;  %v14689_v28 = vld [vmem:[#allocation18_spill] sm:$0xff] }
 0x3d4   :  { %v3817_v30 = vsel %vm3773_vm2, %v3756_v3, 0  ;;  %6929 = vmatmul.mubr.bf16.gmra.mrb[20].mxu1 %v4152_v42  ;;  %v4160_v5 = vsel %vm2427_vm7, %v4151_v48, %v4159_v54  ;;  %v3453_v38 = vsel %vm3361_vm12, %v14680_v43, %v14679_v60  ;;  %v3554_v55 = vsel %vm3464_vm13, %v3451_v19, %v14681_v44  ;;  %v12528_v2 = vpop.permute.xlu0 %4881 }
 0x3d5   :  { %v3818_v61 = vsel %vm3773_vm2, %v3758_v8, 0  ;;  %6932 = vmatprep.mubr.bf16.mxu1 %v4160_v5  ;;  %v4843_v40 = vsel %vm188_vm3, 1, %v14548_v52  ;;  %v3556_v36 = vsel %vm3464_vm13, %v3453_v38, %v14682_v47  ;;  %v3657_v7 = vsel %vm3567_vm4, %v3554_v55, %v14683_v45  ;;  %v96_v55 = vld [vmem:[%s13350_s4 + $0x238] sm:$0xff] }
 0x3d6   :  { %v4842_v57 = vsel %vm187_vm6, 1, %v14548_v52  ;;  %vm190_vm8 = vcmp.ne.f32.partialorder %v90_v6, 0.0  ;;  %v4177_v33 = vshrl.u32 %v3817_v30, 16  ;;  %v4180_v34 = vshll.u32 %v3817_v30, 16  ;;  %5061 = vperm.xlu1 %6985, %v4840_v11   ;;  %v14693_v6 = vld [vmem:[#allocation72_spill] sm:$0xff]  ;;  %v14695_v45 = vld [vmem:[#allocation23_spill] sm:$0xff] }
 0x3d7   :  { %v4056_v50 = vsel %vm2427_vm7, %v12420_v29, %v12264_v59  ;;  %v4167_v23 = vor.u32 %v4166_v22, %v4163_v21  ;;  %v4185_v27 = vshrl.u32 %v3818_v61, 16  ;;  %v4188_v16 = vshll.u32 %v3818_v61, 16  ;;  %5070 = vperm.xlu0 %6984, %v4843_v40   ;;  %v14691_v21 = vld [vmem:[#allocation291_spill] sm:$0xff]  ;;  %v14692_v22 = vld [vmem:[#allocation136_spill] sm:$0xff] }
 0x3d8   :  { %6905 = vmatmul.mubr.bf16.gmra.mrb[48].mxu0 %v4056_v50  ;;  %v4175_v37 = vor.u32 %v4174_v41, %v4171_v1  ;;  %vm189_vm9 = vcmp.ne.f32.partialorder %v89_v49, 0.0  ;;  %v3356_v63 = vsel %vm3258_vm11, %v14685_v56, %v14684_v26  ;;  %v3659_v58 = vsel %vm3567_vm4, %v3556_v36, %v14686_v12  ;;  %v14694_v41 = vld [vmem:[#allocation180_spill] sm:$0xff]  ;;  %v12554_v38 = vpop.permute.xlu0 %4890  ;;  %v95_v36 = vld [vmem:[%s13350_s4 + $0x230] sm:$0xff] }
 0x3d9   :  { %v3760_v59 = vsel %vm3670_vm5, %v3657_v7, %v12400_v32  ;;  %v4845_v29 = vsel %vm190_vm8, 1, %v14548_v52  ;;  %v3455_v48 = vsel %vm3361_vm12, %v14688_v4, %v14687_v17  ;;  %v3457_v35 = vsel %vm3361_vm12, %v3354_v9, %v14689_v28  ;;  %v91_v32 = vld [vmem:[%s13350_s4 + $0x210] sm:$0xff]  ;;  %v14699_v28 = vld [vmem:[#allocation75_spill] sm:$0xff] }
 0x3da   :  { %v3762_v24 = vsel %vm3670_vm5, %v3659_v58, %v12416_v15  ;;  %vm192_vm14 = vcmp.ne.f32.partialorder %v92_v39, 0.0  ;;  %v4179_v53 = vrot.slane %v4177_v33, 2  ;;  %v4182_v31 = vrot.slane %v4180_v34, 3  ;;  %5067 = vperm.xlu1 %6985, %v4842_v57   ;;  %v94_v15 = vld [vmem:[%s13350_s4 + $0x228] sm:$0xff]  ;;  %v14698_v4 = vld [vmem:[#allocation70_spill] sm:$0xff] }
 0x3db   :  { %v4168_v25 = vsel %vm2427_vm7, %v4159_v54, %v4167_v23  ;;  %v4844_v9 = vsel %vm189_vm9, 1, %v14548_v52  ;;  %v4187_v10 = vrot.slane %v4185_v27, 2  ;;  %v4190_v3 = vrot.slane %v4188_v16, 3  ;;  %5076 = vperm.xlu0 %6984, %v4845_v29   ;;  %v93_v54 = vld [vmem:[%s13350_s4 + $0x220] sm:$0xff]  ;;  %v12552_v5 = vpop.permute.xlu1 %4884  ;;  %v14696_v57 = vld [vmem:[#allocation181_spill] sm:$0xff] }
 0x3dc   :  { %v3819_v13 = vsel %vm3773_vm2, %v3760_v59, 0  ;;  %6933 = vmatmul.mubr.bf16.gmra.mrb[24].mxu1 %v4168_v25  ;;  %v4176_v14 = vsel %vm2427_vm7, %v4167_v23, %v4175_v37  ;;  %v3558_v19 = vsel %vm3464_vm13, %v3455_v48, %v14690_v46  ;;  %v3820_v8 = vsel %vm3773_vm2, %v3762_v24, 0  ;;  %v14697_v23 = vld [vmem:[#allocation20_spill] sm:$0xff]  ;;  %v98_v58 = vld [vmem:[%s13350_s4 + $0x248] sm:$0xff]  ;;  %v14701_v25 = vld [vmem:[#allocation186_spill] sm:$0xff] }
 0x3dd   :  { %6936 = vmatprep.mubr.bf16.mxu1 %v4176_v14  ;;  %v4847_v11 = vsel %vm192_vm14, 1, %v14548_v52  ;;  %vm191_vm15 = vcmp.ne.f32.partialorder %v91_v32, 0.0  ;;  %v3358_v42 = vsel %vm3258_vm11, %v14692_v22, %v14691_v21  ;;  %v3560_v1 = vsel %vm3464_vm13, %v3457_v35, %v14693_v6  ;;  %v100_v46 = vld [vmem:[%s13350_s4 + $0x258] sm:$0xff]  ;;  %v14702_v22 = vld [vmem:[#allocation241_spill] sm:$0xff] }
 0x3de   :  { %v3661_v30 = vsel %vm3567_vm4, %v3558_v19, %v14694_v41  ;;  %vm194_vm0 = vcmp.ne.f32.partialorder %v94_v15, 0.0  ;;  %v4193_v60 = vshrl.u32 %v3819_v13, 16  ;;  %v4196_v43 = vshll.u32 %v3819_v13, 16  ;;  %5073 = vperm.xlu1 %6985, %v4844_v9  }
 0x3df   :  { %v4183_v44 = vor.u32 %v4182_v31, %v4179_v53  ;;  %vm193_vm1 = vcmp.ne.f32.partialorder %v93_v54, 0.0  ;;  %v4201_v61 = vshrl.u32 %v3820_v8, 16  ;;  %v4204_v40 = vshll.u32 %v3820_v8, 16  ;;  %5082 = vperm.xlu0 %6984, %v4847_v11   ;;  %v12576_v16 = vpop.permute.xlu1 %4887  ;;  %v14700_v53 = vld [vmem:[#allocation182_spill] sm:$0xff] }
 0x3e0   :  { %v4846_v49 = vsel %vm191_vm15, 1, %v14548_v52  ;;  %v4191_v47 = vor.u32 %v4190_v3, %v4187_v10  ;;  %v3459_v7 = vsel %vm3361_vm12, %v3356_v63, %v14695_v45  ;;  %v3663_v33 = vsel %vm3567_vm4, %v3560_v1, %v14696_v57 }
 0x3e1   :  { %v3764_v34 = vsel %vm3670_vm5, %v3661_v30, %v12441_v18  ;;  %v4849_v50 = vsel %vm194_vm0, 1, %v14548_v52  ;;  %v3461_v39 = vsel %vm3361_vm12, %v3358_v42, %v14697_v23  ;;  %v3766_v27 = vsel %vm3670_vm5, %v3663_v33, %v12462_v62  ;;  %v12580_v18 = vpop.permute.xlu0 %4896  ;;  %v14703_v42 = vld [vmem:[#allocation124_spill] sm:$0xff] }
 0x3e2   :  { %v4848_v26 = vsel %vm193_vm1, 1, %v14548_v52  ;;  %vm196_vm3 = vcmp.ne.f32.partialorder %v96_v55, 0.0  ;;  %v4195_v56 = vrot.slane %v4193_v60, 2  ;;  %v4198_v63 = vrot.slane %v4196_v43, 3  ;;  %5079 = vperm.xlu1 %6985, %v4846_v49   ;;  %v14704_v30 = vld [vmem:[#allocation292_spill] sm:$0xff] }
 0x3e3   :  { %v4184_v12 = vsel %vm2427_vm7, %v4175_v37, %v4183_v44  ;;  %vm195_vm6 = vcmp.ne.f32.partialorder %v95_v36, 0.0  ;;  %v4203_v59 = vrot.slane %v4201_v61, 2  ;;  %v4206_v29 = vrot.slane %v4204_v40, 3  ;;  %5088 = vperm.xlu0 %6984, %v4849_v50   ;;  %v97_v37 = vld [vmem:[%s13350_s4 + $0x240] sm:$0xff]  ;;  %v12601_v15 = vpop.permute.xlu1 %4893  ;;  %v102_v36 = vld [vmem:[%s13350_s4 + $0x268] sm:$0xff] }
 0x3e4   :  { %v3821_v62 = vsel %vm3773_vm2, %v3764_v34, 0  ;;  %6937 = vmatmul.mubr.bf16.gmra.mrb[28].mxu1 %v4184_v12  ;;  %v4192_v17 = vsel %vm2427_vm7, %v4183_v44, %v4191_v47  ;;  %v3562_v48 = vsel %vm3464_vm13, %v3459_v7, %v14698_v4  ;;  %v3564_v35 = vsel %vm3464_vm13, %v3461_v39, %v14699_v28  ;;  %v14705_v34 = vld [vmem:[#allocation26_spill] sm:$0xff]  ;;  %v14706_v23 = vld [vmem:[#allocation80_spill] sm:$0xff] }
 0x3e5   :  { %v3822_v24 = vsel %vm3773_vm2, %v3766_v27, 0  ;;  %6940 = vmatprep.mubr.bf16.mxu1 %v4192_v17  ;;  %v4851_v32 = vsel %vm196_vm3, 1, %v14548_v52  ;;  %v3665_v31 = vsel %vm3567_vm4, %v3562_v48, %v14700_v53  ;;  %v3667_v9 = vsel %vm3567_vm4, %v3564_v35, %v14701_v25  ;;  %v12605_v14 = vpop.permute.xlu0 %4902 }
 0x3e6   :  { %v4850_v10 = vsel %vm195_vm6, 1, %v14548_v52  ;;  %vm198_vm8 = vcmp.ne.f32.partialorder %v98_v58, 0.0  ;;  %v4209_v3 = vshrl.u32 %v3821_v62, 16  ;;  %v4212_v13 = vshll.u32 %v3821_v62, 16  ;;  %5085 = vperm.xlu1 %6985, %v4848_v26   ;;  %v101_v26 = vld [vmem:[%s13350_s4 + $0x260] sm:$0xff]  ;;  %v14707_v62 = vld [vmem:[#allocation187_spill] sm:$0xff] }
 0x3e7   :  { %v4199_v54 = vor.u32 %v4198_v63, %v4195_v56  ;;  %vm197_vm9 = vcmp.ne.f32.partialorder %v97_v37, 0.0  ;;  %v4217_v19 = vshrl.u32 %v3822_v24, 16  ;;  %v4220_v8 = vshll.u32 %v3822_v24, 16  ;;  %5094 = vperm.xlu0 %6984, %v4851_v32   ;;  %v12620_v43 = vpop.permute.xlu1 %4899  ;;  %v103_v32 = vld [vmem:[%s13350_s4 + $0x270] sm:$0xff] }
 0x3e8   :  { %v3768_v11 = vsel %vm3670_vm5, %v3665_v31, %v12478_v51  ;;  %v4207_v21 = vor.u32 %v4206_v29, %v4203_v59  ;;  %v3257_v6 = vsel %vm3155_vm10, %v14703_v42, %v14702_v22  ;;  %v3770_v1 = vsel %vm3670_vm5, %v3667_v9, %v12498_v0  ;;  %v99_v51 = vld [vmem:[%s13350_s4 + $0x250] sm:$0xff]  ;;  %v104_v29 = vld [vmem:[%s13350_s4 + $0x278] sm:$0xff] }
 0x3e9   :  { %v4853_v41 = vsel %vm198_vm8, 1, %v14548_v52  ;;  %v3360_v60 = vsel %vm3258_vm11, %v3257_v6, %v14704_v30  ;;  %v4852_v44 = vsel %vm197_vm9, 1, %v14548_v52  ;;  %vm200_vm14 = vcmp.ne.f32.partialorder %v100_v46, 0.0  ;;  %v12628_v49 = vpop.permute.xlu0 %4908 }
 0x3ea   :  { %v4211_v55 = vrot.slane %v4209_v3, 2  ;;  %v4214_v61 = vrot.slane %v4212_v13, 3  ;;  %v3823_v40 = vsel %vm3773_vm2, %v3768_v11, 0  ;;  %v4200_v0 = vsel %vm2427_vm7, %v4191_v47, %v4199_v54  ;;  %5091 = vperm.xlu1 %6985, %v4850_v10   ;;  %v105_v11 = vld [vmem:[%s13350_s4 + $0x280] sm:$0xff] }
 0x3eb   :  { %v4219_v45 = vrot.slane %v4217_v19, 2  ;;  %v4222_v7 = vrot.slane %v4220_v8, 3  ;;  %v3824_v57 = vsel %vm3773_vm2, %v3770_v1, 0  ;;  %v4208_v33 = vsel %vm2427_vm7, %v4199_v54, %v4207_v21  ;;  %5100 = vperm.xlu0 %6984, %v4853_v41   ;;  %v12641_v27 = vpop.permute.xlu1 %4905  ;;  %v108_v1 = vld [vmem:[%s13350_s4 + $0x298] sm:$0xff] }
 0x3ec   :  { %6941 = vmatmul.mubr.bf16.gmra.mrb[32].mxu1 %v4200_v0  ;;  %v3463_v50 = vsel %vm3361_vm12, %v3360_v60, %v14705_v34  ;;  %v4855_v47 = vsel %vm200_vm14, 1, %v14548_v52  ;;  %vm199_vm10 = vcmp.ne.f32.partialorder %v99_v51, 0.0  ;;  %vm202_vm11 = vcmp.ne.f32.partialorder %v102_v36, 0.0  ;;  %v107_v51 = vld [vmem:[%s13350_s4 + $0x290] sm:$0xff]  ;;  %v110_v36 = vld [vmem:[%s13350_s4 + $0x2a8] sm:$0xff]  ;;  %v109_v34 = vld [vmem:[%s13350_s4 + $0x2a0] sm:$0xff] }
 0x3ed   :  { %6944 = vmatprep.mubr.bf16.mxu1 %v4208_v33  ;;  %v3566_v39 = vsel %vm3464_vm13, %v3463_v50, %v14706_v23  ;;  %v4225_v56 = vshrl.u32 %v3823_v40, 16  ;;  %v4228_v63 = vshll.u32 %v3823_v40, 16  ;;  %v4233_v12 = vshrl.u32 %v3824_v57, 16  ;;  %v12646_v58 = vpop.permute.xlu0 %4914  ;;  %v112_v23 = vld [vmem:[%s13350_s4 + $0x2b8] sm:$0xff] }
 0x3ee   :  { %5097 = vperm.xlu1 %6985, %v4852_v44   ;;  %v4215_v59 = vor.u32 %v4214_v61, %v4211_v55  ;;  %v3669_v17 = vsel %vm3567_vm4, %v3566_v39, %v14707_v62  ;;  %v4236_v37 = vshll.u32 %v3824_v57, 16  ;;  %v4854_v4 = vsel %vm199_vm10, 1, %v14548_v52 }
 0x3ef   :  { %5106 = vperm.xlu0 %6984, %v4855_v47   ;;  %v4223_v48 = vor.u32 %v4222_v7, %v4219_v45  ;;  %v3772_v28 = vsel %vm3670_vm5, %v3669_v17, %v12522_v20  ;;  %v4857_v35 = vsel %vm202_vm11, 1, %v14548_v52  ;;  %vm201_vm12 = vcmp.ne.f32.partialorder %v101_v26, 0.0  ;;  %v12657_v24 = vpop.permute.xlu1 %4911  ;;  %v106_v20 = vld [vmem:[%s13350_s4 + $0x288] sm:$0xff] }
 0x3f0   :  { %vm204_vm13 = vcmp.ne.f32.partialorder %v104_v29, 0.0  ;;  %v4227_v53 = vrot.slane %v4225_v56, 2  ;;  %v4230_v31 = vrot.slane %v4228_v63, 3  ;;  %v4235_v25 = vrot.slane %v4233_v12, 2  ;;  %v111_v63 = vld [vmem:[%s13350_s4 + $0x2b0] sm:$0xff]  ;;  %v114_v29 = vld [vmem:[%s13350_s4 + $0x2c8] sm:$0xff] }
 0x3f1   :  { %v4216_v9 = vsel %vm2427_vm7, %v4207_v21, %v4215_v59  ;;  %v12663_v10 = vpop.permute.xlu0 %4920  ;;  %v4238_v3 = vrot.slane %v4236_v37, 3  ;;  %v3825_v13 = vsel %vm3773_vm2, %v3772_v28, 0  ;;  %v4224_v54 = vsel %vm2427_vm7, %v4215_v59, %v4223_v48  ;;  %v116_v28 = vld [vmem:[%s13350_s4 + $0x2d8] sm:$0xff] }
 0x3f2   :  { %5103 = vperm.xlu1 %6985, %v4854_v4   ;;  %v4856_v46 = vsel %vm201_vm12, 1, %v14548_v52  ;;  %v4859_v19 = vsel %vm204_vm13, 1, %v14548_v52  ;;  %vm203_vm5 = vcmp.ne.f32.partialorder %v103_v32, 0.0  ;;  %vm206_vm4 = vcmp.ne.f32.partialorder %v106_v20, 0.0  ;;  %v113_v4 = vld [vmem:[%s13350_s4 + $0x2c0] sm:$0xff] }
 0x3f3   :  { %5112 = vperm.xlu0 %6984, %v4857_v35   ;;  %v12674_v8 = vpop.permute.xlu1 %4917  ;;  %v4241_v21 = vshrl.u32 %v3825_v13, 16  ;;  %v4244_v22 = vshll.u32 %v3825_v13, 16  ;;  %v4231_v6 = vor.u32 %v4230_v31, %v4227_v53  ;;  %v4858_v41 = vsel %vm203_vm5, 1, %v14548_v52  ;;  %v115_v31 = vld [vmem:[%s13350_s4 + $0x2d0] sm:$0xff] }
 0x3f4   :  { %6945 = vmatmul.mubr.bf16.gmra.mrb[36].mxu1 %v4216_v9  ;;  %v4239_v30 = vor.u32 %v4238_v3, %v4235_v25  ;;  %v4861_v60 = vsel %vm206_vm4, 1, %v14548_v52  ;;  %vm205_vm2 = vcmp.ne.f32.partialorder %v105_v11, 0.0  ;;  %vm208_vm15 = vcmp.ne.f32.partialorder %v108_v1, 0.0  ;;  %v118_v9 = vld [vmem:[%s13350_s4 + $0x2e8] sm:$0xff] }
 0x3f5   :  { %6948 = vmatprep.mubr.bf16.mxu1 %v4224_v54  ;;  %v12679_v42 = vpop.permute.xlu0 %4926  ;;  %v4243_v55 = vrot.slane %v4241_v21, 2  ;;  %v4246_v61 = vrot.slane %v4244_v22, 3  ;;  %v4232_v40 = vsel %vm2427_vm7, %v4223_v48, %v4231_v6  ;;  %v4860_v7 = vsel %vm205_vm2, 1, %v14548_v52  ;;  %v117_v54 = vld [vmem:[%s13350_s4 + $0x2e0] sm:$0xff] }
 0x3f6   :  { %5109 = vperm.xlu1 %6985, %v4856_v46   ;;  %v4240_v45 = vsel %vm2427_vm7, %v4231_v6, %v4239_v30  ;;  %v4863_v57 = vsel %vm208_vm15, 1, %v14548_v52  ;;  %vm207_vm0 = vcmp.ne.f32.partialorder %v107_v51, 0.0  ;;  %vm210_vm1 = vcmp.ne.f32.partialorder %v110_v36, 0.0  ;;  %v119_v6 = vld [vmem:[%s13350_s4 + $0x2f0] sm:$0xff] }
 0x3f7   :  { %5118 = vperm.xlu0 %6984, %v4859_v19   ;;  %v12686_v44 = vpop.permute.xlu1 %4923  ;;  %v4247_v47 = vor.u32 %v4246_v61, %v4243_v55  ;;  %v4862_v39 = vsel %vm207_vm0, 1, %v14548_v52  ;;  %v4865_v26 = vsel %vm210_vm1, 1, %v14548_v52  ;;  %vm209_vm3 = vcmp.ne.f32.partialorder %v109_v34, 0.0  ;;  %v120_v19 = vld [vmem:[%s13350_s4 + $0x2f8] sm:$0xff]  ;;  %v121_v55 = vld [vmem:[%s13350_s4 + $0x300] sm:$0xff] }
 0x3f8   :  { %vm212_vm6 = vcmp.ne.f32.partialorder %v112_v23, 0.0  ;;  %v4864_v62 = vsel %vm209_vm3, 1, %v14548_v52  ;;  %vm211_vm8 = vcmp.ne.f32.partialorder %v111_v63, 0.0  ;;  %vm214_vm9 = vcmp.ne.f32.partialorder %v114_v29, 0.0 }
 0x3f9   :  { %v12692_v0 = vpop.permute.xlu0 %4932  ;;  %v4248_v12 = vsel %vm2427_vm7, %v4239_v30, %v4247_v47  ;;  %v4867_v17 = vsel %vm212_vm6, 1, %v14548_v52  ;;  %v4866_v35 = vsel %vm211_vm8, 1, %v14548_v52  ;;  %v4869_v32 = vsel %vm214_vm9, 1, %v14548_v52 }
 0x3fa   :  { %5115 = vperm.xlu1 %6985, %v4858_v41   ;;  %vm213_vm7 = vcmp.ne.f32.partialorder %v113_v4, 0.0  ;;  %vm216_vm14 = vcmp.ne.f32.partialorder %v116_v28, 0.0  ;;  %vm215_vm10 = vcmp.ne.f32.partialorder %v115_v31, 0.0  ;;  %vm218_vm11 = vcmp.ne.f32.partialorder %v118_v9, 0.0  ;;  %v122_v41 = vld [vmem:[%s13350_s4 + $0x308] sm:$0xff] }
 0x3fb   :  { %5124 = vperm.xlu0 %6984, %v4861_v60   ;;  %v12700_v33 = vpop.permute.xlu1 %4929  ;;  %v4868_v20 = vsel %vm213_vm7, 1, %v14548_v52  ;;  %v4871_v3 = vsel %vm216_vm14, 1, %v14548_v52  ;;  %v4870_v11 = vsel %vm215_vm10, 1, %v14548_v52  ;;  %v4873_v21 = vsel %vm218_vm11, 1, %v14548_v52 }
 0x3fc   :  { %6949 = vmatmul.mubr.bf16.gmra.mrb[40].mxu1 %v4232_v40  ;;  %vm217_vm12 = vcmp.ne.f32.partialorder %v117_v54, 0.0  ;;  %vm220_vm13 = vcmp.ne.f32.partialorder %v120_v19, 0.0  ;;  %vm219_vm5 = vcmp.ne.f32.partialorder %v119_v6, 0.0  ;;  %vm222_vm4 = vcmp.ne.f32.partialorder %v122_v41, 0.0  ;;  %v124_v40 = vld [vmem:[%s13350_s4 + $0x318] sm:$0xff] }
 0x3fd   :  { %6952 = vmatprep.mubr.bf16.mxu1 %v4240_v45  ;;  %v12705_v50 = vpop.permute.xlu0 %4938  ;;  %v4872_v30 = vsel %vm217_vm12, 1, %v14548_v52  ;;  %v4875_v60 = vsel %vm220_vm13, 1, %v14548_v52  ;;  %v4874_v36 = vsel %vm219_vm5, 1, %v14548_v52  ;;  %v4877_v45 = vsel %vm222_vm4, 1, %v14548_v52 }
 0x3fe   :  { %5121 = vperm.xlu1 %6985, %v4860_v7   ;;  %vm221_vm2 = vcmp.ne.f32.partialorder %v121_v55, 0.0  ;;  %vm224_vm15 = vcmp.ne.f32.partialorder %v124_v40, 0.0  ;;  %vm5180_vm1 = vcmp.eq.s32.totalorder %v12528_v2, 1  ;;  %vm5183_vm3 = vcmp.eq.s32.totalorder %v12554_v38, 1 }
 0x3ff   :  { %5130 = vperm.xlu0 %6984, %v4863_v57   ;;  %v12712_v56 = vpop.permute.xlu1 %4935  ;;  %v123_v57 = vld [vmem:[%s13350_s4 + $0x310] sm:$0xff]  ;;  %v4876_v47 = vsel %vm221_vm2, 1, %v14548_v52  ;;  %v4879_v23 = vsel %vm224_vm15, 1, %v14548_v52  ;;  %vm5182_vm6 = vcmp.eq.s32.totalorder %v12576_v16, 1  ;;  %vm5181_vm8 = vcmp.eq.s32.totalorder %v12552_v5, 1  ;;  %s7237_s4 = smov [#allocation3]  }
 0x400   :  { %vm223_vm0 = vcmp.ne.f32.partialorder %v123_v57, 0.0  ;;  %vm5184_vm9 = vcmp.eq.s32.totalorder %v12601_v15, 1  ;;  %vm5186_vm7 = vcmp.eq.s32.totalorder %v12620_v43, 1  ;;  %vm5185_vm14 = vcmp.eq.s32.totalorder %v12580_v18, 1  ;;  %s6200_s26 = sshll.u32 %s7237_s4, 4  ;;  %s6201_s26 = int_to_ptr.vmem [resolvable:$true] %s6200_s26 }
 0x401   :  { %v12718_v59 = vpop.permute.xlu0 %4944  ;;  %v4878_v63 = vsel %vm223_vm0, 1, %v14548_v52  ;;  %vm5187_vm10 = vcmp.eq.s32.totalorder %v12605_v14, 1  ;;  %vm5188_vm11 = vcmp.eq.s32.totalorder %v12641_v27, 1  ;;  %vm5190_vm12 = vcmp.eq.s32.totalorder %v12657_v24, 1  ;;  %s7180_s27 = scalar_lea.vmem %s6201_s26, 6400  ;;  %p7185_p1 = scmp.lt.s32.totalorder %s6201_s26, %s6201_s26 }
 0x402   :  { %5127 = vperm.xlu1 %6985, %v4862_v39   ;;  %vm5189_vm13 = vcmp.eq.s32.totalorder %v12628_v49, 1  ;;  %vm5191_vm5 = vcmp.eq.s32.totalorder %v12646_v58, 1  ;;  %vm5192_vm4 = vcmp.eq.s32.totalorder %v12674_v8, 1  ;;  %vm5194_vm2 = vcmp.eq.s32.totalorder %v12686_v44, 1  ;;  %p7181_p0 = scmp.ne.s32.totalorder %s6201_s26, %s7180_s27  ;;  %p7186_p2 = scmp.lt.s32.totalorder %s7180_s27, %s7180_s27 }
 0x403   :  { %5136 = vperm.xlu0 %6984, %v4865_v26   ;;  %vm5193_vm15 = vcmp.eq.s32.totalorder %v12663_v10, 1  ;;  %vm5195_vm0 = vcmp.eq.s32.totalorder %v12679_v42, 1 }
 0x404   :  { %6953 = vmatmul.mubr.bf16.gmra.mrb[44].mxu1 %v4248_v12  ;;  %v12725_v37 = vpop.permute.xlu1 %4941  ;;  %p7187_p3 = por %p7186_p2, %p7185_p1 }
 0x405   :  { %v12730_v48 = vpop.permute.xlu0 %4950 }
 0x406   :  { %5133 = vperm.xlu1 %6985, %v4864_v62   ;;  %p7188_p4 = pnand %p7187_p3, %p7181_p0 }
 0x407   :  { %5142 = vperm.xlu0 %6984, %v4867_v17  }
 0x409   :  { %v12737_v53 = vpop.permute.xlu1 %4947  ;;  %v12742_v25 = vpop.permute.xlu0 %4956 }
 0x40a   :  { %5139 = vperm.xlu1 %6985, %v4866_v35  }
 0x40b   :  { %5148 = vperm.xlu0 %6984, %v4869_v32  }
 0x40d   :  { %v12749_v13 = vpop.permute.xlu1 %4953  ;;  %v12754_v46 = vpop.permute.xlu0 %4962 }
 0x40e   :  { %5145 = vperm.xlu1 %6985, %v4868_v20  }
 0x40f   :  { %5154 = vperm.xlu0 %6984, %v4871_v3  }
 0x411   :  { %v12761_v22 = vpop.permute.xlu1 %4959 }
 0x412   :  { %5151 = vperm.xlu1 %6985, %v4870_v11   ;;  %v12766_v1 = vpop.permute.xlu0 %4968 }
 0x413   :  { %5160 = vperm.xlu0 %6984, %v4873_v21  }
 0x415   :  { %v12773_v51 = vpop.permute.xlu1 %4965 }
 0x416   :  { %5157 = vperm.xlu1 %6985, %v4872_v30   ;;  %v12778_v61 = vpop.permute.xlu0 %4974 }
 0x417   :  { %5166 = vperm.xlu0 %6984, %v4875_v60  }
 0x419   :  { %v12785_v7 = vpop.permute.xlu1 %4971 }
 0x41a   :  { %5163 = vperm.xlu1 %6985, %v4874_v36   ;;  %v12790_v34 = vpop.permute.xlu0 %4980 }
 0x41b   :  { %5172 = vperm.xlu0 %6984, %v4877_v45  }
 0x41d   :  { %v12794_v39 = vpop.permute.xlu1 %4977 }
 0x41e   :  { %5169 = vperm.xlu1 %6985, %v4876_v47   ;;  %v12796_v26 = vpop.permute.xlu0 %4986 }
 0x41f   :  { %5178 = vperm.xlu0 %6984, %v4879_v23  }
 0x421   :  { %v12799_v12 = vpop.permute.xlu1 %4983 }
 0x422   :  { %5175 = vperm.xlu1 %6985, %v4878_v63   ;;  %v12801_v29 = vpop.permute.xlu0 %4992 }
 0x425   :  { %v12803_v62 = vpop.permute.xlu1 %4989 }
 0x426   :  { %v12805_v17 = vpop.permute.xlu0 %4998 }
 0x429   :  { %v12807_v4 = vpop.permute.xlu1 %4995 }
 0x42a   :  { %v12809_v28 = vpop.permute.xlu0 %5004 }
 0x42d   :  { %v12811_v35 = vpop.permute.xlu1 %5001 }
 0x42e   :  { %v12813_v32 = vpop.permute.xlu0 %5010 }
 0x431   :  { %v12815_v31 = vpop.permute.xlu1 %5007 }
 0x432   :  { %v12817_v52 = vpop.permute.xlu0 %5016 }
 0x433   :  { %14708 = vst [vmem:[#allocation104_spill] sm:$0xff] %v12817_v52 }
 0x435   :  { %v12819_v9 = vpop.permute.xlu1 %5013 }
 0x436   :  { %v12821_v20 = vpop.permute.xlu0 %5022 }
 0x437   :  { %14709 = vst [vmem:[#allocation11_spill] sm:$0xff] %v12821_v20 }
 0x439   :  { %v12823_v3 = vpop.permute.xlu1 %5019 }
 0x43a   :  { %14710 = vst [vmem:[#allocation106_spill] sm:$0xff] %v12823_v3  ;;  %v12825_v54 = vpop.permute.xlu0 %5028 }
 0x43b   :  { %14711 = vst [vmem:[#allocation14_spill] sm:$0xff] %v12825_v54 }
 0x43d   :  { %v12827_v19 = vpop.permute.xlu1 %5025 }
 0x43e   :  { %14712 = vst [vmem:[#allocation109_spill] sm:$0xff] %v12827_v19  ;;  %v12829_v11 = vpop.permute.xlu0 %5034 }
 0x43f   :  { %14713 = vst [vmem:[#allocation13_spill] sm:$0xff] %v12829_v11 }
 0x441   :  { %v12831_v21 = vpop.permute.xlu1 %5031 }
 0x442   :  { %14714 = vst [vmem:[#allocation111_spill] sm:$0xff] %v12831_v21  ;;  %v12836_v6 = vpop.permute.xlu0 %5040 }
 0x445   :  { %v12838_v30 = vpop.permute.xlu1 %5037 }
 0x446   :  { %v12841_v16 = vpop.permute.xlu0 %5046 }
 0x449   :  { %v12843_v11 = vpop.permute.xlu1 %5043 }
 0x44a   :  { %v12849_v15 = vpop.permute.xlu0 %5052 }
 0x44b   :  { %v6858_v41 = vpop.f32.mrb[0].mxu0 }
 0x44c   :  { %v4381_v60 = vpop.f32.mrb[1].mxu0  ;;  %v5282_v36 = vsel %vm5182_vm6, %v6858_v41, 0.0  ;;  %vm5197_vm6 = vcmp.eq.s32.totalorder %v12692_v0, 1 }
 0x44d   :  { %v5280_v55 = vsel %vm5180_vm1, %v4381_v60, 0.0  ;;  %v6859_v40 = vpop.f32.mrb[2].mxu0  ;;  %v5987_v21 = vmul.f32 %v5282_v36, %v5282_v36  ;;  %v12851_v20 = vpop.permute.xlu1 %5049  ;;  %vm5196_vm1 = vcmp.eq.s32.totalorder %v12700_v33, 1 }
 0x44e   :  { %v5283_v45 = vsel %vm5183_vm3, %v6859_v40, 0.0  ;;  %v4384_v57 = vpop.f32.mrb[3].mxu0  ;;  %v5985_v2 = vmul.f32 %v5280_v55, %v5280_v55  ;;  %vm5198_vm3 = vcmp.eq.s32.totalorder %v12712_v56, 1 }
 0x44f   :  { %v6491_v47 = vpack.c.bf16 %v5283_v45, %v5282_v36  ;;  %v5281_v23 = vsel %vm5181_vm8, %v4384_v57, 0.0  ;;  %v5988_v5 = vmul.f32 %v5283_v45, %v5283_v45  ;;  %vm5199_vm8 = vcmp.eq.s32.totalorder %v12705_v50, 1 }
 0x450   :  { %v6486_v63 = vpack.c.bf16 %v5281_v23, %v5280_v55  ;;  %v5880_v38 = vadd.f32 %v5281_v23, %v5280_v55  ;;  %v5986_v54 = vmul.f32 %v5281_v23, %v5281_v23 }
 0x451   :  { %6733 = vst [vmem:[#allocation3 + $0x8] sm:$0xff] %v6491_v47  }
 0x452   :  { %6487 = vst [vmem:[#allocation3] sm:$0xff] %v6486_v63   ;;  %v5881_v60 = vadd.f32 %v5880_v38, %v5282_v36  ;;  %v6085_v19 = vadd.f32 %v5986_v54, %v5985_v2 }
 0x453   :  { %v6862_v41 = vpop.f32.mrb[4].mxu0 }
 0x454   :  { %v5882_v40 = vadd.f32 %v5881_v60, %v5283_v45  ;;  %v6086_v57 = vadd.f32 %v6085_v19, %v5987_v21  ;;  %v4397_v52 = vpop.f32.mrb[5].mxu0  ;;  %v5286_v55 = vsel %vm5186_vm7, %v6862_v41, 0.0  ;;  %vm5202_vm7 = vcmp.eq.s32.totalorder %v12737_v53, 1 }
 0x455   :  { %v5284_v47 = vsel %vm5184_vm9, %v4397_v52, 0.0  ;;  %v6863_v23 = vpop.f32.mrb[6].mxu0  ;;  %v5991_v14 = vmul.f32 %v5286_v55, %v5286_v55  ;;  %vm5200_vm9 = vcmp.eq.s32.totalorder %v12725_v37, 1 }
 0x456   :  { %v6087_v3 = vadd.f32 %v6086_v57, %v5988_v5  ;;  %v5883_v63 = vadd.f32 %v5882_v40, %v5284_v47  ;;  %v5989_v36 = vmul.f32 %v5284_v47, %v5284_v47  ;;  %v5287_v54 = vsel %vm5187_vm10, %v6863_v23, 0.0  ;;  %v4400_v2 = vpop.f32.mrb[7].mxu0 }
 0x457   :  { %v6501_v38 = vpack.c.bf16 %v5287_v54, %v5286_v55  ;;  %v5285_v43 = vsel %vm5185_vm14, %v4400_v2, 0.0  ;;  %v5992_v5 = vmul.f32 %v5287_v54, %v5287_v54  ;;  %vm5201_vm14 = vcmp.eq.s32.totalorder %v12718_v59, 1 }
 0x458   :  { %v6088_v19 = vadd.f32 %v6087_v3, %v5989_v36  ;;  %v6496_v21 = vpack.c.bf16 %v5285_v43, %v5284_v47  ;;  %v5884_v45 = vadd.f32 %v5883_v63, %v5285_v43  ;;  %v5990_v18 = vmul.f32 %v5285_v43, %v5285_v43  ;;  %v12857_v3 = vpop.permute.xlu0 %5058 }
 0x459   :  { %6735 = vst [vmem:[#allocation3 + $0x18] sm:$0xff] %v6501_v38   ;;  %vm5203_vm10 = vcmp.eq.s32.totalorder %v12730_v48, 1 }
 0x45a   :  { %6734 = vst [vmem:[#allocation3 + $0x10] sm:$0xff] %v6496_v21   ;;  %v5885_v52 = vadd.f32 %v5884_v45, %v5286_v55  ;;  %v6089_v60 = vadd.f32 %v6088_v19, %v5990_v18  ;;  %v12859_v55 = vpop.permute.xlu1 %5055 }
 0x45b   :  { %v6866_v41 = vpop.f32.mrb[8].mxu0 }
 0x45c   :  { %v5886_v40 = vadd.f32 %v5885_v52, %v5287_v54  ;;  %v6090_v57 = vadd.f32 %v6089_v60, %v5991_v14  ;;  %v4413_v23 = vpop.f32.mrb[9].mxu0  ;;  %v5290_v47 = vsel %vm5190_vm12, %v6866_v41, 0.0  ;;  %v12862_v60 = vpop.permute.xlu0 %5064  ;;  %vm5206_vm12 = vcmp.eq.s32.totalorder %v12761_v22, 1 }
 0x45d   :  { %v5288_v63 = vsel %vm5188_vm11, %v4413_v23, 0.0  ;;  %v6867_v36 = vpop.f32.mrb[10].mxu0  ;;  %v5995_v58 = vmul.f32 %v5290_v47, %v5290_v47  ;;  %vm5204_vm11 = vcmp.eq.s32.totalorder %v12749_v13, 1 }
 0x45e   :  { %v6091_v2 = vadd.f32 %v6090_v57, %v5992_v5  ;;  %v5887_v27 = vadd.f32 %v5886_v40, %v5288_v63  ;;  %v5993_v38 = vmul.f32 %v5288_v63, %v5288_v63  ;;  %v5291_v43 = vsel %vm5191_vm5, %v6867_v36, 0.0  ;;  %v4416_v24 = vpop.f32.mrb[11].mxu0  ;;  %v12865_v5 = vpop.permute.xlu1 %5061 }
 0x45f   :  { %v6511_v19 = vpack.c.bf16 %v5291_v43, %v5290_v47  ;;  %v5289_v54 = vsel %vm5189_vm13, %v4416_v24, 0.0  ;;  %v5996_v40 = vmul.f32 %v5291_v43, %v5291_v43  ;;  %vm5205_vm13 = vcmp.eq.s32.totalorder %v12742_v25, 1 }
 0x460   :  { %v6092_v21 = vadd.f32 %v6091_v2, %v5993_v38  ;;  %v6506_v45 = vpack.c.bf16 %v5289_v54, %v5288_v63  ;;  %v5888_v18 = vadd.f32 %v5887_v27, %v5289_v54  ;;  %v5994_v49 = vmul.f32 %v5289_v54, %v5289_v54 }
 0x461   :  { %6737 = vst [vmem:[#allocation3 + $0x28] sm:$0xff] %v6511_v19   ;;  %vm5207_vm5 = vcmp.eq.s32.totalorder %v12754_v46, 1 }
 0x462   :  { %6736 = vst [vmem:[#allocation3 + $0x20] sm:$0xff] %v6506_v45   ;;  %v5889_v14 = vadd.f32 %v5888_v18, %v5290_v47  ;;  %v6093_v52 = vadd.f32 %v6092_v21, %v5994_v49  ;;  %v12869_v49 = vpop.permute.xlu0 %5070  ;;  %v12871_v10 = vpop.permute.xlu1 %5067 }
 0x463   :  { %v6870_v41 = vpop.f32.mrb[12].mxu0 }
 0x464   :  { %v5890_v57 = vadd.f32 %v5889_v14, %v5291_v43  ;;  %v6094_v23 = vadd.f32 %v6093_v52, %v5995_v58  ;;  %v4429_v63 = vpop.f32.mrb[13].mxu0  ;;  %v5294_v36 = vsel %vm5194_vm2, %v6870_v41, 0.0  ;;  %vm5233_vm2 = vcmp.eq.s32.totalorder %v12836_v6, 1 }
 0x465   :  { %v5292_v47 = vsel %vm5192_vm4, %v4429_v63, 0.0  ;;  %v6871_v2 = vpop.f32.mrb[14].mxu0  ;;  %v5999_v42 = vmul.f32 %v5294_v36, %v5294_v36  ;;  %vm5208_vm4 = vcmp.eq.s32.totalorder %v12773_v51, 1 }
 0x466   :  { %v6095_v27 = vadd.f32 %v6094_v23, %v5996_v40  ;;  %v5891_v8 = vadd.f32 %v5890_v57, %v5292_v47  ;;  %v5997_v38 = vmul.f32 %v5292_v47, %v5292_v47  ;;  %v5295_v24 = vsel %vm5195_vm0, %v6871_v2, 0.0  ;;  %v4432_v19 = vpop.f32.mrb[15].mxu0  ;;  %v12877_v33 = vpop.permute.xlu0 %5076 }
 0x467   :  { %v6521_v54 = vpack.c.bf16 %v5295_v24, %v5294_v36  ;;  %v5293_v44 = vsel %vm5193_vm15, %v4432_v19, 0.0  ;;  %v6000_v41 = vmul.f32 %v5295_v24, %v5295_v24  ;;  %vm5232_vm15 = vcmp.eq.s32.totalorder %v12838_v30, 1 }
 0x468   :  { %v6096_v21 = vadd.f32 %v6095_v27, %v5997_v38  ;;  %v6516_v45 = vpack.c.bf16 %v5293_v44, %v5292_v47  ;;  %v5892_v18 = vadd.f32 %v5891_v8, %v5293_v44  ;;  %v5998_v43 = vmul.f32 %v5293_v44, %v5293_v44  ;;  %v12879_v44 = vpop.permute.xlu1 %5073 }
 0x469   :  { %6739 = vst [vmem:[#allocation3 + $0x38] sm:$0xff] %v6521_v54   ;;  %vm5235_vm0 = vcmp.eq.s32.totalorder %v12841_v16, 1 }
 0x46a   :  { %6738 = vst [vmem:[#allocation3 + $0x30] sm:$0xff] %v6516_v45   ;;  %v5893_v58 = vadd.f32 %v5892_v18, %v5294_v36  ;;  %v6097_v14 = vadd.f32 %v6096_v21, %v5998_v43 }
 0x46b   :  { %v6874_v52 = vpop.f32.mrb[16].mxu0 }
 0x46c   :  { %v6098_v40 = vadd.f32 %v6097_v14, %v5999_v42  ;;  %v4445_v57 = vpop.f32.mrb[17].mxu0  ;;  %v5894_v23 = vadd.f32 %v5893_v58, %v5295_v24  ;;  %v5298_v63 = vsel %vm5198_vm3, %v6874_v52, 0.0  ;;  %vm5211_vm3 = vcmp.eq.s32.totalorder %v12778_v61, 1 }
 0x46d   :  { %v5296_v47 = vsel %vm5196_vm1, %v4445_v57, 0.0  ;;  %v6875_v2 = vpop.f32.mrb[18].mxu0  ;;  %v6003_v50 = vmul.f32 %v5298_v63, %v5298_v63  ;;  %vm5234_vm1 = vcmp.eq.s32.totalorder %v12843_v11, 1 }
 0x46e   :  { %v5895_v27 = vadd.f32 %v5894_v23, %v5296_v47  ;;  %v6001_v8 = vmul.f32 %v5296_v47, %v5296_v47  ;;  %v6099_v36 = vadd.f32 %v6098_v40, %v6000_v41  ;;  %v5299_v38 = vsel %vm5199_vm8, %v6875_v2, 0.0  ;;  %v4448_v19 = vpop.f32.mrb[19].mxu0  ;;  %v12885_v40 = vpop.permute.xlu0 %5082 }
 0x46f   :  { %v6531_v54 = vpack.c.bf16 %v5299_v38, %v5298_v63  ;;  %v5297_v56 = vsel %vm5197_vm6, %v4448_v19, 0.0  ;;  %v6004_v58 = vmul.f32 %v5299_v38, %v5299_v38  ;;  %vm5210_vm6 = vcmp.eq.s32.totalorder %v12785_v7, 1 }
 0x470   :  { %v6100_v21 = vadd.f32 %v6099_v36, %v6001_v8  ;;  %v6526_v24 = vpack.c.bf16 %v5297_v56, %v5296_v47  ;;  %v5896_v45 = vadd.f32 %v5895_v27, %v5297_v56  ;;  %v6002_v0 = vmul.f32 %v5297_v56, %v5297_v56 }
 0x471   :  { %6741 = vst [vmem:[#allocation3 + $0x48] sm:$0xff] %v6531_v54   ;;  %vm5209_vm8 = vcmp.eq.s32.totalorder %v12766_v1, 1 }
 0x472   :  { %6740 = vst [vmem:[#allocation3 + $0x40] sm:$0xff] %v6526_v24   ;;  %v5897_v18 = vadd.f32 %v5896_v45, %v5298_v63  ;;  %v6101_v43 = vadd.f32 %v6100_v21, %v6002_v0  ;;  %v12887_v63 = vpop.permute.xlu1 %5079  ;;  %v12890_v45 = vpop.permute.xlu0 %5088 }
 0x473   :  { %v6878_v42 = vpop.f32.mrb[20].mxu0 }
 0x474   :  { %v6102_v14 = vadd.f32 %v6101_v43, %v6003_v50  ;;  %v4461_v52 = vpop.f32.mrb[21].mxu0  ;;  %v5898_v41 = vadd.f32 %v5897_v18, %v5299_v38  ;;  %v5302_v57 = vsel %vm5202_vm7, %v6878_v42, 0.0  ;;  %vm5238_vm7 = vcmp.eq.s32.totalorder %v12859_v55, 1 }
 0x475   :  { %v5300_v23 = vsel %vm5200_vm9, %v4461_v52, 0.0  ;;  %v6879_v47 = vpop.f32.mrb[22].mxu0  ;;  %v6007_v48 = vmul.f32 %v5302_v57, %v5302_v57  ;;  %vm5239_vm9 = vcmp.eq.s32.totalorder %v12857_v3, 1 }
 0x476   :  { %v5899_v2 = vadd.f32 %v5898_v41, %v5300_v23  ;;  %v6005_v37 = vmul.f32 %v5300_v23, %v5300_v23  ;;  %v6103_v27 = vadd.f32 %v6102_v14, %v6004_v58  ;;  %v5303_v8 = vsel %vm5203_vm10, %v6879_v47, 0.0  ;;  %v4464_v53 = vpop.f32.mrb[23].mxu0  ;;  %v12893_v50 = vpop.permute.xlu1 %5085 }
 0x477   :  { %v6541_v36 = vpack.c.bf16 %v5303_v8, %v5302_v57  ;;  %v5301_v19 = vsel %vm5201_vm14, %v4464_v53, 0.0  ;;  %v6008_v18 = vmul.f32 %v5303_v8, %v5303_v8  ;;  %v12901_v25 = vpop.permute.xlu0 %5094  ;;  %vm5237_vm14 = vcmp.eq.s32.totalorder %v12849_v15, 1 }
 0x478   :  { %v6104_v54 = vadd.f32 %v6103_v27, %v6005_v37  ;;  %v6536_v38 = vpack.c.bf16 %v5301_v19, %v5300_v23  ;;  %v5900_v56 = vadd.f32 %v5899_v2, %v5301_v19  ;;  %v6006_v59 = vmul.f32 %v5301_v19, %v5301_v19 }
 0x479   :  { %6743 = vst [vmem:[#allocation3 + $0x58] sm:$0xff] %v6541_v36   ;;  %vm5236_vm10 = vcmp.eq.s32.totalorder %v12851_v20, 1 }
 0x47a   :  { %6742 = vst [vmem:[#allocation3 + $0x50] sm:$0xff] %v6536_v38   ;;  %v5901_v21 = vadd.f32 %v5900_v56, %v5302_v57  ;;  %v6105_v24 = vadd.f32 %v6104_v54, %v6006_v59  ;;  %v12904_v38 = vpop.permute.xlu1 %5091 }
 0x47b   :  { %v6882_v0 = vpop.f32.mrb[24].mxu0 }
 0x47c   :  { %v6106_v43 = vadd.f32 %v6105_v24, %v6007_v48  ;;  %v4477_v42 = vpop.f32.mrb[25].mxu0  ;;  %v5902_v58 = vadd.f32 %v5901_v21, %v5303_v8  ;;  %v5306_v14 = vsel %vm5206_vm12, %v6882_v0, 0.0  ;;  %vm5215_vm12 = vcmp.eq.s32.totalorder %v12796_v26, 1 }
 0x47d   :  { %v5304_v52 = vsel %vm5204_vm11, %v4477_v42, 0.0  ;;  %v6883_v41 = vpop.f32.mrb[26].mxu0  ;;  %v6011_v56 = vmul.f32 %v5306_v14, %v5306_v14  ;;  %vm5212_vm11 = vcmp.eq.s32.totalorder %v12794_v39, 1 }
 0x47e   :  { %v5903_v57 = vadd.f32 %v5902_v58, %v5304_v52  ;;  %v6009_v13 = vmul.f32 %v5304_v52, %v5304_v52  ;;  %v6107_v23 = vadd.f32 %v6106_v43, %v6008_v18  ;;  %v5307_v47 = vsel %vm5207_vm5, %v6883_v41, 0.0  ;;  %v4480_v2 = vpop.f32.mrb[27].mxu0  ;;  %v6910_v27 = vpop.f32.mrb[0].mxu1 }
 0x47f   :  { %v6551_v37 = vpack.c.bf16 %v5307_v47, %v5306_v14  ;;  %v5305_v22 = vsel %vm5205_vm13, %v4480_v2, 0.0  ;;  %v4589_v8 = vpop.f32.mrb[1].mxu1  ;;  %v12906_v24 = vsel %vm5234_vm1, %v6910_v27, 0.0  ;;  %v6012_v43 = vmul.f32 %v5307_v47, %v5307_v47  ;;  %v12928_v51 = vpop.permute.xlu1 %5097 }
 0x480   :  { %v6108_v53 = vadd.f32 %v6107_v23, %v6009_v13  ;;  %v6546_v36 = vpack.c.bf16 %v5305_v22, %v5304_v52  ;;  %v5904_v19 = vadd.f32 %v5903_v57, %v5305_v22  ;;  %v6010_v54 = vmul.f32 %v5305_v22, %v5305_v22  ;;  %v6911_v46 = vpop.f32.mrb[2].mxu1  ;;  %v12925_v22 = vpop.permute.xlu0 %5100 }
 0x481   :  { %6745 = vst [vmem:[#allocation3 + $0x68] sm:$0xff] %v6551_v37   ;;  %v4592_v21 = vpop.f32.mrb[3].mxu1  ;;  %v12908_v0 = vsel %vm5232_vm15, %v4589_v8, 0.0  ;;  %v12910_v30 = vsel %vm5235_vm0, %v6911_v46, 0.0  ;;  %vm5214_vm13 = vcmp.eq.s32.totalorder %v12799_v12, 1  ;;  %vm5213_vm5 = vcmp.eq.s32.totalorder %v12790_v34, 1 }
 0x482   :  { %6744 = vst [vmem:[#allocation3 + $0x60] sm:$0xff] %v6546_v36   ;;  %v5905_v59 = vadd.f32 %v5904_v19, %v5306_v14  ;;  %v6109_v48 = vadd.f32 %v6108_v53, %v6010_v54  ;;  %v12914_v16 = vsel %vm5233_vm2, %v4592_v21, 0.0  ;;  %v6621_v42 = vpack.c.bf16 %v12910_v30, %v12906_v24 }
 0x483   :  { %v6886_v18 = vpop.f32.mrb[28].mxu0  ;;  %v6616_v58 = vpack.c.bf16 %v12914_v16, %v12908_v0  ;;  %vm5243_vm2 = vcmp.eq.s32.totalorder %v12869_v49, 1  ;;  %vm5242_vm15 = vcmp.eq.s32.totalorder %v12871_v10, 1  ;;  %vm5241_vm0 = vcmp.eq.s32.totalorder %v12862_v60, 1 }
 0x484   :  { %v6110_v11 = vadd.f32 %v6109_v48, %v6011_v56  ;;  %v4493_v14 = vpop.f32.mrb[29].mxu0  ;;  %v5906_v6 = vadd.f32 %v5905_v59, %v5307_v47  ;;  %6759 = vst [vmem:[#allocation3 + $0xd8] sm:$0xff] %v6621_v42   ;;  %v5310_v57 = vsel %vm5210_vm6, %v6886_v18, 0.0  ;;  %vm5240_vm1 = vcmp.eq.s32.totalorder %v12865_v5, 1 }
 0x485   :  { %v5308_v52 = vsel %vm5208_vm4, %v4493_v14, 0.0  ;;  %v6887_v41 = vpop.f32.mrb[30].mxu0  ;;  %6758 = vst [vmem:[#allocation3 + $0xd0] sm:$0xff] %v6616_v58   ;;  %v6015_v59 = vmul.f32 %v5310_v57, %v5310_v57  ;;  %vm5216_vm4 = vcmp.eq.s32.totalorder %v12803_v62, 1  ;;  %vm5218_vm6 = vcmp.eq.s32.totalorder %v12807_v4, 1 }
 0x486   :  { %v6013_v13 = vmul.f32 %v5308_v52, %v5308_v52  ;;  %v6111_v23 = vadd.f32 %v6110_v11, %v6012_v43  ;;  %v5311_v2 = vsel %vm5211_vm3, %v6887_v41, 0.0  ;;  %v4496_v37 = vpop.f32.mrb[31].mxu0  ;;  %v5907_v27 = vadd.f32 %v5906_v6, %v5308_v52  ;;  %v12946_v11 = vpop.permute.xlu0 %5106 }
 0x487   :  { %v6561_v61 = vpack.c.bf16 %v5311_v2, %v5310_v57  ;;  %v6914_v53 = vpop.f32.mrb[4].mxu1  ;;  %v5309_v47 = vsel %vm5209_vm8, %v4496_v37, 0.0  ;;  %v6016_v42 = vmul.f32 %v5311_v2, %v5311_v2  ;;  %v12950_v6 = vpop.permute.xlu1 %5103  ;;  %vm5219_vm3 = vcmp.eq.s32.totalorder %v12805_v17, 1 }
 0x488   :  { %v6112_v7 = vadd.f32 %v6111_v23, %v6013_v13  ;;  %v4605_v36 = vpop.f32.mrb[5].mxu1  ;;  %v6556_v19 = vpack.c.bf16 %v5309_v47, %v5308_v52  ;;  %v5908_v54 = vadd.f32 %v5907_v27, %v5309_v47  ;;  %v6014_v8 = vmul.f32 %v5309_v47, %v5309_v47 }
 0x489   :  { %6747 = vst [vmem:[#allocation3 + $0x78] sm:$0xff] %v6561_v61   ;;  %v6915_v46 = vpop.f32.mrb[6].mxu1  ;;  %v12933_v1 = vsel %vm5238_vm7, %v6914_v53, 0.0  ;;  %v12941_v15 = vsel %vm5236_vm10, %v4605_v36, 0.0  ;;  %vm5217_vm8 = vcmp.eq.s32.totalorder %v12801_v29, 1  ;;  %vm5247_vm7 = vcmp.eq.s32.totalorder %v12885_v40, 1 }
 0x48a   :  { %v12935_v56 = vsel %vm5239_vm9, %v6915_v46, 0.0  ;;  %v4608_v3 = vpop.f32.mrb[7].mxu1  ;;  %6746 = vst [vmem:[#allocation3 + $0x70] sm:$0xff] %v6556_v19   ;;  %v5909_v48 = vadd.f32 %v5908_v54, %v5310_v57  ;;  %v6113_v21 = vadd.f32 %v6112_v7, %v6014_v8  ;;  %v12962_v49 = vpop.permute.xlu0 %5112  ;;  %vm5220_vm9 = vcmp.eq.s32.totalorder %v12811_v35, 1 }
 0x48b   :  { %v6631_v55 = vpack.c.bf16 %v12935_v56, %v12933_v1  ;;  %v6890_v18 = vpop.f32.mrb[32].mxu0  ;;  %v12943_v20 = vsel %vm5237_vm14, %v4608_v3, 0.0  ;;  %vm5246_vm14 = vcmp.eq.s32.totalorder %v12887_v63, 1  ;;  %vm5245_vm10 = vcmp.eq.s32.totalorder %v12877_v33, 1 }
 0x48c   :  { %v4509_v43 = vpop.f32.mrb[33].mxu0  ;;  %v6114_v58 = vadd.f32 %v6113_v21, %v6015_v59  ;;  %v6626_v14 = vpack.c.bf16 %v12943_v20, %v12941_v15  ;;  %v5314_v39 = vsel %vm5214_vm13, %v6890_v18, 0.0  ;;  %v5910_v41 = vadd.f32 %v5909_v48, %v5311_v2  ;;  %v12967_v21 = vpop.permute.xlu1 %5109 }
 0x48d   :  { %6761 = vst [vmem:[#allocation3 + $0xe8] sm:$0xff] %v6631_v55   ;;  %v6891_v52 = vpop.f32.mrb[34].mxu0  ;;  %v5312_v26 = vsel %vm5212_vm11, %v4509_v43, 0.0  ;;  %v6019_v3 = vmul.f32 %v5314_v39, %v5314_v39  ;;  %vm5244_vm11 = vcmp.eq.s32.totalorder %v12879_v44, 1  ;;  %vm5222_vm13 = vcmp.eq.s32.totalorder %v12815_v31, 1 }
 0x48e   :  { %v5315_v57 = vsel %vm5215_vm12, %v6891_v52, 0.0  ;;  %v4512_v13 = vpop.f32.mrb[35].mxu0  ;;  %6760 = vst [vmem:[#allocation3 + $0xe0] sm:$0xff] %v6626_v14   ;;  %v6017_v12 = vmul.f32 %v5312_v26, %v5312_v26  ;;  %v6115_v23 = vadd.f32 %v6114_v58, %v6016_v42  ;;  %v5911_v61 = vadd.f32 %v5910_v41, %v5312_v26  ;;  %v12984_v62 = vpop.permute.xlu0 %5118 }
 0x48f   :  { %v6571_v37 = vpack.c.bf16 %v5315_v57, %v5314_v39  ;;  %v6918_v27 = vpop.f32.mrb[8].mxu1  ;;  %v5313_v53 = vsel %vm5213_vm5, %v4512_v13, 0.0  ;;  %v6020_v42 = vmul.f32 %v5315_v57, %v5315_v57  ;;  %vm5223_vm12 = vcmp.eq.s32.totalorder %v12813_v32, 1 }
 0x490   :  { %v4621_v7 = vpop.f32.mrb[9].mxu1  ;;  %v6116_v47 = vadd.f32 %v6115_v23, %v6017_v12  ;;  %v6566_v2 = vpack.c.bf16 %v5313_v53, %v5312_v26  ;;  %v6018_v36 = vmul.f32 %v5313_v53, %v5313_v53  ;;  %v5912_v34 = vadd.f32 %v5911_v61, %v5313_v53 }
 0x491   :  { %6749 = vst [vmem:[#allocation3 + $0x88] sm:$0xff] %v6571_v37   ;;  %v6919_v19 = vpop.f32.mrb[10].mxu1  ;;  %v12957_v54 = vsel %vm5242_vm15, %v6918_v27, 0.0  ;;  %v12969_v18 = vsel %vm5240_vm1, %v4621_v7, 0.0  ;;  %vm5221_vm5 = vcmp.eq.s32.totalorder %v12809_v28, 1  ;;  %vm5250_vm15 = vcmp.eq.s32.totalorder %v12904_v38, 1 }
 0x492   :  { %v12959_v8 = vsel %vm5243_vm2, %v6919_v19, 0.0  ;;  %v4624_v46 = vpop.f32.mrb[11].mxu1  ;;  %6748 = vst [vmem:[#allocation3 + $0x80] sm:$0xff] %v6566_v2   ;;  %v6117_v10 = vadd.f32 %v6116_v47, %v6018_v36  ;;  %v5913_v55 = vadd.f32 %v5912_v34, %v5314_v39  ;;  %v12987_v47 = vpop.permute.xlu1 %5115  ;;  %vm5251_vm2 = vcmp.eq.s32.totalorder %v12901_v25, 1 }
 0x493   :  { %v6641_v59 = vpack.c.bf16 %v12959_v8, %v12957_v54  ;;  %v6894_v48 = vpop.f32.mrb[36].mxu0  ;;  %v12973_v43 = vsel %vm5241_vm0, %v4624_v46, 0.0  ;;  %vm5249_vm0 = vcmp.eq.s32.totalorder %v12890_v45, 1  ;;  %vm5248_vm1 = vcmp.eq.s32.totalorder %v12893_v50, 1 }
 0x494   :  { %v4525_v5 = vpop.f32.mrb[37].mxu0  ;;  %v6118_v58 = vadd.f32 %v6117_v10, %v6019_v3  ;;  %v6636_v14 = vpack.c.bf16 %v12973_v43, %v12969_v18  ;;  %v5318_v17 = vsel %vm5218_vm6, %v6894_v48, 0.0  ;;  %v5914_v26 = vadd.f32 %v5913_v55, %v5315_v57 }
 0x495   :  { %6763 = vst [vmem:[#allocation3 + $0xf8] sm:$0xff] %v6641_v59   ;;  %v6895_v52 = vpop.f32.mrb[38].mxu0  ;;  %v5316_v39 = vsel %vm5216_vm4, %v4525_v5, 0.0  ;;  %v6023_v63 = vmul.f32 %v5318_v17, %v5318_v17  ;;  %vm5224_vm4 = vcmp.eq.s32.totalorder %v12819_v9, 1 }
 0x496   :  { %v5319_v41 = vsel %vm5219_vm3, %v6895_v52, 0.0  ;;  %v4528_v13 = vpop.f32.mrb[39].mxu0  ;;  %6762 = vst [vmem:[#allocation3 + $0xf0] sm:$0xff] %v6636_v14   ;;  %v6021_v60 = vmul.f32 %v5316_v39, %v5316_v39  ;;  %v6119_v12 = vadd.f32 %v6118_v58, %v6020_v42  ;;  %v5915_v37 = vadd.f32 %v5914_v26, %v5316_v39 }
 0x497   :  { %v6581_v4 = vpack.c.bf16 %v5319_v41, %v5318_v17  ;;  %v6922_v23 = vpop.f32.mrb[12].mxu1  ;;  %v5317_v27 = vsel %vm5217_vm8, %v4528_v13, 0.0  ;;  %v6024_v55 = vmul.f32 %v5319_v41, %v5319_v41 }
 0x498   :  { %v4637_v61 = vpop.f32.mrb[13].mxu1  ;;  %v6120_v57 = vadd.f32 %v6119_v12, %v6021_v60  ;;  %v6576_v53 = vpack.c.bf16 %v5317_v27, %v5316_v39  ;;  %v6022_v29 = vmul.f32 %v5317_v27, %v5317_v27  ;;  %v5916_v2 = vadd.f32 %v5915_v37, %v5317_v27  ;;  %v13007_v39 = vpop.permute.xlu0 %5124 }
 0x499   :  { %6751 = vst [vmem:[#allocation3 + $0x98] sm:$0xff] %v6581_v4   ;;  %v6923_v7 = vpop.f32.mrb[14].mxu1  ;;  %v12989_v36 = vsel %vm5246_vm14, %v6922_v23, 0.0  ;;  %v12997_v10 = vsel %vm5244_vm11, %v4637_v61, 0.0  ;;  %v13011_v12 = vpop.permute.xlu1 %5121  ;;  %vm5254_vm14 = vcmp.eq.s32.totalorder %v12950_v6, 1  ;;  %vm5252_vm11 = vcmp.eq.s32.totalorder %v12928_v51, 1 }
 0x49a   :  { %v12991_v40 = vsel %vm5247_vm7, %v6923_v7, 0.0  ;;  %v4640_v19 = vpop.f32.mrb[15].mxu1  ;;  %6750 = vst [vmem:[#allocation3 + $0x90] sm:$0xff] %v6576_v53   ;;  %v6121_v34 = vadd.f32 %v6120_v57, %v6022_v29  ;;  %v5917_v33 = vadd.f32 %v5916_v2, %v5318_v17  ;;  %vm5255_vm7 = vcmp.eq.s32.totalorder %v12946_v11, 1 }
 0x49b   :  { %v6651_v46 = vpack.c.bf16 %v12991_v40, %v12989_v36  ;;  %v6898_v3 = vpop.f32.mrb[40].mxu0  ;;  %v12999_v59 = vsel %vm5245_vm10, %v4640_v19, 0.0  ;;  %v14715_v19 = vld [vmem:[#allocation11_spill] sm:$0xff]  ;;  %vm5253_vm10 = vcmp.eq.s32.totalorder %v12925_v22, 1  ;;  %v14721_v22 = vld [vmem:[#allocation14_spill] sm:$0xff] }
 0x49c   :  { %v4541_v48 = vpop.f32.mrb[41].mxu0  ;;  %v6122_v5 = vadd.f32 %v6121_v34, %v6023_v63  ;;  %v6646_v44 = vpack.c.bf16 %v12999_v59, %v12997_v10  ;;  %v5322_v58 = vsel %vm5222_vm13, %v6898_v3, 0.0  ;;  %v5918_v32 = vadd.f32 %v5917_v33, %v5319_v41  ;;  %v14716_v3 = vld [vmem:[#allocation106_spill] sm:$0xff]  ;;  %v13028_v33 = vpop.permute.xlu0 %5130 }
 0x49d   :  { %6765 = vst [vmem:[#allocation3 + $0x108] sm:$0xff] %v6651_v46   ;;  %v6899_v42 = vpop.f32.mrb[42].mxu0  ;;  %v5320_v14 = vsel %vm5220_vm9, %v4541_v48, 0.0  ;;  %v6027_v29 = vmul.f32 %v5322_v58, %v5322_v58  ;;  %vm5227_vm3 = vcmp.eq.s32.totalorder %v14715_v19, 1  ;;  %vm5226_vm6 = vcmp.eq.s32.totalorder %v14716_v3, 1 }
 0x49e   :  { %v5323_v52 = vsel %vm5223_vm12, %v6899_v42, 0.0  ;;  %v4544_v17 = vpop.f32.mrb[43].mxu0  ;;  %6764 = vst [vmem:[#allocation3 + $0x100] sm:$0xff] %v6646_v44   ;;  %v6025_v31 = vmul.f32 %v5320_v14, %v5320_v14  ;;  %v6123_v26 = vadd.f32 %v6122_v5, %v6024_v55  ;;  %v5919_v35 = vadd.f32 %v5918_v32, %v5320_v14  ;;  %v13032_v44 = vpop.permute.xlu1 %5127 }
 0x49f   :  { %v6591_v13 = vpack.c.bf16 %v5323_v52, %v5322_v58  ;;  %v6926_v60 = vpop.f32.mrb[16].mxu1  ;;  %v5321_v4 = vsel %vm5221_vm5, %v4544_v17, 0.0  ;;  %v6028_v50 = vmul.f32 %v5323_v52, %v5323_v52  ;;  %vm5229_vm5 = vcmp.eq.s32.totalorder %v14721_v22, 1 }
 0x4a0   :  { %v4653_v41 = vpop.f32.mrb[17].mxu1  ;;  %v6124_v23 = vadd.f32 %v6123_v26, %v6025_v31  ;;  %v6586_v28 = vpack.c.bf16 %v5321_v4, %v5320_v14  ;;  %v6026_v37 = vmul.f32 %v5321_v4, %v5321_v4  ;;  %v5920_v61 = vadd.f32 %v5919_v35, %v5321_v4  ;;  %v14717_v31 = vld [vmem:[#allocation104_spill] sm:$0xff]  ;;  %v14718_v4 = vld [vmem:[#allocation109_spill] sm:$0xff]  ;;  %v13048_v11 = vpop.permute.xlu0 %5136 }
 0x4a1   :  { %6753 = vst [vmem:[#allocation3 + $0xa8] sm:$0xff] %v6591_v13   ;;  %v6927_v27 = vpop.f32.mrb[18].mxu1  ;;  %v13015_v57 = vsel %vm5250_vm15, %v6926_v60, 0.0  ;;  %v13023_v34 = vsel %vm5248_vm1, %v4653_v41, 0.0  ;;  %vm5225_vm8 = vcmp.eq.s32.totalorder %v14717_v31, 1  ;;  %vm5228_vm9 = vcmp.eq.s32.totalorder %v14718_v4, 1 }
 0x4a2   :  { %v13017_v53 = vsel %vm5251_vm2, %v6927_v27, 0.0  ;;  %v4656_v25 = vpop.f32.mrb[19].mxu1  ;;  %6752 = vst [vmem:[#allocation3 + $0xa0] sm:$0xff] %v6586_v28   ;;  %v6125_v7 = vadd.f32 %v6124_v23, %v6026_v37  ;;  %v5921_v63 = vadd.f32 %v5920_v61, %v5322_v58  ;;  %vm5258_vm2 = vcmp.eq.s32.totalorder %v12987_v47, 1 }
 0x4a3   :  { %v6661_v38 = vpack.c.bf16 %v13017_v53, %v13015_v57  ;;  %v6902_v2 = vpop.f32.mrb[44].mxu0  ;;  %v13025_v45 = vsel %vm5249_vm0, %v4656_v25, 0.0  ;;  %vm5257_vm15 = vcmp.eq.s32.totalorder %v12962_v49, 1  ;;  %vm5256_vm0 = vcmp.eq.s32.totalorder %v12967_v21, 1 }
 0x4a4   :  { %v4557_v46 = vpop.f32.mrb[45].mxu0  ;;  %v6126_v48 = vadd.f32 %v6125_v7, %v6027_v29  ;;  %v6656_v55 = vpack.c.bf16 %v13025_v45, %v13023_v34  ;;  %v5326_v42 = vsel %vm5226_vm6, %v6902_v2, 0.0  ;;  %v5922_v14 = vadd.f32 %v5921_v63, %v5323_v52  ;;  %v14719_v63 = vld [vmem:[#allocation13_spill] sm:$0xff] }
 0x4a5   :  { %6767 = vst [vmem:[#allocation3 + $0x118] sm:$0xff] %v6661_v38   ;;  %v6903_v5 = vpop.f32.mrb[46].mxu0  ;;  %v5324_v58 = vsel %vm5224_vm4, %v4557_v46, 0.0  ;;  %v6031_v38 = vmul.f32 %v5326_v42, %v5326_v42  ;;  %vm5231_vm12 = vcmp.eq.s32.totalorder %v14719_v63, 1  ;;  %v13053_v46 = vpop.permute.xlu1 %5133  ;;  %vm5259_vm4 = vcmp.eq.s32.totalorder %v12984_v62, 1 }
 0x4a6   :  { %v5327_v32 = vsel %vm5227_vm3, %v6903_v5, 0.0  ;;  %v4560_v17 = vpop.f32.mrb[47].mxu0  ;;  %6766 = vst [vmem:[#allocation3 + $0x110] sm:$0xff] %v6656_v55   ;;  %v6029_v26 = vmul.f32 %v5324_v58, %v5324_v58  ;;  %v6127_v13 = vadd.f32 %v6126_v48, %v6028_v50  ;;  %v5923_v41 = vadd.f32 %v5922_v14, %v5324_v58  ;;  %v14720_v55 = vld [vmem:[#allocation111_spill] sm:$0xff] }
 0x4a7   :  { %v6601_v60 = vpack.c.bf16 %v5327_v32, %v5326_v42  ;;  %v6930_v35 = vpop.f32.mrb[20].mxu1  ;;  %v5325_v23 = vsel %vm5225_vm8, %v4560_v17, 0.0  ;;  %vm5230_vm13 = vcmp.eq.s32.totalorder %v14720_v55, 1  ;;  %v6032_v5 = vmul.f32 %v5327_v32, %v5327_v32 }
 0x4a8   :  { %v4669_v9 = vpop.f32.mrb[21].mxu1  ;;  %v6128_v52 = vadd.f32 %v6127_v13, %v6029_v26  ;;  %v6596_v28 = vpack.c.bf16 %v5325_v23, %v5324_v58  ;;  %v6030_v37 = vmul.f32 %v5325_v23, %v5325_v23  ;;  %v5924_v61 = vadd.f32 %v5923_v41, %v5325_v23 }
 0x4a9   :  { %6755 = vst [vmem:[#allocation3 + $0xb8] sm:$0xff] %v6601_v60   ;;  %v6931_v27 = vpop.f32.mrb[22].mxu1  ;;  %v13043_v25 = vsel %vm5254_vm14, %v6930_v35, 0.0  ;;  %v13055_v50 = vsel %vm5252_vm11, %v4669_v9, 0.0  ;;  %v6037_v21 = vmul.f32 %v12908_v0, %v12908_v0  ;;  %vm5261_vm1 = vcmp.eq.s32.totalorder %v13007_v39, 1 }
 0x4aa   :  { %v13045_v29 = vsel %vm5255_vm7, %v6931_v27, 0.0  ;;  %v4672_v7 = vpop.f32.mrb[23].mxu1  ;;  %6754 = vst [vmem:[#allocation3 + $0xb0] sm:$0xff] %v6596_v28   ;;  %v6129_v6 = vadd.f32 %v6128_v52, %v6030_v37  ;;  %v5925_v3 = vadd.f32 %v5924_v61, %v5326_v42  ;;  %v13069_v27 = vpop.permute.xlu0 %5142  ;;  %vm5260_vm3 = vcmp.eq.s32.totalorder %v13011_v12, 1 }
 0x4ab   :  { %v6671_v2 = vpack.c.bf16 %v13045_v29, %v13043_v25  ;;  %v6906_v19 = vpop.f32.mrb[48].mxu0  ;;  %v13059_v48 = vsel %vm5253_vm10, %v4672_v7, 0.0  ;;  %vm5263_vm6 = vcmp.eq.s32.totalorder %v13028_v33, 1  ;;  %vm5262_vm8 = vcmp.eq.s32.totalorder %v13032_v44, 1 }
 0x4ac   :  { %v4573_v51 = vpop.f32.mrb[49].mxu0  ;;  %v6130_v58 = vadd.f32 %v6129_v6, %v6031_v38  ;;  %v6666_v14 = vpack.c.bf16 %v13059_v48, %v13055_v50  ;;  %v5330_v31 = vsel %vm5230_vm13, %v6906_v19, 0.0  ;;  %v5926_v26 = vadd.f32 %v5925_v3, %v5327_v32  ;;  %v13072_v38 = vpop.permute.xlu1 %5139 }
 0x4ad   :  { %6769 = vst [vmem:[#allocation3 + $0x128] sm:$0xff] %v6671_v2   ;;  %v6907_v17 = vpop.f32.mrb[50].mxu0  ;;  %v5328_v42 = vsel %vm5228_vm9, %v4573_v51, 0.0  ;;  %v6035_v47 = vmul.f32 %v5330_v31, %v5330_v31  ;;  %v6041_v39 = vmul.f32 %v12941_v15, %v12941_v15  ;;  %vm5265_vm9 = vcmp.eq.s32.totalorder %v13048_v11, 1 }
 0x4ae   :  { %v5331_v13 = vsel %vm5231_vm12, %v6907_v17, 0.0  ;;  %v4576_v60 = vpop.f32.mrb[51].mxu0  ;;  %6768 = vst [vmem:[#allocation3 + $0x120] sm:$0xff] %v6666_v14   ;;  %v6033_v35 = vmul.f32 %v5328_v42, %v5328_v42  ;;  %v6131_v41 = vadd.f32 %v6130_v58, %v6032_v5  ;;  %v5927_v52 = vadd.f32 %v5926_v26, %v5328_v42 }
 0x4af   :  { %v6611_v23 = vpack.c.bf16 %v5331_v13, %v5330_v31  ;;  %v6934_v9 = vpop.f32.mrb[24].mxu1  ;;  %v5329_v28 = vsel %vm5229_vm5, %v4576_v60, 0.0  ;;  %v6036_v5 = vmul.f32 %v5331_v13, %v5331_v13  ;;  %vm5264_vm7 = vcmp.eq.s32.totalorder %v13053_v46, 1 }
 0x4b0   :  { %v4685_v37 = vpop.f32.mrb[25].mxu1  ;;  %v6132_v4 = vadd.f32 %v6131_v41, %v6033_v35  ;;  %v6606_v32 = vpack.c.bf16 %v5329_v28, %v5328_v42  ;;  %v6034_v61 = vmul.f32 %v5329_v28, %v5329_v28  ;;  %v5928_v6 = vadd.f32 %v5927_v52, %v5329_v28  ;;  %v13089_v42 = vpop.permute.xlu0 %5148 }
 0x4b1   :  { %6757 = vst [vmem:[#allocation3 + $0xc8] sm:$0xff] %v6611_v23   ;;  %v6935_v7 = vpop.f32.mrb[26].mxu1  ;;  %v13074_v2 = vsel %vm5258_vm2, %v6934_v9, 0.0  ;;  %v13081_v55 = vsel %vm5256_vm0, %v4685_v37, 0.0  ;;  %v6039_v9 = vmul.f32 %v12906_v24, %v12906_v24  ;;  %vm5267_vm14 = vcmp.eq.s32.totalorder %v13069_v27, 1 }
 0x4b2   :  { %v13076_v62 = vsel %vm5259_vm4, %v6935_v7, 0.0  ;;  %v4688_v19 = vpop.f32.mrb[27].mxu1  ;;  %6756 = vst [vmem:[#allocation3 + $0xc0] sm:$0xff] %v6606_v32   ;;  %v6133_v63 = vadd.f32 %v6132_v4, %v6034_v61  ;;  %v5929_v51 = vadd.f32 %v5928_v6, %v5330_v31  ;;  %v13093_v31 = vpop.permute.xlu1 %5145  ;;  %v6040_v61 = vmul.f32 %v12910_v30, %v12910_v30 }
 0x4b3   :  { %v6681_v3 = vpack.c.bf16 %v13076_v62, %v13074_v2  ;;  %v13083_v49 = vsel %vm5257_vm15, %v4688_v19, 0.0  ;;  %vm5266_vm10 = vcmp.eq.s32.totalorder %v13072_v38, 1  ;;  %vm5269_vm11 = vcmp.eq.s32.totalorder %v13089_v42, 1 }
 0x4b4   :  { %v6134_v58 = vadd.f32 %v6133_v63, %v6035_v47  ;;  %v6676_v14 = vpack.c.bf16 %v13083_v49, %v13081_v55  ;;  %v5930_v17 = vadd.f32 %v5929_v51, %v5331_v13  ;;  %v6038_v13 = vmul.f32 %v12914_v16, %v12914_v16  ;;  %v5155_v7 = vpop.permute.xlu0 %5154 }
 0x4b5   :  { %6771 = vst [vmem:[#allocation3 + $0x138] sm:$0xff] %v6681_v3   ;;  %vm5268_vm12 = vcmp.eq.s32.totalorder %v13093_v31, 1  ;;  %vm5271_vm13 = vcmp.eq.s32.totalorder %v5155_v7, 1 }
 0x4b6   :  { %v6135_v26 = vadd.f32 %v6134_v58, %v6036_v5  ;;  %6770 = vst [vmem:[#allocation3 + $0x130] sm:$0xff] %v6676_v14   ;;  %v5931_v22 = vadd.f32 %v5930_v17, %v12908_v0  ;;  %v5152_v19 = vpop.permute.xlu1 %5151  ;;  %v6042_v5 = vmul.f32 %v12943_v20, %v12943_v20  ;;  %v6043_v14 = vmul.f32 %v12933_v1, %v12933_v1 }
 0x4b7   :  { %v6938_v60 = vpop.f32.mrb[28].mxu1  ;;  %vm5270_vm5 = vcmp.eq.s32.totalorder %v5152_v19, 1 }
 0x4b8   :  { %v4701_v35 = vpop.f32.mrb[29].mxu1  ;;  %v6136_v41 = vadd.f32 %v6135_v26, %v6037_v21  ;;  %v5932_v52 = vadd.f32 %v5931_v22, %v12914_v16  ;;  %v13103_v12 = vsel %vm5262_vm8, %v6938_v60, 0.0  ;;  %v13137_v26 = vpop.permute.xlu0 %5160 }
 0x4b9   :  { %v6939_v23 = vpop.f32.mrb[30].mxu1  ;;  %v13107_v4 = vsel %vm5260_vm3, %v4701_v35, 0.0  ;;  %vm5273_vm4 = vcmp.eq.s32.totalorder %v13137_v26, 1  ;;  %v6053_v26 = vmul.f32 %v13023_v34, %v13023_v34 }
 0x4ba   :  { %v13105_v28 = vsel %vm5263_vm6, %v6939_v23, 0.0  ;;  %v4704_v0 = vpop.f32.mrb[31].mxu1  ;;  %v6137_v37 = vadd.f32 %v6136_v41, %v6038_v13  ;;  %v5933_v32 = vadd.f32 %v5932_v52, %v12906_v24  ;;  %v5158_v35 = vpop.permute.xlu1 %5157  ;;  %v6044_v41 = vmul.f32 %v12935_v56, %v12935_v56 }
 0x4bb   :  { %v6691_v33 = vpack.c.bf16 %v13105_v28, %v13103_v12  ;;  %v13113_v44 = vsel %vm5261_vm1, %v4704_v0, 0.0  ;;  %v6045_v52 = vmul.f32 %v12969_v18, %v12969_v18  ;;  %vm5272_vm2 = vcmp.eq.s32.totalorder %v5158_v35, 1 }
 0x4bc   :  { %v6686_v16 = vpack.c.bf16 %v13113_v44, %v13107_v4  ;;  %v6138_v6 = vadd.f32 %v6137_v37, %v6039_v9  ;;  %v5934_v47 = vadd.f32 %v5933_v32, %v12910_v30  ;;  %v5167_v32 = vpop.permute.xlu0 %5166 }
 0x4bd   :  { %6773 = vst [vmem:[#allocation3 + $0x148] sm:$0xff] %v6691_v33   ;;  %v6046_v33 = vmul.f32 %v12973_v43, %v12973_v43  ;;  %vm5275_vm15 = vcmp.eq.s32.totalorder %v5167_v32, 1 }
 0x4be   :  { %6772 = vst [vmem:[#allocation3 + $0x140] sm:$0xff] %v6686_v16   ;;  %v6139_v63 = vadd.f32 %v6138_v6, %v6040_v61  ;;  %v5935_v24 = vadd.f32 %v5934_v47, %v12941_v15  ;;  %v6047_v61 = vmul.f32 %v12957_v54, %v12957_v54  ;;  %v5164_v6 = vpop.permute.xlu1 %5163 }
 0x4bf   :  { %v6942_v3 = vpop.f32.mrb[32].mxu1  ;;  %vm5274_vm0 = vcmp.eq.s32.totalorder %v5164_v6, 1 }
 0x4c0   :  { %v4717_v51 = vpop.f32.mrb[33].mxu1  ;;  %v6140_v30 = vadd.f32 %v6139_v63, %v6041_v39  ;;  %v5936_v17 = vadd.f32 %v5935_v24, %v12943_v20  ;;  %v13133_v21 = vsel %vm5266_vm10, %v6942_v3, 0.0 }
 0x4c1   :  { %v6943_v58 = vpop.f32.mrb[34].mxu1  ;;  %v13139_v60 = vsel %vm5264_vm7, %v4717_v51, 0.0 }
 0x4c2   :  { %v13135_v46 = vsel %vm5267_vm14, %v6943_v58, 0.0  ;;  %v4720_v15 = vpop.f32.mrb[35].mxu1  ;;  %v6141_v27 = vadd.f32 %v6140_v30, %v6042_v5  ;;  %v5937_v20 = vadd.f32 %v5936_v17, %v12933_v1  ;;  %v6048_v5 = vmul.f32 %v12959_v8, %v12959_v8 }
 0x4c3   :  { %v6701_v38 = vpack.c.bf16 %v13135_v46, %v13133_v21  ;;  %v13145_v22 = vsel %vm5265_vm9, %v4720_v15, 0.0  ;;  %v6049_v58 = vmul.f32 %v12997_v10, %v12997_v10 }
 0x4c4   :  { %v6696_v13 = vpack.c.bf16 %v13145_v22, %v13139_v60  ;;  %v6142_v23 = vadd.f32 %v6141_v27, %v6043_v14  ;;  %v5938_v9 = vadd.f32 %v5937_v20, %v12935_v56  ;;  %v5173_v14 = vpop.permute.xlu0 %5172 }
 0x4c5   :  { %6775 = vst [vmem:[#allocation3 + $0x158] sm:$0xff] %v6701_v38   ;;  %v6050_v38 = vmul.f32 %v12999_v59, %v12999_v59  ;;  %vm5277_vm1 = vcmp.eq.s32.totalorder %v5173_v14, 1 }
 0x4c6   :  { %6774 = vst [vmem:[#allocation3 + $0x150] sm:$0xff] %v6696_v13   ;;  %v6143_v11 = vadd.f32 %v6142_v23, %v6044_v41  ;;  %v5939_v1 = vadd.f32 %v5938_v9, %v12969_v18  ;;  %v6051_v13 = vmul.f32 %v12989_v36, %v12989_v36 }
 0x4c7   :  { %v6946_v0 = vpop.f32.mrb[36].mxu1 }
 0x4c8   :  { %v4733_v37 = vpop.f32.mrb[37].mxu1  ;;  %v6144_v56 = vadd.f32 %v6143_v11, %v6045_v52  ;;  %v5940_v47 = vadd.f32 %v5939_v1, %v12973_v43  ;;  %v13163_v39 = vsel %vm5270_vm5, %v6946_v0, 0.0  ;;  %v5179_v32 = vpop.permute.xlu0 %5178 }
 0x4c9   :  { %v6947_v16 = vpop.f32.mrb[38].mxu1  ;;  %v13169_v7 = vsel %vm5268_vm12, %v4733_v37, 0.0  ;;  %v6052_v37 = vmul.f32 %v12991_v40, %v12991_v40  ;;  %vm5279_vm6 = vcmp.eq.s32.totalorder %v5179_v32, 1 }
 0x4ca   :  { %v13165_v63 = vsel %vm5271_vm13, %v6947_v16, 0.0  ;;  %v4736_v18 = vpop.f32.mrb[39].mxu1  ;;  %v6145_v3 = vadd.f32 %v6144_v56, %v6046_v33  ;;  %v5941_v51 = vadd.f32 %v5940_v47, %v12957_v54  ;;  %v5170_v54 = vpop.permute.xlu1 %5169 }
 0x4cb   :  { %v6711_v19 = vpack.c.bf16 %v13165_v63, %v13163_v39  ;;  %v13175_v24 = vsel %vm5269_vm11, %v4736_v18, 0.0  ;;  %vm5276_vm3 = vcmp.eq.s32.totalorder %v5170_v54, 1  ;;  %v6054_v18 = vmul.f32 %v13025_v45, %v13025_v45 }
 0x4cc   :  { %v6706_v43 = vpack.c.bf16 %v13175_v24, %v13169_v7  ;;  %v6146_v30 = vadd.f32 %v6145_v3, %v6047_v61  ;;  %v5942_v31 = vadd.f32 %v5941_v51, %v12959_v8 }
 0x4cd   :  { %6777 = vst [vmem:[#allocation3 + $0x168] sm:$0xff] %v6711_v19  }
 0x4ce   :  { %6776 = vst [vmem:[#allocation3 + $0x160] sm:$0xff] %v6706_v43   ;;  %v6147_v42 = vadd.f32 %v6146_v30, %v6048_v5  ;;  %v5943_v15 = vadd.f32 %v5942_v31, %v12997_v10  ;;  %v5176_v56 = vpop.permute.xlu1 %5175 }
 0x4cf   :  { %v6950_v17 = vpop.f32.mrb[40].mxu1  ;;  %vm5278_vm8 = vcmp.eq.s32.totalorder %v5176_v56, 1 }
 0x4d0   :  { %v4749_v27 = vpop.f32.mrb[41].mxu1  ;;  %v6148_v8 = vadd.f32 %v6147_v42, %v6049_v58  ;;  %v5944_v41 = vadd.f32 %v5943_v15, %v12999_v59  ;;  %v13192_v23 = vsel %vm5274_vm0, %v6950_v17, 0.0  ;;  %v6056_v15 = vmul.f32 %v13017_v53, %v13017_v53 }
 0x4d1   :  { %v6951_v20 = vpop.f32.mrb[42].mxu1  ;;  %v13196_v10 = vsel %vm5272_vm2, %v4749_v27, 0.0 }
 0x4d2   :  { %v13194_v9 = vsel %vm5275_vm15, %v6951_v20, 0.0  ;;  %v4752_v35 = vpop.f32.mrb[43].mxu1  ;;  %v6149_v52 = vadd.f32 %v6148_v8, %v6050_v38  ;;  %v5945_v1 = vadd.f32 %v5944_v41, %v12989_v36  ;;  %v6057_v38 = vmul.f32 %v13055_v50, %v13055_v50 }
 0x4d3   :  { %v6721_v11 = vpack.c.bf16 %v13194_v9, %v13192_v23  ;;  %v13202_v0 = vsel %vm5273_vm4, %v4752_v35, 0.0 }
 0x4d4   :  { %v6716_v59 = vpack.c.bf16 %v13202_v0, %v13196_v10  ;;  %v6150_v33 = vadd.f32 %v6149_v52, %v6051_v13  ;;  %v5946_v16 = vadd.f32 %v5945_v1, %v12991_v40  ;;  %v6055_v40 = vmul.f32 %v13015_v57, %v13015_v57 }
 0x4d5   :  { %6779 = vst [vmem:[#allocation3 + $0x178] sm:$0xff] %v6721_v11  }
 0x4d6   :  { %6778 = vst [vmem:[#allocation3 + $0x170] sm:$0xff] %v6716_v59   ;;  %v6151_v61 = vadd.f32 %v6150_v33, %v6052_v37  ;;  %v5947_v36 = vadd.f32 %v5946_v16, %v13023_v34 }
 0x4d7   :  { %v6954_v6 = vpop.f32.mrb[44].mxu1 }
 0x4d8   :  { %v4765_v47 = vpop.f32.mrb[45].mxu1  ;;  %v6152_v3 = vadd.f32 %v6151_v61, %v6053_v26  ;;  %v5948_v51 = vadd.f32 %v5947_v36, %v13025_v45  ;;  %v13218_v43 = vsel %vm5278_vm8, %v6954_v6, 0.0 }
 0x4d9   :  { %v6955_v19 = vpop.f32.mrb[46].mxu1  ;;  %v13223_v31 = vsel %vm5276_vm3, %v4765_v47, 0.0 }
 0x4da   :  { %v13220_v5 = vsel %vm5279_vm6, %v6955_v19, 0.0  ;;  %v4768_v34 = vpop.f32.mrb[47].mxu1  ;;  %v6153_v30 = vadd.f32 %v6152_v3, %v6054_v18  ;;  %v5949_v17 = vadd.f32 %v5948_v51, %v13015_v57 }
 0x4db   :  { %v6731_v58 = vpack.c.bf16 %v13220_v5, %v13218_v43  ;;  %v13228_v42 = vsel %vm5277_vm1, %v4768_v34, 0.0 }
 0x4dc   :  { %v6726_v45 = vpack.c.bf16 %v13228_v42, %v13223_v31  ;;  %v6154_v27 = vadd.f32 %v6153_v30, %v6055_v40  ;;  %v5950_v54 = vadd.f32 %v5949_v17, %v13017_v53 }
 0x4dd   :  { %6781 = vst [vmem:[#allocation3 + $0x188] sm:$0xff] %v6731_v58  }
 0x4de   :  { %6780 = vst [vmem:[#allocation3 + $0x180] sm:$0xff] %v6726_v45   ;;  %v6155_v14 = vadd.f32 %v6154_v27, %v6056_v15 }
 0x4df   :  { %7191 = shalt.err (!%p7188_p4)
}
 0x4e0   :  { %s7192_s1 = scalar_lea.hbm %s13351_s5, 6400 }
 0x4e1   :  { %p7193_p5 = scmp.ne.s32.totalorder %s13351_s5, %s7192_s1  ;;  %p7196_p6 = scmp.lt.u32.totalorder %s7192_s1, %s13351_s5 }
 0x4e3   :  { %p7198_p7 = pnand %p7196_p6, %p7193_p5 }
 0x4e5   :  { %7201 = shalt.err (!%p7198_p7)
}
 0x4e6   :  { %s7238_s10 = smov 64   ;;  %v5951_v57 = vadd.f32 %v5950_v54, %v13055_v50  ;;  %v6058_v53 = vmul.f32 %v13059_v48, %v13059_v48  ;;  %v6156_v8 = vadd.f32 %v6155_v14, %v6057_v38  ;;  %v6059_v13 = vmul.f32 %v13043_v25, %v13043_v25 }
 0x4e7   :  { %6206 = dma.vmem_to_hbm [thread:$0]  %s6201_s26, 6400, %s13351_s5, [#allocation4], %s7238_s10, %s7238_s10, %s7229_s2   ;;  %v6060_v52 = vmul.f32 %v13045_v29, %v13045_v29  ;;  %v6061_v50 = vmul.f32 %v13081_v55, %v13081_v55  ;;  %vm6190_vm9 = vcmask 1040384   ;;  %vm14722_vm7 = vcmask 1041408  }
 0x4e8   :  { %v5952_v20 = vadd.f32 %v5951_v57, %v13059_v48  ;;  %v6157_v41 = vadd.f32 %v6156_v8, %v6058_v53  ;;  %v6062_v48 = vmul.f32 %v13083_v49, %v13083_v49  ;;  %s7239_s5 = smov [#allocation5]  }
 0x4e9   :  { %s6213_s2 = sshll.u32 %s7239_s5, 4  ;;  %s6214_s2 = int_to_ptr.vmem [resolvable:$true] %s6213_s2 }
 0x4ea   :  { %v5953_v35 = vadd.f32 %v5952_v20, %v13043_v25  ;;  %v6158_v11 = vadd.f32 %v6157_v41, %v6059_v13  ;;  %v6063_v25 = vmul.f32 %v13074_v2, %v13074_v2  ;;  %s7202_s13 = scalar_lea.vmem %s6214_s2, 128  ;;  %p7207_p9 = scmp.lt.s32.totalorder %s6214_s2, %s6214_s2 }
 0x4eb   :  { %p7203_p8 = scmp.ne.s32.totalorder %s6214_s2, %s7202_s13  ;;  %p7208_p10 = scmp.lt.s32.totalorder %s7202_s13, %s7202_s13 }
 0x4ec   :  { %v5954_v1 = vadd.f32 %v5953_v35, %v13045_v29  ;;  %v6159_v59 = vadd.f32 %v6158_v11, %v6060_v52  ;;  %v6064_v29 = vmul.f32 %v13076_v62, %v13076_v62 }
 0x4ed   :  { %p7209_p11 = por %p7208_p10, %p7207_p9 }
 0x4ee   :  { %v5955_v37 = vadd.f32 %v5954_v1, %v13081_v55  ;;  %v6160_v33 = vadd.f32 %v6159_v59, %v6061_v50  ;;  %v6065_v55 = vmul.f32 %v13107_v4, %v13107_v4 }
 0x4ef   :  { %p7210_p12 = pnand %p7209_p11, %p7203_p8 }
 0x4f0   :  { %v5956_v32 = vadd.f32 %v5955_v37, %v13083_v49  ;;  %v6161_v56 = vadd.f32 %v6160_v33, %v6062_v48  ;;  %v6066_v49 = vmul.f32 %v13113_v44, %v13113_v44 }
 0x4f2   :  { %v5957_v16 = vadd.f32 %v5956_v32, %v13074_v2  ;;  %v6162_v26 = vadd.f32 %v6161_v56, %v6063_v25  ;;  %v6067_v2 = vmul.f32 %v13103_v12, %v13103_v12 }
 0x4f4   :  { %v5958_v61 = vadd.f32 %v5957_v16, %v13076_v62  ;;  %v6163_v6 = vadd.f32 %v6162_v26, %v6064_v29  ;;  %v6068_v62 = vmul.f32 %v13105_v28, %v13105_v28 }
 0x4f6   :  { %v5959_v36 = vadd.f32 %v5958_v61, %v13107_v4  ;;  %v6164_v47 = vadd.f32 %v6163_v6, %v6065_v55  ;;  %v6069_v4 = vmul.f32 %v13139_v60, %v13139_v60 }
 0x4f8   :  { %v5960_v18 = vadd.f32 %v5959_v36, %v13113_v44  ;;  %v6165_v3 = vadd.f32 %v6164_v47, %v6066_v49  ;;  %v6070_v44 = vmul.f32 %v13145_v22, %v13145_v22 }
 0x4fa   :  { %v5961_v19 = vadd.f32 %v5960_v18, %v13103_v12  ;;  %v6166_v40 = vadd.f32 %v6165_v3, %v6067_v2  ;;  %v6071_v12 = vmul.f32 %v13133_v21, %v13133_v21 }
 0x4fc   :  { %v5962_v51 = vadd.f32 %v5961_v19, %v13105_v28  ;;  %v6167_v34 = vadd.f32 %v6166_v40, %v6068_v62  ;;  %v6072_v28 = vmul.f32 %v13135_v46, %v13135_v46 }
 0x4fe   :  { %v5963_v30 = vadd.f32 %v5962_v51, %v13139_v60  ;;  %v6168_v58 = vadd.f32 %v6167_v34, %v6069_v4  ;;  %v6073_v60 = vmul.f32 %v13169_v7, %v13169_v7 }
 0x500   :  { %v5964_v17 = vadd.f32 %v5963_v30, %v13145_v22  ;;  %v6169_v45 = vadd.f32 %v6168_v58, %v6070_v44  ;;  %v6074_v22 = vmul.f32 %v13175_v24, %v13175_v24 }
 0x502   :  { %v5965_v15 = vadd.f32 %v5964_v17, %v13133_v21  ;;  %v6170_v27 = vadd.f32 %v6169_v45, %v6071_v12  ;;  %v6075_v21 = vmul.f32 %v13163_v39, %v13163_v39 }
 0x504   :  { %v5966_v54 = vadd.f32 %v5965_v15, %v13135_v46  ;;  %v6171_v38 = vadd.f32 %v6170_v27, %v6072_v28  ;;  %v6076_v46 = vmul.f32 %v13165_v63, %v13165_v63 }
 0x506   :  { %v5967_v14 = vadd.f32 %v5966_v54, %v13169_v7  ;;  %v6172_v57 = vadd.f32 %v6171_v38, %v6073_v60  ;;  %v6077_v7 = vmul.f32 %v13196_v10, %v13196_v10 }
 0x508   :  { %v5968_v53 = vadd.f32 %v5967_v14, %v13175_v24  ;;  %v6173_v8 = vadd.f32 %v6172_v57, %v6074_v22  ;;  %v6078_v24 = vmul.f32 %v13202_v0, %v13202_v0 }
 0x50a   :  { %v5969_v20 = vadd.f32 %v5968_v53, %v13163_v39  ;;  %v6174_v13 = vadd.f32 %v6173_v8, %v6075_v21  ;;  %v6079_v39 = vmul.f32 %v13192_v23, %v13192_v23 }
 0x50c   :  { %v5970_v41 = vadd.f32 %v5969_v20, %v13165_v63  ;;  %v6175_v35 = vadd.f32 %v6174_v13, %v6076_v46  ;;  %v6080_v63 = vmul.f32 %v13194_v9, %v13194_v9 }
 0x50e   :  { %v5971_v52 = vadd.f32 %v5970_v41, %v13196_v10  ;;  %v6176_v11 = vadd.f32 %v6175_v35, %v6077_v7  ;;  %v6081_v10 = vmul.f32 %v13223_v31, %v13223_v31 }
 0x510   :  { %v5972_v1 = vadd.f32 %v5971_v52, %v13202_v0  ;;  %v6177_v50 = vadd.f32 %v6176_v11, %v6078_v24  ;;  %v6082_v0 = vmul.f32 %v13228_v42, %v13228_v42 }
 0x512   :  { %v5973_v59 = vadd.f32 %v5972_v1, %v13192_v23  ;;  %v6178_v37 = vadd.f32 %v6177_v50, %v6079_v39  ;;  %v6083_v23 = vmul.f32 %v13218_v43, %v13218_v43 }
 0x514   :  { %v5974_v33 = vadd.f32 %v5973_v59, %v13194_v9  ;;  %v6179_v48 = vadd.f32 %v6178_v37, %v6080_v63  ;;  %v6084_v9 = vmul.f32 %v13220_v5, %v13220_v5 }
 0x516   :  { %v5975_v32 = vadd.f32 %v5974_v33, %v13223_v31  ;;  %v6180_v25 = vadd.f32 %v6179_v48, %v6081_v10 }
 0x518   :  { %v5976_v56 = vadd.f32 %v5975_v32, %v13228_v42  ;;  %v6181_v16 = vadd.f32 %v6180_v25, %v6082_v0 }
 0x51a   :  { %v5977_v29 = vadd.f32 %v5976_v56, %v13218_v43  ;;  %v6182_v26 = vadd.f32 %v6181_v16, %v6083_v23 }
 0x51c   :  { %v5978_v61 = vadd.f32 %v5977_v29, %v13220_v5  ;;  %v6183_v55 = vadd.f32 %v6182_v26, %v6084_v9 }
 0x51e   :  { %v5979_v31 = vrot.slane %v5978_v61, 4  ;;  %v6184_v6 = vrot.slane %v6183_v55, 4 }
 0x520   :  { %v5980_v36 = vadd.f32 %v5979_v31, %v5978_v61  ;;  %v6185_v47 = vadd.f32 %v6184_v6, %v6183_v55 }
 0x522   :  { %v5981_v49 = vrot.slane %v5980_v36, 2  ;;  %v6186_v18 = vrot.slane %v6185_v47, 2 }
 0x524   :  { %v5982_v42 = vadd.f32 %v5981_v49, %v5980_v36  ;;  %v6187_v2 = vadd.f32 %v6186_v18, %v6185_v47 }
 0x526   :  { %v5983_v3 = vrot.slane %v5982_v42, 1  ;;  %v6188_v19 = vrot.slane %v6187_v2, 1 }
 0x528   :  { %v5984_v43 = vadd.f32 %v5983_v3, %v5982_v42  ;;  %v6189_v62 = vadd.f32 %v6188_v19, %v6187_v2 }
 0x52a   :  { %v6191_v40 = vsel %vm6190_vm9, %v5984_v43, %v6189_v62 }
 0x52b   :  { %v6193_v5 = vsel %vm14722_vm7, %v6191_v40, 0.0 }
 0x52c   :  { %6194 = vst [vmem:[#allocation5] sm:$0xff] %v6193_v5 }
 0x52d   :  { %7213 = shalt.err (!%p7210_p12)
}
 0x52e   :  { %s7214_s16 = scalar_lea.hbm %s13352_s6, 128 }
 0x52f   :  { %p7215_p13 = scmp.ne.s32.totalorder %s13352_s6, %s7214_s16  ;;  %p7218_p0 = scmp.lt.u32.totalorder %s7214_s16, %s13352_s6 }
 0x531   :  { %p7220_p1 = pnand %p7218_p0, %p7215_p13 }
 0x533   :  { %7223 = shalt.err (!%p7220_p1)
}
 0x534   :  { %6216 = dma.vmem_to_hbm [thread:$0]  %s6214_s2, 128, %s13352_s6, [#allocation6]  }
 0x535   :  { %7224 = dma.done.wait [#allocation4], 6400  }
 0x536   :  { %7225 = vsyncadd [#allocation4], 4294960896 }
 0x537   :  { %7226 = dma.done.wait [#allocation6], 128  }
 0x538   :  { %7227 = vsyncadd [#allocation6], 4294967168 }
 0x539   :  { %6223 = vsyncpa [#allocation4], 1 }
 0x53a   :  { %6224 = vsyncpa [#allocation6], 1 }

</bundles_post_ra>
